<compile_context>
chip_gen: v5e
topology: v5e:2x2
jax: 0.10.0
libtpu: 0.0.40
codegen_flags: <defaults>
</compile_context>

<pallas_src>
import functools
import math

import numpy as np
import jax
import jax.numpy as jnp
from jax.experimental import pallas as pl
from jax.experimental.pallas import tpu as pltpu

SAMPLE_RATE = 16000
N_FFT = 512
N_FREQS = N_FFT // 2 + 1
WIN_LENGTH = 320
HOP_LENGTH = 160
N_MELS = 40


# ------------------------------ Pallas kernels -------------------------------

def _mel_norm_kernel(frames_ref, cos_ref, sin_ref, fb_ref, o_ref):
    """Windowed DFT (2 GEMMs) -> power -> mel GEMM -> InstanceNorm2d(1), per sample."""
    f = frames_ref[0]                                                  # (T, N_FFT) f32
    re = jnp.dot(f, cos_ref[...], preferred_element_type=jnp.float32)  # (T, N_FREQS)
    im = jnp.dot(f, sin_ref[...], preferred_element_type=jnp.float32)
    power = re * re + im * im
    mel = jnp.dot(power, fb_ref[...], preferred_element_type=jnp.float32)  # (T, N_MELS)
    mean = jnp.mean(mel)
    var = jnp.mean(jnp.square(mel - mean))                             # biased var, eps=1e-5
    o_ref[0] = ((mel - mean) * jax.lax.rsqrt(var + 1e-5)).astype(o_ref.dtype)


def mel_instance_norm(frames, dft_cos, dft_sin, fb):
    B, T, nfft = frames.shape
    nmels = fb.shape[1]
    return pl.pallas_call(
        _mel_norm_kernel,
        out_shape=jax.ShapeDtypeStruct((B, T, nmels), jnp.bfloat16),
        grid=(B,),
        in_specs=[pl.BlockSpec((1, T, nfft), lambda b: (b, 0, 0)),
                  pl.BlockSpec(dft_cos.shape, lambda b: (0, 0)),
                  pl.BlockSpec(dft_sin.shape, lambda b: (0, 0)),
                  pl.BlockSpec(fb.shape, lambda b: (0, 0))],
        out_specs=pl.BlockSpec((1, T, nmels), lambda b: (b, 0, 0)),
        compiler_params=pltpu.CompilerParams(dimension_semantics=("parallel",)),
    )(frames, dft_cos, dft_sin, fb)


def _conv_relu_pool_kernel(x_ref, we_ref, wo_ref, b_ref, o_ref, *, h_out, hp):
    """5x5 conv (+bias) + ReLU + 2x2 maxpool on a lane-flattened (H, W*Cin) map.

    Conv = 5 banded GEMMs (one per time tap, no im2col).  Even/odd output-column
    weight matrices make the W half of the pool a jnp.maximum of two f32
    accumulators; the H half is a pair-max via exact 0/1 row-selection matmuls.
    """
    acc_e = None
    acc_o = None
    for ki in range(5):
        lhs = x_ref[0, ki:ki + h_out, :]                               # (h_out, W*Cin) bf16
        pe = jnp.dot(lhs, we_ref[ki], preferred_element_type=jnp.float32)
        po = jnp.dot(lhs, wo_ref[ki], preferred_element_type=jnp.float32)
        acc_e = pe if acc_e is None else acc_e + pe
        acc_o = po if acc_o is None else acc_o + po
    # W-pool (even/odd columns) + bias + ReLU, all f32.
    m = jnp.maximum(jnp.maximum(acc_e, acc_o) + b_ref[...], 0.0)       # (h_out, Wp*Cout)
    mb = m.astype(jnp.bfloat16)
    # H-pool: max of rows (2j, 2j+1) via 0/1 selection matmuls (exact picks).
    rows = jax.lax.broadcasted_iota(jnp.int32, (hp, h_out), 0)
    cols = jax.lax.broadcasted_iota(jnp.int32, (hp, h_out), 1)
    sel_e = jnp.where(cols == 2 * rows, 1.0, 0.0).astype(jnp.bfloat16)
    sel_o = jnp.where(cols == 2 * rows + 1, 1.0, 0.0).astype(jnp.bfloat16)
    he = jnp.dot(sel_e, mb, preferred_element_type=jnp.float32)
    ho = jnp.dot(sel_o, mb, preferred_element_type=jnp.float32)
    o_ref[0] = jnp.maximum(he, ho).astype(o_ref.dtype)


def conv_relu_pool(x, we, wo, b_tile):
    B, h_in, kdim = x.shape
    h_out = h_in - 4
    hp = h_out // 2                                                    # floor-mode pool
    n_cols = we.shape[2]
    return pl.pallas_call(
        functools.partial(_conv_relu_pool_kernel, h_out=h_out, hp=hp),
        out_shape=jax.ShapeDtypeStruct((B, hp, n_cols), jnp.bfloat16),
        grid=(B,),
        in_specs=[pl.BlockSpec((1, h_in, kdim), lambda b: (b, 0, 0)),
                  pl.BlockSpec(we.shape, lambda b: (0, 0, 0)),
                  pl.BlockSpec(wo.shape, lambda b: (0, 0, 0)),
                  pl.BlockSpec(b_tile.shape, lambda b: (0, 0))],
        out_specs=pl.BlockSpec((1, hp, n_cols), lambda b: (b, 0, 0)),
        compiler_params=pltpu.CompilerParams(dimension_semantics=("parallel",)),
    )(x, we, wo, b_tile)


def _mlp_kernel(x_ref, w1_ref, b1_ref, w2_ref, b2_ref, o_ref):
    """Linear + ReLU + Linear + sigmoid fused (dropouts are inference no-ops)."""
    h = jnp.dot(x_ref[...].astype(jnp.bfloat16), w1_ref[...],
                preferred_element_type=jnp.float32)
    h = jnp.maximum(h + b1_ref[...], 0.0)
    z = jnp.dot(h.astype(jnp.bfloat16), w2_ref[...],
                preferred_element_type=jnp.float32)
    o_ref[...] = jax.nn.sigmoid(z + b2_ref[...]).astype(o_ref.dtype)


def mlp_head(feat, w1, b1, w2, b2):
    B, F = feat.shape
    H = w1.shape[1]
    C = w2.shape[1]
    return pl.pallas_call(
        _mlp_kernel,
        out_shape=jax.ShapeDtypeStruct((B, C), jnp.float32),
        grid=(1,),
        in_specs=[pl.BlockSpec((B, F), lambda i: (0, 0)),
                  pl.BlockSpec((F, H), lambda i: (0, 0)),
                  pl.BlockSpec((1, H), lambda i: (0, 0)),
                  pl.BlockSpec((H, C), lambda i: (0, 0)),
                  pl.BlockSpec((1, C), lambda i: (0, 0))],
        out_specs=pl.BlockSpec((B, C), lambda i: (0, 0)),
    )(feat, w1, b1, w2, b2)


# ---------------- fixed transforms & weight relayout (one-time init) ---------

def _dft_matrices():
    """Windowed real-DFT as two (N_FFT, N_FREQS) GEMM operands (f32).

    The periodic hann window (win_length=320, centered-padded to n_fft=512) is
    folded into the DFT matrices; |rfft|^2 == (frames@cos)^2 + (frames@sin)^2.
    """
    n = np.arange(N_FFT)
    k = np.arange(N_FREQS)
    ang = 2.0 * np.pi * ((n[:, None] * k[None, :]) % N_FFT) / N_FFT    # exact phase
    m = np.arange(WIN_LENGTH)
    win = 0.5 * (1.0 - np.cos(2.0 * np.pi * m / WIN_LENGTH))           # periodic hann
    wfull = np.zeros(N_FFT)
    left = (N_FFT - WIN_LENGTH) // 2
    wfull[left:left + WIN_LENGTH] = win
    cos_m = wfull[:, None] * np.cos(ang)
    sin_m = wfull[:, None] * np.sin(ang)
    return jnp.asarray(cos_m, jnp.float32), jnp.asarray(sin_m, jnp.float32)


def mel_filterbank():
    """torchaudio-style HTK mel filterbank, norm=None. Shape (N_FREQS, N_MELS)."""
    def hz_to_mel(f):
        return 2595.0 * np.log10(1.0 + f / 700.0)

    def mel_to_hz(m):
        return 700.0 * (10.0 ** (m / 2595.0) - 1.0)

    all_freqs = np.linspace(0.0, SAMPLE_RATE / 2.0, N_FREQS)
    m_pts = np.linspace(hz_to_mel(0.0), hz_to_mel(SAMPLE_RATE / 2.0), N_MELS + 2)
    f_pts = mel_to_hz(m_pts)
    f_diff = f_pts[1:] - f_pts[:-1]
    slopes = f_pts[None, :] - all_freqs[:, None]
    down = (-slopes[:, :-2]) / f_diff[:-1]
    up = slopes[:, 2:] / f_diff[1:]
    return jnp.asarray(np.maximum(0.0, np.minimum(down, up)), jnp.float32)


def _banded_conv_weights(w, b, w_px, cin, cout):
    """Scatter a (5,5,cin,cout) conv kernel into per-time-tap banded GEMM weights.

    Returns (we, wo, b_tile): we/wo are (5, w_px*cin, wp*cout) bf16 matrices whose
    columns are the conv outputs at even/odd W positions (the maxpool W-pairs);
    b_tile is the per-channel bias tiled over the wp output positions (f32).
    """
    w_out = w_px - 4
    wp = w_out // 2
    we = np.zeros((5, w_px * cin, wp * cout), np.float32)
    wo = np.zeros_like(we)
    for parity, mat in ((0, we), (1, wo)):
        for j in range(wp):
            q = 2 * j + parity
            for kj in range(5):
                mat[:, (q + kj) * cin:(q + kj + 1) * cin,
                    j * cout:(j + 1) * cout] = w[:, kj]
    b_tile = np.tile(np.asarray(b, np.float32), wp)[None, :]
    return (jnp.asarray(we, jnp.bfloat16), jnp.asarray(wo, jnp.bfloat16),
            jnp.asarray(b_tile, jnp.float32))


def init_params(num_classes, t_bins, key):
    def get_size(d):  # mirrors LeNetAudio.__get_size
        return int(math.floor(((d - 4) / 2 - 4) / 2))

    f_r, t_r = get_size(N_MELS), get_size(t_bins)
    flat = 32 * f_r * t_r
    ks = jax.random.split(key, 8)

    def rnd(k, shape, scale):
        return np.asarray(scale * jax.random.normal(k, shape), np.float32)

    # Conv weights in (k_time, k_mel, Cin, Cout) layout (see header NOTE).
    w1, b1 = rnd(ks[0], (5, 5, 1, 16), 0.2), rnd(ks[1], (16,), 0.1)
    w2, b2 = rnd(ks[2], (5, 5, 16, 32), 0.05), rnd(ks[3], (32,), 0.1)
    c1_we, c1_wo, c1_b = _banded_conv_weights(w1, b1, N_MELS, 1, 16)
    c2_we, c2_wo, c2_b = _banded_conv_weights(w2, b2, (N_MELS - 4) // 2, 16, 32)
    dft_cos, dft_sin = _dft_matrices()
    return {
        "dft_cos": dft_cos, "dft_sin": dft_sin, "mel_fb": mel_filterbank(),
        "conv1_we": c1_we, "conv1_wo": c1_wo, "conv1_b": c1_b,
        "conv2_we": c2_we, "conv2_wo": c2_wo, "conv2_b": c2_b,
        # fc1 rows ordered for the channels-last (t, mel-block, C) flatten.
        "fc1_w": jnp.asarray(rnd(ks[4], (flat, 100), 0.05), jnp.bfloat16),
        "fc1_b": jnp.asarray(rnd(ks[5], (1, 100), 0.1)),
        "fc2_w": jnp.asarray(rnd(ks[6], (100, num_classes), 0.1), jnp.bfloat16),
        "fc2_b": jnp.asarray(rnd(ks[7], (1, num_classes), 0.1)),
    }


# --------------------------------- forward -----------------------------------

def lenet_audio_forward(x, params):
    B, L = x.shape
    T = L // HOP_LENGTH + 1
    pad = N_FFT // 2
    # STFT framing (center=True, reflect pad): one XLA gather instead of T slices.
    xp = jnp.pad(x, ((0, 0), (pad, pad)), mode="reflect")
    idx = (jnp.arange(T) * HOP_LENGTH)[:, None] + jnp.arange(N_FFT)[None, :]
    frames = xp[:, idx]                                               # (B, T, N_FFT) f32
    # 1) mel spectrogram + InstanceNorm2d(1)                           -> (B, T, 40)
    mel = mel_instance_norm(frames, params["dft_cos"], params["dft_sin"],
                            params["mel_fb"])
    # 2) Conv2d(1,16,5)+ReLU+MaxPool2d(2)                              -> (B, (T-4)//2, 18*16)
    h1 = conv_relu_pool(mel, params["conv1_we"], params["conv1_wo"], params["conv1_b"])
    # 3) Conv2d(16,32,5)+ReLU+MaxPool2d(2)                             -> (B, t_r, 7*32)
    h2 = conv_relu_pool(h1, params["conv2_we"], params["conv2_wo"], params["conv2_b"])
    # 4) Dropouts are identity at inference; flatten is a free contiguous reshape.
    feat = h2.reshape(B, -1)
    return mlp_head(feat, params["fc1_w"], params["fc1_b"],
                    params["fc2_w"], params["fc2_b"])


if __name__ == "__main__":
    num_classes = 10
    window_size = 3200           # small: t_bins = 3200/160 + 1 = 21 (module default is 24000)
    key = jax.random.PRNGKey(0)
    k_x, k_p = jax.random.split(key)

    x = jax.random.normal(k_x, (2, window_size), dtype=jnp.float32)
    t_bins = window_size // HOP_LENGTH + 1
    params = init_params(num_classes, t_bins, k_p)

    fwd = jax.jit(lenet_audio_forward)
    out = jax.block_until_ready(fwd(x, params))

    assert out.shape == (2, num_classes), out.shape
    assert bool(jnp.all(jnp.isfinite(out)))
    assert bool(jnp.all((out >= 0.0) & (out <= 1.0)))  # sigmoid output
    print("KERNEL_OK")
</pallas_src>

<mosaic_0001>
module attributes {stable_mosaic.version = 11 : i64} {
  func.func @_mel_norm_kernel(%arg0: i32, %arg1: memref<1x21x512xf32, #tpu.memory_space<vmem>>, %arg2: memref<512x257xf32, #tpu.memory_space<vmem>>, %arg3: memref<512x257xf32, #tpu.memory_space<vmem>>, %arg4: memref<257x40xf32, #tpu.memory_space<vmem>>, %arg5: memref<1x21x40xbf16, #tpu.memory_space<vmem>>) attributes {dimension_semantics = [#tpu.dimension_semantics<parallel>], iteration_bounds = array<i64: 2>, scalar_prefetch = 0 : i64, scratch_operands = 0 : i64, tpu.core_type = #tpu.core_type<tc>, window_params = [{transform_indices = @transform_0, window_bounds = array<i64: 1, 21, 512>}, {pipeline_mode = #tpu.pipeline_mode<synchronous>, transform_indices = @transform_1, window_bounds = array<i64: 512, 257>}, {pipeline_mode = #tpu.pipeline_mode<synchronous>, transform_indices = @transform_2, window_bounds = array<i64: 512, 257>}, {pipeline_mode = #tpu.pipeline_mode<synchronous>, transform_indices = @transform_3, window_bounds = array<i64: 257, 40>}, {transform_indices = @transform_4, window_bounds = array<i64: 1, 21, 40>}]} {
    %c0 = arith.constant 0 : index
    %c0_0 = arith.constant 0 : index
    %c0_1 = arith.constant 0 : index
    %0 = vector.load %arg1[%c0, %c0_0, %c0_1] : memref<1x21x512xf32, #tpu.memory_space<vmem>>, vector<1x21x512xf32>
    %1 = vector.shape_cast %0 : vector<1x21x512xf32> to vector<21x512xf32>
    %c0_2 = arith.constant 0 : index
    %c0_3 = arith.constant 0 : index
    %2 = vector.load %arg2[%c0_2, %c0_3] : memref<512x257xf32, #tpu.memory_space<vmem>>, vector<512x257xf32>
    %cst = arith.constant dense<0.000000e+00> : vector<21x257xf32>
    %3 = tpu.matmul %1, %2, %cst {dimension_numbers = #tpu.dot_dimension_numbers<[1], [0], [0], [1], [0, 0, 1, 1], [], []>} : vector<21x512xf32>, vector<512x257xf32>, vector<21x257xf32> -> vector<21x257xf32>
    %c0_4 = arith.constant 0 : index
    %c0_5 = arith.constant 0 : index
    %4 = vector.load %arg3[%c0_4, %c0_5] : memref<512x257xf32, #tpu.memory_space<vmem>>, vector<512x257xf32>
    %cst_6 = arith.constant dense<0.000000e+00> : vector<21x257xf32>
    %5 = tpu.matmul %1, %4, %cst_6 {dimension_numbers = #tpu.dot_dimension_numbers<[1], [0], [0], [1], [0, 0, 1, 1], [], []>} : vector<21x512xf32>, vector<512x257xf32>, vector<21x257xf32> -> vector<21x257xf32>
    %6 = arith.mulf %3, %3 : vector<21x257xf32>
    %7 = arith.mulf %5, %5 : vector<21x257xf32>
    %8 = arith.addf %6, %7 : vector<21x257xf32>
    %c0_7 = arith.constant 0 : index
    %c0_8 = arith.constant 0 : index
    %9 = vector.load %arg4[%c0_7, %c0_8] : memref<257x40xf32, #tpu.memory_space<vmem>>, vector<257x40xf32>
    %cst_9 = arith.constant dense<0.000000e+00> : vector<21x40xf32>
    %10 = tpu.matmul %8, %9, %cst_9 {dimension_numbers = #tpu.dot_dimension_numbers<[1], [0], [0], [1], [0, 0, 1, 1], [], []>} : vector<21x257xf32>, vector<257x40xf32>, vector<21x40xf32> -> vector<21x40xf32>
    %11 = vector.shape_cast %10 : vector<21x40xf32> to vector<1x21x40xf32>
    %cst_10 = arith.constant dense<0.000000e+00> : vector<1xf32>
    %12 = vector.multi_reduction <add>, %11, %cst_10 [1, 2] : vector<1x21x40xf32> to vector<1xf32>
    %13 = vector.shape_cast %12 : vector<1xf32> to vector<1x1x1xf32>
    %14 = vector.extract %13[0, 0, 0] : f32 from vector<1x1x1xf32>
    %cst_11 = arith.constant 8.400000e+02 : f32
    %15 = arith.divf %14, %cst_11 : f32
    %16 = vector.broadcast %15 : f32 to vector<21x40xf32>
    %17 = arith.subf %10, %16 : vector<21x40xf32>
    %18 = arith.mulf %17, %17 : vector<21x40xf32>
    %19 = vector.shape_cast %18 : vector<21x40xf32> to vector<1x21x40xf32>
    %cst_12 = arith.constant dense<0.000000e+00> : vector<1xf32>
    %20 = vector.multi_reduction <add>, %19, %cst_12 [1, 2] : vector<1x21x40xf32> to vector<1xf32>
    %21 = vector.shape_cast %20 : vector<1xf32> to vector<1x1x1xf32>
    %22 = vector.extract %21[0, 0, 0] : f32 from vector<1x1x1xf32>
    %cst_13 = arith.constant 8.400000e+02 : f32
    %23 = arith.divf %22, %cst_13 : f32
    %24 = vector.broadcast %15 : f32 to vector<21x40xf32>
    %25 = arith.subf %10, %24 : vector<21x40xf32>
    %cst_14 = arith.constant 9.99999974E-6 : f32
    %26 = arith.addf %23, %cst_14 : f32
    %27 = math.rsqrt %26 : f32
    %28 = vector.broadcast %27 : f32 to vector<21x40xf32>
    %29 = arith.mulf %25, %28 : vector<21x40xf32>
    %30 = arith.truncf %29 : vector<21x40xf32> to vector<21x40xbf16>
    %c0_15 = arith.constant 0 : index
    %c0_16 = arith.constant 0 : index
    %c0_17 = arith.constant 0 : index
    %31 = vector.load %arg5[%c0_15, %c0_16, %c0_17] : memref<1x21x40xbf16, #tpu.memory_space<vmem>>, vector<1x21x40xbf16>
    %32 = vector.shape_cast %31 : vector<1x21x40xbf16> to vector<21x40xbf16>
    %33 = vector.shape_cast %30 : vector<21x40xbf16> to vector<1x21x40xbf16>
    tpu.vector_store %arg5[%c0_15, %c0_16, %c0_17], %33 {strides = array<i32>} : memref<1x21x40xbf16, #tpu.memory_space<vmem>>, vector<1x21x40xbf16>,
    return
  }
  func.func @transform_0(%arg0: i32) -> (i32, i32, i32) {
    %c0_i32 = arith.constant 0 : i32
    %c0_i32_0 = arith.constant 0 : i32
    %c0_i32_1 = arith.constant 0 : i32
    return %arg0, %c0_i32, %c0_i32_0 : i32, i32, i32
  }
  func.func @transform_1(%arg0: i32) -> (i32, i32) {
    %c0_i32 = arith.constant 0 : i32
    %c0_i32_0 = arith.constant 0 : i32
    %c0_i32_1 = arith.constant 0 : i32
    return %c0_i32, %c0_i32_0 : i32, i32
  }
  func.func @transform_2(%arg0: i32) -> (i32, i32) {
    %c0_i32 = arith.constant 0 : i32
    %c0_i32_0 = arith.constant 0 : i32
    %c0_i32_1 = arith.constant 0 : i32
    return %c0_i32, %c0_i32_0 : i32, i32
  }
  func.func @transform_3(%arg0: i32) -> (i32, i32) {
    %c0_i32 = arith.constant 0 : i32
    %c0_i32_0 = arith.constant 0 : i32
    %c0_i32_1 = arith.constant 0 : i32
    return %c0_i32, %c0_i32_0 : i32, i32
  }
  func.func @transform_4(%arg0: i32) -> (i32, i32, i32) {
    %c0_i32 = arith.constant 0 : i32
    %c0_i32_0 = arith.constant 0 : i32
    %c0_i32_1 = arith.constant 0 : i32
    return %arg0, %c0_i32, %c0_i32_0 : i32, i32, i32
  }
}

module attributes {stable_mosaic.version = 11 : i64} {
  func.func @_conv_relu_pool_kernel(%arg0: i32, %arg1: memref<1x21x40xbf16, #tpu.memory_space<vmem>>, %arg2: memref<5x40x288xbf16, #tpu.memory_space<vmem>>, %arg3: memref<5x40x288xbf16, #tpu.memory_space<vmem>>, %arg4: memref<1x288xf32, #tpu.memory_space<vmem>>, %arg5: memref<1x8x288xbf16, #tpu.memory_space<vmem>>) attributes {dimension_semantics = [#tpu.dimension_semantics<parallel>], iteration_bounds = array<i64: 2>, scalar_prefetch = 0 : i64, scratch_operands = 0 : i64, tpu.core_type = #tpu.core_type<tc>, window_params = [{transform_indices = @transform_0, window_bounds = array<i64: 1, 21, 40>}, {pipeline_mode = #tpu.pipeline_mode<synchronous>, transform_indices = @transform_1, window_bounds = array<i64: 5, 40, 288>}, {pipeline_mode = #tpu.pipeline_mode<synchronous>, transform_indices = @transform_2, window_bounds = array<i64: 5, 40, 288>}, {pipeline_mode = #tpu.pipeline_mode<synchronous>, transform_indices = @transform_3, window_bounds = array<i64: 1, 288>}, {transform_indices = @transform_4, window_bounds = array<i64: 1, 8, 288>}]} {
    %c0 = arith.constant 0 : index
    %c0_0 = arith.constant 0 : index
    %c0_1 = arith.constant 0 : index
    %0 = vector.load %arg1[%c0, %c0_0, %c0_1] : memref<1x21x40xbf16, #tpu.memory_space<vmem>>, vector<1x17x40xbf16>
    %1 = vector.shape_cast %0 : vector<1x17x40xbf16> to vector<17x40xbf16>
    %c0_2 = arith.constant 0 : index
    %c0_3 = arith.constant 0 : index
    %c0_4 = arith.constant 0 : index
    %2 = vector.load %arg2[%c0_2, %c0_3, %c0_4] : memref<5x40x288xbf16, #tpu.memory_space<vmem>>, vector<1x40x288xbf16>
    %3 = vector.shape_cast %2 : vector<1x40x288xbf16> to vector<40x288xbf16>
    %cst = arith.constant dense<0.000000e+00> : vector<17x288xf32>
    %4 = tpu.matmul %1, %3, %cst {dimension_numbers = #tpu.dot_dimension_numbers<[1], [0], [0], [1], [0, 0, 1, 1], [], []>} : vector<17x40xbf16>, vector<40x288xbf16>, vector<17x288xf32> -> vector<17x288xf32>
    %c0_5 = arith.constant 0 : index
    %c0_6 = arith.constant 0 : index
    %c0_7 = arith.constant 0 : index
    %5 = vector.load %arg3[%c0_5, %c0_6, %c0_7] : memref<5x40x288xbf16, #tpu.memory_space<vmem>>, vector<1x40x288xbf16>
    %6 = vector.shape_cast %5 : vector<1x40x288xbf16> to vector<40x288xbf16>
    %cst_8 = arith.constant dense<0.000000e+00> : vector<17x288xf32>
    %7 = tpu.matmul %1, %6, %cst_8 {dimension_numbers = #tpu.dot_dimension_numbers<[1], [0], [0], [1], [0, 0, 1, 1], [], []>} : vector<17x40xbf16>, vector<40x288xbf16>, vector<17x288xf32> -> vector<17x288xf32>
    %c0_9 = arith.constant 0 : index
    %c1 = arith.constant 1 : index
    %c0_10 = arith.constant 0 : index
    %8 = vector.load %arg1[%c0_9, %c1, %c0_10] : memref<1x21x40xbf16, #tpu.memory_space<vmem>>, vector<1x17x40xbf16>
    %9 = vector.shape_cast %8 : vector<1x17x40xbf16> to vector<17x40xbf16>
    %c1_11 = arith.constant 1 : index
    %c0_12 = arith.constant 0 : index
    %c0_13 = arith.constant 0 : index
    %10 = vector.load %arg2[%c1_11, %c0_12, %c0_13] : memref<5x40x288xbf16, #tpu.memory_space<vmem>>, vector<1x40x288xbf16>
    %11 = vector.shape_cast %10 : vector<1x40x288xbf16> to vector<40x288xbf16>
    %cst_14 = arith.constant dense<0.000000e+00> : vector<17x288xf32>
    %12 = tpu.matmul %9, %11, %cst_14 {dimension_numbers = #tpu.dot_dimension_numbers<[1], [0], [0], [1], [0, 0, 1, 1], [], []>} : vector<17x40xbf16>, vector<40x288xbf16>, vector<17x288xf32> -> vector<17x288xf32>
    %c1_15 = arith.constant 1 : index
    %c0_16 = arith.constant 0 : index
    %c0_17 = arith.constant 0 : index
    %13 = vector.load %arg3[%c1_15, %c0_16, %c0_17] : memref<5x40x288xbf16, #tpu.memory_space<vmem>>, vector<1x40x288xbf16>
    %14 = vector.shape_cast %13 : vector<1x40x288xbf16> to vector<40x288xbf16>
    %cst_18 = arith.constant dense<0.000000e+00> : vector<17x288xf32>
    %15 = tpu.matmul %9, %14, %cst_18 {dimension_numbers = #tpu.dot_dimension_numbers<[1], [0], [0], [1], [0, 0, 1, 1], [], []>} : vector<17x40xbf16>, vector<40x288xbf16>, vector<17x288xf32> -> vector<17x288xf32>
    %16 = arith.addf %4, %12 : vector<17x288xf32>
    %17 = arith.addf %7, %15 : vector<17x288xf32>
    %c0_19 = arith.constant 0 : index
    %c2 = arith.constant 2 : index
    %c0_20 = arith.constant 0 : index
    %18 = vector.load %arg1[%c0_19, %c2, %c0_20] : memref<1x21x40xbf16, #tpu.memory_space<vmem>>, vector<1x17x40xbf16>
    %19 = vector.shape_cast %18 : vector<1x17x40xbf16> to vector<17x40xbf16>
    %c2_21 = arith.constant 2 : index
    %c0_22 = arith.constant 0 : index
    %c0_23 = arith.constant 0 : index
    %20 = vector.load %arg2[%c2_21, %c0_22, %c0_23] : memref<5x40x288xbf16, #tpu.memory_space<vmem>>, vector<1x40x288xbf16>
    %21 = vector.shape_cast %20 : vector<1x40x288xbf16> to vector<40x288xbf16>
    %cst_24 = arith.constant dense<0.000000e+00> : vector<17x288xf32>
    %22 = tpu.matmul %19, %21, %cst_24 {dimension_numbers = #tpu.dot_dimension_numbers<[1], [0], [0], [1], [0, 0, 1, 1], [], []>} : vector<17x40xbf16>, vector<40x288xbf16>, vector<17x288xf32> -> vector<17x288xf32>
    %c2_25 = arith.constant 2 : index
    %c0_26 = arith.constant 0 : index
    %c0_27 = arith.constant 0 : index
    %23 = vector.load %arg3[%c2_25, %c0_26, %c0_27] : memref<5x40x288xbf16, #tpu.memory_space<vmem>>, vector<1x40x288xbf16>
    %24 = vector.shape_cast %23 : vector<1x40x288xbf16> to vector<40x288xbf16>
    %cst_28 = arith.constant dense<0.000000e+00> : vector<17x288xf32>
    %25 = tpu.matmul %19, %24, %cst_28 {dimension_numbers = #tpu.dot_dimension_numbers<[1], [0], [0], [1], [0, 0, 1, 1], [], []>} : vector<17x40xbf16>, vector<40x288xbf16>, vector<17x288xf32> -> vector<17x288xf32>
    %26 = arith.addf %16, %22 : vector<17x288xf32>
    %27 = arith.addf %17, %25 : vector<17x288xf32>
    %c0_29 = arith.constant 0 : index
    %c3 = arith.constant 3 : index
    %c0_30 = arith.constant 0 : index
    %28 = vector.load %arg1[%c0_29, %c3, %c0_30] : memref<1x21x40xbf16, #tpu.memory_space<vmem>>, vector<1x17x40xbf16>
    %29 = vector.shape_cast %28 : vector<1x17x40xbf16> to vector<17x40xbf16>
    %c3_31 = arith.constant 3 : index
    %c0_32 = arith.constant 0 : index
    %c0_33 = arith.constant 0 : index
    %30 = vector.load %arg2[%c3_31, %c0_32, %c0_33] : memref<5x40x288xbf16, #tpu.memory_space<vmem>>, vector<1x40x288xbf16>
    %31 = vector.shape_cast %30 : vector<1x40x288xbf16> to vector<40x288xbf16>
    %cst_34 = arith.constant dense<0.000000e+00> : vector<17x288xf32>
    %32 = tpu.matmul %29, %31, %cst_34 {dimension_numbers = #tpu.dot_dimension_numbers<[1], [0], [0], [1], [0, 0, 1, 1], [], []>} : vector<17x40xbf16>, vector<40x288xbf16>, vector<17x288xf32> -> vector<17x288xf32>
    %c3_35 = arith.constant 3 : index
    %c0_36 = arith.constant 0 : index
    %c0_37 = arith.constant 0 : index
    %33 = vector.load %arg3[%c3_35, %c0_36, %c0_37] : memref<5x40x288xbf16, #tpu.memory_space<vmem>>, vector<1x40x288xbf16>
    %34 = vector.shape_cast %33 : vector<1x40x288xbf16> to vector<40x288xbf16>
    %cst_38 = arith.constant dense<0.000000e+00> : vector<17x288xf32>
    %35 = tpu.matmul %29, %34, %cst_38 {dimension_numbers = #tpu.dot_dimension_numbers<[1], [0], [0], [1], [0, 0, 1, 1], [], []>} : vector<17x40xbf16>, vector<40x288xbf16>, vector<17x288xf32> -> vector<17x288xf32>
    %36 = arith.addf %26, %32 : vector<17x288xf32>
    %37 = arith.addf %27, %35 : vector<17x288xf32>
    %c0_39 = arith.constant 0 : index
    %c4 = arith.constant 4 : index
    %c0_40 = arith.constant 0 : index
    %38 = vector.load %arg1[%c0_39, %c4, %c0_40] : memref<1x21x40xbf16, #tpu.memory_space<vmem>>, vector<1x17x40xbf16>
    %39 = vector.shape_cast %38 : vector<1x17x40xbf16> to vector<17x40xbf16>
    %c4_41 = arith.constant 4 : index
    %c0_42 = arith.constant 0 : index
    %c0_43 = arith.constant 0 : index
    %40 = vector.load %arg2[%c4_41, %c0_42, %c0_43] : memref<5x40x288xbf16, #tpu.memory_space<vmem>>, vector<1x40x288xbf16>
    %41 = vector.shape_cast %40 : vector<1x40x288xbf16> to vector<40x288xbf16>
    %cst_44 = arith.constant dense<0.000000e+00> : vector<17x288xf32>
    %42 = tpu.matmul %39, %41, %cst_44 {dimension_numbers = #tpu.dot_dimension_numbers<[1], [0], [0], [1], [0, 0, 1, 1], [], []>} : vector<17x40xbf16>, vector<40x288xbf16>, vector<17x288xf32> -> vector<17x288xf32>
    %c4_45 = arith.constant 4 : index
    %c0_46 = arith.constant 0 : index
    %c0_47 = arith.constant 0 : index
    %43 = vector.load %arg3[%c4_45, %c0_46, %c0_47] : memref<5x40x288xbf16, #tpu.memory_space<vmem>>, vector<1x40x288xbf16>
    %44 = vector.shape_cast %43 : vector<1x40x288xbf16> to vector<40x288xbf16>
    %cst_48 = arith.constant dense<0.000000e+00> : vector<17x288xf32>
    %45 = tpu.matmul %39, %44, %cst_48 {dimension_numbers = #tpu.dot_dimension_numbers<[1], [0], [0], [1], [0, 0, 1, 1], [], []>} : vector<17x40xbf16>, vector<40x288xbf16>, vector<17x288xf32> -> vector<17x288xf32>
    %46 = arith.addf %36, %42 : vector<17x288xf32>
    %47 = arith.addf %37, %45 : vector<17x288xf32>
    %48 = arith.maximumf %46, %47 : vector<17x288xf32>
    %c0_49 = arith.constant 0 : index
    %c0_50 = arith.constant 0 : index
    %49 = vector.load %arg4[%c0_49, %c0_50] : memref<1x288xf32, #tpu.memory_space<vmem>>, vector<1x288xf32>
    %50 = vector.broadcast %49 : vector<1x288xf32> to vector<17x288xf32>
    %51 = arith.addf %48, %50 : vector<17x288xf32>
    %cst_51 = arith.constant 0.000000e+00 : f32
    %52 = vector.broadcast %cst_51 : f32 to vector<17x288xf32>
    %53 = arith.maximumf %51, %52 : vector<17x288xf32>
    %54 = arith.truncf %53 : vector<17x288xf32> to vector<17x288xbf16>
    %55 = tpu.iota {dimensions = array<i32: 0>} : vector<8x17xi32>
    %56 = tpu.iota {dimensions = array<i32: 1>} : vector<8x17xi32>
    %c2_i32 = arith.constant 2 : i32
    %57 = vector.broadcast %c2_i32 : i32 to vector<8x17xi32>
    %58 = arith.muli %57, %55 : vector<8x17xi32>
    %59 = arith.cmpi eq, %56, %58 : vector<8x17xi32>
    %cst_52 = arith.constant 1.000000e+00 : f32
    %cst_53 = arith.constant 0.000000e+00 : f32
    %60 = vector.broadcast %cst_52 : f32 to vector<8x17xf32>
    %61 = vector.broadcast %cst_53 : f32 to vector<8x17xf32>
    %62 = arith.select %59, %60, %61 : vector<8x17xi1>, vector<8x17xf32>
    %63 = arith.truncf %62 : vector<8x17xf32> to vector<8x17xbf16>
    %c2_i32_54 = arith.constant 2 : i32
    %64 = vector.broadcast %c2_i32_54 : i32 to vector<8x17xi32>
    %65 = arith.muli %64, %55 : vector<8x17xi32>
    %c1_i32 = arith.constant 1 : i32
    %66 = vector.broadcast %c1_i32 : i32 to vector<8x17xi32>
    %67 = arith.addi %65, %66 : vector<8x17xi32>
    %68 = arith.cmpi eq, %56, %67 : vector<8x17xi32>
    %cst_55 = arith.constant 1.000000e+00 : f32
    %cst_56 = arith.constant 0.000000e+00 : f32
    %69 = vector.broadcast %cst_55 : f32 to vector<8x17xf32>
    %70 = vector.broadcast %cst_56 : f32 to vector<8x17xf32>
    %71 = arith.select %68, %69, %70 : vector<8x17xi1>, vector<8x17xf32>
    %72 = arith.truncf %71 : vector<8x17xf32> to vector<8x17xbf16>
    %cst_57 = arith.constant dense<0.000000e+00> : vector<8x288xf32>
    %73 = tpu.matmul %63, %54, %cst_57 {dimension_numbers = #tpu.dot_dimension_numbers<[1], [0], [0], [1], [0, 0, 1, 1], [], []>} : vector<8x17xbf16>, vector<17x288xbf16>, vector<8x288xf32> -> vector<8x288xf32>
    %cst_58 = arith.constant dense<0.000000e+00> : vector<8x288xf32>
    %74 = tpu.matmul %72, %54, %cst_58 {dimension_numbers = #tpu.dot_dimension_numbers<[1], [0], [0], [1], [0, 0, 1, 1], [], []>} : vector<8x17xbf16>, vector<17x288xbf16>, vector<8x288xf32> -> vector<8x288xf32>
    %75 = arith.maximumf %73, %74 : vector<8x288xf32>
    %76 = arith.truncf %75 : vector<8x288xf32> to vector<8x288xbf16>
    %c0_59 = arith.constant 0 : index
    %c0_60 = arith.constant 0 : index
    %c0_61 = arith.constant 0 : index
    %77 = vector.load %arg5[%c0_59, %c0_60, %c0_61] : memref<1x8x288xbf16, #tpu.memory_space<vmem>>, vector<1x8x288xbf16>
    %78 = vector.shape_cast %77 : vector<1x8x288xbf16> to vector<8x288xbf16>
    %79 = vector.shape_cast %76 : vector<8x288xbf16> to vector<1x8x288xbf16>
    tpu.vector_store %arg5[%c0_59, %c0_60, %c0_61], %79 {strides = array<i32>} : memref<1x8x288xbf16, #tpu.memory_space<vmem>>, vector<1x8x288xbf16>,
    return
  }
  func.func @transform_0(%arg0: i32) -> (i32, i32, i32) {
    %c0_i32 = arith.constant 0 : i32
    %c0_i32_0 = arith.constant 0 : i32
    %c0_i32_1 = arith.constant 0 : i32
    return %arg0, %c0_i32, %c0_i32_0 : i32, i32, i32
  }
  func.func @transform_1(%arg0: i32) -> (i32, i32, i32) {
    %c0_i32 = arith.constant 0 : i32
    %c0_i32_0 = arith.constant 0 : i32
    %c0_i32_1 = arith.constant 0 : i32
    %c0_i32_2 = arith.constant 0 : i32
    return %c0_i32, %c0_i32_0, %c0_i32_1 : i32, i32, i32
  }
  func.func @transform_2(%arg0: i32) -> (i32, i32, i32) {
    %c0_i32 = arith.constant 0 : i32
    %c0_i32_0 = arith.constant 0 : i32
    %c0_i32_1 = arith.constant 0 : i32
    %c0_i32_2 = arith.constant 0 : i32
    return %c0_i32, %c0_i32_0, %c0_i32_1 : i32, i32, i32
  }
  func.func @transform_3(%arg0: i32) -> (i32, i32) {
    %c0_i32 = arith.constant 0 : i32
    %c0_i32_0 = arith.constant 0 : i32
    %c0_i32_1 = arith.constant 0 : i32
    return %c0_i32, %c0_i32_0 : i32, i32
  }
  func.func @transform_4(%arg0: i32) -> (i32, i32, i32) {
    %c0_i32 = arith.constant 0 : i32
    %c0_i32_0 = arith.constant 0 : i32
    %c0_i32_1 = arith.constant 0 : i32
    return %arg0, %c0_i32, %c0_i32_0 : i32, i32, i32
  }
}

module attributes {stable_mosaic.version = 11 : i64} {
  func.func @_conv_relu_pool_kernel(%arg0: i32, %arg1: memref<1x8x288xbf16, #tpu.memory_space<vmem>>, %arg2: memref<5x288x224xbf16, #tpu.memory_space<vmem>>, %arg3: memref<5x288x224xbf16, #tpu.memory_space<vmem>>, %arg4: memref<1x224xf32, #tpu.memory_space<vmem>>, %arg5: memref<1x2x224xbf16, #tpu.memory_space<vmem>>) attributes {dimension_semantics = [#tpu.dimension_semantics<parallel>], iteration_bounds = array<i64: 2>, scalar_prefetch = 0 : i64, scratch_operands = 0 : i64, tpu.core_type = #tpu.core_type<tc>, window_params = [{transform_indices = @transform_0, window_bounds = array<i64: 1, 8, 288>}, {pipeline_mode = #tpu.pipeline_mode<synchronous>, transform_indices = @transform_1, window_bounds = array<i64: 5, 288, 224>}, {pipeline_mode = #tpu.pipeline_mode<synchronous>, transform_indices = @transform_2, window_bounds = array<i64: 5, 288, 224>}, {pipeline_mode = #tpu.pipeline_mode<synchronous>, transform_indices = @transform_3, window_bounds = array<i64: 1, 224>}, {transform_indices = @transform_4, window_bounds = array<i64: 1, 2, 224>}]} {
    %c0 = arith.constant 0 : index
    %c0_0 = arith.constant 0 : index
    %c0_1 = arith.constant 0 : index
    %0 = vector.load %arg1[%c0, %c0_0, %c0_1] : memref<1x8x288xbf16, #tpu.memory_space<vmem>>, vector<1x4x288xbf16>
    %1 = vector.shape_cast %0 : vector<1x4x288xbf16> to vector<4x288xbf16>
    %c0_2 = arith.constant 0 : index
    %c0_3 = arith.constant 0 : index
    %c0_4 = arith.constant 0 : index
    %2 = vector.load %arg2[%c0_2, %c0_3, %c0_4] : memref<5x288x224xbf16, #tpu.memory_space<vmem>>, vector<1x288x224xbf16>
    %3 = vector.shape_cast %2 : vector<1x288x224xbf16> to vector<288x224xbf16>
    %cst = arith.constant dense<0.000000e+00> : vector<4x224xf32>
    %4 = tpu.matmul %1, %3, %cst {dimension_numbers = #tpu.dot_dimension_numbers<[1], [0], [0], [1], [0, 0, 1, 1], [], []>} : vector<4x288xbf16>, vector<288x224xbf16>, vector<4x224xf32> -> vector<4x224xf32>
    %c0_5 = arith.constant 0 : index
    %c0_6 = arith.constant 0 : index
    %c0_7 = arith.constant 0 : index
    %5 = vector.load %arg3[%c0_5, %c0_6, %c0_7] : memref<5x288x224xbf16, #tpu.memory_space<vmem>>, vector<1x288x224xbf16>
    %6 = vector.shape_cast %5 : vector<1x288x224xbf16> to vector<288x224xbf16>
    %cst_8 = arith.constant dense<0.000000e+00> : vector<4x224xf32>
    %7 = tpu.matmul %1, %6, %cst_8 {dimension_numbers = #tpu.dot_dimension_numbers<[1], [0], [0], [1], [0, 0, 1, 1], [], []>} : vector<4x288xbf16>, vector<288x224xbf16>, vector<4x224xf32> -> vector<4x224xf32>
    %c0_9 = arith.constant 0 : index
    %c1 = arith.constant 1 : index
    %c0_10 = arith.constant 0 : index
    %8 = vector.load %arg1[%c0_9, %c1, %c0_10] : memref<1x8x288xbf16, #tpu.memory_space<vmem>>, vector<1x4x288xbf16>
    %9 = vector.shape_cast %8 : vector<1x4x288xbf16> to vector<4x288xbf16>
    %c1_11 = arith.constant 1 : index
    %c0_12 = arith.constant 0 : index
    %c0_13 = arith.constant 0 : index
    %10 = vector.load %arg2[%c1_11, %c0_12, %c0_13] : memref<5x288x224xbf16, #tpu.memory_space<vmem>>, vector<1x288x224xbf16>
    %11 = vector.shape_cast %10 : vector<1x288x224xbf16> to vector<288x224xbf16>
    %cst_14 = arith.constant dense<0.000000e+00> : vector<4x224xf32>
    %12 = tpu.matmul %9, %11, %cst_14 {dimension_numbers = #tpu.dot_dimension_numbers<[1], [0], [0], [1], [0, 0, 1, 1], [], []>} : vector<4x288xbf16>, vector<288x224xbf16>, vector<4x224xf32> -> vector<4x224xf32>
    %c1_15 = arith.constant 1 : index
    %c0_16 = arith.constant 0 : index
    %c0_17 = arith.constant 0 : index
    %13 = vector.load %arg3[%c1_15, %c0_16, %c0_17] : memref<5x288x224xbf16, #tpu.memory_space<vmem>>, vector<1x288x224xbf16>
    %14 = vector.shape_cast %13 : vector<1x288x224xbf16> to vector<288x224xbf16>
    %cst_18 = arith.constant dense<0.000000e+00> : vector<4x224xf32>
    %15 = tpu.matmul %9, %14, %cst_18 {dimension_numbers = #tpu.dot_dimension_numbers<[1], [0], [0], [1], [0, 0, 1, 1], [], []>} : vector<4x288xbf16>, vector<288x224xbf16>, vector<4x224xf32> -> vector<4x224xf32>
    %16 = arith.addf %4, %12 : vector<4x224xf32>
    %17 = arith.addf %7, %15 : vector<4x224xf32>
    %c0_19 = arith.constant 0 : index
    %c2 = arith.constant 2 : index
    %c0_20 = arith.constant 0 : index
    %18 = vector.load %arg1[%c0_19, %c2, %c0_20] : memref<1x8x288xbf16, #tpu.memory_space<vmem>>, vector<1x4x288xbf16>
    %19 = vector.shape_cast %18 : vector<1x4x288xbf16> to vector<4x288xbf16>
    %c2_21 = arith.constant 2 : index
    %c0_22 = arith.constant 0 : index
    %c0_23 = arith.constant 0 : index
    %20 = vector.load %arg2[%c2_21, %c0_22, %c0_23] : memref<5x288x224xbf16, #tpu.memory_space<vmem>>, vector<1x288x224xbf16>
    %21 = vector.shape_cast %20 : vector<1x288x224xbf16> to vector<288x224xbf16>
    %cst_24 = arith.constant dense<0.000000e+00> : vector<4x224xf32>
    %22 = tpu.matmul %19, %21, %cst_24 {dimension_numbers = #tpu.dot_dimension_numbers<[1], [0], [0], [1], [0, 0, 1, 1], [], []>} : vector<4x288xbf16>, vector<288x224xbf16>, vector<4x224xf32> -> vector<4x224xf32>
    %c2_25 = arith.constant 2 : index
    %c0_26 = arith.constant 0 : index
    %c0_27 = arith.constant 0 : index
    %23 = vector.load %arg3[%c2_25, %c0_26, %c0_27] : memref<5x288x224xbf16, #tpu.memory_space<vmem>>, vector<1x288x224xbf16>
    %24 = vector.shape_cast %23 : vector<1x288x224xbf16> to vector<288x224xbf16>
    %cst_28 = arith.constant dense<0.000000e+00> : vector<4x224xf32>
    %25 = tpu.matmul %19, %24, %cst_28 {dimension_numbers = #tpu.dot_dimension_numbers<[1], [0], [0], [1], [0, 0, 1, 1], [], []>} : vector<4x288xbf16>, vector<288x224xbf16>, vector<4x224xf32> -> vector<4x224xf32>
    %26 = arith.addf %16, %22 : vector<4x224xf32>
    %27 = arith.addf %17, %25 : vector<4x224xf32>
    %c0_29 = arith.constant 0 : index
    %c3 = arith.constant 3 : index
    %c0_30 = arith.constant 0 : index
    %28 = vector.load %arg1[%c0_29, %c3, %c0_30] : memref<1x8x288xbf16, #tpu.memory_space<vmem>>, vector<1x4x288xbf16>
    %29 = vector.shape_cast %28 : vector<1x4x288xbf16> to vector<4x288xbf16>
    %c3_31 = arith.constant 3 : index
    %c0_32 = arith.constant 0 : index
    %c0_33 = arith.constant 0 : index
    %30 = vector.load %arg2[%c3_31, %c0_32, %c0_33] : memref<5x288x224xbf16, #tpu.memory_space<vmem>>, vector<1x288x224xbf16>
    %31 = vector.shape_cast %30 : vector<1x288x224xbf16> to vector<288x224xbf16>
    %cst_34 = arith.constant dense<0.000000e+00> : vector<4x224xf32>
    %32 = tpu.matmul %29, %31, %cst_34 {dimension_numbers = #tpu.dot_dimension_numbers<[1], [0], [0], [1], [0, 0, 1, 1], [], []>} : vector<4x288xbf16>, vector<288x224xbf16>, vector<4x224xf32> -> vector<4x224xf32>
    %c3_35 = arith.constant 3 : index
    %c0_36 = arith.constant 0 : index
    %c0_37 = arith.constant 0 : index
    %33 = vector.load %arg3[%c3_35, %c0_36, %c0_37] : memref<5x288x224xbf16, #tpu.memory_space<vmem>>, vector<1x288x224xbf16>
    %34 = vector.shape_cast %33 : vector<1x288x224xbf16> to vector<288x224xbf16>
    %cst_38 = arith.constant dense<0.000000e+00> : vector<4x224xf32>
    %35 = tpu.matmul %29, %34, %cst_38 {dimension_numbers = #tpu.dot_dimension_numbers<[1], [0], [0], [1], [0, 0, 1, 1], [], []>} : vector<4x288xbf16>, vector<288x224xbf16>, vector<4x224xf32> -> vector<4x224xf32>
    %36 = arith.addf %26, %32 : vector<4x224xf32>
    %37 = arith.addf %27, %35 : vector<4x224xf32>
    %c0_39 = arith.constant 0 : index
    %c4 = arith.constant 4 : index
    %c0_40 = arith.constant 0 : index
    %38 = vector.load %arg1[%c0_39, %c4, %c0_40] : memref<1x8x288xbf16, #tpu.memory_space<vmem>>, vector<1x4x288xbf16>
    %39 = vector.shape_cast %38 : vector<1x4x288xbf16> to vector<4x288xbf16>
    %c4_41 = arith.constant 4 : index
    %c0_42 = arith.constant 0 : index
    %c0_43 = arith.constant 0 : index
    %40 = vector.load %arg2[%c4_41, %c0_42, %c0_43] : memref<5x288x224xbf16, #tpu.memory_space<vmem>>, vector<1x288x224xbf16>
    %41 = vector.shape_cast %40 : vector<1x288x224xbf16> to vector<288x224xbf16>
    %cst_44 = arith.constant dense<0.000000e+00> : vector<4x224xf32>
    %42 = tpu.matmul %39, %41, %cst_44 {dimension_numbers = #tpu.dot_dimension_numbers<[1], [0], [0], [1], [0, 0, 1, 1], [], []>} : vector<4x288xbf16>, vector<288x224xbf16>, vector<4x224xf32> -> vector<4x224xf32>
    %c4_45 = arith.constant 4 : index
    %c0_46 = arith.constant 0 : index
    %c0_47 = arith.constant 0 : index
    %43 = vector.load %arg3[%c4_45, %c0_46, %c0_47] : memref<5x288x224xbf16, #tpu.memory_space<vmem>>, vector<1x288x224xbf16>
    %44 = vector.shape_cast %43 : vector<1x288x224xbf16> to vector<288x224xbf16>
    %cst_48 = arith.constant dense<0.000000e+00> : vector<4x224xf32>
    %45 = tpu.matmul %39, %44, %cst_48 {dimension_numbers = #tpu.dot_dimension_numbers<[1], [0], [0], [1], [0, 0, 1, 1], [], []>} : vector<4x288xbf16>, vector<288x224xbf16>, vector<4x224xf32> -> vector<4x224xf32>
    %46 = arith.addf %36, %42 : vector<4x224xf32>
    %47 = arith.addf %37, %45 : vector<4x224xf32>
    %48 = arith.maximumf %46, %47 : vector<4x224xf32>
    %c0_49 = arith.constant 0 : index
    %c0_50 = arith.constant 0 : index
    %49 = vector.load %arg4[%c0_49, %c0_50] : memref<1x224xf32, #tpu.memory_space<vmem>>, vector<1x224xf32>
    %50 = vector.broadcast %49 : vector<1x224xf32> to vector<4x224xf32>
    %51 = arith.addf %48, %50 : vector<4x224xf32>
    %cst_51 = arith.constant 0.000000e+00 : f32
    %52 = vector.broadcast %cst_51 : f32 to vector<4x224xf32>
    %53 = arith.maximumf %51, %52 : vector<4x224xf32>
    %54 = arith.truncf %53 : vector<4x224xf32> to vector<4x224xbf16>
    %55 = tpu.iota {dimensions = array<i32: 0>} : vector<2x4xi32>
    %56 = tpu.iota {dimensions = array<i32: 1>} : vector<2x4xi32>
    %c2_i32 = arith.constant 2 : i32
    %57 = vector.broadcast %c2_i32 : i32 to vector<2x4xi32>
    %58 = arith.muli %57, %55 : vector<2x4xi32>
    %59 = arith.cmpi eq, %56, %58 : vector<2x4xi32>
    %cst_52 = arith.constant 1.000000e+00 : f32
    %cst_53 = arith.constant 0.000000e+00 : f32
    %60 = vector.broadcast %cst_52 : f32 to vector<2x4xf32>
    %61 = vector.broadcast %cst_53 : f32 to vector<2x4xf32>
    %62 = arith.select %59, %60, %61 : vector<2x4xi1>, vector<2x4xf32>
    %63 = arith.truncf %62 : vector<2x4xf32> to vector<2x4xbf16>
    %c2_i32_54 = arith.constant 2 : i32
    %64 = vector.broadcast %c2_i32_54 : i32 to vector<2x4xi32>
    %65 = arith.muli %64, %55 : vector<2x4xi32>
    %c1_i32 = arith.constant 1 : i32
    %66 = vector.broadcast %c1_i32 : i32 to vector<2x4xi32>
    %67 = arith.addi %65, %66 : vector<2x4xi32>
    %68 = arith.cmpi eq, %56, %67 : vector<2x4xi32>
    %cst_55 = arith.constant 1.000000e+00 : f32
    %cst_56 = arith.constant 0.000000e+00 : f32
    %69 = vector.broadcast %cst_55 : f32 to vector<2x4xf32>
    %70 = vector.broadcast %cst_56 : f32 to vector<2x4xf32>
    %71 = arith.select %68, %69, %70 : vector<2x4xi1>, vector<2x4xf32>
    %72 = arith.truncf %71 : vector<2x4xf32> to vector<2x4xbf16>
    %cst_57 = arith.constant dense<0.000000e+00> : vector<2x224xf32>
    %73 = tpu.matmul %63, %54, %cst_57 {dimension_numbers = #tpu.dot_dimension_numbers<[1], [0], [0], [1], [0, 0, 1, 1], [], []>} : vector<2x4xbf16>, vector<4x224xbf16>, vector<2x224xf32> -> vector<2x224xf32>
    %cst_58 = arith.constant dense<0.000000e+00> : vector<2x224xf32>
    %74 = tpu.matmul %72, %54, %cst_58 {dimension_numbers = #tpu.dot_dimension_numbers<[1], [0], [0], [1], [0, 0, 1, 1], [], []>} : vector<2x4xbf16>, vector<4x224xbf16>, vector<2x224xf32> -> vector<2x224xf32>
    %75 = arith.maximumf %73, %74 : vector<2x224xf32>
    %76 = arith.truncf %75 : vector<2x224xf32> to vector<2x224xbf16>
    %c0_59 = arith.constant 0 : index
    %c0_60 = arith.constant 0 : index
    %c0_61 = arith.constant 0 : index
    %77 = vector.load %arg5[%c0_59, %c0_60, %c0_61] : memref<1x2x224xbf16, #tpu.memory_space<vmem>>, vector<1x2x224xbf16>
    %78 = vector.shape_cast %77 : vector<1x2x224xbf16> to vector<2x224xbf16>
    %79 = vector.shape_cast %76 : vector<2x224xbf16> to vector<1x2x224xbf16>
    tpu.vector_store %arg5[%c0_59, %c0_60, %c0_61], %79 {strides = array<i32>} : memref<1x2x224xbf16, #tpu.memory_space<vmem>>, vector<1x2x224xbf16>,
    return
  }
  func.func @transform_0(%arg0: i32) -> (i32, i32, i32) {
    %c0_i32 = arith.constant 0 : i32
    %c0_i32_0 = arith.constant 0 : i32
    %c0_i32_1 = arith.constant 0 : i32
    return %arg0, %c0_i32, %c0_i32_0 : i32, i32, i32
  }
  func.func @transform_1(%arg0: i32) -> (i32, i32, i32) {
    %c0_i32 = arith.constant 0 : i32
    %c0_i32_0 = arith.constant 0 : i32
    %c0_i32_1 = arith.constant 0 : i32
    %c0_i32_2 = arith.constant 0 : i32
    return %c0_i32, %c0_i32_0, %c0_i32_1 : i32, i32, i32
  }
  func.func @transform_2(%arg0: i32) -> (i32, i32, i32) {
    %c0_i32 = arith.constant 0 : i32
    %c0_i32_0 = arith.constant 0 : i32
    %c0_i32_1 = arith.constant 0 : i32
    %c0_i32_2 = arith.constant 0 : i32
    return %c0_i32, %c0_i32_0, %c0_i32_1 : i32, i32, i32
  }
  func.func @transform_3(%arg0: i32) -> (i32, i32) {
    %c0_i32 = arith.constant 0 : i32
    %c0_i32_0 = arith.constant 0 : i32
    %c0_i32_1 = arith.constant 0 : i32
    return %c0_i32, %c0_i32_0 : i32, i32
  }
  func.func @transform_4(%arg0: i32) -> (i32, i32, i32) {
    %c0_i32 = arith.constant 0 : i32
    %c0_i32_0 = arith.constant 0 : i32
    %c0_i32_1 = arith.constant 0 : i32
    return %arg0, %c0_i32, %c0_i32_0 : i32, i32, i32
  }
}

module attributes {stable_mosaic.version = 11 : i64} {
  func.func @_mlp_kernel(%arg0: i32, %arg1: memref<2x448xbf16, #tpu.memory_space<vmem>>, %arg2: memref<448x100xbf16, #tpu.memory_space<vmem>>, %arg3: memref<1x100xf32, #tpu.memory_space<vmem>>, %arg4: memref<100x10xbf16, #tpu.memory_space<vmem>>, %arg5: memref<1x10xf32, #tpu.memory_space<vmem>>, %arg6: memref<2x10xf32, #tpu.memory_space<vmem>>) attributes {dimension_semantics = [#tpu.dimension_semantics<arbitrary>], iteration_bounds = array<i64: 1>, scalar_prefetch = 0 : i64, scratch_operands = 0 : i64, tpu.core_type = #tpu.core_type<tc>, window_params = [{pipeline_mode = #tpu.pipeline_mode<synchronous>, transform_indices = @transform_0, window_bounds = array<i64: 2, 448>}, {pipeline_mode = #tpu.pipeline_mode<synchronous>, transform_indices = @transform_1, window_bounds = array<i64: 448, 100>}, {pipeline_mode = #tpu.pipeline_mode<synchronous>, transform_indices = @transform_2, window_bounds = array<i64: 1, 100>}, {pipeline_mode = #tpu.pipeline_mode<synchronous>, transform_indices = @transform_3, window_bounds = array<i64: 100, 10>}, {pipeline_mode = #tpu.pipeline_mode<synchronous>, transform_indices = @transform_4, window_bounds = array<i64: 1, 10>}, {pipeline_mode = #tpu.pipeline_mode<synchronous>, transform_indices = @transform_5, window_bounds = array<i64: 2, 10>}]} {
    %c0 = arith.constant 0 : index
    %c0_0 = arith.constant 0 : index
    %0 = vector.load %arg1[%c0, %c0_0] : memref<2x448xbf16, #tpu.memory_space<vmem>>, vector<2x448xbf16>
    %c0_1 = arith.constant 0 : index
    %c0_2 = arith.constant 0 : index
    %1 = vector.load %arg2[%c0_1, %c0_2] : memref<448x100xbf16, #tpu.memory_space<vmem>>, vector<448x100xbf16>
    %cst = arith.constant dense<0.000000e+00> : vector<2x100xf32>
    %2 = tpu.matmul %0, %1, %cst {dimension_numbers = #tpu.dot_dimension_numbers<[1], [0], [0], [1], [0, 0, 1, 1], [], []>} : vector<2x448xbf16>, vector<448x100xbf16>, vector<2x100xf32> -> vector<2x100xf32>
    %c0_3 = arith.constant 0 : index
    %c0_4 = arith.constant 0 : index
    %3 = vector.load %arg3[%c0_3, %c0_4] : memref<1x100xf32, #tpu.memory_space<vmem>>, vector<1x100xf32>
    %4 = vector.broadcast %3 : vector<1x100xf32> to vector<2x100xf32>
    %5 = arith.addf %2, %4 : vector<2x100xf32>
    %cst_5 = arith.constant 0.000000e+00 : f32
    %6 = vector.broadcast %cst_5 : f32 to vector<2x100xf32>
    %7 = arith.maximumf %5, %6 : vector<2x100xf32>
    %8 = arith.truncf %7 : vector<2x100xf32> to vector<2x100xbf16>
    %c0_6 = arith.constant 0 : index
    %c0_7 = arith.constant 0 : index
    %9 = vector.load %arg4[%c0_6, %c0_7] : memref<100x10xbf16, #tpu.memory_space<vmem>>, vector<100x10xbf16>
    %cst_8 = arith.constant dense<0.000000e+00> : vector<2x10xf32>
    %10 = tpu.matmul %8, %9, %cst_8 {dimension_numbers = #tpu.dot_dimension_numbers<[1], [0], [0], [1], [0, 0, 1, 1], [], []>} : vector<2x100xbf16>, vector<100x10xbf16>, vector<2x10xf32> -> vector<2x10xf32>
    %c0_9 = arith.constant 0 : index
    %c0_10 = arith.constant 0 : index
    %11 = vector.load %arg5[%c0_9, %c0_10] : memref<1x10xf32, #tpu.memory_space<vmem>>, vector<1x10xf32>
    %12 = vector.broadcast %11 : vector<1x10xf32> to vector<2x10xf32>
    %13 = arith.addf %10, %12 : vector<2x10xf32>
    %14 = arith.negf %13 : vector<2x10xf32>
    %15 = math.exp %14 : vector<2x10xf32>
    %cst_11 = arith.constant 1.000000e+00 : f32
    %16 = vector.broadcast %cst_11 : f32 to vector<2x10xf32>
    %17 = arith.addf %16, %15 : vector<2x10xf32>
    %18 = arith.divf %16, %17 : vector<2x10xf32>
    %c0_12 = arith.constant 0 : index
    %c0_13 = arith.constant 0 : index
    %19 = vector.load %arg6[%c0_12, %c0_13] : memref<2x10xf32, #tpu.memory_space<vmem>>, vector<2x10xf32>
    tpu.vector_store %arg6[%c0_12, %c0_13], %18 {strides = array<i32>} : memref<2x10xf32, #tpu.memory_space<vmem>>, vector<2x10xf32>,
    return
  }
  func.func @transform_0(%arg0: i32) -> (i32, i32) {
    %c0_i32 = arith.constant 0 : i32
    %c0_i32_0 = arith.constant 0 : i32
    %c0_i32_1 = arith.constant 0 : i32
    return %c0_i32, %c0_i32_0 : i32, i32
  }
  func.func @transform_1(%arg0: i32) -> (i32, i32) {
    %c0_i32 = arith.constant 0 : i32
    %c0_i32_0 = arith.constant 0 : i32
    %c0_i32_1 = arith.constant 0 : i32
    return %c0_i32, %c0_i32_0 : i32, i32
  }
  func.func @transform_2(%arg0: i32) -> (i32, i32) {
    %c0_i32 = arith.constant 0 : i32
    %c0_i32_0 = arith.constant 0 : i32
    %c0_i32_1 = arith.constant 0 : i32
    return %c0_i32, %c0_i32_0 : i32, i32
  }
  func.func @transform_3(%arg0: i32) -> (i32, i32) {
    %c0_i32 = arith.constant 0 : i32
    %c0_i32_0 = arith.constant 0 : i32
    %c0_i32_1 = arith.constant 0 : i32
    return %c0_i32, %c0_i32_0 : i32, i32
  }
  func.func @transform_4(%arg0: i32) -> (i32, i32) {
    %c0_i32 = arith.constant 0 : i32
    %c0_i32_0 = arith.constant 0 : i32
    %c0_i32_1 = arith.constant 0 : i32
    return %c0_i32, %c0_i32_0 : i32, i32
  }
  func.func @transform_5(%arg0: i32) -> (i32, i32) {
    %c0_i32 = arith.constant 0 : i32
    %c0_i32_0 = arith.constant 0 : i32
    %c0_i32_1 = arith.constant 0 : i32
    return %c0_i32, %c0_i32_0 : i32, i32
  }
}

</mosaic_0001>

<bundles_post_ra>
// kernel: lenet_audio_forward.5
= control target key start
LH: loop header
LB: loop body
LE: loop exit
PB: predicated region body
PF: predicated region fallthrough
CT: control target
= control target key end

     0   :  { %s2207_s15 = smov 0   ;;  %s3013_s0 = inlined_call_operand.vmem [shape: bf16[2,21,40], index: 0, kind: input, shape index: {}]   ;;  %s3014_s1 = inlined_call_operand.vmem [shape: bf16[5,40,288], index: 1, kind: input, shape index: {}]   ;;  %s3015_s2 = inlined_call_operand.vmem [shape: bf16[5,40,288], index: 2, kind: input, shape index: {}]   ;;  %s3016_s3 = inlined_call_operand.vmem [shape: f32[1,288], index: 3, kind: input, shape index: {}]   ;;  %s3017_s4 = inlined_call_operand.vmem [shape: bf16[2,8,288], index: 4, kind: output, shape index: {}]  }
   0x1 LB: > { %s1702_s16 = sadd.s32 4294967295, %s2178_s15   ;;  %p1706_p0 = scmp.ge.s32.totalorder %s2178_s15, 1  ;;  %s2178_s15 = sphi %s2207_s15, %s14_s15  }
   0x2   : > { %p162_p1 = scmp.lt.s32.totalorder %s2178_s15, 3 }
   0x4   : > { %p163_p2 = pnand %p1706_p0, %p162_p1 }
   0x5   : > { %p2226_p3 = scmp.lt.s32.totalorder (!%p163_p2), %s1702_s16, 1 }
   0x6   : > { %166 = sbr.rel (%p163_p2) target bundleno = 572 (0x23c), region = 36 }
   0xb   : > { %v1717_v0 = vld [vmem:[%s3014_s1 + $0x6c] sm:$0xff]  ;;  %vm303_vm0 = vcmask 1043456   ;;  %v1718_v1 = vld [vmem:[%s3014_s1 + $0x74] sm:$0xf]  ;;  %v2113_v8 = vld [vmem:[%s3014_s1 + $0x5c] sm:$0xf0] }
   0xc   : > { %v1757_v2 = vld [vmem:[%s3015_s2 + $0x6c] sm:$0xff]  ;;  %v278_v3 = vunpack.c.l.b16 %v1717_v0  ;;  %v279_v4 = vunpack.c.h.b16 %v1717_v0  ;;  %v280_v5 = vunpack.c.l.b16 %v1718_v1  ;;  %v1733_v7 = vld [vmem:[%s3014_s1 + $0x54] sm:$0xf]  ;;  %v2112_v9 = vld [vmem:[%s3014_s1 + $0x58] sm:$0xf]  ;;  %s3020_s16 = smov (!%p2226_p3, %s1702_s16), 1 }
   0xd   : > { %v400_v6 = vunpack.c.l.b16 %v1757_v2  ;;  %v1735_v14 = vld [vmem:[%s3014_s1 + $0x60] sm:$0xf0]  ;;  %v1741_v15 = vld [vmem:[%s3014_s1 + $0x5c] sm:$0xf]  ;;  %v2114_v16 = vld [vmem:[%s3014_s1 + $0x64] sm:$0xf0]  ;;  %v1734_v25 = vor.u32 %v2113_v8, %v1733_v7  ;;  %v401_v36 = vunpack.c.h.b16 %v1757_v2 }
   0xe   : > { %v287_v10 = vpack.c.b16 %v278_v3, %v278_v3  ;;  %v288_v11 = vpack.c.b16 %v279_v4, %v279_v4  ;;  %v289_v12 = vpack.c.b16 %v280_v5, %v280_v5  ;;  %v1773_v17 = vld [vmem:[%s3015_s2 + $0x54] sm:$0xf]  ;;  %v2119_v18 = vld [vmem:[%s3015_s2 + $0x5c] sm:$0xf0]  ;;  %v1721_v19 = vld [vmem:[%s3014_s1 + $0x3c] sm:$0xf]  ;;  %v1738_v26 = vor.u32 %v2112_v9, %v1735_v14 }
   0xf   : > { %v409_v13 = vpack.c.b16 %v400_v6, %v400_v6  ;;  %v2110_v24 = vld [vmem:[%s3014_s1 + $0x44] sm:$0xf0]  ;;  %v2109_v27 = vld [vmem:[%s3014_s1 + $0x40] sm:$0xf]  ;;  %v1723_v28 = vld [vmem:[%s3014_s1 + $0x48] sm:$0xf0]  ;;  %v1742_v30 = vor.u32 %v2114_v16, %v1741_v15  ;;  %v1774_v31 = vor.u32 %v2119_v18, %v1773_v17  ;;  %v410_v44 = vpack.c.b16 %v401_v36, %v401_v36 }
  0x10   : > { %v305_v20 = vsel %vm303_vm0, %v287_v10, 0  ;;  %v308_v21 = vsel %vm303_vm0, %v288_v11, 0  ;;  %v311_v22 = vsel %vm303_vm0, %v289_v12, 0  ;;  %v1729_v29 = vld [vmem:[%s3014_s1 + $0x44] sm:$0xf]  ;;  %v210_v38 = vld [vmem:[%s3014_s1 + $0x30] sm:$0xff]  ;;  %v1722_v39 = vor.u32 %v2110_v24, %v1721_v19 }
  0x11   : > { %v419_v23 = vsel %vm303_vm0, %v409_v13, 0  ;;  %318 = vmatpush.bf16.msra.mxu0 %v305_v20  ;;  %336 = vmatpush.bf16.msra.mxu1 %v308_v21  ;;  %v2111_v32 = vld [vmem:[%s3014_s1 + $0x4c] sm:$0xf0]  ;;  %v1758_v33 = vld [vmem:[%s3015_s2 + $0x74] sm:$0xf]  ;;  %v1726_v40 = vor.u32 %v2109_v27, %v1723_v28  ;;  %s2161_s10 = smul.u32 12, %s3020_s16  ;;  %v503_v41 = vunpack.c.l.b16 %v210_v38  ;;  %v504_v42 = vunpack.c.h.b16 %v210_v38 }
  0x12   : > { %354 = vmatpush.bf16.msra.mxu2 %v311_v22  ;;  %432 = vmatpush.bf16.msra.mxu3 %v419_v23  ;;  %v1761_v34 = vld [vmem:[%s3015_s2 + $0x3c] sm:$0xf]  ;;  %v2116_v35 = vld [vmem:[%s3015_s2 + $0x44] sm:$0xf0]  ;;  %v402_v37 = vunpack.c.l.b16 %v1758_v33  ;;  %v1730_v43 = vor.u32 %v2111_v32, %v1729_v29  ;;  %v2118_v49 = vld [vmem:[%s3015_s2 + $0x58] sm:$0xf] }
  0x13   : > { %v1762_v46 = vor.u32 %v2116_v35, %v1761_v34  ;;  %s2300_s13 = scalar_lea.vmem %s3013_s0, %s2161_s10  ;;  %v512_v47 = vpack.c.b16 %v503_v41, %v503_v41  ;;  %v513_v48 = vpack.c.b16 %v504_v42, %v504_v42  ;;  %v1775_v50 = vld [vmem:[%s3015_s2 + $0x60] sm:$0xf0]  ;;  %v1781_v51 = vld [vmem:[%s3015_s2 + $0x5c] sm:$0xf]  ;;  %v2120_v52 = vld [vmem:[%s3015_s2 + $0x64] sm:$0xf0]  ;;  %s197_s12 = scalar_lea.vmem %s3017_s4, %s2161_s10 }
  0x14   : > { %v411_v45 = vpack.c.b16 %v402_v37, %v402_v37  ;;  %v2315_v53 = vld [vmem:[%s2300_s13] sm:$0xff]   ;;  %v201_v54 = vld [vmem:[%s2300_s13 + $0x8] sm:$0x1]  ;;  %v422_v55 = vsel %vm303_vm0, %v410_v44, 0  ;;  %v1803_v56 = vld [vmem:[%s3014_s1 + $0x18] sm:$0xf]  ;;  %v1778_v4 = vor.u32 %v2118_v49, %v1775_v50  ;;  %v1782_v5 = vor.u32 %v2120_v52, %v1781_v51 }
  0x15   : > { %319 = vmatpush.bf16.msra.mxu0 %v1734_v25  ;;  %337 = vmatpush.bf16.msra.mxu1 %v1738_v26  ;;  %v238_v57 = vunpack.c.l.b16 %v201_v54  ;;  %v243_v58 = vshrl.u32 %v2315_v53, 16  ;;  %v245_v59 = vshll.u32 %v2315_v53, 16  ;;  %v2101_v61 = vld [vmem:[%s3014_s1 + $0x20] sm:$0xf0]  ;;  %v526_v62 = vsel %vm303_vm0, %v512_v47, 0  ;;  %v220_v26 = vld [vmem:[%s3015_s2 + $0x30] sm:$0xff] }
  0x16   : > { %355 = vmatpush.bf16.msra.mxu2 %v1742_v30  ;;  %433 = vmatpush.bf16.msra.mxu3 %v1774_v31  ;;  %v425_v60 = vsel %vm303_vm0, %v411_v45, 0  ;;  %v529_v63 = vsel %vm303_vm0, %v513_v48, 0  ;;  %v2100_v0 = vld [vmem:[%s3014_s1 + $0x1c] sm:$0xf]  ;;  %v1805_v1 = vld [vmem:[%s3014_s1 + $0x24] sm:$0xf0]  ;;  %v1804_v11 = vor.u32 %v2101_v61, %v1803_v56  ;;  %v610_v29 = vunpack.c.l.b16 %v220_v26 }
  0x17   : > { %v2336_v2 = vpack.c.b16 %v238_v57, %v238_v57  ;;  %vm241_vm1 = vsmask.f32 7424  ;;  %v247_v3 = vrot.slane %v245_v59, 1  ;;  %v2115_v6 = vld [vmem:[%s3015_s2 + $0x40] sm:$0xf]  ;;  %v1808_v12 = vor.u32 %v2100_v0, %v1805_v1  ;;  %v1857_v1 = vld [vmem:[%s3014_s1 + $0xa8] sm:$0xff] }
  0x18   : > { %v1763_v7 = vld [vmem:[%s3015_s2 + $0x48] sm:$0xf0]  ;;  %v1769_v8 = vld [vmem:[%s3015_s2 + $0x44] sm:$0xf]  ;;  %v2117_v13 = vld [vmem:[%s3015_s2 + $0x4c] sm:$0xf0]  ;;  %v611_v30 = vunpack.c.h.b16 %v220_v26  ;;  %v619_v35 = vpack.c.b16 %v610_v29, %v610_v29 }
  0x19   : > { %320 = vmatpush.bf16.msra.mxu0 %v1722_v39  ;;  %338 = vmatpush.bf16.msra.mxu1 %v1726_v40  ;;  %v248_v9 = vor.u32 %v247_v3, %v243_v58  ;;  %v250_v10 = vshll.u32 %v2336_v2, 16  ;;  %v1791_v14 = vld [vmem:[%s3014_s1] sm:$0xf]  ;;  %v2098_v15 = vld [vmem:[%s3014_s1 + $0x8] sm:$0xf0]  ;;  %vm296_vm2 = vcmask 326656   ;;  %v1766_v19 = vor.u32 %v2115_v6, %v1763_v7 }
  0x1a   : > { %356 = vmatpush.bf16.msra.mxu2 %v1730_v43  ;;  %434 = vmatpush.bf16.msra.mxu3 %v1762_v46  ;;  %v2097_v16 = vld [vmem:[%s3014_s1 + $0x4] sm:$0xf]  ;;  %v1793_v17 = vld [vmem:[%s3014_s1 + $0xc] sm:$0xf0]  ;;  %v1770_v20 = vor.u32 %v2117_v13, %v1769_v8  ;;  %v1792_v22 = vor.u32 %v2098_v15, %v1791_v14  ;;  %v254_v24 = vshrl.u32 %v2336_v2, 16  ;;  %v620_v36 = vpack.c.b16 %v611_v30, %v611_v30 }
  0x1b   : > { %v252_v18 = vrot.slane %v250_v10, 1  ;;  %v1796_v23 = vor.u32 %v2097_v16, %v1793_v17  ;;  %v211_v25 = vld [vmem:[%s3014_s1 + $0x38] sm:$0xf]  ;;  %v1811_v32 = vld [vmem:[%s3014_s1 + $0x20] sm:$0xf]  ;;  %v629_v45 = vsel %vm303_vm0, %v619_v35, 0  ;;  %v737_v6 = vunpack.c.h.b16 %v1857_v1 }
  0x1c   : > { %v221_v27 = vld [vmem:[%s3015_s2 + $0x38] sm:$0xf]  ;;  %v505_v28 = vunpack.c.l.b16 %v211_v25  ;;  %v2102_v33 = vld [vmem:[%s3014_s1 + $0x28] sm:$0xf0]  ;;  %v2107_v39 = vld [vmem:[%s3015_s2 + $0x20] sm:$0xf0] }
  0x1d   : > { %450 = vmatpush.bf16.msrb.mxu0 %v422_v55  ;;  %468 = vmatpush.bf16.msrb.mxu1 %v425_v60  ;;  %v2364_v21 = vsel %vm241_vm1, %v248_v9, %v252_v18  ;;  %v612_v31 = vunpack.c.l.b16 %v221_v27  ;;  %v1833_v38 = vld [vmem:[%s3015_s2 + $0x18] sm:$0xf]  ;;  %v2106_v40 = vld [vmem:[%s3015_s2 + $0x1c] sm:$0xf]  ;;  %v1835_v41 = vld [vmem:[%s3015_s2 + $0x24] sm:$0xf0]  ;;  %v1812_v48 = vor.u32 %v2102_v33, %v1811_v32 }
  0x1e   : > { %539 = vmatpush.bf16.msrb.mxu2 %v526_v62  ;;  %557 = vmatpush.bf16.msrb.mxu3 %v529_v63  ;;  %v514_v34 = vpack.c.b16 %v505_v28, %v505_v28  ;;  %v1841_v42 = vld [vmem:[%s3015_s2 + $0x20] sm:$0xf]  ;;  %v2108_v43 = vld [vmem:[%s3015_s2 + $0x28] sm:$0xf0]  ;;  %v632_v46 = vsel %vm303_vm0, %v620_v36, 0  ;;  %v1834_v49 = vor.u32 %v2107_v39, %v1833_v38  ;;  %v1838_v52 = vor.u32 %v2106_v40, %v1835_v41 }
  0x1f   : > { %1743 = vmatmul.msk.bf16.vlgmr.msra.gmra.mxu0 %vm296_vm2, %v2364_v21  ;;  %1745 = vmatmul.msk.bf16.vlgmr.msra.gmra.mxu1 %vm296_vm2, %v2364_v21  ;;  %v621_v37 = vpack.c.b16 %v612_v31, %v612_v31  ;;  %v1799_v50 = vld [vmem:[%s3014_s1 + $0x8] sm:$0xf]  ;;  %v2099_v51 = vld [vmem:[%s3014_s1 + $0x10] sm:$0xf0]  ;;  %v1842_v54 = vor.u32 %v2108_v43, %v1841_v42  ;;  %v1821_v55 = vld [vmem:[%s3015_s2] sm:$0xf]  ;;  %v2160_v43 = vunpack.c.h.b16 %v2315_v53 }
  0x20   : > { %1747 = vmatmul.msk.bf16.vlgmr.msra.gmra.mxu2 %vm296_vm2, %v2364_v21  ;;  %1783 = vmatmul.msk.bf16.vlgmr.msra.gmra.mxu3 %vm296_vm2, %v2364_v21  ;;  %v532_v44 = vsel %vm303_vm0, %v514_v34, 0  ;;  %v2104_v56 = vld [vmem:[%s3015_s2 + $0x8] sm:$0xf0]  ;;  %v2103_v57 = vld [vmem:[%s3015_s2 + $0x4] sm:$0xf]  ;;  %v1800_v61 = vor.u32 %v2099_v51, %v1799_v50  ;;  %vm710_vm3 = vcmask 1046528  }
  0x21   : > { %451 = vmatpush.bf16.msrb.mxu0 %v1778_v4  ;;  %469 = vmatpush.bf16.msrb.mxu1 %v1782_v5  ;;  %v635_v47 = vsel %vm303_vm0, %v621_v37, 0  ;;  %v1823_v58 = vld [vmem:[%s3015_s2 + $0xc] sm:$0xf0]  ;;  %v1829_v59 = vld [vmem:[%s3015_s2 + $0x8] sm:$0xf]  ;;  %v1822_v62 = vor.u32 %v2104_v56, %v1821_v55  ;;  %v736_v5 = vunpack.c.l.b16 %v1857_v1  ;;  %vm1244_vm5 = vcmask 1045504  }
  0x22   : > { %540 = vmatpush.bf16.msrb.mxu2 %v1804_v11  ;;  %558 = vmatpush.bf16.msrb.mxu3 %v1808_v12  ;;  %v2105_v60 = vld [vmem:[%s3015_s2 + $0x10] sm:$0xf0]  ;;  %v1826_v63 = vor.u32 %v2103_v57, %v1823_v58  ;;  %v1858_v3 = vld [vmem:[%s3014_s1 + $0xb0] sm:$0xf]  ;;  %v2459_v4 = vld [vmem:[%s3015_s2 + $0xa8] sm:$0xff]  ;;  %v746_v12 = vpack.c.b16 %v737_v6, %v737_v6  ;;  %vm1546_vm6 = vcmask 1040384  }
  0x23   : > { %v1830_v0 = vor.u32 %v2105_v60, %v1829_v59  ;;  %v738_v7 = vunpack.c.l.b16 %v1858_v3  ;;  %v856_v8 = vunpack.c.l.b16 %v2459_v4  ;;  %v1873_v9 = vld [vmem:[%s3014_s1 + $0x90] sm:$0xf]  ;;  %v2125_v10 = vld [vmem:[%s3014_s1 + $0x98] sm:$0xf0]  ;;  %v745_v11 = vpack.c.b16 %v736_v5, %v736_v5  ;;  %v2124_v15 = vld [vmem:[%s3014_s1 + $0x94] sm:$0xf] }
  0x24   : > { %v1875_v16 = vld [vmem:[%s3014_s1 + $0x9c] sm:$0xf0]  ;;  %v1881_v17 = vld [vmem:[%s3014_s1 + $0x98] sm:$0xf]  ;;  %v2126_v18 = vld [vmem:[%s3014_s1 + $0xa0] sm:$0xf0]  ;;  %v1874_v25 = vor.u32 %v2125_v10, %v1873_v9 }
  0x25   : > { %452 = vmatpush.bf16.msrb.mxu0 %v1766_v19  ;;  %470 = vmatpush.bf16.msrb.mxu1 %v1770_v20  ;;  %v747_v13 = vpack.c.b16 %v738_v7, %v738_v7  ;;  %v865_v14 = vpack.c.b16 %v856_v8, %v856_v8  ;;  %v1913_v19 = vld [vmem:[%s3015_s2 + $0x90] sm:$0xf]  ;;  %v2131_v20 = vld [vmem:[%s3015_s2 + $0x98] sm:$0xf0]  ;;  %v1878_v26 = vor.u32 %v2124_v15, %v1875_v16  ;;  %v1861_v27 = vld [vmem:[%s3014_s1 + $0x78] sm:$0xf] }
  0x26   : > { %541 = vmatpush.bf16.msrb.mxu2 %v1792_v22  ;;  %559 = vmatpush.bf16.msrb.mxu3 %v1796_v23  ;;  %v764_v22 = vsel %vm303_vm0, %v746_v12, 0  ;;  %v2122_v28 = vld [vmem:[%s3014_s1 + $0x80] sm:$0xf0]  ;;  %v1882_v29 = vor.u32 %v2126_v18, %v1881_v17  ;;  %v1914_v30 = vor.u32 %v2131_v20, %v1913_v19  ;;  %v2121_v31 = vld [vmem:[%s3014_s1 + $0x7c] sm:$0xf]  ;;  %vm1542_vm8 = vcmask 138240  }
  0x27   : > { %v767_v23 = vsel %vm303_vm0, %v747_v13, 0  ;;  %v1863_v32 = vld [vmem:[%s3014_s1 + $0x84] sm:$0xf0]  ;;  %v1869_v33 = vld [vmem:[%s3014_s1 + $0x80] sm:$0xf]  ;;  %v1862_v37 = vor.u32 %v2122_v28, %v1861_v27  ;;  %vm1645_vm10 = vcmask 257024  }
  0x28   : > { %v2123_v34 = vld [vmem:[%s3014_s1 + $0x88] sm:$0xf0]  ;;  %v1901_v35 = vld [vmem:[%s3015_s2 + $0x78] sm:$0xf]  ;;  %v2128_v36 = vld [vmem:[%s3015_s2 + $0x80] sm:$0xf0]  ;;  %v1866_v38 = vor.u32 %v2121_v31, %v1863_v32 }
  0x29   : > { %575 = vmatpush.bf16.msra.mxu0 %v532_v44  ;;  %642 = vmatpush.bf16.msra.mxu1 %v629_v45  ;;  %v1870_v39 = vor.u32 %v2123_v34, %v1869_v33  ;;  %v1902_v40 = vor.u32 %v2128_v36, %v1901_v35  ;;  %v691_v41 = vld [vmem:[%s2300_s13] sm:$0xe]  ;;  %v692_v42 = vld [vmem:[%s2300_s13 + $0x8] sm:$0x3]  ;;  %v2132_v59 = vld [vmem:[%s3015_s2 + $0xa0] sm:$0xf0] }
  0x2a   : > { %660 = vmatpush.bf16.msra.mxu2 %v632_v46  ;;  %678 = vmatpush.bf16.msra.mxu3 %v635_v47  ;;  %v706_v44 = vunpack.c.l.b16 %v691_v41  ;;  %v707_v45 = vunpack.c.l.b16 %v692_v42  ;;  %v1898_v46 = vld [vmem:[%s3015_s2 + $0xb0] sm:$0xf]  ;;  %v1937_v47 = vld [vmem:[%s3014_s1 + $0xe4] sm:$0xff]  ;;  %v1953_v60 = vld [vmem:[%s3014_s1 + $0xcc] sm:$0xf] }
  0x2b   : > { %v1006_v50 = vunpack.c.l.b16 %v1937_v47  ;;  %v1007_v51 = vunpack.c.h.b16 %v1937_v47  ;;  %v1955_v1 = vld [vmem:[%s3014_s1 + $0xd8] sm:$0xf0]  ;;  %v1909_v15 = vld [vmem:[%s3015_s2 + $0x80] sm:$0xf]  ;;  %v2129_v17 = vld [vmem:[%s3015_s2 + $0x88] sm:$0xf0] }
  0x2c   : > { %v2127_v13 = vld [vmem:[%s3015_s2 + $0x7c] sm:$0xf]  ;;  %v1941_v18 = vld [vmem:[%s3014_s1 + $0xb4] sm:$0xf]  ;;  %v2134_v19 = vld [vmem:[%s3014_s1 + $0xbc] sm:$0xf0] }
  0x2d   : > { %576 = vmatpush.bf16.msra.mxu0 %v1812_v48  ;;  %643 = vmatpush.bf16.msra.mxu1 %v1834_v49  ;;  %v857_v48 = vunpack.c.h.b16 %v2459_v4  ;;  %v858_v49 = vunpack.c.l.b16 %v1898_v46  ;;  %v1015_v57 = vpack.c.b16 %v1006_v50, %v1006_v50  ;;  %v1016_v58 = vpack.c.b16 %v1007_v51, %v1007_v51  ;;  %v1977_v31 = vld [vmem:[%s3015_s2 + $0xe4] sm:$0xff]  ;;  %v1978_v32 = vld [vmem:[%s3015_s2 + $0xec] sm:$0xf]  ;;  %v1961_v50 = vld [vmem:[%s3014_s1 + $0xd4] sm:$0xf] }
  0x2e   : > { %661 = vmatpush.bf16.msra.mxu2 %v1838_v52  ;;  %679 = vmatpush.bf16.msra.mxu3 %v1842_v54  ;;  %v2130_v52 = vld [vmem:[%s3015_s2 + $0x94] sm:$0xf]  ;;  %v1915_v54 = vld [vmem:[%s3015_s2 + $0x9c] sm:$0xf0]  ;;  %v1126_v34 = vunpack.c.l.b16 %v1977_v31  ;;  %v1127_v35 = vunpack.c.h.b16 %v1977_v31  ;;  %v1128_v36 = vunpack.c.l.b16 %v1978_v32  ;;  %vm966_vm4 = vsmask.f32 6400 }
  0x2f   : > { %1744 = vmatmul.msk.bf16.gmra.mxu0 %vm296_vm2, %v254_v24  ;;  %1746 = vmatmul.msk.bf16.gmra.mxu1 %vm296_vm2, %v254_v24  ;;  %v866_v55 = vpack.c.b16 %v857_v48, %v857_v48  ;;  %v867_v56 = vpack.c.b16 %v858_v49, %v858_v49  ;;  %v1031_v5 = vsel %vm303_vm0, %v1015_v57, 0  ;;  %v1034_v6 = vsel %vm303_vm0, %v1016_v58, 0  ;;  %v2138_v51 = vld [vmem:[%s3014_s1 + $0xdc] sm:$0xf0]  ;;  %v2142_v57 = vld [vmem:[%s3015_s2 + $0xd0] sm:$0xf] }
  0x30   : > { %1748 = vmatmul.msk.bf16.gmra.mxu2 %vm296_vm2, %v254_v24  ;;  %1784 = vmatmul.msk.bf16.gmra.mxu3 %vm296_vm2, %v254_v24  ;;  %v1918_v7 = vor.u32 %v2130_v52, %v1915_v54  ;;  %v1993_v52 = vld [vmem:[%s3015_s2 + $0xcc] sm:$0xf]  ;;  %v2143_v54 = vld [vmem:[%s3015_s2 + $0xd4] sm:$0xf0]  ;;  %v1995_v58 = vld [vmem:[%s3015_s2 + $0xd8] sm:$0xf0] }
  0x31   : > { %577 = vmatpush.bf16.msra.mxu0 %v1800_v61  ;;  %644 = vmatpush.bf16.msra.mxu1 %v1822_v62  ;;  %v2561_v61 = vpack.c.b16 %v2160_v43, %v706_v44  ;;  %v2563_v62 = vpack.c.b16 %v707_v45, %v707_v45  ;;  %v878_v3 = vsel %vm303_vm0, %v866_v55, 0  ;;  %v881_v4 = vsel %vm303_vm0, %v867_v56, 0 }
  0x32   : > { %662 = vmatpush.bf16.msra.mxu2 %v1826_v63  ;;  %680 = vmatpush.bf16.msra.mxu3 %v1830_v0  ;;  %v2137_v63 = vld [vmem:[%s3014_s1 + $0xd4] sm:$0xf0]  ;;  %v2136_v0 = vld [vmem:[%s3014_s1 + $0xd0] sm:$0xf]  ;;  %v1962_v55 = vor.u32 %v2138_v51, %v1961_v50  ;;  %v1994_v56 = vor.u32 %v2143_v54, %v1993_v52  ;;  %v2150_v52 = vld [vmem:[%s3014_s1 + $0x118] sm:$0xf0] }
  0x33   : > { %v1954_v9 = vor.u32 %v2137_v63, %v1953_v60  ;;  %v1958_v10 = vor.u32 %v2136_v0, %v1955_v1  ;;  %v2580_v12 = vrot.slane %v2563_v62, 1  ;;  %v971_v27 = vshll.u32 %v2561_v61, 16  ;;  %v2144_v60 = vld [vmem:[%s3015_s2 + $0xdc] sm:$0xf0]  ;;  %v1949_v0 = vld [vmem:[%s3014_s1 + $0xbc] sm:$0xf] }
  0x34   : > { %v976_v28 = vshrl.u32 %v2563_v62, 16  ;;  %v2135_v1 = vld [vmem:[%s3014_s1 + $0xc4] sm:$0xf0]  ;;  %v2041_v51 = vld [vmem:[%s3014_s1 + $0x110] sm:$0xf] }
  0x35   : > { %v973_v42 = vrot.slane %v971_v27, 2  ;;  %v2737_v27 = vld [vmem:[%s3015_s2 + $0x120] sm:$0xff]  ;;  %v2073_v54 = vld [vmem:[%s3015_s2 + $0x108] sm:$0xf] }
  0x36   : > { %v2638_v44 = vrot.slane %v976_v28, 1 }
  0x3f   : > { %1785 = vmatmul.msk.bf16.vlgmr.msrb.gmra.mxu0 %vm296_vm2, %v2364_v21  ;;  %1787 = vmatmul.msk.bf16.vlgmr.msrb.gmra.mxu1 %vm296_vm2, %v2364_v21  ;;  %v761_v21 = vsel %vm303_vm0, %v745_v11, 0  ;;  %v711_v11 = vrot.slane %v2561_v61, 1 }
  0x40   : > { %1813 = vmatmul.msk.bf16.vlgmr.msrb.gmra.mxu2 %vm296_vm2, %v2315_v53  ;;  %1815 = vmatmul.msk.bf16.vlgmr.msrb.gmra.mxu3 %vm296_vm2, %v2315_v53 }
  0x41   : > { %774 = vmatpush.bf16.msrb.mxu0 %v761_v21  ;;  %792 = vmatpush.bf16.msrb.mxu1 %v764_v22  ;;  %v2601_v20 = vsel %vm710_vm3, %v711_v11, %v2580_v12  ;;  %v1910_v21 = vor.u32 %v2129_v17, %v1909_v15  ;;  %v1942_v22 = vor.u32 %v2134_v19, %v1941_v18 }
  0x42   : > { %810 = vmatpush.bf16.msrb.mxu2 %v767_v23  ;;  %v2133_v23 = vld [vmem:[%s3014_s1 + $0xb8] sm:$0xf] }
  0x45   : > { %775 = vmatpush.bf16.msrb.mxu0 %v1874_v25  ;;  %793 = vmatpush.bf16.msrb.mxu1 %v1878_v26  ;;  %v968_v26 = vshrl.u32 %v2561_v61, 16 }
  0x46   : > { %811 = vmatpush.bf16.msrb.mxu2 %v1882_v29  ;;  %v979_v29 = vshll.u32 %v2563_v62, 16 }
  0x47   : > { %v970_v41 = vrot.slane %v968_v26, 1  ;;  %v2018_v26 = vld [vmem:[%s3014_s1 + $0x128] sm:$0xf] }
  0x48   : > { %v981_v45 = vrot.slane %v979_v29, 2  ;;  %v1272_v29 = vunpack.c.l.b16 %v2018_v26 }
  0x49   : > { %776 = vmatpush.bf16.msrb.mxu0 %v1862_v37  ;;  %794 = vmatpush.bf16.msrb.mxu1 %v1866_v38  ;;  %v1135_v38 = vpack.c.b16 %v1126_v34, %v1126_v34  ;;  %v974_v62 = vor.u32 %v973_v42, %v970_v41 }
  0x4a   : > { %812 = vmatpush.bf16.msrb.mxu2 %v1870_v39  ;;  %v1136_v39 = vpack.c.b16 %v1127_v35, %v1127_v35  ;;  %v982_v63 = vor.u32 %v981_v45, %v2638_v44  ;;  %v2033_v45 = vld [vmem:[%s3014_s1 + $0x108] sm:$0xf] }
  0x4b   : > { %v1145_v47 = vsel %vm303_vm0, %v1135_v38, 0 }
  0x4c   : > { %v1148_v48 = vsel %vm303_vm0, %v1136_v39, 0  ;;  %v2698_v15 = vsel %vm966_vm4, %v974_v62, %v982_v63  ;;  %v2023_v63 = vld [vmem:[%s3014_s1 + $0xfc] sm:$0xf0] }
  0x4f   : > { %1786 = vmatmul.msk.bf16.gmra.mxu0 %vm296_vm2, %v254_v24  ;;  %1788 = vmatmul.msk.bf16.gmra.mxu1 %vm296_vm2, %v254_v24  ;;  %v875_v24 = vsel %vm303_vm0, %v865_v14, 0  ;;  %v1903_v14 = vld [vmem:[%s3015_s2 + $0x84] sm:$0xf0] }
  0x50   : > { %1814 = vmatmul.msk.bf16.gmra.mxu2 %vm296_vm2, %v2336_v2  ;;  %1816 = vmatmul.msk.bf16.gmra.mxu3 %vm296_vm2, %v2336_v2  ;;  %v1906_v16 = vor.u32 %v2127_v13, %v1903_v14  ;;  %v1989_v13 = vld [vmem:[%s3015_s2 + $0xbc] sm:$0xf]  ;;  %v2141_v14 = vld [vmem:[%s3015_s2 + $0xc4] sm:$0xf0] }
  0x51   : > { %888 = vmatpush.bf16.msrb.mxu3 %v875_v24  ;;  %v1943_v24 = vld [vmem:[%s3014_s1 + $0xc0] sm:$0xf0] }
  0x52   : > { %v1946_v25 = vor.u32 %v2133_v23, %v1943_v24 }
  0x55   : > { %889 = vmatpush.bf16.msrb.mxu3 %v1914_v30  ;;  %v1938_v30 = vld [vmem:[%s3014_s1 + $0xec] sm:$0xf] }
  0x56   : > { %v1008_v33 = vunpack.c.l.b16 %v1938_v30  ;;  %v1390_v30 = vunpack.c.l.b16 %v2737_v27 }
  0x58   : > { %v1017_v37 = vpack.c.b16 %v1008_v33, %v1008_v33  ;;  %v1281_v33 = vpack.c.b16 %v1272_v29, %v1272_v29  ;;  %v1399_v34 = vpack.c.b16 %v1390_v30, %v1390_v30 }
  0x59   : > { %890 = vmatpush.bf16.msrb.mxu3 %v1902_v40  ;;  %v1137_v40 = vpack.c.b16 %v1128_v36, %v1128_v36 }
  0x5a   : > { %v1037_v46 = vsel %vm303_vm0, %v1017_v37, 0  ;;  %v1301_v41 = vsel %vm303_vm0, %v1281_v33, 0  ;;  %v1409_v42 = vsel %vm303_vm0, %v1399_v34, 0  ;;  %v2058_v33 = vld [vmem:[%s3015_s2 + $0x128] sm:$0xf]  ;;  %v1391_v34 = vunpack.c.h.b16 %v2737_v27 }
  0x5b   : > { %v1151_v49 = vsel %vm303_vm0, %v1137_v40, 0 }
  0x5f   : > { %1817 = vmatmul.msk.bf16.vlgmr.msra.gmra.mxu0 %vm296_vm2, %v2315_v53  ;;  %1843 = vmatmul.msk.bf16.vlgmr.msra.gmra.mxu1 %vm296_vm2, %v2315_v53 }
  0x60   : > { %1845 = vmatmul.msk.bf16.vlgmr.msra.gmra.mxu2 %vm296_vm2, %v2315_v53  ;;  %1847 = vmatmul.msk.bf16.vlgmr.msra.gmra.mxu3 %vm296_vm2, %v2315_v53  ;;  %v2075_v53 = vld [vmem:[%s3015_s2 + $0x114] sm:$0xf0] }
  0x61   : > { %906 = vmatpush.bf16.msra.mxu0 %v878_v3  ;;  %924 = vmatpush.bf16.msra.mxu1 %v881_v4  ;;  %v1981_v3 = vld [vmem:[%s3015_s2 + $0xb4] sm:$0xf]  ;;  %v1950_v4 = vor.u32 %v2135_v1, %v1949_v0  ;;  %v2029_v0 = vld [vmem:[%s3014_s1 + $0xf8] sm:$0xf]  ;;  %v2147_v1 = vld [vmem:[%s3014_s1 + $0x100] sm:$0xf0] }
  0x62   : > { %1044 = vmatpush.bf16.msra.mxu2 %v1031_v5  ;;  %1062 = vmatpush.bf16.msra.mxu3 %v1034_v6  ;;  %v2140_v5 = vld [vmem:[%s3015_s2 + $0xbc] sm:$0xf0]  ;;  %v2139_v6 = vld [vmem:[%s3015_s2 + $0xb8] sm:$0xf] }
  0x65   : > { %907 = vmatpush.bf16.msra.mxu0 %v1918_v7  ;;  %v1983_v7 = vld [vmem:[%s3015_s2 + $0xc0] sm:$0xf0] }
  0x66   : > { %1045 = vmatpush.bf16.msra.mxu2 %v1954_v9  ;;  %1063 = vmatpush.bf16.msra.mxu3 %v1958_v10  ;;  %v1982_v10 = vor.u32 %v2140_v5, %v1981_v3  ;;  %v1986_v11 = vor.u32 %v2139_v6, %v1983_v7  ;;  %v2030_v6 = vor.u32 %v2147_v1, %v2029_v0  ;;  %v2061_v7 = vld [vmem:[%s3015_s2 + $0xf0] sm:$0xf] }
  0x69   : > { %908 = vmatpush.bf16.msra.mxu0 %v1906_v16  ;;  %v1990_v16 = vor.u32 %v2141_v14, %v1989_v13 }
  0x6a   : > { %1046 = vmatpush.bf16.msra.mxu2 %v1942_v22  ;;  %1064 = vmatpush.bf16.msra.mxu3 %v1946_v25  ;;  %v2017_v25 = vld [vmem:[%s3014_s1 + $0x120] sm:$0xff] }
  0x6b   : > { %v1271_v28 = vunpack.c.h.b16 %v2017_v25 }
  0x6d   : > { %v1280_v32 = vpack.c.b16 %v1271_v28, %v1271_v28 }
  0x6f   : > { %1818 = vmatmul.msk.bf16.gmra.mxu0 %vm296_vm2, %v2336_v2  ;;  %1844 = vmatmul.msk.bf16.gmra.mxu1 %vm296_vm2, %v2336_v2  ;;  %v1298_v40 = vsel %vm303_vm0, %v1280_v32, 0  ;;  %v1226_v32 = vld [vmem:[%s2300_s13 + $0x8] sm:$0x7] }
  0x70   : > { %1846 = vmatmul.msk.bf16.gmra.mxu2 %vm296_vm2, %v2336_v2  ;;  %1848 = vmatmul.msk.bf16.gmra.mxu3 %vm296_vm2, %v2336_v2  ;;  %v1921_v2 = vld [vmem:[%s3015_s2 + $0x98] sm:$0xf] }
  0x71   : > { %v1922_v8 = vor.u32 %v2132_v59, %v1921_v2  ;;  %v2001_v2 = vld [vmem:[%s3015_s2 + $0xd4] sm:$0xf]  ;;  %v1998_v59 = vor.u32 %v2142_v57, %v1995_v58  ;;  %v2021_v58 = vld [vmem:[%s3014_s1 + $0xf0] sm:$0xf] }
  0x72   : > { %v2002_v61 = vor.u32 %v2144_v60, %v2001_v2  ;;  %v2146_v2 = vld [vmem:[%s3014_s1 + $0xf8] sm:$0xf0] }
  0x73   : > { %925 = vmatpush.bf16.msra.mxu1 %v1922_v8  ;;  %v2022_v62 = vor.u32 %v2146_v2, %v2021_v58 }
  0x77   : > { %926 = vmatpush.bf16.msra.mxu1 %v1910_v21 }
  0x7f   : > { %1883 = vmatmul.msk.bf16.vlgmr.msrb.gmra.mxu0 %vm296_vm2, %v2601_v20  ;;  %1885 = vmatmul.msk.bf16.vlgmr.msrb.gmra.mxu1 %vm296_vm2, %v2601_v20 }
  0x80   : > { %1887 = vmatmul.msk.bf16.vlgmr.msrb.gmra.mxu2 %vm296_vm2, %v2601_v20  ;;  %1923 = vmatmul.msk.bf16.vlgmr.msrb.gmra.mxu3 %vm296_vm2, %v2601_v20 }
  0x81   : > { %1080 = vmatpush.bf16.msrb.mxu0 %v1037_v46  ;;  %1158 = vmatpush.bf16.msrb.mxu1 %v1145_v47  ;;  %v2149_v46 = vld [vmem:[%s3014_s1 + $0x110] sm:$0xf0]  ;;  %v2148_v47 = vld [vmem:[%s3014_s1 + $0x10c] sm:$0xf] }
  0x82   : > { %1176 = vmatpush.bf16.msrb.mxu2 %v1148_v48  ;;  %1194 = vmatpush.bf16.msrb.mxu3 %v1151_v49  ;;  %v2035_v48 = vld [vmem:[%s3014_s1 + $0x114] sm:$0xf0]  ;;  %v2034_v49 = vor.u32 %v2149_v46, %v2033_v45 }
  0x83   : > { %v2038_v50 = vor.u32 %v2148_v47, %v2035_v48 }
  0x85   : > { %1081 = vmatpush.bf16.msrb.mxu0 %v1962_v55  ;;  %1159 = vmatpush.bf16.msrb.mxu1 %v1994_v56  ;;  %v2042_v55 = vor.u32 %v2150_v52, %v2041_v51  ;;  %v2155_v56 = vld [vmem:[%s3015_s2 + $0x110] sm:$0xf0] }
  0x86   : > { %1177 = vmatpush.bf16.msrb.mxu2 %v1998_v59  ;;  %1195 = vmatpush.bf16.msrb.mxu3 %v2002_v61  ;;  %v2074_v57 = vor.u32 %v2155_v56, %v2073_v54  ;;  %v2145_v59 = vld [vmem:[%s3014_s1 + $0xf4] sm:$0xf]  ;;  %v2063_v56 = vld [vmem:[%s3015_s2 + $0xfc] sm:$0xf0] }
  0x87   : > { %v2026_v5 = vor.u32 %v2145_v59, %v2023_v63 }
  0x89   : > { %1082 = vmatpush.bf16.msrb.mxu0 %v1950_v4  ;;  %1160 = vmatpush.bf16.msrb.mxu1 %v1982_v10  ;;  %v2152_v10 = vld [vmem:[%s3015_s2 + $0xf8] sm:$0xf0] }
  0x8a   : > { %1178 = vmatpush.bf16.msrb.mxu2 %v1986_v11  ;;  %1196 = vmatpush.bf16.msrb.mxu3 %v1990_v16  ;;  %v2062_v11 = vor.u32 %v2152_v10, %v2061_v7 }
  0x8f   : > { %1884 = vmatmul.msk.bf16.gmra.mxu0 %vm296_vm2, %v2580_v12  ;;  %1886 = vmatmul.msk.bf16.gmra.mxu1 %vm296_vm2, %v2580_v12 }
  0x90   : > { %1888 = vmatmul.msk.bf16.gmra.mxu2 %vm296_vm2, %v2580_v12  ;;  %1924 = vmatmul.msk.bf16.gmra.mxu3 %vm296_vm2, %v2580_v12 }
  0x9c   : > { %v2687_v8 = vpop.f32.mrf.mxu0  ;;  %v2689_v9 = vpop.f32.mrf.mxu1 }
  0x9f   : > { %1925 = vmatmul.msk.bf16.vlgmr.msra.gmra.mxu0 %vm296_vm2, %v2601_v20  ;;  %1927 = vmatmul.msk.bf16.vlgmr.msra.gmra.mxu1 %vm296_vm2, %v2601_v20 }
  0xa0   : > { %1963 = vmatmul.msk.bf16.vlgmr.msra.gmra.mxu2 %vm296_vm2, %v2698_v15  ;;  %1965 = vmatmul.msk.bf16.vlgmr.msra.gmra.mxu3 %vm296_vm2, %v2698_v15 }
  0xa1   : > { %1326 = vmatpush.bf16.msra.mxu1 %v1298_v40  ;;  %1344 = vmatpush.bf16.msra.mxu2 %v1301_v41 }
  0xa2   : > { %1422 = vmatpush.bf16.msra.mxu3 %v1409_v42 }
  0xa3   : > { %v2708_v17 = vpop.f32.mrf.mxu2  ;;  %v2710_v18 = vpop.f32.mrf.mxu3 }
  0xa4   : > { %v2712_v19 = vpop.f32.mrf.mxu0  ;;  %v2714_v21 = vpop.f32.mrf.mxu1 }
  0xa5   : > { %1327 = vmatpush.bf16.msra.mxu1 %v2038_v50  ;;  %1345 = vmatpush.bf16.msra.mxu2 %v2042_v55  ;;  %v2154_v50 = vld [vmem:[%s3015_s2 + $0x10c] sm:$0xf]  ;;  %v2151_v55 = vld [vmem:[%s3015_s2 + $0xf4] sm:$0xf] }
  0xa6   : > { %1423 = vmatpush.bf16.msra.mxu3 %v2074_v57  ;;  %v2069_v57 = vld [vmem:[%s3015_s2 + $0xf8] sm:$0xf]  ;;  %v2066_v59 = vor.u32 %v2151_v55, %v2063_v56 }
  0xa9   : > { %1328 = vmatpush.bf16.msra.mxu1 %v2026_v5  ;;  %1346 = vmatpush.bf16.msra.mxu2 %v2030_v6 }
  0xaa   : > { %1424 = vmatpush.bf16.msra.mxu3 %v2062_v11 }
  0xab   : > { %v2716_v22 = vpop.f32.mrf.mxu2  ;;  %v2718_v23 = vpop.f32.mrf.mxu3 }
  0xac   : > { %v2720_v20 = vpop.f32.mrf.mxu0  ;;  %v2722_v24 = vpop.f32.mrf.mxu1 }
  0xaf   : > { %1926 = vmatmul.msk.bf16.gmra.mxu0 %vm296_vm2, %v2580_v12  ;;  %1928 = vmatmul.msk.bf16.gmra.mxu1 %vm296_vm2, %v2580_v12  ;;  %v1270_v12 = vunpack.c.l.b16 %v2017_v25 }
  0xb0   : > { %1964 = vmatmul.msk.bf16.gmra.mxu2 %vm296_vm2, %v2638_v44  ;;  %1966 = vmatmul.msk.bf16.gmra.mxu3 %vm296_vm2, %v2638_v44 }
  0xb1   : > { %v1279_v31 = vpack.c.b16 %v1270_v12, %v1270_v12 }
  0xb3   : > { %v2744_v35 = vpop.f32.mrf.mxu2  ;;  %v2746_v36 = vpop.f32.mrf.mxu3  ;;  %v1295_v39 = vsel %vm303_vm0, %v1279_v31, 0  ;;  %v1225_v31 = vld [vmem:[%s2300_s13] sm:$0xc] }
  0xb4   : > { %v329_v37 = vpop.f32.mrf.mxu0  ;;  %v347_v38 = vpop.f32.mrf.mxu1  ;;  %1308 = vmatpush.bf16.msra.mxu0 %v1295_v39 }
  0xb5   : > { %v1392_v37 = vunpack.c.l.b16 %v2058_v33  ;;  %v1400_v38 = vpack.c.b16 %v1391_v34, %v1391_v34 }
  0xb7   : > { %v1401_v39 = vpack.c.b16 %v1392_v37, %v1392_v37 }
  0xb8   : > { %1309 = vmatpush.bf16.msra.mxu0 %v2034_v49 }
  0xb9   : > { %v1415_v27 = vsel %vm303_vm0, %v1401_v39, 0 }
  0xbb   : > { %v365_v60 = vpop.f32.mrf.mxu2  ;;  %v443_v61 = vpop.f32.mrf.mxu3 }
  0xbc   : > { %v2794_v3 = vpop.f32.mrf.mxu0  ;;  %v2796_v4 = vpop.f32.mrf.mxu1  ;;  %1310 = vmatpush.bf16.msra.mxu0 %v2022_v62  ;;  %v2153_v60 = vld [vmem:[%s3015_s2 + $0x100] sm:$0xf0] }
  0xbd   : > { %v2070_v0 = vor.u32 %v2153_v60, %v2069_v57 }
  0xbf   : > { %1967 = vmatmul.msk.bf16.vlgmr.msrb.gmra.mxu0 %vm296_vm2, %v2698_v15  ;;  %2003 = vmatmul.msk.bf16.vlgmr.msrb.gmra.mxu1 %vm296_vm2, %v2698_v15 }
  0xc0   : > { %2005 = vmatmul.msk.bf16.vlgmr.msrb.gmra.mxu2 %vm296_vm2, %v2698_v15  ;;  %2007 = vmatmul.msk.bf16.vlgmr.msrb.gmra.mxu3 %vm296_vm2, %v2698_v15 }
  0xc1   : > { %1458 = vmatpush.bf16.msrb.mxu1 %v1415_v27 }
  0xc3   : > { %v543_v13 = vpop.f32.mrf.mxu2  ;;  %v561_v14 = vpop.f32.mrf.mxu3 }
  0xc4   : > { %v2813_v16 = vadd.f32 %v543_v13, %v2687_v8  ;;  %v2816_v25 = vadd.f32 %v561_v14, %v2689_v9  ;;  %v2818_v26 = vpop.f32.mrf.mxu0  ;;  %v2820_v12 = vpop.f32.mrf.mxu1  ;;  %v1240_v8 = vunpack.c.l.b16 %v1225_v31  ;;  %v1241_v9 = vunpack.c.l.b16 %v1226_v32 }
  0xc6   : > { %v1242_v42 = vpack.c.b16 %v2160_v43, %v1240_v8  ;;  %v1243_v45 = vpack.c.b16 %v1241_v9, %v1241_v9  ;;  %v2078_v43 = vor.u32 %v2154_v50, %v2075_v53 }
  0xc8   : > { %v1245_v52 = vrot.slane %v1242_v42, 2  ;;  %v2866_v54 = vrot.slane %v1243_v45, 2 }
  0xca   : > { %v1247_v63 = vsel %vm1244_vm5, %v1245_v52, %v2866_v54 }
  0xcb   : > { %v2822_v28 = vpop.f32.mrf.mxu2  ;;  %v2824_v29 = vpop.f32.mrf.mxu3 }
  0xcc   : > { %v2826_v30 = vpop.f32.mrf.mxu0  ;;  %v2828_v15 = vpop.f32.mrf.mxu1  ;;  %v546_v45 = vadd.f32 %v2822_v28, %v2712_v19 }
  0xcf   : > { %1968 = vmatmul.msk.bf16.gmra.mxu0 %vm296_vm2, %v2638_v44  ;;  %2004 = vmatmul.msk.bf16.gmra.mxu1 %vm296_vm2, %v2638_v44 }
  0xd0   : > { %2006 = vmatmul.msk.bf16.gmra.mxu2 %vm296_vm2, %v2638_v44  ;;  %2008 = vmatmul.msk.bf16.gmra.mxu3 %vm296_vm2, %v2638_v44  ;;  %v1412_v44 = vsel %vm303_vm0, %v1400_v38, 0 }
  0xd1   : > { %1440 = vmatpush.bf16.msrb.mxu0 %v1412_v44 }
  0xd3   : > { %v548_v40 = vpop.f32.mrf.mxu2  ;;  %v566_v41 = vpop.f32.mrf.mxu3 }
  0xd4   : > { %v2847_v46 = vadd.f32 %v548_v40, %v2720_v20  ;;  %v2850_v47 = vadd.f32 %v566_v41, %v2722_v24  ;;  %v461_v48 = vpop.f32.mrf.mxu0  ;;  %v479_v49 = vpop.f32.mrf.mxu1  ;;  %v2081_v20 = vld [vmem:[%s3015_s2 + $0x110] sm:$0xf]  ;;  %v2156_v24 = vld [vmem:[%s3015_s2 + $0x118] sm:$0xf0] }
  0xd5   : > { %v2082_v51 = vor.u32 %v2156_v24, %v2081_v20  ;;  %1441 = vmatpush.bf16.msrb.mxu0 %v2078_v43 }
  0xd7   : > { %1459 = vmatpush.bf16.msrb.mxu1 %v2082_v51 }
  0xd9   : > { %1442 = vmatpush.bf16.msrb.mxu0 %v2066_v59 }
  0xdb   : > { %v550_v58 = vpop.f32.mrf.mxu2  ;;  %v568_v2 = vpop.f32.mrf.mxu3  ;;  %1460 = vmatpush.bf16.msrb.mxu1 %v2070_v0 }
  0xdc   : > { %v579_v61 = vpop.f32.mrf.mxu0  ;;  %v646_v62 = vpop.f32.mrf.mxu1 }
  0xdd   : > { %v580_v1 = vadd.f32 %v579_v61, %v2708_v17  ;;  %v647_v5 = vadd.f32 %v646_v62, %v2710_v18 }
  0xdf   : > { %2043 = vmatmul.msk.bf16.vlgmr.msra.gmra.mxu0 %vm296_vm2, %v1247_v63  ;;  %2045 = vmatmul.msk.bf16.vlgmr.msra.gmra.mxu1 %vm296_vm2, %v1247_v63 }
  0xe0   : > { %2047 = vmatmul.msk.bf16.vlgmr.msra.gmra.mxu2 %vm296_vm2, %v1247_v63  ;;  %2083 = vmatmul.msk.bf16.vlgmr.msra.gmra.mxu3 %vm296_vm2, %v1247_v63 }
  0xe3   : > { %v664_v6 = vpop.f32.mrf.mxu2  ;;  %v682_v7 = vpop.f32.mrf.mxu3 }
  0xe4   : > { %v665_v10 = vadd.f32 %v664_v6, %v2794_v3  ;;  %v683_v11 = vadd.f32 %v682_v7, %v2796_v4  ;;  %v581_v13 = vpop.f32.mrf.mxu0  ;;  %v648_v17 = vpop.f32.mrf.mxu1 }
  0xe5   : > { %v649_v43 = vadd.f32 %v648_v17, %v2718_v23 }
  0xeb   : > { %v666_v14 = vpop.f32.mrf.mxu2  ;;  %v684_v18 = vpop.f32.mrf.mxu3 }
  0xec   : > { %v2890_v31 = vadd.f32 %v666_v14, %v2818_v26  ;;  %v2893_v32 = vadd.f32 %v684_v18, %v2820_v12  ;;  %v584_v8 = vpop.f32.mrf.mxu0  ;;  %v651_v9 = vpop.f32.mrf.mxu1 }
  0xed   : > { %v585_v33 = vadd.f32 %v584_v8, %v2744_v35  ;;  %v652_v34 = vadd.f32 %v651_v9, %v2746_v36 }
  0xef   : > { %2044 = vmatmul.msk.bf16.gmra.mxu0 %vm296_vm2, %v2866_v54  ;;  %2046 = vmatmul.msk.bf16.gmra.mxu1 %vm296_vm2, %v2866_v54 }
  0xf0   : > { %2048 = vmatmul.msk.bf16.gmra.mxu2 %vm296_vm2, %v2866_v54  ;;  %2084 = vmatmul.msk.bf16.gmra.mxu3 %vm296_vm2, %v2866_v54 }
  0xf3   : > { %v669_v3 = vpop.f32.mrf.mxu2  ;;  %v687_v4 = vpop.f32.mrf.mxu3 }
  0xf4   : > { %v670_v26 = vadd.f32 %v669_v3, %v2826_v30  ;;  %v688_v35 = vadd.f32 %v687_v4, %v2828_v15  ;;  %v586_v12 = vpop.f32.mrf.mxu0  ;;  %v653_v36 = vpop.f32.mrf.mxu1  ;;  %v564_v30 = vadd.f32 %v2824_v29, %v2714_v21 }
  0xfb   : > { %v671_v37 = vpop.f32.mrf.mxu2  ;;  %v689_v38 = vpop.f32.mrf.mxu3 }
  0xfc   : > { %v778_v39 = vpop.f32.mrf.mxu0  ;;  %v796_v40 = vpop.f32.mrf.mxu1 }
  0xfd   : > { %v937_v41 = vadd.f32 %v778_v39, %v2813_v16  ;;  %v938_v42 = vadd.f32 %v796_v40, %v2816_v25  ;;  %v582_v25 = vadd.f32 %v581_v13, %v2716_v22 }
  0xff   : > { %2085 = vmatmul.msk.bf16.vlgmr.msrb.gmra.mxu0 %vm296_vm2, %v1247_v63  ;;  %2087 = vmatmul.msk.bf16.vlgmr.msrb.gmra.mxu1 %vm296_vm2, %v1247_v63 }
 0x103   : > { %v814_v15 = vpop.f32.mrf.mxu2  ;;  %v892_v48 = vpop.f32.mrf.mxu3 }
 0x104   : > { %v939_v49 = vadd.f32 %v814_v15, %v580_v1  ;;  %v2915_v44 = vadd.f32 %v892_v48, %v647_v5  ;;  %v780_v27 = vpop.f32.mrf.mxu0  ;;  %v798_v50 = vpop.f32.mrf.mxu1 }
 0x105   : > { %v940_v16 = vadd.f32 %v780_v27, %v546_v45  ;;  %v941_v53 = vadd.f32 %v798_v50, %v564_v30 }
 0x10b   : > { %v816_v20 = vpop.f32.mrf.mxu2  ;;  %v894_v24 = vpop.f32.mrf.mxu3 }
 0x10c   : > { %v942_v51 = vadd.f32 %v816_v20, %v582_v25  ;;  %v2919_v19 = vadd.f32 %v894_v24, %v649_v43  ;;  %v783_v28 = vpop.f32.mrf.mxu0  ;;  %v801_v21 = vpop.f32.mrf.mxu1 }
 0x10d   : > { %v2922_v29 = vadd.f32 %v783_v28, %v2847_v46  ;;  %v944_v52 = vadd.f32 %v801_v21, %v2850_v47 }
 0x10f   : > { %2086 = vmatmul.msk.bf16.gmra.mxu0 %vm296_vm2, %v2866_v54  ;;  %2088 = vmatmul.msk.bf16.gmra.mxu1 %vm296_vm2, %v2866_v54 }
 0x113   : > { %v819_v22 = vpop.f32.mrf.mxu2  ;;  %v897_v23 = vpop.f32.mrf.mxu3 }
 0x114   : > { %v2929_v55 = vadd.f32 %v819_v22, %v585_v33  ;;  %v2931_v56 = vadd.f32 %v897_v23, %v652_v34  ;;  %v785_v57 = vpop.f32.mrf.mxu0  ;;  %v803_v58 = vpop.f32.mrf.mxu1 }
 0x11b   : > { %v821_v2 = vpop.f32.mrf.mxu2  ;;  %v899_v59 = vpop.f32.mrf.mxu3 }
 0x11c   : > { %v910_v46 = vpop.f32.mrf.mxu0  ;;  %v928_v60 = vpop.f32.mrf.mxu1 }
 0x11d   : > { %v947_v61 = vadd.f32 %v910_v46, %v665_v10  ;;  %v948_v47 = vadd.f32 %v928_v60, %v683_v11  ;;  %v1498_v46 = vld [vmem:[%s3016_s3] sm:$0x7] }
 0x123   : > { %v1048_v62 = vpop.f32.mrf.mxu2  ;;  %v1066_v63 = vpop.f32.mrf.mxu3 }
 0x124   : > { %v1207_v0 = vadd.f32 %v1048_v62, %v937_v41  ;;  %v2933_v1 = vadd.f32 %v1066_v63, %v938_v42  ;;  %v912_v54 = vpop.f32.mrf.mxu0  ;;  %v930_v5 = vpop.f32.mrf.mxu1 }
 0x125   : > { %v950_v6 = vadd.f32 %v912_v54, %v2890_v31  ;;  %v951_v7 = vadd.f32 %v930_v5, %v2893_v32 }
 0x12b   : > { %v1050_v13 = vpop.f32.mrf.mxu2  ;;  %v1068_v17 = vpop.f32.mrf.mxu3 }
 0x12c   : > { %v1210_v14 = vadd.f32 %v1050_v13, %v940_v16  ;;  %v2937_v18 = vadd.f32 %v1068_v17, %v941_v53  ;;  %v915_v8 = vpop.f32.mrf.mxu0  ;;  %v933_v9 = vpop.f32.mrf.mxu1  ;;  %v1530_v13 = vlaneseq }
 0x12d   : > { %v2939_v10 = vadd.f32 %v915_v8, %v670_v26  ;;  %v2941_v11 = vadd.f32 %v933_v9, %v688_v35 }
 0x133   : > { %v1053_v33 = vpop.f32.mrf.mxu2  ;;  %v1071_v34 = vpop.f32.mrf.mxu3 }
 0x134   : > { %v2943_v3 = vadd.f32 %v1071_v34, %v944_v52  ;;  %v917_v4 = vpop.f32.mrf.mxu0  ;;  %v935_v12 = vpop.f32.mrf.mxu1  ;;  %v1213_v17 = vadd.f32 %v1053_v33, %v2922_v29  ;;  %v2180_v33 = vmov 0  }
 0x13b   : > { %v1055_v31 = vpop.f32.mrf.mxu2  ;;  %v1073_v36 = vpop.f32.mrf.mxu3 }
 0x13c   : > { %v1084_v32 = vpop.f32.mrf.mxu0  ;;  %v1162_v37 = vpop.f32.mrf.mxu1 }
 0x13d   : > { %v2945_v38 = vadd.f32 %v1084_v32, %v939_v49  ;;  %v1216_v21 = vadd.f32 %v1162_v37, %v2915_v44  ;;  %v2974_v37 = vshrl.u32 %v1530_v13, 7 }
 0x13f   : > { %v1534_v29 = vmul.u32 2, %v2974_v37 }
 0x143   : > { %v1180_v39 = vpop.f32.mrf.mxu2  ;;  %v1198_v40 = vpop.f32.mrf.mxu3 }
 0x144   : > { %v2947_v41 = vadd.f32 %v1180_v39, %v947_v61  ;;  %v2949_v26 = vadd.f32 %v1198_v40, %v948_v47  ;;  %v1086_v35 = vpop.f32.mrf.mxu0  ;;  %v1164_v42 = vpop.f32.mrf.mxu1  ;;  %v1500_v61 = vperm.slane %v1498_v46, 0 }
 0x145   : > { %v2951_v45 = vadd.f32 %v1086_v35, %v942_v51  ;;  %v1219_v60 = vadd.f32 %v1164_v42, %v2919_v19  ;;  %v2976_v35 = vand.u32 127, %v1530_v13  ;;  %v1548_v42 = vsel %vm1546_vm6, 65535, %v2180_v33 }
 0x147   : > { %vm1535_vm7 = vcmp.eq.s32.totalorder %v2976_v35, %v1534_v29 }
 0x14b   : > { %v1182_v30 = vpop.f32.mrf.mxu2  ;;  %v1200_v15 = vpop.f32.mrf.mxu3 }
 0x14c   : > { %v2953_v48 = vadd.f32 %v1182_v30, %v950_v6  ;;  %v2955_v27 = vadd.f32 %v1200_v15, %v951_v7  ;;  %v2957_v50 = vpop.f32.mrf.mxu0  ;;  %v1167_v49 = vpop.f32.mrf.mxu1 }
 0x14d   : > { %v1222_v8 = vadd.f32 %v1167_v49, %v2931_v56 }
 0x153   : > { %v2959_v16 = vpop.f32.mrf.mxu2  ;;  %v2961_v53 = vpop.f32.mrf.mxu3 }
 0x154   : > { %v1091_v25 = vpop.f32.mrf.mxu0  ;;  %v1169_v43 = vpop.f32.mrf.mxu1 }
 0x15b   : > { %v1187_v20 = vpop.f32.mrf.mxu2  ;;  %v1205_v24 = vpop.f32.mrf.mxu3 }
 0x15c   : > { %v1312_v28 = vpop.f32.mrf.mxu0  ;;  %v1330_v51 = vpop.f32.mrf.mxu1 }
 0x15d   : > { %v1471_v23 = vadd.f32 %v1312_v28, %v1207_v0  ;;  %v1472_v49 = vadd.f32 %v1330_v51, %v2933_v1 }
 0x163   : > { %v1348_v52 = vpop.f32.mrf.mxu2  ;;  %v1426_v22 = vpop.f32.mrf.mxu3 }
 0x164   : > { %v1480_v57 = vadd.f32 %v1426_v22, %v1216_v21  ;;  %v1314_v58 = vpop.f32.mrf.mxu0  ;;  %v1332_v2 = vpop.f32.mrf.mxu1  ;;  %v1473_v25 = vadd.f32 %v1348_v52, %v2945_v38 }
 0x165   : > { %v1474_v63 = vadd.f32 %v1314_v58, %v1210_v14  ;;  %v2181_v58 = vmov 0.0  }
 0x166   : > { %v1489_v59 = vmax.f32 %v1471_v23, %v1480_v57 }
 0x168   : > { %v1506_v6 = vadd.f32 %v1500_v61, %v1489_v59  ;;  %v1536_v59 = vsel %vm1535_vm7, 1.0, %v2181_v58 }
 0x169   : > { %v1537_v1 = vpack.c.bf16 %v1536_v59, %v1536_v59 }
 0x16a   : > { %v1515_v9 = vmax.f32 %v1506_v6, 0.0 }
 0x16b   : > { %v1350_v47 = vpop.f32.mrf.mxu2  ;;  %v1428_v62 = vpop.f32.mrf.mxu3 }
 0x16c   : > { %v1483_v54 = vadd.f32 %v1428_v62, %v1219_v60  ;;  %v1317_v5 = vpop.f32.mrf.mxu0  ;;  %v2968_v44 = vpop.f32.mrf.mxu1  ;;  %v1501_v60 = vperm.slane %v1498_v46, 1 }
 0x16d   : > { %v1477_v12 = vadd.f32 %v1317_v5, %v1213_v17  ;;  %v1478_v13 = vadd.f32 %v2968_v44, %v2943_v3 }
 0x16e   : > { %v1492_v0 = vmax.f32 %v1474_v63, %v1483_v54 }
 0x170   : > { %v1509_v7 = vadd.f32 %v1500_v61, %v1492_v0 }
 0x172   : > { %v1518_v34 = vmax.f32 %v1509_v7, 0.0  ;;  %v1215_v7 = vadd.f32 %v2957_v50, %v2929_v55 }
 0x173   : > { %v1353_v4 = vpop.f32.mrf.mxu2  ;;  %v1431_v19 = vpop.f32.mrf.mxu3 }
 0x174   : > { %v1486_v31 = vadd.f32 %v1431_v19, %v1222_v8  ;;  %v1319_v36 = vpop.f32.mrf.mxu0  ;;  %v1337_v14 = vpop.f32.mrf.mxu1  ;;  %v2972_v32 = vpack.c.bf16 %v1518_v34, %v1515_v9  ;;  %v1479_v17 = vadd.f32 %v1353_v4, %v1215_v7 }
 0x176   : > { %v1495_v39 = vmax.f32 %v1477_v12, %v1486_v31 }
 0x178   : > { %v1512_v40 = vadd.f32 %v1500_v61, %v1495_v39  ;;  %v1502_v61 = vperm.slane %v1498_v46, 2 }
 0x17a   : > { %v1521_v56 = vmax.f32 %v1512_v40, 0.0 }
 0x17b   : > { %v1433_v30 = vpop.f32.mrf.mxu3  ;;  %v1355_v15 = vpop.f32.mrf.mxu2 }
 0x17c   : > { %v1527_v43 = vpack.c.bf16 %v1521_v56, %v1521_v56  ;;  %v1444_v20 = vpop.f32.mrf.mxu0  ;;  %v1462_v24 = vpop.f32.mrf.mxu1 }
 0x17d   : > { %v1481_v28 = vadd.f32 %v1444_v20, %v2947_v41  ;;  %v1482_v21 = vadd.f32 %v1462_v24, %v2949_v26  ;;  %v1475_v41 = vadd.f32 %v1332_v2, %v2937_v18  ;;  %v1476_v26 = vadd.f32 %v1350_v47, %v2951_v45 }
 0x17e   : > { %v1550_v22 = vand.u32 %v1548_v42, %v1527_v43  ;;  %v1223_v18 = vadd.f32 %v2959_v16, %v2939_v10  ;;  %v1224_v45 = vadd.f32 %v2961_v53, %v2941_v11  ;;  %v1538_v53 = vadd.s32 1, %v1534_v29 }
 0x17f   : > { %v1490_v23 = vmax.f32 %v1472_v49, %v1481_v28  ;;  %v1491_v57 = vmax.f32 %v1473_v25, %v1482_v21 }
 0x180   : > { %1564 = vmatpush.bf16.msrb.mxu2 %v1550_v22  ;;  %vm1539_vm9 = vcmp.eq.s32.totalorder %v2976_v35, %v1538_v53 }
 0x181   : > { %v1507_v63 = vadd.f32 %v1501_v60, %v1490_v23  ;;  %v1508_v54 = vadd.f32 %v1502_v61, %v1491_v57  ;;  %v1540_v44 = vsel %vm1539_vm9, 1.0, %v2181_v58 }
 0x182   : > { %v1541_v4 = vpack.c.bf16 %v1540_v44, %v1540_v44 }
 0x183   : > { %v1517_v2 = vmax.f32 %v1508_v54, 0.0 }
 0x184   : > { %1565 = vmatpush.bf16.msrb.mxu2 %v2972_v32  ;;  %v1446_v38 = vpop.f32.mrf.mxu0  ;;  %v1464_v51 = vpop.f32.mrf.mxu1 }
 0x185   : > { %v1484_v52 = vadd.f32 %v1446_v38, %v2953_v48  ;;  %v1485_v62 = vadd.f32 %v1464_v51, %v2955_v27  ;;  %v1516_v48 = vmax.f32 %v1507_v63, 0.0 }
 0x187   : > { %v1493_v5 = vmax.f32 %v1475_v41, %v1484_v52  ;;  %v1494_v6 = vmax.f32 %v1476_v26, %v1485_v62  ;;  %2089 = vmatmul.msk.bf16.vlgmr.msrb.gmra.mxu2 %vm1542_vm8, %v1537_v1 }
 0x189   : > { %v1510_v46 = vadd.f32 %v1501_v60, %v1493_v5  ;;  %v1511_v0 = vadd.f32 %v1502_v61, %v1494_v6 }
 0x18b   : > { %v1519_v27 = vmax.f32 %v1510_v46, 0.0  ;;  %v1520_v47 = vmax.f32 %v1511_v0, 0.0 }
 0x18c   : > { %v1449_v8 = vpop.f32.mrf.mxu0  ;;  %v1467_v9 = vpop.f32.mrf.mxu1 }
 0x18d   : > { %v1487_v34 = vadd.f32 %v1449_v8, %v1223_v18  ;;  %v1488_v19 = vadd.f32 %v1467_v9, %v1224_v45  ;;  %v1525_v12 = vpack.c.bf16 %v1519_v27, %v1516_v48  ;;  %v1526_v55 = vpack.c.bf16 %v1520_v47, %v1517_v2 }
 0x18f   : > { %v1496_v50 = vmax.f32 %v1478_v13, %v1487_v34  ;;  %v1497_v31 = vmax.f32 %v1479_v17, %v1488_v19 }
 0x191   : > { %v1513_v10 = vadd.f32 %v1501_v60, %v1496_v50  ;;  %v1514_v16 = vadd.f32 %v1502_v61, %v1497_v31 }
 0x193   : > { %v1522_v36 = vmax.f32 %v1513_v10, 0.0  ;;  %v1523_v11 = vmax.f32 %v1514_v16, 0.0 }
 0x194   : > { %v1451_v14 = vpop.f32.mrf.mxu0  ;;  %v1469_v37 = vpop.f32.mrf.mxu1 }
 0x195   : > { %v1528_v39 = vpack.c.bf16 %v1522_v36, %v1522_v36  ;;  %v1529_v40 = vpack.c.bf16 %v1523_v11, %v1523_v11 }
 0x197   : > { %v1553_v56 = vand.u32 %v1548_v42, %v1528_v39  ;;  %v1556_v3 = vand.u32 %v1548_v42, %v1529_v40 }
 0x199   : > { %1577 = vmatpush.bf16.msrb.mxu3 %v1553_v56  ;;  %1590 = vmatpush.bf16.msra.mxu2 %v1556_v3 }
 0x19a   : > { %1619 = vmatpush.bf16.msra.mxu0 %v1553_v56  ;;  %1632 = vmatpush.bf16.msra.mxu1 %v1556_v3 }
 0x19d   : > { %1578 = vmatpush.bf16.msrb.mxu3 %v1525_v12  ;;  %1591 = vmatpush.bf16.msra.mxu2 %v1526_v55 }
 0x19e   : > { %1620 = vmatpush.bf16.msra.mxu0 %v1525_v12  ;;  %1633 = vmatpush.bf16.msra.mxu1 %v1526_v55 }
 0x1a0   : > { %2090 = vmatmul.msk.bf16.vlgmr.msrb.gmra.mxu3 %vm1542_vm8, %v1537_v1  ;;  %2091 = vmatmul.msk.bf16.vlgmr.msra.gmra.mxu2 %vm1542_vm8, %v1537_v1 }
 0x1a1   : > { %1606 = vmatpush.bf16.msra.mxu3 %v1550_v22  ;;  %2093 = vmatmul.msk.bf16.vlgmr.msra.gmra.mxu0 %vm1542_vm8, %v1541_v4 }
 0x1a2   : > { %2094 = vmatmul.msk.bf16.vlgmr.msra.gmra.mxu1 %vm1542_vm8, %v1541_v4 }
 0x1a5   : > { %1607 = vmatpush.bf16.msra.mxu3 %v2972_v32 }
 0x1b0   : > { %2092 = vmatmul.msk.bf16.vlgmr.msra.gmra.mxu3 %vm1542_vm8, %v1541_v4 }
 0x20a   : > { %v1567_v35 = vpop.f32.mrf.mxu2 }
 0x212   : > { %v1569_v29 = vpop.f32.mrf.mxu2 }
 0x21e   : > { %v1622_v33 = vpop.f32.mrf.mxu0 }
 0x21f   : > { %v1635_v42 = vpop.f32.mrf.mxu1 }
 0x223   : > { %v1580_v30 = vpop.f32.mrf.mxu3  ;;  %v1593_v15 = vpop.f32.mrf.mxu2 }
 0x224   : > { %v1641_v49 = vmax.f32 %v1593_v15, %v1635_v42  ;;  %v1640_v22 = vmax.f32 %v1580_v30, %v1622_v33 }
 0x226   : > { %v1643_v25 = vpack.c.bf16 %v1641_v49, %v1641_v49  ;;  %v1624_v43 = vpop.f32.mrf.mxu0 }
 0x227   : > { %v1637_v20 = vpop.f32.mrf.mxu1 }
 0x228   : > { %1646 = vst.msk [vmem:[%s197_s12 + $0x8] sm:$0xf] %vm1645_vm10, %v1643_v25 }
 0x22b   : > { %v1582_v32 = vpop.f32.mrf.mxu3  ;;  %v1595_v24 = vpop.f32.mrf.mxu2 }
 0x233   : > { %v1609_v28 = vpop.f32.mrf.mxu3 }
 0x234   : > { %v1639_v21 = vmax.f32 %v1567_v35, %v1609_v28 }
 0x236   : > { %v1642_v23 = vpack.c.bf16 %v1640_v22, %v1639_v21 }
 0x238   : > { %1644 = vst [vmem:[%s197_s12] sm:$0xff] %v1642_v23 }
 0x23b   : > { %v1611_v57 = vpop.f32.mrf.mxu3 }
 0x23c PF: > { %s14_s15 = sadd.s32 1, %s2178_s15  }
 0x23d   : > { %p11_p4 = scmp.ge.s32.totalorder %s14_s15, 4  }
 0x23f   :  { %13 = sbr.rel (!%p11_p4) target bundleno = 1 (0x1), region = 74 }

// kernel: lenet_audio_forward.4
= control target key start
LH: loop header
LB: loop body
LE: loop exit
PB: predicated region body
PF: predicated region fallthrough
CT: control target
= control target key end

     0   :  { %s1607_s15 = smov 0   ;;  %s3044_s0 = inlined_call_operand.vmem [shape: f32[2,21,512], index: 0, kind: input, shape index: {}]   ;;  %s3045_s1 = inlined_call_operand.vmem [shape: f32[512,257], index: 1, kind: input, shape index: {}]   ;;  %s3046_s2 = inlined_call_operand.vmem [shape: f32[512,257], index: 2, kind: input, shape index: {}]   ;;  %s3047_s3 = inlined_call_operand.vmem [shape: f32[257,40], index: 3, kind: input, shape index: {}]   ;;  %s3048_s4 = inlined_call_operand.vmem [shape: bf16[2,21,40], index: 4, kind: output, shape index: {}]  }
   0x1 LB: > { %s1509_s16 = sadd.s32 4294967295, %s1579_s15   ;;  %p1513_p0 = scmp.ge.s32.totalorder %s1579_s15, 1  ;;  %s1579_s15 = sphi %s1607_s15, %s14_s15  }
   0x2   : > { %p162_p1 = scmp.lt.s32.totalorder %s1579_s15, 3 }
   0x4   : > { %p163_p2 = pnand %p1513_p0, %p162_p1 }
   0x5   : > { %p1845_p3 = scmp.lt.s32.totalorder (!%p163_p2), %s1509_s16, 1 }
   0x6   : > { %166 = sbr.rel (%p163_p2) target bundleno = 976 (0x3d0), region = 36 }
   0xb   : > { %v351_v0 = vld [vmem:[%s3045_s1 + $0x468] sm:$0xff]  ;;  %v348_v1 = vld [vmem:[%s3045_s1 + $0x450] sm:$0xff]  ;;  %v345_v5 = vld [vmem:[%s3045_s1 + $0x438] sm:$0xff]  ;;  %s3051_s16 = smov (!%p1845_p3, %s1509_s16), 1  ;;  %vm1288_vm0 = vcmask 1040384   ;;  %vm1278_vm1 = vcmask 7168  }
   0xc   : > { %v399_v2 = vld [vmem:[%s3045_s1 + $0x5e8] sm:$0xff]  ;;  %454 = vmatpush.msra.mxu2 %v351_v0  ;;  %v396_v6 = vld [vmem:[%s3045_s1 + $0x5d0] sm:$0xff]  ;;  %v393_v9 = vld [vmem:[%s3045_s1 + $0x5b8] sm:$0xff]  ;;  %s1538_s8 = smul.u32 96, %s3051_s16  ;;  %vm1370_vm2 = vcmask 326656   ;;  %vm1374_vm3 = vcmask 323584  }
   0xd   : > { %480 = vmatpush.msra.mxu3 %v399_v2  ;;  %v255_v3 = vld [vmem:[%s3045_s1 + $0x168] sm:$0xff]  ;;  %v252_v7 = vld [vmem:[%s3045_s1 + $0x150] sm:$0xff]  ;;  %v249_v10 = vld [vmem:[%s3045_s1 + $0x138] sm:$0xff]  ;;  %vm1448_vm8 = vcmask 321536   ;;  %vm1449_vm9 = vsmask.f32 2304 }
   0xe   : > { %v303_v4 = vld [vmem:[%s3045_s1 + $0x2e8] sm:$0xff]  ;;  %402 = vmatpush.msra.mxu0 %v255_v3  ;;  %v300_v8 = vld [vmem:[%s3045_s1 + $0x2d0] sm:$0xff]  ;;  %455 = vmatpush.msra.mxu2 %v348_v1  ;;  %v342_v11 = vld [vmem:[%s3045_s1 + $0x420] sm:$0xff]  ;;  %s1931_s29 = scalar_lea.vmem %s3044_s0, %s1538_s8  ;;  %vm1445_vm10 = vcmask 322560  }
   0xf   : > { %428 = vmatpush.msra.mxu1 %v303_v4  ;;  %481 = vmatpush.msra.mxu3 %v396_v6  ;;  %v297_v12 = vld [vmem:[%s3045_s1 + $0x2b8] sm:$0xff]  ;;  %v390_v13 = vld [vmem:[%s3045_s1 + $0x5a0] sm:$0xff]  ;;  %v339_v16 = vld [vmem:[%s3045_s1 + $0x408] sm:$0xff] }
  0x10   : > { %403 = vmatpush.msra.mxu0 %v252_v7  ;;  %456 = vmatpush.msra.mxu2 %v345_v5  ;;  %v246_v14 = vld [vmem:[%s3045_s1 + $0x120] sm:$0xff]  ;;  %v387_v17 = vld [vmem:[%s3045_s1 + $0x588] sm:$0xff]  ;;  %v336_v20 = vld [vmem:[%s3045_s1 + $0x3f0] sm:$0xff] }
  0x11   : > { %429 = vmatpush.msra.mxu1 %v300_v8  ;;  %482 = vmatpush.msra.mxu3 %v393_v9  ;;  %v294_v15 = vld [vmem:[%s3045_s1 + $0x2a0] sm:$0xff]  ;;  %v243_v18 = vld [vmem:[%s3045_s1 + $0x108] sm:$0xff]  ;;  %v384_v21 = vld [vmem:[%s3045_s1 + $0x570] sm:$0xff] }
  0x12   : > { %404 = vmatpush.msra.mxu0 %v249_v10  ;;  %457 = vmatpush.msra.mxu2 %v342_v11  ;;  %v291_v19 = vld [vmem:[%s3045_s1 + $0x288] sm:$0xff]  ;;  %v240_v22 = vld [vmem:[%s3045_s1 + $0xf0] sm:$0xff]  ;;  %v333_v24 = vld [vmem:[%s3045_s1 + $0x3d8] sm:$0xff] }
  0x13   : > { %430 = vmatpush.msra.mxu1 %v297_v12  ;;  %483 = vmatpush.msra.mxu3 %v390_v13  ;;  %v288_v23 = vld [vmem:[%s3045_s1 + $0x270] sm:$0xff]  ;;  %v381_v25 = vld [vmem:[%s3045_s1 + $0x558] sm:$0xff]  ;;  %v330_v28 = vld [vmem:[%s3045_s1 + $0x3c0] sm:$0xff] }
  0x14   : > { %405 = vmatpush.msra.mxu0 %v246_v14  ;;  %458 = vmatpush.msra.mxu2 %v339_v16  ;;  %v237_v26 = vld [vmem:[%s3045_s1 + $0xd8] sm:$0xff]  ;;  %v378_v29 = vld [vmem:[%s3045_s1 + $0x540] sm:$0xff]  ;;  %v327_v32 = vld [vmem:[%s3045_s1 + $0x3a8] sm:$0xff] }
  0x15   : > { %431 = vmatpush.msra.mxu1 %v294_v15  ;;  %484 = vmatpush.msra.mxu3 %v387_v17  ;;  %v285_v27 = vld [vmem:[%s3045_s1 + $0x258] sm:$0xff]  ;;  %v234_v30 = vld [vmem:[%s3045_s1 + $0xc0] sm:$0xff]  ;;  %v375_v33 = vld [vmem:[%s3045_s1 + $0x528] sm:$0xff] }
  0x16   : > { %406 = vmatpush.msra.mxu0 %v243_v18  ;;  %459 = vmatpush.msra.mxu2 %v336_v20  ;;  %v282_v31 = vld [vmem:[%s3045_s1 + $0x240] sm:$0xff]  ;;  %v231_v34 = vld [vmem:[%s3045_s1 + $0xa8] sm:$0xff]  ;;  %v324_v36 = vld [vmem:[%s3045_s1 + $0x390] sm:$0xff] }
  0x17   : > { %432 = vmatpush.msra.mxu1 %v291_v19  ;;  %485 = vmatpush.msra.mxu3 %v384_v21  ;;  %v279_v35 = vld [vmem:[%s3045_s1 + $0x228] sm:$0xff]  ;;  %v372_v37 = vld [vmem:[%s3045_s1 + $0x510] sm:$0xff]  ;;  %v321_v40 = vld [vmem:[%s3045_s1 + $0x378] sm:$0xff] }
  0x18   : > { %407 = vmatpush.msra.mxu0 %v240_v22  ;;  %460 = vmatpush.msra.mxu2 %v333_v24  ;;  %v228_v38 = vld [vmem:[%s3045_s1 + $0x90] sm:$0xff]  ;;  %v369_v41 = vld [vmem:[%s3045_s1 + $0x4f8] sm:$0xff]  ;;  %v318_v44 = vld [vmem:[%s3045_s1 + $0x360] sm:$0xff] }
  0x19   : > { %433 = vmatpush.msra.mxu1 %v288_v23  ;;  %486 = vmatpush.msra.mxu3 %v381_v25  ;;  %v276_v39 = vld [vmem:[%s3045_s1 + $0x210] sm:$0xff]  ;;  %v225_v42 = vld [vmem:[%s3045_s1 + $0x78] sm:$0xff]  ;;  %v366_v45 = vld [vmem:[%s3045_s1 + $0x4e0] sm:$0xff] }
  0x1a   : > { %408 = vmatpush.msra.mxu0 %v237_v26  ;;  %461 = vmatpush.msra.mxu2 %v330_v28  ;;  %v273_v43 = vld [vmem:[%s3045_s1 + $0x1f8] sm:$0xff]  ;;  %v222_v46 = vld [vmem:[%s3045_s1 + $0x60] sm:$0xff]  ;;  %v315_v48 = vld [vmem:[%s3045_s1 + $0x348] sm:$0xff] }
  0x1b   : > { %434 = vmatpush.msra.mxu1 %v285_v27  ;;  %487 = vmatpush.msra.mxu3 %v378_v29  ;;  %v270_v47 = vld [vmem:[%s3045_s1 + $0x1e0] sm:$0xff]  ;;  %v363_v49 = vld [vmem:[%s3045_s1 + $0x4c8] sm:$0xff]  ;;  %v312_v52 = vld [vmem:[%s3045_s1 + $0x330] sm:$0xff] }
  0x1c   : > { %409 = vmatpush.msra.mxu0 %v234_v30  ;;  %462 = vmatpush.msra.mxu2 %v327_v32  ;;  %v219_v50 = vld [vmem:[%s3045_s1 + $0x48] sm:$0xff]  ;;  %v360_v53 = vld [vmem:[%s3045_s1 + $0x4b0] sm:$0xff]  ;;  %v309_v56 = vld [vmem:[%s3045_s1 + $0x318] sm:$0xff] }
  0x1d   : > { %435 = vmatpush.msra.mxu1 %v282_v31  ;;  %488 = vmatpush.msra.mxu3 %v375_v33  ;;  %v267_v51 = vld [vmem:[%s3045_s1 + $0x1c8] sm:$0xff]  ;;  %v216_v54 = vld [vmem:[%s3045_s1 + $0x30] sm:$0xff]  ;;  %v357_v57 = vld [vmem:[%s3045_s1 + $0x498] sm:$0xff] }
  0x1e   : > { %410 = vmatpush.msra.mxu0 %v231_v34  ;;  %463 = vmatpush.msra.mxu2 %v324_v36  ;;  %v264_v55 = vld [vmem:[%s3045_s1 + $0x1b0] sm:$0xff]  ;;  %v213_v58 = vld [vmem:[%s3045_s1 + $0x18] sm:$0xff]  ;;  %v306_v60 = vld [vmem:[%s3045_s1 + $0x300] sm:$0xff] }
  0x1f   : > { %436 = vmatpush.msra.mxu1 %v279_v35  ;;  %489 = vmatpush.msra.mxu3 %v372_v37  ;;  %v261_v59 = vld [vmem:[%s3045_s1 + $0x198] sm:$0xff]  ;;  %v354_v61 = vld [vmem:[%s3045_s1 + $0x480] sm:$0xff]  ;;  %v352_v62 = vld [vmem:[%s3045_s1 + $0x470] sm:$0xff] }
  0x20   : > { %411 = vmatpush.msra.mxu0 %v228_v38  ;;  %464 = vmatpush.msra.mxu2 %v321_v40  ;;  %v400_v63 = vld [vmem:[%s3045_s1 + $0x5f0] sm:$0xff]  ;;  %v210_v0 = vld [vmem:[%s3045_s1] sm:$0xff]  ;;  %v349_v2 = vld [vmem:[%s3045_s1 + $0x458] sm:$0xff] }
  0x21   : > { %437 = vmatpush.msra.mxu1 %v276_v39  ;;  %490 = vmatpush.msra.mxu3 %v369_v41  ;;  %v258_v1 = vld [vmem:[%s3045_s1 + $0x180] sm:$0xff]  ;;  %v256_v3 = vld [vmem:[%s3045_s1 + $0x170] sm:$0xff]  ;;  %v397_v5 = vld [vmem:[%s3045_s1 + $0x5d8] sm:$0xff] }
  0x22   : > { %412 = vmatpush.msra.mxu0 %v225_v42  ;;  %465 = vmatpush.msra.mxu2 %v318_v44  ;;  %v304_v4 = vld [vmem:[%s3045_s1 + $0x2f0] sm:$0xff]  ;;  %v346_v6 = vld [vmem:[%s3045_s1 + $0x440] sm:$0xff]  ;;  %v253_v7 = vld [vmem:[%s3045_s1 + $0x158] sm:$0xff] }
  0x23   : > { %438 = vmatpush.msra.mxu1 %v273_v43  ;;  %491 = vmatpush.msra.mxu3 %v366_v45  ;;  %v301_v8 = vld [vmem:[%s3045_s1 + $0x2d8] sm:$0xff]  ;;  %v394_v9 = vld [vmem:[%s3045_s1 + $0x5c0] sm:$0xff]  ;;  %v343_v10 = vld [vmem:[%s3045_s1 + $0x428] sm:$0xff] }
  0x24   : > { %413 = vmatpush.msra.mxu0 %v222_v46  ;;  %466 = vmatpush.msra.mxu2 %v315_v48  ;;  %v250_v11 = vld [vmem:[%s3045_s1 + $0x140] sm:$0xff]  ;;  %v391_v13 = vld [vmem:[%s3045_s1 + $0x5a8] sm:$0xff]  ;;  %v340_v14 = vld [vmem:[%s3045_s1 + $0x410] sm:$0xff] }
  0x25   : > { %439 = vmatpush.msra.mxu1 %v270_v47  ;;  %492 = vmatpush.msra.mxu3 %v363_v49  ;;  %v298_v12 = vld [vmem:[%s3045_s1 + $0x2c0] sm:$0xff]  ;;  %v247_v15 = vld [vmem:[%s3045_s1 + $0x128] sm:$0xff]  ;;  %v388_v17 = vld [vmem:[%s3045_s1 + $0x590] sm:$0xff] }
  0x26   : > { %414 = vmatpush.msra.mxu0 %v219_v50  ;;  %467 = vmatpush.msra.mxu2 %v312_v52  ;;  %v295_v16 = vld [vmem:[%s3045_s1 + $0x2a8] sm:$0xff]  ;;  %v337_v18 = vld [vmem:[%s3045_s1 + $0x3f8] sm:$0xff]  ;;  %v244_v19 = vld [vmem:[%s3045_s1 + $0x110] sm:$0xff] }
  0x27   : > { %440 = vmatpush.msra.mxu1 %v267_v51  ;;  %493 = vmatpush.msra.mxu3 %v360_v53  ;;  %v292_v20 = vld [vmem:[%s3045_s1 + $0x290] sm:$0xff]  ;;  %v385_v21 = vld [vmem:[%s3045_s1 + $0x578] sm:$0xff]  ;;  %v334_v22 = vld [vmem:[%s3045_s1 + $0x3e0] sm:$0xff] }
  0x28   : > { %415 = vmatpush.msra.mxu0 %v216_v54  ;;  %468 = vmatpush.msra.mxu2 %v309_v56  ;;  %v241_v23 = vld [vmem:[%s3045_s1 + $0xf8] sm:$0xff]  ;;  %v382_v25 = vld [vmem:[%s3045_s1 + $0x560] sm:$0xff]  ;;  %v331_v26 = vld [vmem:[%s3045_s1 + $0x3c8] sm:$0xff] }
  0x29   : > { %441 = vmatpush.msra.mxu1 %v264_v55  ;;  %494 = vmatpush.msra.mxu3 %v357_v57  ;;  %v289_v24 = vld [vmem:[%s3045_s1 + $0x278] sm:$0xff]  ;;  %v238_v27 = vld [vmem:[%s3045_s1 + $0xe0] sm:$0xff]  ;;  %v379_v29 = vld [vmem:[%s3045_s1 + $0x548] sm:$0xff] }
  0x2a   : > { %416 = vmatpush.msra.mxu0 %v213_v58  ;;  %469 = vmatpush.msra.mxu2 %v306_v60  ;;  %v286_v28 = vld [vmem:[%s3045_s1 + $0x260] sm:$0xff]  ;;  %v328_v30 = vld [vmem:[%s3045_s1 + $0x3b0] sm:$0xff]  ;;  %v235_v31 = vld [vmem:[%s3045_s1 + $0xc8] sm:$0xff] }
  0x2b   : > { %442 = vmatpush.msra.mxu1 %v261_v59  ;;  %495 = vmatpush.msra.mxu3 %v354_v61  ;;  %v283_v32 = vld [vmem:[%s3045_s1 + $0x248] sm:$0xff]  ;;  %v376_v33 = vld [vmem:[%s3045_s1 + $0x530] sm:$0xff]  ;;  %v325_v34 = vld [vmem:[%s3045_s1 + $0x398] sm:$0xff] }
  0x2c   : > { %558 = vmatpush.msrb.mxu2 %v352_v62  ;;  %417 = vmatpush.msra.mxu0 %v210_v0  ;;  %v232_v35 = vld [vmem:[%s3045_s1 + $0xb0] sm:$0xff]  ;;  %v373_v37 = vld [vmem:[%s3045_s1 + $0x518] sm:$0xff]  ;;  %v322_v38 = vld [vmem:[%s3045_s1 + $0x380] sm:$0xff] }
  0x2d   : > { %584 = vmatpush.msrb.mxu3 %v400_v63  ;;  %443 = vmatpush.msra.mxu1 %v258_v1  ;;  %v280_v36 = vld [vmem:[%s3045_s1 + $0x230] sm:$0xff]  ;;  %v229_v39 = vld [vmem:[%s3045_s1 + $0x98] sm:$0xff]  ;;  %v319_v42 = vld [vmem:[%s3045_s1 + $0x368] sm:$0xff] }
  0x2e   : > { %559 = vmatpush.msrb.mxu2 %v349_v2  ;;  %506 = vmatpush.msrb.mxu0 %v256_v3  ;;  %v1946_v40 = vld [vmem:[%s1931_s29 + $0x10] sm:$0xff]  ;;  %v277_v41 = vld [vmem:[%s3045_s1 + $0x218] sm:$0xff]  ;;  %v370_v43 = vld [vmem:[%s3045_s1 + $0x500] sm:$0xff] }
  0x2f   : > { %532 = vmatpush.msrb.mxu1 %v304_v4  ;;  %585 = vmatpush.msrb.mxu3 %v397_v5  ;;  %v1958_v44 = vld [vmem:[%s1931_s29 + $0x18] sm:$0xff]  ;;  %v226_v45 = vld [vmem:[%s3045_s1 + $0x80] sm:$0xff]  ;;  %v316_v47 = vld [vmem:[%s3045_s1 + $0x350] sm:$0xff] }
  0x30   : > { %560 = vmatpush.msrb.mxu2 %v346_v6  ;;  %507 = vmatpush.msrb.mxu0 %v253_v7  ;;  %v274_v46 = vld [vmem:[%s3045_s1 + $0x200] sm:$0xff]  ;;  %v367_v48 = vld [vmem:[%s3045_s1 + $0x4e8] sm:$0xff]  ;;  %v313_v53 = vld [vmem:[%s3045_s1 + $0x338] sm:$0xff] }
  0x31   : > { %533 = vmatpush.msrb.mxu1 %v301_v8  ;;  %586 = vmatpush.msrb.mxu3 %v394_v9  ;;  %v1974_v49 = vld [vmem:[%s1931_s29] sm:$0xff]  ;;  %v1978_v50 = vld [vmem:[%s1931_s29 + $0x8] sm:$0xff]  ;;  %v364_v54 = vld [vmem:[%s3045_s1 + $0x4d0] sm:$0xff] }
  0x32   : > { %561 = vmatpush.msrb.mxu2 %v343_v10  ;;  %508 = vmatpush.msrb.mxu0 %v250_v11  ;;  %v223_v51 = vld [vmem:[%s3045_s1 + $0x68] sm:$0xff]  ;;  %v220_v55 = vld [vmem:[%s3045_s1 + $0x50] sm:$0xff]  ;;  %v310_v57 = vld [vmem:[%s3045_s1 + $0x320] sm:$0xff] }
  0x33   : > { %534 = vmatpush.msrb.mxu1 %v298_v12  ;;  %587 = vmatpush.msrb.mxu3 %v391_v13  ;;  %v271_v52 = vld [vmem:[%s3045_s1 + $0x1e8] sm:$0xff]  ;;  %v268_v56 = vld [vmem:[%s3045_s1 + $0x1d0] sm:$0xff]  ;;  %v361_v58 = vld [vmem:[%s3045_s1 + $0x4b8] sm:$0xff] }
  0x34   : > { %562 = vmatpush.msrb.mxu2 %v340_v14  ;;  %509 = vmatpush.msrb.mxu0 %v247_v15  ;;  %v2007_v59 = vld [vmem:[%s1931_s29 + $0x30] sm:$0xff]  ;;  %v217_v60 = vld [vmem:[%s3045_s1 + $0x38] sm:$0xff]  ;;  %v307_v62 = vld [vmem:[%s3045_s1 + $0x308] sm:$0xff] }
  0x35   : > { %535 = vmatpush.msrb.mxu1 %v295_v16  ;;  %588 = vmatpush.msrb.mxu3 %v388_v17  ;;  %v265_v61 = vld [vmem:[%s3045_s1 + $0x1b8] sm:$0xff]  ;;  %v358_v63 = vld [vmem:[%s3045_s1 + $0x4a0] sm:$0xff]  ;;  %v355_v4 = vld [vmem:[%s3045_s1 + $0x488] sm:$0xff] }
  0x36   : > { %563 = vmatpush.msrb.mxu2 %v337_v18  ;;  %510 = vmatpush.msrb.mxu0 %v244_v19  ;;  %v2023_v0 = vld [vmem:[%s1931_s29 + $0x38] sm:$0xff]  ;;  %v214_v2 = vld [vmem:[%s3045_s1 + $0x20] sm:$0xff]  ;;  %v2042_v6 = vld [vmem:[%s1931_s29 + $0x28] sm:$0xff] }
  0x37   : > { %536 = vmatpush.msrb.mxu1 %v292_v20  ;;  %589 = vmatpush.msrb.mxu3 %v385_v21  ;;  %v353_v1 = vld [vmem:[%s3045_s1 + $0x478] sm:$0xff]  ;;  %v262_v3 = vld [vmem:[%s3045_s1 + $0x1a0] sm:$0xff]  ;;  %v211_v9 = vld [vmem:[%s3045_s1 + $0x8] sm:$0xff] }
  0x38   : > { %564 = vmatpush.msrb.mxu2 %v334_v22  ;;  %511 = vmatpush.msrb.mxu0 %v241_v23  ;;  %v2038_v5 = vld [vmem:[%s1931_s29 + $0x20] sm:$0xff]  ;;  %v401_v8 = vld [vmem:[%s3045_s1 + $0x5f8] sm:$0xff]  ;;  %v259_v10 = vld [vmem:[%s3045_s1 + $0x188] sm:$0xff] }
  0x39   : > { %537 = vmatpush.msrb.mxu1 %v289_v24  ;;  %590 = vmatpush.msrb.mxu3 %v382_v25  ;;  %v350_v7 = vld [vmem:[%s3045_s1 + $0x460] sm:$0xff]  ;;  %v257_v11 = vld [vmem:[%s3045_s1 + $0x178] sm:$0xff]  ;;  %v347_v13 = vld [vmem:[%s3045_s1 + $0x448] sm:$0xff] }
  0x3a   : > { %565 = vmatpush.msrb.mxu2 %v331_v26  ;;  %512 = vmatpush.msrb.mxu0 %v238_v27  ;;  %v305_v12 = vld [vmem:[%s3045_s1 + $0x2f8] sm:$0xff]  ;;  %v398_v14 = vld [vmem:[%s3045_s1 + $0x5e0] sm:$0xff]  ;;  %v2071_v15 = vld [vmem:[%s1931_s29 + $0x50] sm:$0x1f] }
  0x3b   : > { %538 = vmatpush.msrb.mxu1 %v286_v28  ;;  %591 = vmatpush.msrb.mxu3 %v379_v29  ;;  %v254_v16 = vld [vmem:[%s3045_s1 + $0x160] sm:$0xff]  ;;  %v344_v18 = vld [vmem:[%s3045_s1 + $0x430] sm:$0xff]  ;;  %v395_v19 = vld [vmem:[%s3045_s1 + $0x5c8] sm:$0xff] }
  0x3c   : > { %566 = vmatpush.msrb.mxu2 %v328_v30  ;;  %513 = vmatpush.msrb.mxu0 %v235_v31  ;;  %v302_v17 = vld [vmem:[%s3045_s1 + $0x2e0] sm:$0xff]  ;;  %v2087_v20 = vld [vmem:[%s1931_s29 + $0x58] sm:$0x1f]  ;;  %v251_v21 = vld [vmem:[%s3045_s1 + $0x148] sm:$0xff] }
  0x3d   : > { %539 = vmatpush.msrb.mxu1 %v283_v32  ;;  %592 = vmatpush.msrb.mxu3 %v376_v33  ;;  %v299_v22 = vld [vmem:[%s3045_s1 + $0x2c8] sm:$0xff]  ;;  %v341_v23 = vld [vmem:[%s3045_s1 + $0x418] sm:$0xff]  ;;  %v392_v24 = vld [vmem:[%s3045_s1 + $0x5b0] sm:$0xff] }
  0x3e   : > { %567 = vmatpush.msrb.mxu2 %v325_v34  ;;  %514 = vmatpush.msrb.mxu0 %v232_v35  ;;  %v2102_v25 = vld [vmem:[%s1931_s29 + $0x40] sm:$0x1f]  ;;  %v2106_v26 = vld [vmem:[%s1931_s29 + $0x48] sm:$0x1f]  ;;  %v248_v27 = vld [vmem:[%s3045_s1 + $0x130] sm:$0xff] }
  0x3f   : > { %540 = vmatpush.msrb.mxu1 %v280_v36  ;;  %593 = vmatpush.msrb.mxu3 %v373_v37  ;;  %v296_v28 = vld [vmem:[%s3045_s1 + $0x2b0] sm:$0xff]  ;;  %v338_v29 = vld [vmem:[%s3045_s1 + $0x400] sm:$0xff]  ;;  %v389_v30 = vld [vmem:[%s3045_s1 + $0x598] sm:$0xff] }
  0x40   : > { %568 = vmatpush.msrb.mxu2 %v322_v38  ;;  %515 = vmatpush.msrb.mxu0 %v229_v39  ;;  %v245_v31 = vld [vmem:[%s3045_s1 + $0x118] sm:$0xff]  ;;  %v335_v33 = vld [vmem:[%s3045_s1 + $0x3e8] sm:$0xff]  ;;  %v386_v34 = vld [vmem:[%s3045_s1 + $0x580] sm:$0xff] }
  0x41   : > { %470 = vmatmul.f32.vlgmr.msra.gmra.mxu2 %v1946_v40  ;;  %541 = vmatpush.msrb.mxu1 %v277_v41  ;;  %v293_v32 = vld [vmem:[%s3045_s1 + $0x298] sm:$0xff]  ;;  %v242_v35 = vld [vmem:[%s3045_s1 + $0x100] sm:$0xff]  ;;  %v332_v37 = vld [vmem:[%s3045_s1 + $0x3d0] sm:$0xff] }
  0x42   : > { %569 = vmatpush.msrb.mxu2 %v319_v42  ;;  %594 = vmatpush.msrb.mxu3 %v370_v43  ;;  %v290_v36 = vld [vmem:[%s3045_s1 + $0x280] sm:$0xff]  ;;  %v383_v38 = vld [vmem:[%s3045_s1 + $0x568] sm:$0xff]  ;;  %v329_v42 = vld [vmem:[%s3045_s1 + $0x3b8] sm:$0xff] }
  0x43   : > { %496 = vmatmul.f32.vlgmr.msra.gmra.mxu3 %v1958_v44  ;;  %516 = vmatpush.msrb.mxu0 %v226_v45  ;;  %v239_v39 = vld [vmem:[%s3045_s1 + $0xe8] sm:$0xff]  ;;  %v380_v43 = vld [vmem:[%s3045_s1 + $0x550] sm:$0xff]  ;;  %vm1450_vm11 = vmand %vm1448_vm8, %vm1449_vm9 }
  0x44   : > { %542 = vmatpush.msrb.mxu1 %v274_v46  ;;  %570 = vmatpush.msrb.mxu2 %v316_v47  ;;  %v287_v41 = vld [vmem:[%s3045_s1 + $0x268] sm:$0xff]  ;;  %v236_v45 = vld [vmem:[%s3045_s1 + $0xd0] sm:$0xff]  ;;  %v326_v47 = vld [vmem:[%s3045_s1 + $0x3a0] sm:$0xff] }
  0x45   : > { %595 = vmatpush.msrb.mxu3 %v367_v48  ;;  %418 = vmatmul.f32.vlgmr.msra.gmra.mxu0 %v1974_v49  ;;  %v284_v46 = vld [vmem:[%s3045_s1 + $0x250] sm:$0xff]  ;;  %v377_v48 = vld [vmem:[%s3045_s1 + $0x538] sm:$0xff] }
  0x46   : > { %444 = vmatmul.f32.vlgmr.msra.gmra.mxu1 %v1978_v50  ;;  %517 = vmatpush.msrb.mxu0 %v223_v51  ;;  %v233_v51 = vld [vmem:[%s3045_s1 + $0xb8] sm:$0xff] }
  0x47   : > { %543 = vmatpush.msrb.mxu1 %v271_v52  ;;  %571 = vmatpush.msrb.mxu2 %v313_v53  ;;  %v281_v52 = vld [vmem:[%s3045_s1 + $0x238] sm:$0xff]  ;;  %v323_v53 = vld [vmem:[%s3045_s1 + $0x388] sm:$0xff] }
  0x48   : > { %596 = vmatpush.msrb.mxu3 %v364_v54  ;;  %518 = vmatpush.msrb.mxu0 %v220_v55  ;;  %v374_v54 = vld [vmem:[%s3045_s1 + $0x520] sm:$0xff] }
  0x49   : > { %544 = vmatpush.msrb.mxu1 %v268_v56  ;;  %572 = vmatpush.msrb.mxu2 %v310_v57  ;;  %v230_v55 = vld [vmem:[%s3045_s1 + $0xa0] sm:$0xff]  ;;  %v320_v57 = vld [vmem:[%s3045_s1 + $0x370] sm:$0xff] }
  0x4a   : > { %597 = vmatpush.msrb.mxu3 %v361_v58  ;;  %473 = vmatmul.f32.gmra.mxu2 %v2007_v59  ;;  %v278_v56 = vld [vmem:[%s3045_s1 + $0x220] sm:$0xff]  ;;  %v371_v58 = vld [vmem:[%s3045_s1 + $0x508] sm:$0xff] }
  0x4b   : > { %519 = vmatpush.msrb.mxu0 %v217_v60  ;;  %545 = vmatpush.msrb.mxu1 %v265_v61  ;;  %v227_v60 = vld [vmem:[%s3045_s1 + $0x88] sm:$0xff] }
  0x4c   : > { %573 = vmatpush.msrb.mxu2 %v307_v62  ;;  %598 = vmatpush.msrb.mxu3 %v358_v63  ;;  %v275_v61 = vld [vmem:[%s3045_s1 + $0x208] sm:$0xff]  ;;  %v317_v62 = vld [vmem:[%s3045_s1 + $0x358] sm:$0xff]  ;;  %v368_v63 = vld [vmem:[%s3045_s1 + $0x4f0] sm:$0xff] }
  0x4d   : > { %499 = vmatmul.f32.gmra.mxu3 %v2023_v0  ;;  %520 = vmatpush.msrb.mxu0 %v214_v2  ;;  %v272_v2 = vld [vmem:[%s3045_s1 + $0x1f0] sm:$0xff] }
  0x4e   : > { %662 = vmatpush.msra.mxu2 %v353_v1  ;;  %546 = vmatpush.msrb.mxu1 %v262_v3  ;;  %v224_v1 = vld [vmem:[%s3045_s1 + $0x70] sm:$0xff]  ;;  %v314_v3 = vld [vmem:[%s3045_s1 + $0x340] sm:$0xff] }
  0x4f   : > { %599 = vmatpush.msrb.mxu3 %v355_v4  ;;  %421 = vmatmul.f32.gmra.mxu0 %v2038_v5  ;;  %v365_v4 = vld [vmem:[%s3045_s1 + $0x4d8] sm:$0xff] }
  0x50   : > { %447 = vmatmul.f32.gmra.mxu1 %v2042_v6  ;;  %663 = vmatpush.msra.mxu2 %v350_v7  ;;  %v221_v7 = vld [vmem:[%s3045_s1 + $0x58] sm:$0xff] }
  0x51   : > { %688 = vmatpush.msra.mxu3 %v401_v8  ;;  %521 = vmatpush.msrb.mxu0 %v211_v9  ;;  %v269_v8 = vld [vmem:[%s3045_s1 + $0x1d8] sm:$0xff]  ;;  %v311_v9 = vld [vmem:[%s3045_s1 + $0x328] sm:$0xff] }
  0x52   : > { %547 = vmatpush.msrb.mxu1 %v259_v10  ;;  %664 = vmatpush.msra.mxu2 %v347_v13  ;;  %v362_v10 = vld [vmem:[%s3045_s1 + $0x4c0] sm:$0xff]  ;;  %v308_v13 = vld [vmem:[%s3045_s1 + $0x310] sm:$0xff] }
  0x53   : > { %610 = vmatpush.msra.mxu0 %v257_v11  ;;  %689 = vmatpush.msra.mxu3 %v398_v14  ;;  %v218_v11 = vld [vmem:[%s3045_s1 + $0x40] sm:$0xff]  ;;  %v359_v14 = vld [vmem:[%s3045_s1 + $0x4a8] sm:$0xff] }
  0x54   : > { %636 = vmatpush.msra.mxu1 %v305_v12  ;;  %476 = vmatmul.f32.gmra.mxu2 %v2071_v15  ;;  %v266_v12 = vld [vmem:[%s3045_s1 + $0x1c0] sm:$0xff] }
  0x55   : > { %611 = vmatpush.msra.mxu0 %v254_v16  ;;  %665 = vmatpush.msra.mxu2 %v344_v18  ;;  %v855_v16 = vld [vmem:[%s3046_s2 + $0x468] sm:$0xff] }
  0x56   : > { %637 = vmatpush.msra.mxu1 %v302_v17  ;;  %690 = vmatpush.msra.mxu3 %v395_v19  ;;  %v215_v17 = vld [vmem:[%s3045_s1 + $0x28] sm:$0xff]  ;;  %v356_v19 = vld [vmem:[%s3045_s1 + $0x490] sm:$0xff] }
  0x57   : > { %502 = vmatmul.f32.gmra.mxu3 %v2087_v20  ;;  %612 = vmatpush.msra.mxu0 %v251_v21  ;;  %v263_v18 = vld [vmem:[%s3045_s1 + $0x1a8] sm:$0xff]  ;;  %v852_v21 = vld [vmem:[%s3046_s2 + $0x450] sm:$0xff] }
  0x58   : > { %638 = vmatpush.msra.mxu1 %v299_v22  ;;  %666 = vmatpush.msra.mxu2 %v341_v23  ;;  %v903_v22 = vld [vmem:[%s3046_s2 + $0x5e8] sm:$0xff]  ;;  %v212_v23 = vld [vmem:[%s3045_s1 + $0x10] sm:$0xff] }
  0x59   : > { %691 = vmatpush.msra.mxu3 %v392_v24  ;;  %424 = vmatmul.f32.gmra.mxu0 %v2102_v25  ;;  %v260_v24 = vld [vmem:[%s3045_s1 + $0x190] sm:$0xff] }
  0x5a   : > { %450 = vmatmul.f32.gmra.mxu1 %v2106_v26  ;;  %613 = vmatpush.msra.mxu0 %v248_v27  ;;  %v759_v27 = vld [vmem:[%s3046_s2 + $0x168] sm:$0xff] }
  0x5b   : > { %639 = vmatpush.msra.mxu1 %v296_v28  ;;  %667 = vmatpush.msra.mxu2 %v338_v29  ;;  %v807_v28 = vld [vmem:[%s3046_s2 + $0x2e8] sm:$0xff]  ;;  %v849_v29 = vld [vmem:[%s3046_s2 + $0x438] sm:$0xff] }
  0x5c   : > { %692 = vmatpush.msra.mxu3 %v389_v30  ;;  %614 = vmatpush.msra.mxu0 %v245_v31  ;;  %v900_v30 = vld [vmem:[%s3046_s2 + $0x5d0] sm:$0xff] }
  0x5d   : > { %640 = vmatpush.msra.mxu1 %v293_v32  ;;  %668 = vmatpush.msra.mxu2 %v335_v33  ;;  %v756_v31 = vld [vmem:[%s3046_s2 + $0x150] sm:$0xff]  ;;  %v846_v33 = vld [vmem:[%s3046_s2 + $0x420] sm:$0xff] }
  0x5e   : > { %693 = vmatpush.msra.mxu3 %v386_v34  ;;  %574 = vmatmul.f32.vlgmr.msrb.gmra.mxu2 %v1946_v40  ;;  %v804_v32 = vld [vmem:[%s3046_s2 + $0x2d0] sm:$0xff]  ;;  %v897_v34 = vld [vmem:[%s3046_s2 + $0x5b8] sm:$0xff] }
  0x5f   : > { %615 = vmatpush.msra.mxu0 %v242_v35  ;;  %641 = vmatpush.msra.mxu1 %v290_v36  ;;  %v753_v35 = vld [vmem:[%s3046_s2 + $0x138] sm:$0xff] }
  0x60   : > { %669 = vmatpush.msra.mxu2 %v332_v37  ;;  %694 = vmatpush.msra.mxu3 %v383_v38  ;;  %v801_v36 = vld [vmem:[%s3046_s2 + $0x2b8] sm:$0xff]  ;;  %v843_v37 = vld [vmem:[%s3046_s2 + $0x408] sm:$0xff]  ;;  %v894_v38 = vld [vmem:[%s3046_s2 + $0x5a0] sm:$0xff] }
  0x61   : > { %600 = vmatmul.f32.vlgmr.msrb.gmra.mxu3 %v1958_v44  ;;  %616 = vmatpush.msra.mxu0 %v239_v39  ;;  %v750_v39 = vld [vmem:[%s3046_s2 + $0x120] sm:$0xff] }
  0x62   : > { %642 = vmatpush.msra.mxu1 %v287_v41  ;;  %670 = vmatpush.msra.mxu2 %v329_v42  ;;  %v798_v41 = vld [vmem:[%s3046_s2 + $0x2a0] sm:$0xff]  ;;  %v840_v42 = vld [vmem:[%s3046_s2 + $0x3f0] sm:$0xff] }
  0x63   : > { %695 = vmatpush.msra.mxu3 %v380_v43  ;;  %522 = vmatmul.f32.vlgmr.msrb.gmra.mxu0 %v1974_v49  ;;  %v891_v43 = vld [vmem:[%s3046_s2 + $0x588] sm:$0xff] }
  0x64   : > { %548 = vmatmul.f32.vlgmr.msrb.gmra.mxu1 %v1978_v50  ;;  %617 = vmatpush.msra.mxu0 %v236_v45  ;;  %v747_v45 = vld [vmem:[%s3046_s2 + $0x108] sm:$0xff] }
  0x65   : > { %643 = vmatpush.msra.mxu1 %v284_v46  ;;  %671 = vmatpush.msra.mxu2 %v326_v47  ;;  %v795_v46 = vld [vmem:[%s3046_s2 + $0x288] sm:$0xff]  ;;  %v837_v47 = vld [vmem:[%s3046_s2 + $0x3d8] sm:$0xff] }
  0x66   : > { %696 = vmatpush.msra.mxu3 %v377_v48  ;;  %618 = vmatpush.msra.mxu0 %v233_v51  ;;  %v888_v48 = vld [vmem:[%s3046_s2 + $0x570] sm:$0xff] }
  0x67   : > { %644 = vmatpush.msra.mxu1 %v281_v52  ;;  %672 = vmatpush.msra.mxu2 %v323_v53  ;;  %v744_v51 = vld [vmem:[%s3046_s2 + $0xf0] sm:$0xff]  ;;  %v834_v53 = vld [vmem:[%s3046_s2 + $0x3c0] sm:$0xff] }
  0x68   : > { %697 = vmatpush.msra.mxu3 %v374_v54  ;;  %577 = vmatmul.f32.gmra.mxu2 %v2007_v59  ;;  %v792_v52 = vld [vmem:[%s3046_s2 + $0x270] sm:$0xff]  ;;  %v885_v54 = vld [vmem:[%s3046_s2 + $0x558] sm:$0xff] }
  0x69   : > { %619 = vmatpush.msra.mxu0 %v230_v55  ;;  %645 = vmatpush.msra.mxu1 %v278_v56  ;;  %v741_v55 = vld [vmem:[%s3046_s2 + $0xd8] sm:$0xff] }
  0x6a   : > { %673 = vmatpush.msra.mxu2 %v320_v57  ;;  %698 = vmatpush.msra.mxu3 %v371_v58  ;;  %v789_v56 = vld [vmem:[%s3046_s2 + $0x258] sm:$0xff]  ;;  %v831_v57 = vld [vmem:[%s3046_s2 + $0x3a8] sm:$0xff]  ;;  %v882_v58 = vld [vmem:[%s3046_s2 + $0x540] sm:$0xff] }
  0x6b   : > { %603 = vmatmul.f32.gmra.mxu3 %v2023_v0  ;;  %620 = vmatpush.msra.mxu0 %v227_v60  ;;  %v738_v60 = vld [vmem:[%s3046_s2 + $0xc0] sm:$0xff] }
  0x6c   : > { %646 = vmatpush.msra.mxu1 %v275_v61  ;;  %674 = vmatpush.msra.mxu2 %v317_v62  ;;  %v786_v61 = vld [vmem:[%s3046_s2 + $0x240] sm:$0xff]  ;;  %v828_v62 = vld [vmem:[%s3046_s2 + $0x390] sm:$0xff] }
  0x6d   : > { %699 = vmatpush.msra.mxu3 %v368_v63  ;;  %525 = vmatmul.f32.gmra.mxu0 %v2038_v5  ;;  %v879_v63 = vld [vmem:[%s3046_s2 + $0x528] sm:$0xff] }
  0x6e   : > { %551 = vmatmul.f32.gmra.mxu1 %v2042_v6  ;;  %621 = vmatpush.msra.mxu0 %v224_v1  ;;  %v735_v1 = vld [vmem:[%s3046_s2 + $0xa8] sm:$0xff] }
  0x6f   : > { %647 = vmatpush.msra.mxu1 %v272_v2  ;;  %675 = vmatpush.msra.mxu2 %v314_v3  ;;  %v783_v2 = vld [vmem:[%s3046_s2 + $0x228] sm:$0xff]  ;;  %v825_v3 = vld [vmem:[%s3046_s2 + $0x378] sm:$0xff] }
  0x70   : > { %700 = vmatpush.msra.mxu3 %v365_v4  ;;  %622 = vmatpush.msra.mxu0 %v221_v7  ;;  %v876_v4 = vld [vmem:[%s3046_s2 + $0x510] sm:$0xff] }
  0x71   : > { %648 = vmatpush.msra.mxu1 %v269_v8  ;;  %676 = vmatpush.msra.mxu2 %v311_v9  ;;  %v732_v7 = vld [vmem:[%s3046_s2 + $0x90] sm:$0xff]  ;;  %v822_v9 = vld [vmem:[%s3046_s2 + $0x360] sm:$0xff] }
  0x72   : > { %701 = vmatpush.msra.mxu3 %v362_v10  ;;  %580 = vmatmul.f32.gmra.mxu2 %v2071_v15  ;;  %v780_v8 = vld [vmem:[%s3046_s2 + $0x210] sm:$0xff]  ;;  %v873_v10 = vld [vmem:[%s3046_s2 + $0x4f8] sm:$0xff] }
  0x73   : > { %623 = vmatpush.msra.mxu0 %v218_v11  ;;  %649 = vmatpush.msra.mxu1 %v266_v12  ;;  %v729_v11 = vld [vmem:[%s3046_s2 + $0x78] sm:$0xff] }
  0x74   : > { %677 = vmatpush.msra.mxu2 %v308_v13  ;;  %702 = vmatpush.msra.mxu3 %v359_v14  ;;  %v777_v12 = vld [vmem:[%s3046_s2 + $0x1f8] sm:$0xff]  ;;  %v819_v13 = vld [vmem:[%s3046_s2 + $0x348] sm:$0xff]  ;;  %v870_v14 = vld [vmem:[%s3046_s2 + $0x4e0] sm:$0xff] }
  0x75   : > { %606 = vmatmul.f32.gmra.mxu3 %v2087_v20  ;;  %624 = vmatpush.msra.mxu0 %v215_v17  ;;  %v774_v17 = vld [vmem:[%s3046_s2 + $0x1e0] sm:$0xff] }
  0x76   : > { %958 = vmatpush.msrb.mxu2 %v855_v16  ;;  %650 = vmatpush.msra.mxu1 %v263_v18  ;;  %v726_v16 = vld [vmem:[%s3046_s2 + $0x60] sm:$0xff]  ;;  %v816_v18 = vld [vmem:[%s3046_s2 + $0x330] sm:$0xff] }
  0x77   : > { %703 = vmatpush.msra.mxu3 %v356_v19  ;;  %528 = vmatmul.f32.gmra.mxu0 %v2102_v25  ;;  %v867_v19 = vld [vmem:[%s3046_s2 + $0x4c8] sm:$0xff] }
  0x78   : > { %959 = vmatpush.msrb.mxu2 %v852_v21  ;;  %554 = vmatmul.f32.gmra.mxu1 %v2106_v26  ;;  %v723_v21 = vld [vmem:[%s3046_s2 + $0x48] sm:$0xff] }
  0x79   : > { %984 = vmatpush.msrb.mxu3 %v903_v22  ;;  %625 = vmatpush.msra.mxu0 %v212_v23  ;;  %v771_v22 = vld [vmem:[%s3046_s2 + $0x1c8] sm:$0xff]  ;;  %v813_v23 = vld [vmem:[%s3046_s2 + $0x318] sm:$0xff] }
  0x7a   : > { %651 = vmatpush.msra.mxu1 %v260_v24  ;;  %960 = vmatpush.msrb.mxu2 %v849_v29  ;;  %v864_v24 = vld [vmem:[%s3046_s2 + $0x4b0] sm:$0xff]  ;;  %v810_v29 = vld [vmem:[%s3046_s2 + $0x300] sm:$0xff] }
  0x7b   : > { %906 = vmatpush.msrb.mxu0 %v759_v27  ;;  %985 = vmatpush.msrb.mxu3 %v900_v30  ;;  %v720_v27 = vld [vmem:[%s3046_s2 + $0x30] sm:$0xff]  ;;  %v861_v30 = vld [vmem:[%s3046_s2 + $0x498] sm:$0xff] }
  0x7c   : > { %932 = vmatpush.msrb.mxu1 %v807_v28  ;;  %961 = vmatpush.msrb.mxu2 %v846_v33  ;;  %v768_v28 = vld [vmem:[%s3046_s2 + $0x1b0] sm:$0xff]  ;;  %v765_v33 = vld [vmem:[%s3046_s2 + $0x198] sm:$0xff] }
  0x7d   : > { %907 = vmatpush.msrb.mxu0 %v756_v31  ;;  %986 = vmatpush.msrb.mxu3 %v897_v34  ;;  %v856_v31 = vld [vmem:[%s3046_s2 + $0x470] sm:$0xff]  ;;  %v858_v34 = vld [vmem:[%s3046_s2 + $0x480] sm:$0xff] }
  0x7e   : > { %933 = vmatpush.msrb.mxu1 %v804_v32  ;;  %678 = vmatmul.f32.vlgmr.msra.gmra.mxu2 %v1946_v40  ;;  %v717_v32 = vld [vmem:[%s3046_s2 + $0x18] sm:$0xff] }
  0x7f   : > { %908 = vmatpush.msrb.mxu0 %v753_v35  ;;  %962 = vmatpush.msrb.mxu2 %v843_v37  ;;  %v853_v35 = vld [vmem:[%s3046_s2 + $0x458] sm:$0xff]  ;;  %v714_v37 = vld [vmem:[%s3046_s2] sm:$0xff] }
  0x80   : > { %934 = vmatpush.msrb.mxu1 %v801_v36  ;;  %987 = vmatpush.msrb.mxu3 %v894_v38  ;;  %v904_v36 = vld [vmem:[%s3046_s2 + $0x5f0] sm:$0xff]  ;;  %v762_v38 = vld [vmem:[%s3046_s2 + $0x180] sm:$0xff] }
  0x81   : > { %704 = vmatmul.f32.vlgmr.msra.gmra.mxu3 %v1958_v44  ;;  %909 = vmatpush.msrb.mxu0 %v750_v39  ;;  %v760_v39 = vld [vmem:[%s3046_s2 + $0x170] sm:$0xff] }
  0x82   : > { %935 = vmatpush.msrb.mxu1 %v798_v41  ;;  %963 = vmatpush.msrb.mxu2 %v840_v42  ;;  %v808_v41 = vld [vmem:[%s3046_s2 + $0x2f0] sm:$0xff]  ;;  %v850_v42 = vld [vmem:[%s3046_s2 + $0x440] sm:$0xff] }
  0x83   : > { %988 = vmatpush.msrb.mxu3 %v891_v43  ;;  %626 = vmatmul.f32.vlgmr.msra.gmra.mxu0 %v1974_v49  ;;  %v901_v43 = vld [vmem:[%s3046_s2 + $0x5d8] sm:$0xff] }
  0x84   : > { %652 = vmatmul.f32.vlgmr.msra.gmra.mxu1 %v1978_v50  ;;  %910 = vmatpush.msrb.mxu0 %v747_v45  ;;  %v757_v45 = vld [vmem:[%s3046_s2 + $0x158] sm:$0xff] }
  0x85   : > { %936 = vmatpush.msrb.mxu1 %v795_v46  ;;  %964 = vmatpush.msrb.mxu2 %v837_v47  ;;  %v805_v46 = vld [vmem:[%s3046_s2 + $0x2d8] sm:$0xff]  ;;  %v847_v47 = vld [vmem:[%s3046_s2 + $0x428] sm:$0xff] }
  0x86   : > { %989 = vmatpush.msrb.mxu3 %v888_v48  ;;  %911 = vmatpush.msrb.mxu0 %v744_v51  ;;  %v898_v48 = vld [vmem:[%s3046_s2 + $0x5c0] sm:$0xff] }
  0x87   : > { %937 = vmatpush.msrb.mxu1 %v792_v52  ;;  %965 = vmatpush.msrb.mxu2 %v834_v53  ;;  %v754_v51 = vld [vmem:[%s3046_s2 + $0x140] sm:$0xff]  ;;  %v844_v53 = vld [vmem:[%s3046_s2 + $0x410] sm:$0xff] }
  0x88   : > { %990 = vmatpush.msrb.mxu3 %v885_v54  ;;  %681 = vmatmul.f32.gmra.mxu2 %v2007_v59  ;;  %v802_v52 = vld [vmem:[%s3046_s2 + $0x2c0] sm:$0xff]  ;;  %v895_v54 = vld [vmem:[%s3046_s2 + $0x5a8] sm:$0xff] }
  0x89   : > { %912 = vmatpush.msrb.mxu0 %v741_v55  ;;  %938 = vmatpush.msrb.mxu1 %v789_v56  ;;  %v751_v55 = vld [vmem:[%s3046_s2 + $0x128] sm:$0xff] }
  0x8a   : > { %966 = vmatpush.msrb.mxu2 %v831_v57  ;;  %991 = vmatpush.msrb.mxu3 %v882_v58  ;;  %v799_v56 = vld [vmem:[%s3046_s2 + $0x2a8] sm:$0xff]  ;;  %v841_v57 = vld [vmem:[%s3046_s2 + $0x3f8] sm:$0xff]  ;;  %v892_v58 = vld [vmem:[%s3046_s2 + $0x590] sm:$0xff] }
  0x8b   : > { %707 = vmatmul.f32.gmra.mxu3 %v2023_v0  ;;  %913 = vmatpush.msrb.mxu0 %v738_v60  ;;  %v748_v60 = vld [vmem:[%s3046_s2 + $0x110] sm:$0xff] }
  0x8c   : > { %939 = vmatpush.msrb.mxu1 %v786_v61  ;;  %967 = vmatpush.msrb.mxu2 %v828_v62  ;;  %v796_v61 = vld [vmem:[%s3046_s2 + $0x290] sm:$0xff]  ;;  %v838_v62 = vld [vmem:[%s3046_s2 + $0x3e0] sm:$0xff] }
  0x8d   : > { %992 = vmatpush.msrb.mxu3 %v879_v63  ;;  %629 = vmatmul.f32.gmra.mxu0 %v2038_v5  ;;  %v889_v63 = vld [vmem:[%s3046_s2 + $0x578] sm:$0xff] }
  0x8e   : > { %655 = vmatmul.f32.gmra.mxu1 %v2042_v6  ;;  %914 = vmatpush.msrb.mxu0 %v735_v1  ;;  %v745_v1 = vld [vmem:[%s3046_s2 + $0xf8] sm:$0xff] }
  0x8f   : > { %940 = vmatpush.msrb.mxu1 %v783_v2  ;;  %968 = vmatpush.msrb.mxu2 %v825_v3  ;;  %v793_v2 = vld [vmem:[%s3046_s2 + $0x278] sm:$0xff]  ;;  %v835_v3 = vld [vmem:[%s3046_s2 + $0x3c8] sm:$0xff] }
  0x90   : > { %993 = vmatpush.msrb.mxu3 %v876_v4  ;;  %915 = vmatpush.msrb.mxu0 %v732_v7  ;;  %v886_v4 = vld [vmem:[%s3046_s2 + $0x560] sm:$0xff] }
  0x91   : > { %941 = vmatpush.msrb.mxu1 %v780_v8  ;;  %969 = vmatpush.msrb.mxu2 %v822_v9  ;;  %v742_v7 = vld [vmem:[%s3046_s2 + $0xe0] sm:$0xff]  ;;  %v832_v9 = vld [vmem:[%s3046_s2 + $0x3b0] sm:$0xff] }
  0x92   : > { %994 = vmatpush.msrb.mxu3 %v873_v10  ;;  %684 = vmatmul.f32.gmra.mxu2 %v2071_v15  ;;  %v790_v8 = vld [vmem:[%s3046_s2 + $0x260] sm:$0xff]  ;;  %v883_v10 = vld [vmem:[%s3046_s2 + $0x548] sm:$0xff] }
  0x93   : > { %916 = vmatpush.msrb.mxu0 %v729_v11  ;;  %942 = vmatpush.msrb.mxu1 %v777_v12  ;;  %v739_v11 = vld [vmem:[%s3046_s2 + $0xc8] sm:$0xff] }
  0x94   : > { %970 = vmatpush.msrb.mxu2 %v819_v13  ;;  %995 = vmatpush.msrb.mxu3 %v870_v14  ;;  %v787_v12 = vld [vmem:[%s3046_s2 + $0x248] sm:$0xff]  ;;  %v829_v13 = vld [vmem:[%s3046_s2 + $0x398] sm:$0xff]  ;;  %v880_v14 = vld [vmem:[%s3046_s2 + $0x530] sm:$0xff] }
  0x95   : > { %710 = vmatmul.f32.gmra.mxu3 %v2087_v20  ;;  %917 = vmatpush.msrb.mxu0 %v726_v16  ;;  %v736_v16 = vld [vmem:[%s3046_s2 + $0xb0] sm:$0xff] }
  0x96   : > { %943 = vmatpush.msrb.mxu1 %v774_v17  ;;  %971 = vmatpush.msrb.mxu2 %v816_v18  ;;  %v784_v17 = vld [vmem:[%s3046_s2 + $0x230] sm:$0xff]  ;;  %v826_v18 = vld [vmem:[%s3046_s2 + $0x380] sm:$0xff] }
  0x97   : > { %996 = vmatpush.msrb.mxu3 %v867_v19  ;;  %632 = vmatmul.f32.gmra.mxu0 %v2102_v25  ;;  %v877_v19 = vld [vmem:[%s3046_s2 + $0x518] sm:$0xff] }
  0x98   : > { %658 = vmatmul.f32.gmra.mxu1 %v2106_v26  ;;  %918 = vmatpush.msrb.mxu0 %v723_v21  ;;  %v733_v21 = vld [vmem:[%s3046_s2 + $0x98] sm:$0xff] }
  0x99   : > { %944 = vmatpush.msrb.mxu1 %v771_v22  ;;  %972 = vmatpush.msrb.mxu2 %v813_v23  ;;  %v781_v22 = vld [vmem:[%s3046_s2 + $0x218] sm:$0xff]  ;;  %v823_v23 = vld [vmem:[%s3046_s2 + $0x368] sm:$0xff] }
  0x9a   : > { %997 = vmatpush.msrb.mxu3 %v864_v24  ;;  %919 = vmatpush.msrb.mxu0 %v720_v27  ;;  %v874_v24 = vld [vmem:[%s3046_s2 + $0x500] sm:$0xff] }
  0x9b   : > { %945 = vmatpush.msrb.mxu1 %v768_v28  ;;  %973 = vmatpush.msrb.mxu2 %v810_v29  ;;  %v730_v27 = vld [vmem:[%s3046_s2 + $0x80] sm:$0xff]  ;;  %v820_v29 = vld [vmem:[%s3046_s2 + $0x350] sm:$0xff] }
  0x9c   : > { %998 = vmatpush.msrb.mxu3 %v861_v30  ;;  %974 = vmatmul.f32.vlgmr.msrb.gmra.mxu2 %v1946_v40  ;;  %v778_v28 = vld [vmem:[%s3046_s2 + $0x200] sm:$0xff]  ;;  %v871_v30 = vld [vmem:[%s3046_s2 + $0x4e8] sm:$0xff] }
  0x9d   : > { %1062 = vmatpush.msra.mxu2 %v856_v31  ;;  %920 = vmatpush.msrb.mxu0 %v717_v32  ;;  %v727_v31 = vld [vmem:[%s3046_s2 + $0x68] sm:$0xff] }
  0x9e   : > { %946 = vmatpush.msrb.mxu1 %v765_v33  ;;  %999 = vmatpush.msrb.mxu3 %v858_v34  ;;  %v775_v32 = vld [vmem:[%s3046_s2 + $0x1e8] sm:$0xff]  ;;  %v817_v33 = vld [vmem:[%s3046_s2 + $0x338] sm:$0xff]  ;;  %v868_v34 = vld [vmem:[%s3046_s2 + $0x4d0] sm:$0xff] }
  0x9f   : > { %1000 = vmatmul.f32.vlgmr.msrb.gmra.mxu3 %v1958_v44  ;;  %1063 = vmatpush.msra.mxu2 %v853_v35  ;;  %v724_v35 = vld [vmem:[%s3046_s2 + $0x50] sm:$0xff] }
  0xa0   : > { %1088 = vmatpush.msra.mxu3 %v904_v36  ;;  %921 = vmatpush.msrb.mxu0 %v714_v37  ;;  %v772_v36 = vld [vmem:[%s3046_s2 + $0x1d0] sm:$0xff]  ;;  %v814_v37 = vld [vmem:[%s3046_s2 + $0x320] sm:$0xff] }
  0xa1   : > { %947 = vmatpush.msrb.mxu1 %v762_v38  ;;  %922 = vmatmul.f32.vlgmr.msrb.gmra.mxu0 %v1974_v49  ;;  %v865_v38 = vld [vmem:[%s3046_s2 + $0x4b8] sm:$0xff] }
  0xa2   : > { %948 = vmatmul.f32.vlgmr.msrb.gmra.mxu1 %v1978_v50  ;;  %1010 = vmatpush.msra.mxu0 %v760_v39  ;;  %v721_v39 = vld [vmem:[%s3046_s2 + $0x38] sm:$0xff] }
  0xa3   : > { %1036 = vmatpush.msra.mxu1 %v808_v41  ;;  %1064 = vmatpush.msra.mxu2 %v850_v42  ;;  %v769_v41 = vld [vmem:[%s3046_s2 + $0x1b8] sm:$0xff]  ;;  %v811_v42 = vld [vmem:[%s3046_s2 + $0x308] sm:$0xff] }
  0xa4   : > { %1089 = vmatpush.msra.mxu3 %v901_v43  ;;  %1011 = vmatpush.msra.mxu0 %v757_v45  ;;  %v862_v43 = vld [vmem:[%s3046_s2 + $0x4a0] sm:$0xff]  ;;  %v857_v45 = vld [vmem:[%s3046_s2 + $0x478] sm:$0xff] }
  0xa5   : > { %1037 = vmatpush.msra.mxu1 %v805_v46  ;;  %1065 = vmatpush.msra.mxu2 %v847_v47  ;;  %v718_v46 = vld [vmem:[%s3046_s2 + $0x20] sm:$0xff] }
  0xa6   : > { %1090 = vmatpush.msra.mxu3 %v898_v48  ;;  %977 = vmatmul.f32.gmra.mxu2 %v2007_v59  ;;  %v766_v47 = vld [vmem:[%s3046_s2 + $0x1a0] sm:$0xff]  ;;  %v859_v48 = vld [vmem:[%s3046_s2 + $0x488] sm:$0xff] }
  0xa7   : > { %1012 = vmatpush.msra.mxu0 %v754_v51  ;;  %1038 = vmatpush.msra.mxu1 %v802_v52  ;;  %v854_v51 = vld [vmem:[%s3046_s2 + $0x460] sm:$0xff]  ;;  %v905_v52 = vld [vmem:[%s3046_s2 + $0x5f8] sm:$0xff] }
  0xa8   : > { %1066 = vmatpush.msra.mxu2 %v844_v53  ;;  %1091 = vmatpush.msra.mxu3 %v895_v54  ;;  %v715_v53 = vld [vmem:[%s3046_s2 + $0x8] sm:$0xff] }
  0xa9   : > { %1003 = vmatmul.f32.gmra.mxu3 %v2023_v0  ;;  %1013 = vmatpush.msra.mxu0 %v751_v55 }
  0xaa   : > { %1039 = vmatpush.msra.mxu1 %v799_v56  ;;  %1067 = vmatpush.msra.mxu2 %v841_v57  ;;  %v761_v57 = vld [vmem:[%s3046_s2 + $0x178] sm:$0xff] }
  0xab   : > { %1092 = vmatpush.msra.mxu3 %v892_v58  ;;  %925 = vmatmul.f32.gmra.mxu0 %v2038_v5 }
  0xac   : > { %951 = vmatmul.f32.gmra.mxu1 %v2042_v6  ;;  %1014 = vmatpush.msra.mxu0 %v748_v60  ;;  %v809_v60 = vld [vmem:[%s3046_s2 + $0x2f8] sm:$0xff] }
  0xad   : > { %1040 = vmatpush.msra.mxu1 %v796_v61  ;;  %1068 = vmatpush.msra.mxu2 %v838_v62  ;;  %v851_v61 = vld [vmem:[%s3046_s2 + $0x448] sm:$0xff] }
  0xae   : > { %1093 = vmatpush.msra.mxu3 %v889_v63  ;;  %1015 = vmatpush.msra.mxu0 %v745_v1  ;;  %v758_v63 = vld [vmem:[%s3046_s2 + $0x160] sm:$0xff] }
  0xaf   : > { %1041 = vmatpush.msra.mxu1 %v793_v2  ;;  %1069 = vmatpush.msra.mxu2 %v835_v3  ;;  %v806_v2 = vld [vmem:[%s3046_s2 + $0x2e0] sm:$0xff] }
  0xb0   : > { %1094 = vmatpush.msra.mxu3 %v886_v4  ;;  %980 = vmatmul.f32.gmra.mxu2 %v2071_v15  ;;  %v899_v4 = vld [vmem:[%s3046_s2 + $0x5c8] sm:$0xff] }
  0xb1   : > { %1016 = vmatpush.msra.mxu0 %v742_v7  ;;  %1042 = vmatpush.msra.mxu1 %v790_v8  ;;  %v803_v7 = vld [vmem:[%s3046_s2 + $0x2c8] sm:$0xff]  ;;  %v845_v8 = vld [vmem:[%s3046_s2 + $0x418] sm:$0xff] }
  0xb2   : > { %1070 = vmatpush.msra.mxu2 %v832_v9  ;;  %1095 = vmatpush.msra.mxu3 %v883_v10  ;;  %v896_v9 = vld [vmem:[%s3046_s2 + $0x5b0] sm:$0xff] }
  0xb3   : > { %1006 = vmatmul.f32.gmra.mxu3 %v2087_v20  ;;  %1017 = vmatpush.msra.mxu0 %v739_v11  ;;  %v752_v10 = vld [vmem:[%s3046_s2 + $0x130] sm:$0xff] }
  0xb4   : > { %1043 = vmatpush.msra.mxu1 %v787_v12  ;;  %1071 = vmatpush.msra.mxu2 %v829_v13  ;;  %v800_v11 = vld [vmem:[%s3046_s2 + $0x2b0] sm:$0xff]  ;;  %v842_v12 = vld [vmem:[%s3046_s2 + $0x400] sm:$0xff] }
  0xb5   : > { %1096 = vmatpush.msra.mxu3 %v880_v14  ;;  %928 = vmatmul.f32.gmra.mxu0 %v2102_v25 }
  0xb6   : > { %954 = vmatmul.f32.gmra.mxu1 %v2106_v26  ;;  %1018 = vmatpush.msra.mxu0 %v736_v16 }
  0xb7   : > { %1044 = vmatpush.msra.mxu1 %v784_v17  ;;  %1072 = vmatpush.msra.mxu2 %v826_v18  ;;  %v749_v17 = vld [vmem:[%s3046_s2 + $0x118] sm:$0xff] }
  0xb8   : > { %1097 = vmatpush.msra.mxu3 %v877_v19  ;;  %1019 = vmatpush.msra.mxu0 %v733_v21  ;;  %v797_v19 = vld [vmem:[%s3046_s2 + $0x298] sm:$0xff]  ;;  %v839_v21 = vld [vmem:[%s3046_s2 + $0x3e8] sm:$0xff] }
  0xb9   : > { %1045 = vmatpush.msra.mxu1 %v781_v22  ;;  %1073 = vmatpush.msra.mxu2 %v823_v23  ;;  %v746_v23 = vld [vmem:[%s3046_s2 + $0x100] sm:$0xff] }
  0xba   : > { %1098 = vmatpush.msra.mxu3 %v874_v24  ;;  %1020 = vmatpush.msra.mxu0 %v730_v27  ;;  %v794_v27 = vld [vmem:[%s3046_s2 + $0x280] sm:$0xff] }
  0xbb   : > { %1046 = vmatpush.msra.mxu1 %v778_v28  ;;  %1074 = vmatpush.msra.mxu2 %v820_v29  ;;  %v887_v29 = vld [vmem:[%s3046_s2 + $0x568] sm:$0xff] }
  0xbc   : > { %1099 = vmatpush.msra.mxu3 %v871_v30  ;;  %1021 = vmatpush.msra.mxu0 %v727_v31  ;;  %v791_v30 = vld [vmem:[%s3046_s2 + $0x268] sm:$0xff]  ;;  %v833_v31 = vld [vmem:[%s3046_s2 + $0x3b8] sm:$0xff] }
  0xbd   : > { %1047 = vmatpush.msra.mxu1 %v775_v32  ;;  %1075 = vmatpush.msra.mxu2 %v817_v33  ;;  %v884_v32 = vld [vmem:[%s3046_s2 + $0x550] sm:$0xff] }
  0xbe   : > { %1100 = vmatpush.msra.mxu3 %v868_v34  ;;  %1022 = vmatpush.msra.mxu0 %v724_v35  ;;  %v740_v33 = vld [vmem:[%s3046_s2 + $0xd0] sm:$0xff]  ;;  %v830_v35 = vld [vmem:[%s3046_s2 + $0x3a0] sm:$0xff] }
  0xbf   : > { %1048 = vmatpush.msra.mxu1 %v772_v36  ;;  %1076 = vmatpush.msra.mxu2 %v814_v37  ;;  %v788_v34 = vld [vmem:[%s3046_s2 + $0x250] sm:$0xff] }
  0xc0   : > { %1101 = vmatpush.msra.mxu3 %v865_v38  ;;  %1023 = vmatpush.msra.mxu0 %v721_v39  ;;  %v737_v39 = vld [vmem:[%s3046_s2 + $0xb8] sm:$0xff] }
  0xc1   : > { %1049 = vmatpush.msra.mxu1 %v769_v41  ;;  %1077 = vmatpush.msra.mxu2 %v811_v42  ;;  %v785_v42 = vld [vmem:[%s3046_s2 + $0x238] sm:$0xff] }
  0xc2   : > { %1102 = vmatpush.msra.mxu3 %v862_v43  ;;  %1078 = vmatmul.f32.vlgmr.msra.gmra.mxu2 %v1946_v40  ;;  %v419_v54 = vpop.f32.mrf.mxu0  ;;  %v763_v40 = vld [vmem:[%s3046_s2 + $0x188] sm:$0xff] }
  0xc3   : > { %1166 = vmatpush.msrb.mxu2 %v857_v45  ;;  %1024 = vmatpush.msra.mxu0 %v718_v46  ;;  %v445_v55 = vpop.f32.mrf.mxu1  ;;  %v827_v43 = vld [vmem:[%s3046_s2 + $0x388] sm:$0xff]  ;;  %v734_v46 = vld [vmem:[%s3046_s2 + $0xa0] sm:$0xff] }
  0xc4   : > { %1050 = vmatpush.msra.mxu1 %v766_v47  ;;  %1103 = vmatpush.msra.mxu3 %v859_v48  ;;  %v446_v56 = vadd.f32 %v445_v55, %v419_v54  ;;  %v471_v58 = vpop.f32.mrf.mxu2  ;;  %v782_v48 = vld [vmem:[%s3046_s2 + $0x220] sm:$0xff]  ;;  %v821_v54 = vld [vmem:[%s3046_s2 + $0x358] sm:$0xff]  ;;  %v872_v55 = vld [vmem:[%s3046_s2 + $0x4f0] sm:$0xff] }
  0xc5   : > { %1104 = vmatmul.f32.vlgmr.msra.gmra.mxu3 %v1958_v44  ;;  %1167 = vmatpush.msrb.mxu2 %v854_v51  ;;  %v902_v44 = vld [vmem:[%s3046_s2 + $0x5e0] sm:$0xff] }
  0xc6   : > { %1192 = vmatpush.msrb.mxu3 %v905_v52  ;;  %1025 = vmatpush.msra.mxu0 %v715_v53  ;;  %v472_v62 = vadd.f32 %v471_v58, %v446_v56  ;;  %v497_v1 = vpop.f32.mrf.mxu3  ;;  %v875_v52 = vld [vmem:[%s3046_s2 + $0x508] sm:$0xff]  ;;  %v776_v56 = vld [vmem:[%s3046_s2 + $0x1f0] sm:$0xff]  ;;  %v869_v58 = vld [vmem:[%s3046_s2 + $0x4d8] sm:$0xff] }
  0xc7   : > { %1051 = vmatpush.msra.mxu1 %v763_v40  ;;  %1026 = vmatmul.f32.vlgmr.msra.gmra.mxu0 %v1974_v49  ;;  %v848_v49 = vld [vmem:[%s3046_s2 + $0x430] sm:$0xff]  ;;  %v779_v53 = vld [vmem:[%s3046_s2 + $0x208] sm:$0xff] }
  0xc8   : > { %1052 = vmatmul.f32.vlgmr.msra.gmra.mxu1 %v1978_v50  ;;  %1114 = vmatpush.msrb.mxu0 %v761_v57  ;;  %v2711_v3 = vadd.f32 %v497_v1, %v472_v62  ;;  %v755_v50 = vld [vmem:[%s3046_s2 + $0x148] sm:$0xff]  ;;  %v728_v40 = vld [vmem:[%s3046_s2 + $0x70] sm:$0xff]  ;;  %v818_v57 = vld [vmem:[%s3046_s2 + $0x340] sm:$0xff] }
  0xc9   : > { %1140 = vmatpush.msrb.mxu1 %v809_v60  ;;  %1168 = vmatpush.msrb.mxu2 %v851_v61  ;;  %v725_v60 = vld [vmem:[%s3046_s2 + $0x58] sm:$0xff] }
  0xca   : > { %1193 = vmatpush.msrb.mxu3 %v902_v44  ;;  %1115 = vmatpush.msrb.mxu0 %v758_v63  ;;  %v773_v44 = vld [vmem:[%s3046_s2 + $0x1d8] sm:$0xff]  ;;  %v815_v63 = vld [vmem:[%s3046_s2 + $0x328] sm:$0xff] }
  0xcb   : > { %1141 = vmatpush.msrb.mxu1 %v806_v2  ;;  %1169 = vmatpush.msrb.mxu2 %v848_v49  ;;  %v866_v2 = vld [vmem:[%s3046_s2 + $0x4c0] sm:$0xff] }
  0xcc   : > { %1194 = vmatpush.msrb.mxu3 %v899_v4  ;;  %1081 = vmatmul.f32.gmra.mxu2 %v2007_v59  ;;  %v422_v13 = vpop.f32.mrf.mxu0  ;;  %v893_v59 = vld [vmem:[%s3046_s2 + $0x598] sm:$0xff]  ;;  %v722_v49 = vld [vmem:[%s3046_s2 + $0x40] sm:$0xff] }
  0xcd   : > { %1116 = vmatpush.msrb.mxu0 %v755_v50  ;;  %1142 = vmatpush.msrb.mxu1 %v803_v7  ;;  %v448_v14 = vpop.f32.mrf.mxu1  ;;  %v474_v18 = vpop.f32.mrf.mxu2  ;;  %v770_v50 = vld [vmem:[%s3046_s2 + $0x1c0] sm:$0xff]  ;;  %v812_v7 = vld [vmem:[%s3046_s2 + $0x310] sm:$0xff] }
  0xce   : > { %1170 = vmatpush.msrb.mxu2 %v845_v8  ;;  %1195 = vmatpush.msrb.mxu3 %v896_v9  ;;  %v449_v16 = vadd.f32 %v448_v14, %v422_v13  ;;  %v863_v9 = vld [vmem:[%s3046_s2 + $0x4a8] sm:$0xff]  ;;  %v860_v14 = vld [vmem:[%s3046_s2 + $0x490] sm:$0xff] }
  0xcf   : > { %1107 = vmatmul.f32.gmra.mxu3 %v2023_v0  ;;  %1117 = vmatpush.msrb.mxu0 %v752_v10  ;;  %v890_v0 = vld [vmem:[%s3046_s2 + $0x580] sm:$0xff] }
  0xd0   : > { %1143 = vmatpush.msrb.mxu1 %v800_v11  ;;  %1171 = vmatpush.msrb.mxu2 %v842_v12  ;;  %v475_v22 = vadd.f32 %v474_v18, %v449_v16  ;;  %v500_v24 = vpop.f32.mrf.mxu3  ;;  %v719_v11 = vld [vmem:[%s3046_s2 + $0x28] sm:$0xff]  ;;  %v716_v16 = vld [vmem:[%s3046_s2 + $0x10] sm:$0xff]  ;;  %v1260_v18 = vld [vmem:[%s3047_s3 + $0x78] sm:$0xff] }
  0xd1   : > { %1196 = vmatpush.msrb.mxu3 %v893_v59  ;;  %1029 = vmatmul.f32.gmra.mxu0 %v2038_v5  ;;  %v836_v5 = vld [vmem:[%s3046_s2 + $0x3d0] sm:$0xff]  ;;  %v767_v12 = vld [vmem:[%s3046_s2 + $0x1a8] sm:$0xff] }
  0xd2   : > { %1055 = vmatmul.f32.gmra.mxu1 %v2042_v6  ;;  %1118 = vmatpush.msrb.mxu0 %v749_v17  ;;  %v2765_v28 = vadd.f32 %v500_v24, %v475_v22  ;;  %v743_v6 = vld [vmem:[%s3046_s2 + $0xe8] sm:$0xff]  ;;  %v1561_v59 = vld [vmem:[%s1931_s29 + $0x10] sm:$0xff] }
  0xd3   : > { %1144 = vmatpush.msrb.mxu1 %v797_v19  ;;  %1172 = vmatpush.msrb.mxu2 %v839_v21  ;;  %v764_v17 = vld [vmem:[%s3046_s2 + $0x190] sm:$0xff]  ;;  %v1562_v19 = vld [vmem:[%s1931_s29 + $0x18] sm:$0xff] }
  0xd4   : > { %1197 = vmatpush.msrb.mxu3 %v890_v0  ;;  %1119 = vmatpush.msrb.mxu0 %v746_v23  ;;  %v1563_v0 = vld [vmem:[%s1931_s29] sm:$0xff]  ;;  %v1259_v24 = vld [vmem:[%s3047_s3 + $0x70] sm:$0xff] }
  0xd5   : > { %1145 = vmatpush.msrb.mxu1 %v794_v27  ;;  %1173 = vmatpush.msrb.mxu2 %v836_v5  ;;  %v1564_v27 = vld [vmem:[%s1931_s29 + $0x8] sm:$0xff] }
  0xd6   : > { %1198 = vmatpush.msrb.mxu3 %v887_v29  ;;  %1084 = vmatmul.f32.gmra.mxu2 %v2071_v15  ;;  %v425_v36 = vpop.f32.mrf.mxu0  ;;  %v881_v15 = vld [vmem:[%s3046_s2 + $0x538] sm:$0xff] }
  0xd7   : > { %1120 = vmatpush.msrb.mxu0 %v743_v6  ;;  %1146 = vmatpush.msrb.mxu1 %v791_v30  ;;  %v451_v37 = vpop.f32.mrf.mxu1  ;;  %v477_v41 = vpop.f32.mrf.mxu2  ;;  %v1258_v6 = vld [vmem:[%s3047_s3 + $0x68] sm:$0xff] }
  0xd8   : > { %1174 = vmatpush.msrb.mxu2 %v833_v31  ;;  %1199 = vmatpush.msrb.mxu3 %v884_v32  ;;  %v452_v38 = vadd.f32 %v451_v37, %v425_v36  ;;  %v1565_v31 = vld [vmem:[%s1931_s29 + $0x30] sm:$0xff]  ;;  %v1567_v36 = vld [vmem:[%s1931_s29 + $0x20] sm:$0xff] }
  0xd9   : > { %1110 = vmatmul.f32.gmra.mxu3 %v2087_v20  ;;  %1121 = vmatpush.msrb.mxu0 %v740_v33  ;;  %v878_v20 = vld [vmem:[%s3046_s2 + $0x520] sm:$0xff]  ;;  %v1255_v37 = vld [vmem:[%s3047_s3 + $0x50] sm:$0xff] }
  0xda   : > { %1147 = vmatpush.msrb.mxu1 %v788_v34  ;;  %1175 = vmatpush.msrb.mxu2 %v830_v35  ;;  %v478_v45 = vadd.f32 %v477_v41, %v452_v38  ;;  %v503_v47 = vpop.f32.mrf.mxu3  ;;  %v1257_v33 = vld [vmem:[%s3047_s3 + $0x60] sm:$0xff]  ;;  %v1256_v34 = vld [vmem:[%s3047_s3 + $0x58] sm:$0xff]  ;;  %v1254_v41 = vld [vmem:[%s3047_s3 + $0x48] sm:$0xff] }
  0xdb   : > { %1200 = vmatpush.msrb.mxu3 %v881_v15  ;;  %1032 = vmatmul.f32.gmra.mxu0 %v2102_v25  ;;  %v824_v25 = vld [vmem:[%s3046_s2 + $0x370] sm:$0xff]  ;;  %v1566_v35 = vld [vmem:[%s1931_s29 + $0x38] sm:$0xff]  ;;  %v1568_v15 = vld [vmem:[%s1931_s29 + $0x28] sm:$0xff] }
  0xdc   : > { %1058 = vmatmul.f32.gmra.mxu1 %v2106_v26  ;;  %1122 = vmatpush.msrb.mxu0 %v737_v39  ;;  %v2819_v51 = vadd.f32 %v503_v47, %v478_v45  ;;  %v731_v26 = vld [vmem:[%s3046_s2 + $0x88] sm:$0xff]  ;;  %v1569_v45 = vld [vmem:[%s1931_s29 + $0x50] sm:$0x1f] }
  0xdd   : > { %1148 = vmatpush.msrb.mxu1 %v785_v42  ;;  %1176 = vmatpush.msrb.mxu2 %v827_v43 }
  0xde   : > { %1201 = vmatpush.msrb.mxu3 %v878_v20  ;;  %1123 = vmatpush.msrb.mxu0 %v734_v46  ;;  %v1253_v20 = vld [vmem:[%s3047_s3 + $0x40] sm:$0xff] }
  0xdf   : > { %1149 = vmatpush.msrb.mxu1 %v782_v48  ;;  %1177 = vmatpush.msrb.mxu2 %v824_v25  ;;  %v1570_v48 = vld [vmem:[%s1931_s29 + $0x58] sm:$0x1f] }
  0xe0   : > { %1202 = vmatpush.msrb.mxu3 %v875_v52  ;;  %1124 = vmatpush.msrb.mxu0 %v731_v26  ;;  %v523_v61 = vpop.f32.mrf.mxu0  ;;  %v1571_v52 = vld [vmem:[%s1931_s29 + $0x40] sm:$0x1f]  ;;  %v1252_v26 = vld [vmem:[%s3047_s3 + $0x38] sm:$0xff] }
  0xe1   : > { %1150 = vmatpush.msrb.mxu1 %v779_v53  ;;  %1178 = vmatpush.msrb.mxu2 %v821_v54  ;;  %v549_v62 = vpop.f32.mrf.mxu1  ;;  %v575_v4 = vpop.f32.mrf.mxu2  ;;  %v1251_v53 = vld [vmem:[%s3047_s3 + $0x30] sm:$0xff]  ;;  %v1572_v54 = vld [vmem:[%s1931_s29 + $0x48] sm:$0x1f]  ;;  %s1539_s29 = smul.u32 12, %s3051_s16 }
  0xe2   : > { %1203 = vmatpush.msrb.mxu3 %v872_v55  ;;  %1125 = vmatpush.msrb.mxu0 %v728_v40  ;;  %v550_v1 = vadd.f32 %v549_v62, %v523_v61  ;;  %v1250_v40 = vld [vmem:[%s3047_s3 + $0x28] sm:$0xff] }
  0xe3   : > { %1151 = vmatpush.msrb.mxu1 %v776_v56  ;;  %1179 = vmatpush.msrb.mxu2 %v818_v57  ;;  %s197_s25 = scalar_lea.vmem %s3048_s4, %s1539_s29 }
  0xe4   : > { %1204 = vmatpush.msrb.mxu3 %v869_v58  ;;  %1126 = vmatpush.msrb.mxu0 %v725_v60  ;;  %v576_v8 = vadd.f32 %v575_v4, %v550_v1  ;;  %v601_v10 = vpop.f32.mrf.mxu3  ;;  %v1249_v60 = vld [vmem:[%s3047_s3 + $0x20] sm:$0xff]  ;;  %v1247_v1 = vld [vmem:[%s3047_s3 + $0x10] sm:$0xff] }
  0xe5   : > { %1152 = vmatpush.msrb.mxu1 %v773_v44  ;;  %1180 = vmatpush.msrb.mxu2 %v815_v63  ;;  %v1248_v63 = vld [vmem:[%s3047_s3 + $0x18] sm:$0xff] }
  0xe6   : > { %1205 = vmatpush.msrb.mxu3 %v866_v2  ;;  %1127 = vmatpush.msrb.mxu0 %v722_v49  ;;  %v2878_v13 = vadd.f32 %v601_v10, %v576_v8  ;;  %v1246_v49 = vld [vmem:[%s3047_s3 + $0x8] sm:$0xff]  ;;  %v1245_v8 = vld [vmem:[%s3047_s3] sm:$0xff] }
  0xe7   : > { %1153 = vmatpush.msrb.mxu1 %v770_v50  ;;  %1181 = vmatpush.msrb.mxu2 %v812_v7 }
  0xe8   : > { %1206 = vmatpush.msrb.mxu3 %v863_v9  ;;  %1182 = vmatmul.f32.vlgmr.msrb.gmra.mxu2 %v1561_v59  ;;  %v1276_v9 = vld [vmem:[%s3047_s3 + $0xf8] sm:$0xff]  ;;  %v1274_v59 = vld [vmem:[%s3047_s3 + $0xe8] sm:$0xff] }
  0xe9   : > { %1128 = vmatpush.msrb.mxu0 %v719_v11  ;;  %1154 = vmatpush.msrb.mxu1 %v767_v12 }
  0xea   : > { %1207 = vmatpush.msrb.mxu3 %v860_v14  ;;  %v526_v21 = vpop.f32.mrf.mxu0  ;;  %v1275_v14 = vld [vmem:[%s3047_s3 + $0xf0] sm:$0xff] }
  0xeb   : > { %1208 = vmatmul.f32.vlgmr.msrb.gmra.mxu3 %v1562_v19  ;;  %1129 = vmatpush.msrb.mxu0 %v716_v16  ;;  %v552_v22 = vpop.f32.mrf.mxu1  ;;  %v578_v5 = vpop.f32.mrf.mxu2 }
  0xec   : > { %1155 = vmatpush.msrb.mxu1 %v764_v17  ;;  %1130 = vmatmul.f32.vlgmr.msrb.gmra.mxu0 %v1563_v0  ;;  %v553_v23 = vadd.f32 %v552_v22, %v526_v21  ;;  %v1273_v17 = vld [vmem:[%s3047_s3 + $0xe0] sm:$0xff]  ;;  %v1272_v22 = vld [vmem:[%s3047_s3 + $0xd8] sm:$0xff] }
  0xed   : > { %1156 = vmatmul.f32.vlgmr.msrb.gmra.mxu1 %v1564_v27  ;;  %1292 = vmatpush.msra.mxu0 %v1260_v18  ;;  %v1271_v27 = vld [vmem:[%s3047_s3 + $0xd0] sm:$0xff] }
  0xee   : > { %v579_v29 = vadd.f32 %v578_v5, %v553_v23  ;;  %1522 = vmatpush.msra.mxu3 %v1260_v18  ;;  %v604_v30 = vpop.f32.mrf.mxu3  ;;  %1318 = vmatpush.msra.mxu1 %v1276_v9  ;;  %v1270_v5 = vld [vmem:[%s3047_s3 + $0xc8] sm:$0xff] }
  0xef   : > { %1293 = vmatpush.msra.mxu0 %v1259_v24 }
  0xf0   : > { %1185 = vmatmul.f32.gmra.mxu2 %v1565_v31  ;;  %v2903_v32 = vadd.f32 %v604_v30, %v579_v29  ;;  %1523 = vmatpush.msra.mxu3 %v1259_v24  ;;  %v1269_v29 = vld [vmem:[%s3047_s3 + $0xc0] sm:$0xff]  ;;  %v1268_v30 = vld [vmem:[%s3047_s3 + $0xb8] sm:$0xff] }
  0xf1   : > { %1294 = vmatpush.msra.mxu0 %v1258_v6  ;;  %1319 = vmatpush.msra.mxu1 %v1275_v14 }
  0xf2   : > { %1524 = vmatpush.msra.mxu3 %v1258_v6 }
  0xf3   : > { %1211 = vmatmul.f32.gmra.mxu3 %v1566_v35  ;;  %1295 = vmatpush.msra.mxu0 %v1257_v33  ;;  %v1267_v35 = vld [vmem:[%s3047_s3 + $0xb0] sm:$0xff] }
  0xf4   : > { %1133 = vmatmul.f32.gmra.mxu0 %v1567_v36  ;;  %1525 = vmatpush.msra.mxu3 %v1257_v33  ;;  %v529_v38 = vpop.f32.mrf.mxu0 }
  0xf5   : > { %1159 = vmatmul.f32.gmra.mxu1 %v1568_v15  ;;  %1296 = vmatpush.msra.mxu0 %v1256_v34  ;;  %v555_v39 = vpop.f32.mrf.mxu1  ;;  %v581_v43 = vpop.f32.mrf.mxu2 }
  0xf6   : > { %1526 = vmatpush.msra.mxu3 %v1256_v34  ;;  %v556_v42 = vadd.f32 %v555_v39, %v529_v38  ;;  %1320 = vmatpush.msra.mxu1 %v1274_v59  ;;  %v1218_v38 = vmul.f32 %v2711_v3, %v2711_v3 }
  0xf7   : > { %1297 = vmatpush.msra.mxu0 %v1255_v37 }
  0xf8   : > { %1188 = vmatmul.f32.gmra.mxu2 %v1569_v45  ;;  %1527 = vmatpush.msra.mxu3 %v1255_v37  ;;  %v582_v46 = vadd.f32 %v581_v43, %v556_v42  ;;  %v607_v47 = vpop.f32.mrf.mxu3  ;;  %v1265_v45 = vld [vmem:[%s3047_s3 + $0xa0] sm:$0xff] }
  0xf9   : > { %1298 = vmatpush.msra.mxu0 %v1254_v41  ;;  %1321 = vmatpush.msra.mxu1 %v1273_v17 }
  0xfa   : > { %1528 = vmatpush.msra.mxu3 %v1254_v41  ;;  %v2925_v25 = vadd.f32 %v607_v47, %v582_v46  ;;  %v1266_v41 = vld [vmem:[%s3047_s3 + $0xa8] sm:$0xff] }
  0xfb   : > { %1214 = vmatmul.f32.gmra.mxu3 %v1570_v48  ;;  %1299 = vmatpush.msra.mxu0 %v1253_v20 }
  0xfc   : > { %1136 = vmatmul.f32.gmra.mxu0 %v1571_v52  ;;  %1529 = vmatpush.msra.mxu3 %v1253_v20 }
  0xfd   : > { %1162 = vmatmul.f32.gmra.mxu1 %v1572_v54  ;;  %1300 = vmatpush.msra.mxu0 %v1252_v26  ;;  %v1221_v54 = vmul.f32 %v2765_v28, %v2765_v28 }
  0xfe   : > { %1530 = vmatpush.msra.mxu3 %v1252_v26  ;;  %1322 = vmatpush.msra.mxu1 %v1272_v22  ;;  %v1264_v26 = vld [vmem:[%s3047_s3 + $0x98] sm:$0xff] }
  0xff   : > { %1301 = vmatpush.msra.mxu0 %v1251_v53 }
 0x100   : > { %v627_v55 = vpop.f32.mrf.mxu0  ;;  %1531 = vmatpush.msra.mxu3 %v1251_v53  ;;  %1323 = vmatpush.msra.mxu1 %v1271_v27  ;;  %v1263_v53 = vld [vmem:[%s3047_s3 + $0x90] sm:$0xff] }
 0x101   : > { %v653_v56 = vpop.f32.mrf.mxu1  ;;  %v679_v57 = vpop.f32.mrf.mxu2  ;;  %1302 = vmatpush.msra.mxu0 %v1250_v40 }
 0x102   : > { %v654_v58 = vadd.f32 %v653_v56, %v627_v55  ;;  %1532 = vmatpush.msra.mxu3 %v1250_v40  ;;  %1324 = vmatpush.msra.mxu1 %v1270_v5  ;;  %v1262_v40 = vld [vmem:[%s3047_s3 + $0x88] sm:$0xff]  ;;  %v1222_v5 = vmul.f32 %v2903_v32, %v2903_v32 }
 0x103   : > { %1303 = vmatpush.msra.mxu0 %v1249_v60 }
 0x104   : > { %v680_v61 = vadd.f32 %v679_v57, %v654_v58  ;;  %v705_v62 = vpop.f32.mrf.mxu3  ;;  %1533 = vmatpush.msra.mxu3 %v1249_v60  ;;  %1325 = vmatpush.msra.mxu1 %v1269_v29  ;;  %v1261_v58 = vld [vmem:[%s3047_s3 + $0x80] sm:$0xff] }
 0x105   : > { %1304 = vmatpush.msra.mxu0 %v1248_v63 }
 0x106   : > { %v2941_v44 = vadd.f32 %v705_v62, %v680_v61  ;;  %1534 = vmatpush.msra.mxu3 %v1248_v63  ;;  %1326 = vmatpush.msra.mxu1 %v1268_v30 }
 0x107   : > { %1305 = vmatpush.msra.mxu0 %v1247_v1 }
 0x108   : > { %1535 = vmatpush.msra.mxu3 %v1247_v1  ;;  %1327 = vmatpush.msra.mxu1 %v1267_v35 }
 0x109   : > { %1306 = vmatpush.msra.mxu0 %v1246_v49 }
 0x10a   : > { %v630_v2 = vpop.f32.mrf.mxu0  ;;  %1536 = vmatpush.msra.mxu3 %v1246_v49  ;;  %1328 = vmatpush.msra.mxu1 %v1266_v41 }
 0x10b   : > { %v656_v4 = vpop.f32.mrf.mxu1  ;;  %v682_v50 = vpop.f32.mrf.mxu2  ;;  %1307 = vmatpush.msra.mxu0 %v1245_v8 }
 0x10c   : > { %v657_v7 = vadd.f32 %v656_v4, %v630_v2  ;;  %1537 = vmatpush.msra.mxu3 %v1245_v8  ;;  %1329 = vmatpush.msra.mxu1 %v1265_v45  ;;  %v1224_v2 = vmul.f32 %v2819_v51, %v2819_v51 }
 0x10e   : > { %v683_v10 = vadd.f32 %v682_v50, %v657_v7  ;;  %v708_v11 = vpop.f32.mrf.mxu3  ;;  %1330 = vmatpush.msra.mxu1 %v1264_v26  ;;  %v1277_v50 = vld [vmem:[%s3047_s3 + $0x100] sm:$0x1] }
 0x10f   : > { %1516 = vmatpush.msk.msra.mxu2 %vm1288_vm0, %v1277_v50 }
 0x110   : > { %v2958_v12 = vadd.f32 %v708_v11, %v683_v10  ;;  %1331 = vmatpush.msra.mxu1 %v1263_v53 }
 0x112   : > { %1332 = vmatpush.msra.mxu1 %v1262_v40  ;;  %v1223_v40 = vmul.f32 %v2958_v12, %v2958_v12 }
 0x114   : > { %v633_v16 = vpop.f32.mrf.mxu0  ;;  %1333 = vmatpush.msra.mxu1 %v1261_v58 }
 0x115   : > { %v659_v18 = vpop.f32.mrf.mxu1  ;;  %v685_v19 = vpop.f32.mrf.mxu2 }
 0x116   : > { %v660_v21 = vadd.f32 %v659_v18, %v633_v16  ;;  %v1219_v16 = vmul.f32 %v2878_v13, %v2878_v13 }
 0x118   : > { %v686_v0 = vadd.f32 %v685_v19, %v660_v21  ;;  %v711_v23 = vpop.f32.mrf.mxu3 }
 0x11a   : > { %v2972_v24 = vadd.f32 %v711_v23, %v686_v0 }
 0x11e   : > { %v923_v6 = vpop.f32.mrf.mxu0 }
 0x11f   : > { %v949_v31 = vpop.f32.mrf.mxu1  ;;  %v975_v33 = vpop.f32.mrf.mxu2 }
 0x120   : > { %v950_v34 = vadd.f32 %v949_v31, %v923_v6 }
 0x122   : > { %v976_v36 = vadd.f32 %v975_v33, %v950_v34  ;;  %v1001_v37 = vpop.f32.mrf.mxu3 }
 0x124   : > { %v1002_v15 = vadd.f32 %v1001_v37, %v976_v36  ;;  %v1225_v37 = vmul.f32 %v2925_v25, %v2925_v25 }
 0x126   : > { %v1227_v39 = vmul.f32 %v1002_v15, %v1002_v15 }
 0x128   : > { %v1236_v42 = vadd.f32 %v1227_v39, %v1218_v38  ;;  %v926_v43 = vpop.f32.mrf.mxu0 }
 0x129   : > { %v952_v20 = vpop.f32.mrf.mxu1  ;;  %v978_v46 = vpop.f32.mrf.mxu2 }
 0x12a   : > { %v953_v47 = vadd.f32 %v952_v20, %v926_v43  ;;  %1308 = vmatmul.f32.vlgmr.msra.gmra.mxu0 %v1236_v42 }
 0x12c   : > { %v979_v48 = vadd.f32 %v978_v46, %v953_v47  ;;  %v1004_v52 = vpop.f32.mrf.mxu3  ;;  %v1220_v46 = vmul.f32 %v2941_v44, %v2941_v44 }
 0x12e   : > { %v1005_v3 = vadd.f32 %v1004_v52, %v979_v48 }
 0x130   : > { %v1230_v55 = vmul.f32 %v1005_v3, %v1005_v3 }
 0x132   : > { %v1239_v56 = vadd.f32 %v1230_v55, %v1221_v54  ;;  %v929_v57 = vpop.f32.mrf.mxu0 }
 0x133   : > { %v955_v60 = vpop.f32.mrf.mxu1  ;;  %v981_v61 = vpop.f32.mrf.mxu2 }
 0x134   : > { %v956_v62 = vadd.f32 %v955_v60, %v929_v57  ;;  %1311 = vmatmul.f32.vlgmr.msra.gmra.mxu3 %v1239_v56 }
 0x136   : > { %v982_v63 = vadd.f32 %v981_v61, %v956_v62  ;;  %v1007_v28 = vpop.f32.mrf.mxu3 }
 0x138   : > { %v1008_v1 = vadd.f32 %v1007_v28, %v982_v63 }
 0x13a   : > { %v1233_v49 = vmul.f32 %v1008_v1, %v1008_v1  ;;  %v1226_v1 = vmul.f32 %v2972_v24, %v2972_v24 }
 0x13c   : > { %v1242_v4 = vadd.f32 %v1233_v49, %v1224_v2 }
 0x13e   : > { %1314 = vmatmul.f32.gmra.mxu3 %v1242_v4 }
 0x144   : > { %v1027_v7 = vpop.f32.mrf.mxu0 }
 0x145   : > { %v1053_v8 = vpop.f32.mrf.mxu1  ;;  %v1079_v9 = vpop.f32.mrf.mxu2 }
 0x146   : > { %v1054_v10 = vadd.f32 %v1053_v8, %v1027_v7 }
 0x148   : > { %v1080_v11 = vadd.f32 %v1079_v9, %v1054_v10  ;;  %v1105_v14 = vpop.f32.mrf.mxu3 }
 0x14a   : > { %v1106_v59 = vadd.f32 %v1105_v14, %v1080_v11 }
 0x14c   : > { %v1228_v51 = vmul.f32 %v1106_v59, %v1106_v59 }
 0x14e   : > { %v1237_v17 = vadd.f32 %v1228_v51, %v1219_v16  ;;  %v1030_v18 = vpop.f32.mrf.mxu0 }
 0x14f   : > { %v1056_v19 = vpop.f32.mrf.mxu1  ;;  %v1082_v21 = vpop.f32.mrf.mxu2 }
 0x150   : > { %v1057_v22 = vadd.f32 %v1056_v19, %v1030_v18  ;;  %1334 = vmatmul.f32.vlgmr.msra.gmra.mxu1 %v1237_v17 }
 0x152   : > { %v1083_v0 = vadd.f32 %v1082_v21, %v1057_v22  ;;  %v1108_v23 = vpop.f32.mrf.mxu3 }
 0x154   : > { %v1109_v27 = vadd.f32 %v1108_v23, %v1083_v0 }
 0x156   : > { %v1231_v29 = vmul.f32 %v1109_v27, %v1109_v27  ;;  %v1581_v27 = vmov 840.0  }
 0x157   : > { %1557 = vrcp.f32 %v1581_v27 }
 0x158   : > { %v1033_v6 = vpop.f32.mrf.mxu0  ;;  %v1240_v30 = vadd.f32 %v1231_v29, %v1222_v5 }
 0x159   : > { %v1059_v31 = vpop.f32.mrf.mxu1  ;;  %v1085_v33 = vpop.f32.mrf.mxu2 }
 0x15a   : > { %v1060_v34 = vadd.f32 %v1059_v31, %v1033_v6  ;;  %1337 = vmatmul.f32.gmra.mxu1 %v1240_v30 }
 0x15c   : > { %v1086_v13 = vadd.f32 %v1085_v33, %v1060_v34  ;;  %v1111_v35 = vpop.f32.mrf.mxu3 }
 0x15d   : > { %v1558_v5 = vpop.eup %1557 }
 0x15e   : > { %v1112_v36 = vadd.f32 %v1111_v35, %v1086_v13  ;;  %v1387_v29 = vmul.f32 840.0, %v1558_v5  ;;  %vm1391_vm4 = vweird.f32 %v1558_v5 }
 0x160   : > { %v1234_v15 = vmul.f32 %v1112_v36, %v1112_v36  ;;  %v1388_v6 = vsub.f32 1.0, %v1387_v29 }
 0x162   : > { %v1243_v38 = vadd.f32 %v1234_v15, %v1225_v37  ;;  %v1389_v34 = vmul.f32 %v1558_v5, %v1388_v6 }
 0x164   : > { %1340 = vmatmul.f32.gmra.mxu1 %v1243_v38  ;;  %v1390_v36 = vadd.f32 %v1558_v5, %v1389_v34 }
 0x166   : > { %v1392_v38 = vsel %vm1391_vm4, %v1558_v5, %v1390_v36 }
 0x169   : > { %v1131_v39 = vpop.f32.mrf.mxu0 }
 0x16a   : > { %v1157_v41 = vpop.f32.mrf.mxu1 }
 0x16b   : > { %v1158_v42 = vadd.f32 %v1157_v41, %v1131_v39  ;;  %v1183_v32 = vpop.f32.mrf.mxu2 }
 0x16d   : > { %v1184_v43 = vadd.f32 %v1183_v32, %v1158_v42 }
 0x16e   : > { %v1209_v45 = vpop.f32.mrf.mxu3 }
 0x16f   : > { %v1210_v20 = vadd.f32 %v1209_v45, %v1184_v43 }
 0x171   : > { %v1229_v47 = vmul.f32 %v1210_v20, %v1210_v20  ;;  %v1134_v48 = vpop.f32.mrf.mxu0 }
 0x172   : > { %v1160_v52 = vpop.f32.mrf.mxu1 }
 0x173   : > { %v1238_v3 = vadd.f32 %v1229_v47, %v1220_v46  ;;  %v1161_v26 = vadd.f32 %v1160_v52, %v1134_v48  ;;  %v1186_v25 = vpop.f32.mrf.mxu2 }
 0x175   : > { %v1187_v53 = vadd.f32 %v1186_v25, %v1161_v26  ;;  %1517 = vmatmul.msk.f32.vlgmr.msra.gmra.mxu2 %vm1278_vm1, %v1238_v3 }
 0x176   : > { %v1212_v54 = vpop.f32.mrf.mxu3 }
 0x177   : > { %v1213_v55 = vadd.f32 %v1212_v54, %v1187_v53 }
 0x179   : > { %v1232_v56 = vmul.f32 %v1213_v55, %v1213_v55  ;;  %v1137_v57 = vpop.f32.mrf.mxu0 }
 0x17a   : > { %v1163_v58 = vpop.f32.mrf.mxu1 }
 0x17b   : > { %v1241_v60 = vadd.f32 %v1232_v56, %v1223_v40  ;;  %v1164_v44 = vadd.f32 %v1163_v58, %v1137_v57  ;;  %v1189_v61 = vpop.f32.mrf.mxu2 }
 0x17d   : > { %v1190_v62 = vadd.f32 %v1189_v61, %v1164_v44  ;;  %1518 = vmatmul.msk.f32.gmra.mxu2 %vm1278_vm1, %v1241_v60 }
 0x17e   : > { %v1215_v63 = vpop.f32.mrf.mxu3 }
 0x17f   : > { %v1216_v28 = vadd.f32 %v1215_v63, %v1190_v62 }
 0x181   : > { %v1235_v2 = vmul.f32 %v1216_v28, %v1216_v28 }
 0x183   : > { %v1244_v49 = vadd.f32 %v1235_v2, %v1226_v1 }
 0x185   : > { %1519 = vmatmul.msk.f32.gmra.mxu2 %vm1278_vm1, %v1244_v49 }
 0x1a7   : > { %v1309_v10 = vpop.f32.mrf.mxu0 }
 0x1b7   : > { %v1312_v7 = vpop.f32.mrf.mxu3 }
 0x1c1   : > { %v1315_v51 = vpop.f32.mrf.mxu3 }
 0x1cd   : > { %v1335_v4 = vpop.f32.mrf.mxu1 }
 0x1ce   : > { %v1336_v11 = vadd.f32 %v1335_v4, %v1309_v10 }
 0x1d7   : > { %v1338_v50 = vpop.f32.mrf.mxu1 }
 0x1d8   : > { %v1339_v9 = vadd.f32 %v1338_v50, %v1312_v7 }
 0x1e1   : > { %v1341_v59 = vpop.f32.mrf.mxu1 }
 0x1e2   : > { %v1342_v17 = vadd.f32 %v1341_v59, %v1315_v51 }
 0x1f8   : > { %v1361_v12 = vpop.f32.mrf.mxu2 }
 0x1f9   : > { %v1362_v16 = vadd.f32 %v1361_v12, %v1336_v11  ;;  %v1451_v12 = vld [vmem:[%s197_s25 + $0x8] sm:$0x7] }
 0x1fb   : > { %v1371_v19 = vsel %vm1370_vm2, %v1362_v16, 0.0 }
 0x200   : > { %v1364_v8 = vpop.f32.mrf.mxu2 }
 0x201   : > { %v1365_v14 = vadd.f32 %v1364_v8, %v1339_v9 }
 0x203   : > { %v1372_v24 = vsel %vm1370_vm2, %v1365_v14, 0.0 }
 0x204   : > { %v1373_v22 = vadd.f32 %v1372_v24, %v1371_v19 }
 0x208   : > { %v1367_v18 = vpop.f32.mrf.mxu2 }
 0x209   : > { %v1368_v21 = vadd.f32 %v1367_v18, %v1342_v17 }
 0x20b   : > { %v1375_v0 = vsel %vm1374_vm3, %v1368_v21, 0.0 }
 0x20c   : > { %v1376_v23 = vadd.f32 %v1375_v0, %v1373_v22 }
 0x20e   : > { %1377 = vadd.xlane.f32.xlu0 %v1376_v23 }
 0x281   : > { %v1378_v30 = vpop.xlane.xlu0 %1377 }
 0x282   : > { %v1379_v31 = vrot.slane %v1378_v30, 4 }
 0x284   : > { %v1380_v33 = vadd.f32 %v1379_v31, %v1378_v30 }
 0x286   : > { %v1381_v13 = vrot.slane %v1380_v33, 2 }
 0x288   : > { %v1382_v35 = vadd.f32 %v1381_v13, %v1380_v33 }
 0x28a   : > { %v1383_v37 = vrot.slane %v1382_v35, 1 }
 0x28c   : > { %v1384_v15 = vadd.f32 %v1383_v37, %v1382_v35 }
 0x28e   : > { %1540 = vpush %v1384_v15 }
 0x28f   : > { %1542 = vpush %v1392_v38 }
 0x2bf   : > { %s1541_s17 = spop %1540 }
 0x2c0   : > { %s1543_s18 = spop %1542 }
 0x2c1   : > { %s1394_s19 = smul.f32 %s1543_s18, %s1541_s17 }
 0x2c3   : > { %v1395_v39 = vstv %s1394_s19 }
 0x2c4   : > { %v1396_v41 = vsub.f32 %v1362_v16, %v1395_v39  ;;  %v1397_v42 = vsub.f32 %v1365_v14, %v1395_v39  ;;  %v1398_v32 = vsub.f32 %v1368_v21, %v1395_v39 }
 0x2c6   : > { %v1399_v43 = vmul.f32 %v1396_v41, %v1396_v41  ;;  %v1400_v45 = vmul.f32 %v1397_v42, %v1397_v42  ;;  %v1401_v20 = vmul.f32 %v1398_v32, %v1398_v32 }
 0x2c8   : > { %v1402_v46 = vsel %vm1370_vm2, %v1399_v43, 0.0  ;;  %v1403_v47 = vsel %vm1370_vm2, %v1400_v45, 0.0  ;;  %v1405_v52 = vsel %vm1374_vm3, %v1401_v20, 0.0 }
 0x2c9   : > { %v1404_v48 = vadd.f32 %v1403_v47, %v1402_v46 }
 0x2cb   : > { %v1406_v3 = vadd.f32 %v1405_v52, %v1404_v48 }
 0x2cd   : > { %1407 = vadd.xlane.f32.xlu0 %v1406_v3 }
 0x340   : > { %v1408_v26 = vpop.xlane.xlu0 %1407 }
 0x341   : > { %v1409_v25 = vrot.slane %v1408_v26, 4 }
 0x343   : > { %v1410_v53 = vadd.f32 %v1409_v25, %v1408_v26 }
 0x345   : > { %v1411_v54 = vrot.slane %v1410_v53, 2 }
 0x347   : > { %v1412_v55 = vadd.f32 %v1411_v54, %v1410_v53 }
 0x349   : > { %v1413_v40 = vrot.slane %v1412_v55, 1 }
 0x34b   : > { %v1414_v56 = vadd.f32 %v1413_v40, %v1412_v55 }
 0x34d   : > { %1544 = vpush %v1414_v56 }
 0x37e   : > { %s1545_s20 = spop %1544 }
 0x37f   : > { %s1424_s21 = smul.f32 %s1545_s20, %s1543_s18 }
 0x381   : > { %s1425_s22 = sadd.f32 1e-05, %s1424_s21 }
 0x383   : > { %v1426_v57 = vstv %s1425_s22 }
 0x384   : > { %1559 = vrsqrt.f32 %v1426_v57  ;;  %vm1433_vm6 = vweird.f32 %v1426_v57 }
 0x38a   : > { %v1560_v58 = vpop.eup %1559 }
 0x38b   : > { %v1428_v60 = vmul.f32 %v1560_v58, %v1426_v57  ;;  %vm1434_vm5 = vweird.f32 %v1560_v58 }
 0x38c   : > { %vm1435_vm7 = vmor %vm1433_vm6, %vm1434_vm5 }
 0x38d   : > { %v1429_v44 = vmul.f32 %v1560_v58, %v1428_v60 }
 0x38f   : > { %v1430_v61 = vmul.f32 0.5, %v1429_v44 }
 0x391   : > { %v1431_v62 = vsub.f32 1.5, %v1430_v61 }
 0x393   : > { %v1432_v63 = vmul.f32 %v1560_v58, %v1431_v62 }
 0x395   : > { %v1436_v28 = vsel %vm1435_vm7, %v1560_v58, %v1432_v63 }
 0x396   : > { %1546 = vpush %v1436_v28 }
 0x3c7   : > { %s1547_s26 = spop %1546 }
 0x3c8   : > { %v1438_v1 = vstv %s1547_s26 }
 0x3c9   : > { %v1439_v2 = vmul.f32 %v1438_v1, %v1396_v41  ;;  %v1440_v49 = vmul.f32 %v1438_v1, %v1397_v42  ;;  %v1441_v4 = vmul.f32 %v1438_v1, %v1398_v32 }
 0x3cb   : > { %v1442_v50 = vpack.c.bf16 %v1439_v2, %v1439_v2  ;;  %v1443_v7 = vpack.c.bf16 %v1440_v49, %v1440_v49  ;;  %v1444_v8 = vpack.c.bf16 %v1441_v4, %v1441_v4 }
 0x3cd   : > { %1446 = vst.msk [vmem:[%s197_s25] sm:$0xf] %vm1445_vm10, %v1442_v50  ;;  %v1452_v9 = vsel %vm1450_vm11, %v1444_v8, %v1451_v12 }
 0x3ce   : > { %1447 = vst.msk [vmem:[%s197_s25 + $0x4] sm:$0xf] %vm1445_vm10, %v1443_v7 }
 0x3cf   : > { %1453 = vst [vmem:[%s197_s25 + $0x8] sm:$0x7] %v1452_v9 }
 0x3d0 PF: > { %s14_s15 = sadd.s32 1, %s1579_s15  }
 0x3d1   : > { %p11_p4 = scmp.ge.s32.totalorder %s14_s15, 4  }
 0x3d3   :  { %13 = sbr.rel (!%p11_p4) target bundleno = 1 (0x1), region = 66 }

// kernel: lenet_audio_forward.6
= control target key start
LH: loop header
LB: loop body
LE: loop exit
PB: predicated region body
PF: predicated region fallthrough
CT: control target
= control target key end

     0   :  { %s5607_s15 = smov 0   ;;  %s7973_s0 = inlined_call_operand.vmem [shape: bf16[2,8,288], index: 0, kind: input, shape index: {}]   ;;  %s7974_s1 = inlined_call_operand.vmem [shape: bf16[5,288,224], index: 1, kind: input, shape index: {}]   ;;  %s7975_s2 = inlined_call_operand.vmem [shape: bf16[5,288,224], index: 2, kind: input, shape index: {}]   ;;  %s7976_s3 = inlined_call_operand.vmem [shape: f32[1,224], index: 3, kind: input, shape index: {}]   ;;  %s7977_s4 = inlined_call_operand.vmem [shape: bf16[2,2,224], index: 4, kind: output, shape index: {}]  }
   0x1 LB: > { %s3442_s16 = sadd.s32 4294967295, %s5579_s15   ;;  %p3446_p0 = scmp.ge.s32.totalorder %s5579_s15, 1  ;;  %s5579_s15 = sphi %s5607_s15, %s14_s15  }
   0x2   : > { %p162_p1 = scmp.lt.s32.totalorder %s5579_s15, 3 }
   0x4   : > { %p163_p2 = pnand %p3446_p0, %p162_p1 }
   0x5   : > { %p187_p3 = scmp.lt.s32.totalorder (!%p163_p2), %s3442_s16, 1 }
   0x6   : > { %166 = sbr.rel (%p163_p2) target bundleno = 673 (0x2a1), region = 36 }
   0xb   : > { %v3543_v0 = vld [vmem:[%s7974_s1 + $0x190] sm:$0xf]  ;;  %v5290_v1 = vld [vmem:[%s7974_s1 + $0x194] sm:$0xf0]  ;;  %v5289_v9 = vld [vmem:[%s7974_s1 + $0x194] sm:$0xf] }
   0xc   : > { %v3607_v2 = vld [vmem:[%s7974_s1 + $0x210] sm:$0xf]  ;;  %v3544_v3 = vor.u32 %v5290_v1, %v3543_v0  ;;  %v5306_v4 = vld [vmem:[%s7974_s1 + $0x214] sm:$0xf0]  ;;  %v3545_v10 = vld [vmem:[%s7974_s1 + $0x198] sm:$0xf0] }
   0xd   : > { %v3623_v5 = vld [vmem:[%s7974_s1 + $0x230] sm:$0xf]  ;;  %v5310_v6 = vld [vmem:[%s7974_s1 + $0x234] sm:$0xf0]  ;;  %v3608_v7 = vor.u32 %v5306_v4, %v3607_v2  ;;  %v3535_v11 = vld [vmem:[%s7974_s1 + $0x180] sm:$0xf]  ;;  %v3548_v12 = vor.u32 %v5289_v9, %v3545_v10 }
   0xe   : > { %v3624_v8 = vor.u32 %v5310_v6, %v3623_v5  ;;  %525 = vmatpush.bf16.msra.mxu0 %v3544_v3  ;;  %v5288_v13 = vld [vmem:[%s7974_s1 + $0x184] sm:$0xf0]  ;;  %v3599_v14 = vld [vmem:[%s7974_s1 + $0x200] sm:$0xf]  ;;  %v5287_v20 = vld [vmem:[%s7974_s1 + $0x184] sm:$0xf] }
   0xf   : > { %v5304_v15 = vld [vmem:[%s7974_s1 + $0x204] sm:$0xf0]  ;;  %538 = vmatpush.bf16.msra.mxu1 %v3608_v7  ;;  %v3536_v16 = vor.u32 %v5288_v13, %v3535_v11  ;;  %v3615_v18 = vld [vmem:[%s7974_s1 + $0x220] sm:$0xf]  ;;  %564 = vmatpush.bf16.msra.mxu3 %v3548_v12  ;;  %v3537_v22 = vld [vmem:[%s7974_s1 + $0x188] sm:$0xf0] }
  0x10   : > { %557 = vmatpush.bf16.msra.mxu2 %v3624_v8  ;;  %v3600_v17 = vor.u32 %v5304_v15, %v3599_v14  ;;  %v5308_v19 = vld [vmem:[%s7974_s1 + $0x224] sm:$0xf0]  ;;  %v5305_v23 = vld [vmem:[%s7974_s1 + $0x214] sm:$0xf]  ;;  %v3609_v24 = vld [vmem:[%s7974_s1 + $0x218] sm:$0xf0]  ;;  %v3540_v25 = vor.u32 %v5287_v20, %v3537_v22 }
  0x11   : > { %v3616_v21 = vor.u32 %v5308_v19, %v3615_v18  ;;  %v3612_v26 = vor.u32 %v5305_v23, %v3609_v24  ;;  %v3527_v27 = vld [vmem:[%s7974_s1 + $0x170] sm:$0xf]  ;;  %v5286_v28 = vld [vmem:[%s7974_s1 + $0x174] sm:$0xf0]  ;;  %v5285_v32 = vld [vmem:[%s7974_s1 + $0x174] sm:$0xf] }
  0x12   : > { %v3591_v29 = vld [vmem:[%s7974_s1 + $0x1f0] sm:$0xf]  ;;  %526 = vmatpush.bf16.msra.mxu0 %v3536_v16  ;;  %v3528_v30 = vor.u32 %v5286_v28, %v3527_v27  ;;  %v5302_v31 = vld [vmem:[%s7974_s1 + $0x1f4] sm:$0xf0]  ;;  %v3529_v33 = vld [vmem:[%s7974_s1 + $0x178] sm:$0xf0] }
  0x13   : > { %539 = vmatpush.bf16.msra.mxu1 %v3600_v17  ;;  %v3592_v34 = vor.u32 %v5302_v31, %v3591_v29  ;;  %v5303_v35 = vld [vmem:[%s7974_s1 + $0x204] sm:$0xf]  ;;  %v3601_v36 = vld [vmem:[%s7974_s1 + $0x208] sm:$0xf0]  ;;  %v3519_v37 = vld [vmem:[%s7974_s1 + $0x160] sm:$0xf]  ;;  %565 = vmatpush.bf16.msra.mxu3 %v3540_v25  ;;  %v3532_v38 = vor.u32 %v5285_v32, %v3529_v33 }
  0x14   : > { %558 = vmatpush.bf16.msra.mxu2 %v3616_v21  ;;  %v3604_v39 = vor.u32 %v5303_v35, %v3601_v36  ;;  %v5284_v40 = vld [vmem:[%s7974_s1 + $0x164] sm:$0xf0]  ;;  %v3583_v41 = vld [vmem:[%s7974_s1 + $0x1e0] sm:$0xf]  ;;  %v5283_v43 = vld [vmem:[%s7974_s1 + $0x164] sm:$0xf] }
  0x15   : > { %v5300_v42 = vld [vmem:[%s7974_s1 + $0x1e4] sm:$0xf0]  ;;  %v3521_v44 = vld [vmem:[%s7974_s1 + $0x168] sm:$0xf0]  ;;  %v5301_v45 = vld [vmem:[%s7974_s1 + $0x1f4] sm:$0xf]  ;;  %v3520_v46 = vor.u32 %v5284_v40, %v3519_v37 }
  0x16   : > { %527 = vmatpush.bf16.msra.mxu0 %v3528_v30  ;;  %v3593_v47 = vld [vmem:[%s7974_s1 + $0x1f8] sm:$0xf0]  ;;  %v3584_v48 = vor.u32 %v5300_v42, %v3583_v41  ;;  %v3511_v49 = vld [vmem:[%s7974_s1 + $0x150] sm:$0xf]  ;;  %v5282_v50 = vld [vmem:[%s7974_s1 + $0x154] sm:$0xf0]  ;;  %v3524_v51 = vor.u32 %v5283_v43, %v3521_v44 }
  0x17   : > { %540 = vmatpush.bf16.msra.mxu1 %v3592_v34  ;;  %566 = vmatpush.bf16.msra.mxu3 %v3532_v38  ;;  %v3596_v52 = vor.u32 %v5301_v45, %v3593_v47  ;;  %v3575_v53 = vld [vmem:[%s7974_s1 + $0x1d0] sm:$0xf]  ;;  %v5298_v54 = vld [vmem:[%s7974_s1 + $0x1d4] sm:$0xf0]  ;;  %v5281_v55 = vld [vmem:[%s7974_s1 + $0x154] sm:$0xf]  ;;  %v3512_v59 = vor.u32 %v5282_v50, %v3511_v49 }
  0x18   : > { %577 = vmatpush.bf16.msrb.mxu2 %v3612_v26  ;;  %v3513_v56 = vld [vmem:[%s7974_s1 + $0x158] sm:$0xf0]  ;;  %v5299_v57 = vld [vmem:[%s7974_s1 + $0x1e4] sm:$0xf]  ;;  %v3585_v58 = vld [vmem:[%s7974_s1 + $0x1e8] sm:$0xf0]  ;;  %v3576_v61 = vor.u32 %v5298_v54, %v3575_v53 }
  0x19   : > { %v3503_v60 = vld [vmem:[%s7974_s1 + $0x140] sm:$0xf]  ;;  %v5280_v62 = vld [vmem:[%s7974_s1 + $0x144] sm:$0xf0]  ;;  %v3516_v0 = vor.u32 %v5281_v55, %v3513_v56  ;;  %v3588_v1 = vor.u32 %v5299_v57, %v3585_v58  ;;  %v5279_v3 = vld [vmem:[%s7974_s1 + $0x144] sm:$0xf] }
  0x1a   : > { %528 = vmatpush.bf16.msra.mxu0 %v3520_v46  ;;  %v3567_v63 = vld [vmem:[%s7974_s1 + $0x1c0] sm:$0xf]  ;;  %v5296_v2 = vld [vmem:[%s7974_s1 + $0x1c4] sm:$0xf0]  ;;  %v3505_v4 = vld [vmem:[%s7974_s1 + $0x148] sm:$0xf0]  ;;  %v3504_v7 = vor.u32 %v5280_v62, %v3503_v60 }
  0x1b   : > { %541 = vmatpush.bf16.msra.mxu1 %v3584_v48  ;;  %567 = vmatpush.bf16.msra.mxu3 %v3524_v51  ;;  %s7979_s16 = smov (!%p187_p3, %s3442_s16), 1  ;;  %v5297_v5 = vld [vmem:[%s7974_s1 + $0x1d4] sm:$0xf]  ;;  %v3577_v6 = vld [vmem:[%s7974_s1 + $0x1d8] sm:$0xf0]  ;;  %v3568_v9 = vor.u32 %v5296_v2, %v3567_v63  ;;  %v3508_v12 = vor.u32 %v5279_v3, %v3505_v4  ;;  %vm521_vm0 = vcmask 261120  }
  0x1c   : > { %578 = vmatpush.bf16.msrb.mxu2 %v3604_v39  ;;  %v3495_v8 = vld [vmem:[%s7974_s1 + $0x130] sm:$0xf]  ;;  %s5563_s23 = smul.u32 12, %s7979_s16  ;;  %v5278_v10 = vld [vmem:[%s7974_s1 + $0x134] sm:$0xf0]  ;;  %v3580_v13 = vor.u32 %v5297_v5, %v3577_v6  ;;  %vm3314_vm3 = vcmask 1041408  }
  0x1d   : > { %v3559_v11 = vld [vmem:[%s7974_s1 + $0x1b0] sm:$0xf]  ;;  %v5294_v14 = vld [vmem:[%s7974_s1 + $0x1b4] sm:$0xf0]  ;;  %v5277_v15 = vld [vmem:[%s7974_s1 + $0x134] sm:$0xf]  ;;  %v3496_v21 = vor.u32 %v5278_v10, %v3495_v8 }
  0x1e   : > { %529 = vmatpush.bf16.msra.mxu0 %v3512_v59  ;;  %v3497_v16 = vld [vmem:[%s7974_s1 + $0x138] sm:$0xf0]  ;;  %s5793_s10 = scalar_lea.vmem %s7973_s0, %s5563_s23  ;;  %v5295_v17 = vld [vmem:[%s7974_s1 + $0x1c4] sm:$0xf]  ;;  %v3569_v18 = vld [vmem:[%s7974_s1 + $0x1c8] sm:$0xf0]  ;;  %v3560_v25 = vor.u32 %v5294_v14, %v3559_v11 }
  0x1f   : > { %542 = vmatpush.bf16.msra.mxu1 %v3576_v61  ;;  %568 = vmatpush.bf16.msra.mxu3 %v3516_v0  ;;  %v3487_v19 = vld [vmem:[%s7974_s1 + $0x120] sm:$0xf]  ;;  %v272_v20 = vld [vmem:[%s5793_s10 + $0x8] sm:$0x7]  ;;  %v5309_v27 = vld [vmem:[%s7974_s1 + $0x234] sm:$0xf]  ;;  %v3500_v29 = vor.u32 %v5277_v15, %v3497_v16  ;;  %v3572_v30 = vor.u32 %v5295_v17, %v3569_v18 }
  0x20   : > { %579 = vmatpush.bf16.msrb.mxu2 %v3596_v52  ;;  %v5276_v22 = vld [vmem:[%s7974_s1 + $0x124] sm:$0xf0]  ;;  %v3551_v23 = vld [vmem:[%s7974_s1 + $0x1a0] sm:$0xf]  ;;  %v314_v24 = vunpack.c.l.b16 %v272_v20  ;;  %v3625_v28 = vld [vmem:[%s7974_s1 + $0x238] sm:$0xf0] }
  0x21   : > { %v5292_v26 = vld [vmem:[%s7974_s1 + $0x1a4] sm:$0xf0]  ;;  %v5275_v31 = vld [vmem:[%s7974_s1 + $0x124] sm:$0xf]  ;;  %v3489_v32 = vld [vmem:[%s7974_s1 + $0x128] sm:$0xf0]  ;;  %v3488_v40 = vor.u32 %v5276_v22, %v3487_v19  ;;  %v3628_v42 = vor.u32 %v5309_v27, %v3625_v28 }
  0x22   : > { %530 = vmatpush.bf16.msra.mxu0 %v3504_v7  ;;  %v271_v33 = vld [vmem:[%s5793_s10] sm:$0x77]  ;;  %v317_v34 = vpack.c.b16 %v314_v24, %v314_v24  ;;  %v5293_v35 = vld [vmem:[%s7974_s1 + $0x1b4] sm:$0xf]  ;;  %v3561_v36 = vld [vmem:[%s7974_s1 + $0x1b8] sm:$0xf0]  ;;  %v3552_v41 = vor.u32 %v5292_v26, %v3551_v23  ;;  %v3492_v52 = vor.u32 %v5275_v31, %v3489_v32 }
  0x23   : > { %543 = vmatpush.bf16.msra.mxu1 %v3568_v9  ;;  %569 = vmatpush.bf16.msra.mxu3 %v3508_v12  ;;  %v3725_v37 = vld [vmem:[%s7975_s2 + $0x190] sm:$0xf]  ;;  %v312_v38 = vunpack.c.l.b16 %v271_v33  ;;  %v313_v39 = vunpack.c.h.b16 %v271_v33  ;;  %v5326_v43 = vld [vmem:[%s7975_s2 + $0x194] sm:$0xf0]  ;;  %v5291_v50 = vld [vmem:[%s7974_s1 + $0x1a4] sm:$0xf]  ;;  %v3564_v53 = vor.u32 %v5293_v35, %v3561_v36 }
  0x24   : > { %580 = vmatpush.bf16.msrb.mxu2 %v3588_v1  ;;  %v3789_v44 = vld [vmem:[%s7975_s2 + $0x210] sm:$0xf]  ;;  %v5342_v45 = vld [vmem:[%s7975_s2 + $0x214] sm:$0xf0]  ;;  %v333_v46 = vshrl.u32 %v317_v34, 16  ;;  %v335_v47 = vshll.u32 %v317_v34, 16  ;;  %v3726_v58 = vor.u32 %v5326_v43, %v3725_v37 }
  0x25   : > { %v315_v48 = vpack.c.b16 %v312_v38, %v312_v38  ;;  %v316_v49 = vpack.c.b16 %v313_v39, %v313_v39  ;;  %v3553_v51 = vld [vmem:[%s7974_s1 + $0x1a8] sm:$0xf0]  ;;  %v5307_v54 = vld [vmem:[%s7974_s1 + $0x224] sm:$0xf]  ;;  %v3717_v56 = vld [vmem:[%s7975_s2 + $0x180] sm:$0xf]  ;;  %v3790_v62 = vor.u32 %v5342_v45, %v3789_v44 }
  0x26   : > { %531 = vmatpush.bf16.msra.mxu0 %v3496_v21  ;;  %v3617_v55 = vld [vmem:[%s7974_s1 + $0x228] sm:$0xf0]  ;;  %v337_v57 = vrot.slane %v335_v47, 1  ;;  %v5324_v61 = vld [vmem:[%s7975_s2 + $0x184] sm:$0xf0]  ;;  %v3556_v8 = vor.u32 %v5291_v50, %v3553_v51  ;;  %vm3310_vm4 = vcmask 31744  }
  0x27   : > { %544 = vmatpush.bf16.msra.mxu1 %v3560_v25  ;;  %570 = vmatpush.bf16.msra.mxu3 %v3500_v29  ;;  %v319_v59 = vshrl.u32 %v315_v48, 16  ;;  %v321_v60 = vshll.u32 %v315_v48, 16  ;;  %v326_v63 = vshrl.u32 %v316_v49, 16  ;;  %v328_v0 = vshll.u32 %v316_v49, 16  ;;  %v3781_v1 = vld [vmem:[%s7975_s2 + $0x200] sm:$0xf] }
  0x28   : > { %581 = vmatpush.bf16.msrb.mxu2 %v3580_v13  ;;  %v5340_v2 = vld [vmem:[%s7975_s2 + $0x204] sm:$0xf0]  ;;  %v5869_v3 = vor.u32 %v337_v57, %v333_v46  ;;  %v3805_v5 = vld [vmem:[%s7975_s2 + $0x230] sm:$0xf]  ;;  %v5346_v6 = vld [vmem:[%s7975_s2 + $0x234] sm:$0xf0]  ;;  %v3620_v12 = vor.u32 %v5307_v54, %v3617_v55  ;;  %v3718_v13 = vor.u32 %v5324_v61, %v3717_v56 }
  0x29   : > { %v323_v4 = vrot.slane %v321_v60, 1  ;;  %v330_v7 = vrot.slane %v328_v0, 1  ;;  %v5325_v9 = vld [vmem:[%s7975_s2 + $0x194] sm:$0xf]  ;;  %v3727_v10 = vld [vmem:[%s7975_s2 + $0x198] sm:$0xf0]  ;;  %v3782_v15 = vor.u32 %v5340_v2, %v3781_v1  ;;  %v3806_v16 = vor.u32 %v5346_v6, %v3805_v5 }
  0x2a   : > { %532 = vmatpush.bf16.msra.mxu0 %v3488_v40  ;;  %3629 = vmatmul.msk.bf16.vlgmr.msra.gmra.mxu2 %vm521_vm0, %v5869_v3  ;;  %v3709_v17 = vld [vmem:[%s7975_s2 + $0x170] sm:$0xf]  ;;  %v5322_v18 = vld [vmem:[%s7975_s2 + $0x174] sm:$0xf0]  ;;  %v3730_v20 = vor.u32 %v5325_v9, %v3727_v10  ;;  %v3797_v22 = vld [vmem:[%s7975_s2 + $0x220] sm:$0xf] }
  0x2b   : > { %545 = vmatpush.bf16.msra.mxu1 %v3552_v41  ;;  %571 = vmatpush.bf16.msra.mxu3 %v3492_v52  ;;  %v5885_v11 = vor.u32 %v323_v4, %v319_v59  ;;  %v5887_v14 = vor.u32 %v330_v7, %v326_v63  ;;  %v3773_v19 = vld [vmem:[%s7975_s2 + $0x1f0] sm:$0xf]  ;;  %v5338_v21 = vld [vmem:[%s7975_s2 + $0x1f4] sm:$0xf0]  ;;  %v5344_v23 = vld [vmem:[%s7975_s2 + $0x224] sm:$0xf0]  ;;  %v3710_v26 = vor.u32 %v5322_v18, %v3709_v17 }
  0x2c   : > { %582 = vmatpush.bf16.msrb.mxu2 %v3572_v30  ;;  %v5323_v24 = vld [vmem:[%s7975_s2 + $0x184] sm:$0xf]  ;;  %v3719_v25 = vld [vmem:[%s7975_s2 + $0x188] sm:$0xf0]  ;;  %v3774_v27 = vor.u32 %v5338_v21, %v3773_v19  ;;  %v3798_v28 = vor.u32 %v5344_v23, %v3797_v22  ;;  %v3701_v29 = vld [vmem:[%s7975_s2 + $0x160] sm:$0xf] }
  0x2d   : > { %533 = vmatmul.bf16.vlgmr.msra.gmra.mxu0 %v5885_v11  ;;  %v5320_v30 = vld [vmem:[%s7975_s2 + $0x164] sm:$0xf0]  ;;  %v3722_v31 = vor.u32 %v5323_v24, %v3719_v25  ;;  %v3765_v32 = vld [vmem:[%s7975_s2 + $0x1e0] sm:$0xf]  ;;  %v5321_v34 = vld [vmem:[%s7975_s2 + $0x174] sm:$0xf] }
  0x2e   : > { %596 = vmatpush.bf16.msrb.mxu0 %v3628_v42  ;;  %572 = vmatmul.bf16.vlgmr.msra.gmra.mxu3 %v5885_v11  ;;  %v5336_v33 = vld [vmem:[%s7975_s2 + $0x1e4] sm:$0xf0]  ;;  %v3711_v35 = vld [vmem:[%s7975_s2 + $0x178] sm:$0xf0]  ;;  %v3702_v36 = vor.u32 %v5320_v30, %v3701_v29  ;;  %v5341_v37 = vld [vmem:[%s7975_s2 + $0x214] sm:$0xf] }
  0x2f   : > { %820 = vmatpush.bf16.msrb.mxu1 %v3726_v58  ;;  %833 = vmatpush.bf16.msrb.mxu3 %v3790_v62  ;;  %v3766_v38 = vor.u32 %v5336_v33, %v3765_v32  ;;  %v3693_v39 = vld [vmem:[%s7975_s2 + $0x150] sm:$0xf]  ;;  %v5318_v40 = vld [vmem:[%s7975_s2 + $0x154] sm:$0xf0]  ;;  %v3791_v41 = vld [vmem:[%s7975_s2 + $0x218] sm:$0xf0]  ;;  %v3714_v42 = vor.u32 %v5321_v34, %v3711_v35 }
  0x30   : > { %583 = vmatpush.bf16.msrb.mxu2 %v3564_v53  ;;  %546 = vmatmul.bf16.vlgmr.msra.gmra.mxu1 %v5887_v14  ;;  %v3757_v43 = vld [vmem:[%s7975_s2 + $0x1d0] sm:$0xf]  ;;  %v5334_v44 = vld [vmem:[%s7975_s2 + $0x1d4] sm:$0xf0]  ;;  %v5319_v45 = vld [vmem:[%s7975_s2 + $0x164] sm:$0xf]  ;;  %v3694_v47 = vor.u32 %v5318_v40, %v3693_v39  ;;  %v3794_v48 = vor.u32 %v5341_v37, %v3791_v41 }
  0x31   : > { %v3703_v46 = vld [vmem:[%s7975_s2 + $0x168] sm:$0xf0]  ;;  %v5339_v49 = vld [vmem:[%s7975_s2 + $0x204] sm:$0xf]  ;;  %v3758_v50 = vor.u32 %v5334_v44, %v3757_v43  ;;  %v3685_v51 = vld [vmem:[%s7975_s2 + $0x140] sm:$0xf] }
  0x32   : > { %597 = vmatpush.bf16.msrb.mxu0 %v3620_v12  ;;  %v5316_v52 = vld [vmem:[%s7975_s2 + $0x144] sm:$0xf0]  ;;  %v3783_v53 = vld [vmem:[%s7975_s2 + $0x208] sm:$0xf0]  ;;  %v3706_v54 = vor.u32 %v5319_v45, %v3703_v46  ;;  %v3749_v55 = vld [vmem:[%s7975_s2 + $0x1c0] sm:$0xf] }
  0x33   : > { %821 = vmatpush.bf16.msrb.mxu1 %v3718_v13  ;;  %834 = vmatpush.bf16.msrb.mxu3 %v3782_v15  ;;  %v5332_v56 = vld [vmem:[%s7975_s2 + $0x1c4] sm:$0xf0]  ;;  %v5317_v57 = vld [vmem:[%s7975_s2 + $0x154] sm:$0xf]  ;;  %v3695_v58 = vld [vmem:[%s7975_s2 + $0x158] sm:$0xf0]  ;;  %v3686_v59 = vor.u32 %v5316_v52, %v3685_v51  ;;  %v3786_v60 = vor.u32 %v5339_v49, %v3783_v53 }
  0x34   : > { %584 = vmatpush.bf16.msrb.mxu2 %v3556_v8  ;;  %v5337_v61 = vld [vmem:[%s7975_s2 + $0x1f4] sm:$0xf]  ;;  %v3750_v62 = vor.u32 %v5332_v56, %v3749_v55  ;;  %v3677_v63 = vld [vmem:[%s7975_s2 + $0x130] sm:$0xf]  ;;  %v5314_v0 = vld [vmem:[%s7975_s2 + $0x134] sm:$0xf0]  ;;  %v3698_v2 = vor.u32 %v5317_v57, %v3695_v58 }
  0x35   : > { %v3775_v1 = vld [vmem:[%s7975_s2 + $0x1f8] sm:$0xf0]  ;;  %v3741_v4 = vld [vmem:[%s7975_s2 + $0x1b0] sm:$0xf]  ;;  %v5330_v5 = vld [vmem:[%s7975_s2 + $0x1b4] sm:$0xf0]  ;;  %v3678_v9 = vor.u32 %v5314_v0, %v3677_v63 }
  0x36   : > { %859 = vmatpush.bf16.msra.mxu0 %v3730_v20  ;;  %v5315_v6 = vld [vmem:[%s7975_s2 + $0x144] sm:$0xf]  ;;  %v3687_v7 = vld [vmem:[%s7975_s2 + $0x148] sm:$0xf0]  ;;  %v3778_v10 = vor.u32 %v5337_v61, %v3775_v1  ;;  %v3742_v13 = vor.u32 %v5330_v5, %v3741_v4  ;;  %v3669_v15 = vld [vmem:[%s7975_s2 + $0x120] sm:$0xf] }
  0x37   : > { %822 = vmatpush.bf16.msrb.mxu1 %v3710_v26  ;;  %835 = vmatpush.bf16.msrb.mxu3 %v3774_v27  ;;  %v5335_v8 = vld [vmem:[%s7975_s2 + $0x1e4] sm:$0xf]  ;;  %v3767_v12 = vld [vmem:[%s7975_s2 + $0x1e8] sm:$0xf0]  ;;  %v3690_v17 = vor.u32 %v5315_v6, %v3687_v7  ;;  %v3733_v18 = vld [vmem:[%s7975_s2 + $0x1a0] sm:$0xf] }
  0x38   : > { %852 = vmatpush.bf16.msra.mxu2 %v3806_v16  ;;  %v5312_v16 = vld [vmem:[%s7975_s2 + $0x124] sm:$0xf0]  ;;  %v5313_v20 = vld [vmem:[%s7975_s2 + $0x134] sm:$0xf]  ;;  %v3679_v21 = vld [vmem:[%s7975_s2 + $0x138] sm:$0xf0]  ;;  %v3770_v25 = vor.u32 %v5335_v8, %v3767_v12 }
  0x39   : > { %v5328_v19 = vld [vmem:[%s7975_s2 + $0x1a4] sm:$0xf0]  ;;  %v3871_v22 = vld [vmem:[%s7974_s1 + $0x70] sm:$0xf]  ;;  %v5218_v23 = vld [vmem:[%s7974_s1 + $0x74] sm:$0xf0]  ;;  %v3670_v24 = vor.u32 %v5312_v16, %v3669_v15  ;;  %v3682_v29 = vor.u32 %v5313_v20, %v3679_v21 }
  0x3a   : > { %860 = vmatpush.bf16.msra.mxu0 %v3722_v31  ;;  %585 = vmatmul.bf16.vlgmr.msrb.gmra.mxu2 %v5887_v14  ;;  %v5333_v26 = vld [vmem:[%s7975_s2 + $0x1d4] sm:$0xf]  ;;  %v3759_v27 = vld [vmem:[%s7975_s2 + $0x1d8] sm:$0xf0]  ;;  %v3872_v30 = vor.u32 %v5218_v23, %v3871_v22  ;;  %v5311_v31 = vld [vmem:[%s7975_s2 + $0x124] sm:$0xf] }
  0x3b   : > { %823 = vmatpush.bf16.msrb.mxu1 %v3702_v36  ;;  %836 = vmatpush.bf16.msrb.mxu3 %v3766_v38  ;;  %v5345_v32 = vld [vmem:[%s7975_s2 + $0x234] sm:$0xf]  ;;  %v3807_v33 = vld [vmem:[%s7975_s2 + $0x238] sm:$0xf0]  ;;  %v3671_v34 = vld [vmem:[%s7975_s2 + $0x128] sm:$0xf0]  ;;  %v3762_v39 = vor.u32 %v5333_v26, %v3759_v27 }
  0x3c   : > { %853 = vmatpush.bf16.msra.mxu2 %v3798_v28  ;;  %v3734_v28 = vor.u32 %v5328_v19, %v3733_v18  ;;  %v3863_v35 = vld [vmem:[%s7974_s1 + $0x60] sm:$0xf]  ;;  %v5216_v36 = vld [vmem:[%s7974_s1 + $0x64] sm:$0xf0]  ;;  %v3935_v37 = vld [vmem:[%s7974_s1 + $0xf0] sm:$0xf]  ;;  %v3674_v43 = vor.u32 %v5311_v31, %v3671_v34 }
  0x3d   : > { %3630 = vmatmul.msk.bf16.vlgmr.msrb.gmra.mxu0 %vm521_vm0, %v5869_v3  ;;  %v5234_v38 = vld [vmem:[%s7974_s1 + $0xf4] sm:$0xf0]  ;;  %v5331_v40 = vld [vmem:[%s7975_s2 + $0x1c4] sm:$0xf]  ;;  %v3751_v41 = vld [vmem:[%s7975_s2 + $0x1c8] sm:$0xf0]  ;;  %v3864_v44 = vor.u32 %v5216_v36, %v3863_v35 }
  0x3e   : > { %861 = vmatpush.bf16.msra.mxu0 %v3714_v42  ;;  %v3810_v42 = vor.u32 %v5345_v32, %v3807_v33  ;;  %v3855_v45 = vld [vmem:[%s7974_s1 + $0x50] sm:$0xf]  ;;  %v5343_v46 = vld [vmem:[%s7975_s2 + $0x224] sm:$0xf]  ;;  %v5214_v49 = vld [vmem:[%s7974_s1 + $0x54] sm:$0xf0] }
  0x3f   : > { %824 = vmatpush.bf16.msrb.mxu1 %v3694_v47  ;;  %837 = vmatpush.bf16.msrb.mxu3 %v3758_v50  ;;  %v3799_v47 = vld [vmem:[%s7975_s2 + $0x228] sm:$0xf0]  ;;  %v3951_v50 = vld [vmem:[%s7974_s1 + $0x110] sm:$0xf]  ;;  %v5238_v51 = vld [vmem:[%s7974_s1 + $0x114] sm:$0xf0]  ;;  %v3856_v58 = vor.u32 %v5214_v49, %v3855_v45 }
  0x40   : > { %872 = vmatpush.bf16.msrb.mxu2 %v3794_v48  ;;  %v3936_v48 = vor.u32 %v5234_v38, %v3935_v37  ;;  %v3927_v52 = vld [vmem:[%s7974_s1 + $0xe0] sm:$0xf]  ;;  %v5232_v53 = vld [vmem:[%s7974_s1 + $0xe4] sm:$0xf0]  ;;  %v3802_v55 = vor.u32 %v5343_v46, %v3799_v47  ;;  %v5329_v56 = vld [vmem:[%s7975_s2 + $0x1b4] sm:$0xf] }
  0x41   : > { %v3743_v57 = vld [vmem:[%s7975_s2 + $0x1b8] sm:$0xf0]  ;;  %v3928_v61 = vor.u32 %v5232_v53, %v3927_v52  ;;  %v3943_v63 = vld [vmem:[%s7974_s1 + $0x100] sm:$0xf]  ;;  %v5236_v0 = vld [vmem:[%s7974_s1 + $0x104] sm:$0xf0] }
  0x42   : > { %862 = vmatpush.bf16.msra.mxu0 %v3706_v54  ;;  %v3754_v54 = vor.u32 %v5331_v40, %v3751_v41  ;;  %v3919_v1 = vld [vmem:[%s7974_s1 + $0xd0] sm:$0xf]  ;;  %v3746_v4 = vor.u32 %v5329_v56, %v3743_v57  ;;  %v5327_v5 = vld [vmem:[%s7975_s2 + $0x1a4] sm:$0xf]  ;;  %v3735_v6 = vld [vmem:[%s7975_s2 + $0x1a8] sm:$0xf0] }
  0x43   : > { %825 = vmatpush.bf16.msrb.mxu1 %v3686_v59  ;;  %838 = vmatpush.bf16.msrb.mxu3 %v3750_v62  ;;  %v3847_v59 = vld [vmem:[%s7974_s1 + $0x40] sm:$0xf]  ;;  %v5212_v62 = vld [vmem:[%s7974_s1 + $0x44] sm:$0xf0]  ;;  %v5217_v7 = vld [vmem:[%s7974_s1 + $0x74] sm:$0xf]  ;;  %v3738_v18 = vor.u32 %v5327_v5, %v3735_v6 }
  0x44   : > { %873 = vmatpush.bf16.msrb.mxu2 %v3786_v60  ;;  %v3952_v60 = vor.u32 %v5238_v51, %v3951_v50  ;;  %v3848_v8 = vor.u32 %v5212_v62, %v3847_v59  ;;  %v5210_v15 = vld [vmem:[%s7974_s1 + $0x34] sm:$0xf0]  ;;  %v3911_v16 = vld [vmem:[%s7974_s1 + $0xc0] sm:$0xf]  ;;  %v5233_v19 = vld [vmem:[%s7974_s1 + $0xf4] sm:$0xf] }
  0x45   : > { %v3937_v20 = vld [vmem:[%s7974_s1 + $0xf8] sm:$0xf0]  ;;  %v5215_v22 = vld [vmem:[%s7974_s1 + $0x64] sm:$0xf]  ;;  %v5208_v26 = vld [vmem:[%s7974_s1 + $0x24] sm:$0xf0] }
  0x46   : > { %863 = vmatpush.bf16.msra.mxu0 %v3698_v2  ;;  %v5230_v2 = vld [vmem:[%s7974_s1 + $0xd4] sm:$0xf0]  ;;  %v3940_v27 = vor.u32 %v5233_v19, %v3937_v20  ;;  %v3929_v31 = vld [vmem:[%s7974_s1 + $0xe8] sm:$0xf0]  ;;  %v5213_v33 = vld [vmem:[%s7974_s1 + $0x54] sm:$0xf] }
  0x47   : > { %826 = vmatpush.bf16.msrb.mxu1 %v3678_v9  ;;  %839 = vmatpush.bf16.msrb.mxu3 %v3742_v13  ;;  %v3944_v9 = vor.u32 %v5236_v0, %v3943_v63  ;;  %v3920_v12 = vor.u32 %v5230_v2, %v3919_v1  ;;  %v3839_v13 = vld [vmem:[%s7974_s1 + $0x30] sm:$0xf]  ;;  %v3857_v35 = vld [vmem:[%s7974_s1 + $0x58] sm:$0xf0]  ;;  %v5206_v38 = vld [vmem:[%s7974_s1 + $0x14] sm:$0xf0] }
  0x48   : > { %874 = vmatpush.bf16.msrb.mxu2 %v3778_v10  ;;  %v3873_v10 = vld [vmem:[%s7974_s1 + $0x78] sm:$0xf0]  ;;  %v3840_v23 = vor.u32 %v5210_v15, %v3839_v13  ;;  %v3823_v37 = vld [vmem:[%s7974_s1 + $0x10] sm:$0xf]  ;;  %v5224_v40 = vld [vmem:[%s7974_s1 + $0xa4] sm:$0xf0] }
  0x49   : > { %v3876_v21 = vor.u32 %v5217_v7, %v3873_v10  ;;  %v5229_v41 = vld [vmem:[%s7974_s1 + $0xd4] sm:$0xf]  ;;  %v3824_v45 = vor.u32 %v5206_v38, %v3823_v37  ;;  %v6216_v46 = vld [vmem:[%s5793_s10] sm:$0x33]  ;;  %v5204_v49 = vld [vmem:[%s7974_s1 + $0x4] sm:$0xf0] }
  0x4a   : > { %864 = vmatpush.bf16.msra.mxu0 %v3690_v17  ;;  %3811 = vmatmul.msk.bf16.vlgmr.msra.gmra.mxu2 %vm521_vm0, %v5869_v3  ;;  %v5228_v17 = vld [vmem:[%s7974_s1 + $0xc4] sm:$0xf0]  ;;  %v3887_v50 = vld [vmem:[%s7974_s1 + $0x90] sm:$0xf]  ;;  %v5222_v52 = vld [vmem:[%s7974_s1 + $0x94] sm:$0xf0]  ;;  %v900_v57 = vunpack.c.l.b16 %v6216_v46 }
  0x4b   : > { %827 = vmatpush.bf16.msrb.mxu1 %v3670_v24  ;;  %840 = vmatpush.bf16.msrb.mxu3 %v3734_v28  ;;  %v3912_v24 = vor.u32 %v5228_v17, %v3911_v16  ;;  %v3903_v28 = vld [vmem:[%s7974_s1 + $0xb0] sm:$0xf]  ;;  %v5237_v53 = vld [vmem:[%s7974_s1 + $0x114] sm:$0xf]  ;;  %v3913_v56 = vld [vmem:[%s7974_s1 + $0xc8] sm:$0xf0]  ;;  %v3888_v63 = vor.u32 %v5222_v52, %v3887_v50 }
  0x4c   : > { %875 = vmatpush.bf16.msrb.mxu2 %v3770_v25  ;;  %v3831_v25 = vld [vmem:[%s7974_s1 + $0x20] sm:$0xf]  ;;  %v3841_v62 = vld [vmem:[%s7974_s1 + $0x38] sm:$0xf0]  ;;  %v5235_v5 = vld [vmem:[%s7974_s1 + $0x104] sm:$0xf] }
  0x4d   : > { %v3832_v34 = vor.u32 %v5208_v26, %v3831_v25  ;;  %v3879_v1 = vld [vmem:[%s7974_s1 + $0x80] sm:$0xf]  ;;  %v3945_v6 = vld [vmem:[%s7974_s1 + $0x108] sm:$0xf0]  ;;  %v4017_v10 = vld [vmem:[%s7975_s2 + $0x70] sm:$0xf] }
  0x4e   : > { %865 = vmatpush.bf16.msra.mxu0 %v3682_v29  ;;  %828 = vmatmul.bf16.vlgmr.msrb.gmra.mxu1 %v5885_v11  ;;  %v5226_v29 = vld [vmem:[%s7974_s1 + $0xb4] sm:$0xf0]  ;;  %v3905_v15 = vld [vmem:[%s7974_s1 + $0xb8] sm:$0xf0]  ;;  %v4081_v16 = vld [vmem:[%s7975_s2 + $0xf0] sm:$0xf] }
  0x4f   : > { %1091 = vmatpush.bf16.msra.mxu3 %v3872_v30  ;;  %891 = vmatpush.bf16.msra.mxu1 %v3810_v42  ;;  %v5231_v30 = vld [vmem:[%s7974_s1 + $0xe4] sm:$0xf]  ;;  %v3904_v36 = vor.u32 %v5226_v29, %v3903_v28  ;;  %v3921_v42 = vld [vmem:[%s7974_s1 + $0xd8] sm:$0xf0]  ;;  %v5270_v17 = vld [vmem:[%s7975_s2 + $0xf4] sm:$0xf0] }
  0x50   : > { %841 = vmatmul.bf16.vlgmr.msrb.gmra.mxu3 %v5887_v14  ;;  %876 = vmatpush.bf16.msrb.mxu2 %v3762_v39  ;;  %v3932_v39 = vor.u32 %v5231_v30, %v3929_v31  ;;  %v3924_v51 = vor.u32 %v5229_v41, %v3921_v42  ;;  %v5207_v19 = vld [vmem:[%s7974_s1 + $0x24] sm:$0xf]  ;;  %v3833_v20 = vld [vmem:[%s7974_s1 + $0x28] sm:$0xf0]  ;;  %v4082_v25 = vor.u32 %v5270_v17, %v4081_v16  ;;  %v5252_v28 = vld [vmem:[%s7975_s2 + $0x64] sm:$0xf0] }
  0x51   : > { %v5223_v26 = vld [vmem:[%s7974_s1 + $0xa4] sm:$0xf]  ;;  %v3836_v29 = vor.u32 %v5207_v19, %v3833_v20  ;;  %v3897_v30 = vld [vmem:[%s7974_s1 + $0xa8] sm:$0xf0]  ;;  %v4073_v31 = vld [vmem:[%s7975_s2 + $0xe0] sm:$0xf] }
  0x52   : > { %866 = vmatpush.bf16.msra.mxu0 %v3674_v43  ;;  %v3860_v43 = vor.u32 %v5213_v33, %v3857_v35  ;;  %v3825_v35 = vld [vmem:[%s7974_s1 + $0x18] sm:$0xf0]  ;;  %v3900_v37 = vor.u32 %v5223_v26, %v3897_v30  ;;  %v5248_v52 = vld [vmem:[%s7975_s2 + $0x44] sm:$0xf0]  ;;  %v5267_v17 = vld [vmem:[%s7975_s2 + $0xe4] sm:$0xf] }
  0x53   : > { %1092 = vmatpush.bf16.msra.mxu3 %v3864_v44  ;;  %892 = vmatpush.bf16.msra.mxu1 %v3802_v55  ;;  %v3849_v44 = vld [vmem:[%s7974_s1 + $0x48] sm:$0xf0]  ;;  %v5227_v55 = vld [vmem:[%s7974_s1 + $0xc4] sm:$0xf]  ;;  %v3889_v42 = vld [vmem:[%s7974_s1 + $0x98] sm:$0xf0] }
  0x54   : > { %877 = vmatpush.bf16.msrb.mxu2 %v3754_v54  ;;  %v3953_v54 = vld [vmem:[%s7974_s1 + $0x118] sm:$0xf0]  ;;  %v3916_v2 = vor.u32 %v5227_v55, %v3913_v56  ;;  %v3881_v55 = vld [vmem:[%s7974_s1 + $0x88] sm:$0xf0]  ;;  %v4057_v56 = vld [vmem:[%s7975_s2 + $0xc0] sm:$0xf] }
  0x55   : > { %867 = vmatmul.bf16.vlgmr.msra.gmra.mxu0 %v5885_v11  ;;  %v3865_v11 = vld [vmem:[%s7974_s1 + $0x68] sm:$0xf0]  ;;  %v3956_v0 = vor.u32 %v5237_v53, %v3953_v54  ;;  %v5219_v54 = vld [vmem:[%s7974_s1 + $0x84] sm:$0xf]  ;;  %v5249_v26 = vld [vmem:[%s7975_s2 + $0x54] sm:$0xf] }
  0x56   : > { %1104 = vmatpush.bf16.msrb.mxu0 %v3936_v48  ;;  %v3868_v32 = vor.u32 %v5215_v22, %v3865_v11  ;;  %v3815_v48 = vld [vmem:[%s7974_s1] sm:$0xf]  ;;  %v3948_v22 = vor.u32 %v5235_v5, %v3945_v6  ;;  %v3985_v6 = vld [vmem:[%s7975_s2 + $0x30] sm:$0xf]  ;;  %v4067_v30 = vld [vmem:[%s7975_s2 + $0xd8] sm:$0xf0] }
  0x57   : > { %1093 = vmatpush.bf16.msra.mxu3 %v3856_v58  ;;  %1123 = vmatpush.bf16.msrb.mxu1 %v3952_v60  ;;  %v198_v58 = vld [vmem:[%s5793_s10 + $0x8] sm:$0x3]  ;;  %v3816_v60 = vor.u32 %v5204_v49, %v3815_v48  ;;  %s3448_s23 = sshll.u32 %s7979_s16, 1  ;;  %vm3381_vm5 = vcmask 1040384   ;;  %vm3386_vm6 = vcmask 779265  }
  0x58   : > { %878 = vmatpush.bf16.msrb.mxu2 %v3746_v4  ;;  %v5220_v4 = vld [vmem:[%s7974_s1 + $0x84] sm:$0xf0]  ;;  %v902_v7 = vunpack.c.l.b16 %v198_v58  ;;  %s195_s26 = scalar_lea.vmem %s7977_s4, %s3448_s23  ;;  %vm3387_vm7 = vmor %vm3386_vm6, %vm3381_vm5 }
  0x59   : > { %v5264_v58 = vld [vmem:[%s7975_s2 + $0xc4] sm:$0xf0] }
  0x5a   : > { %1105 = vmatpush.bf16.msrb.mxu0 %v3928_v61  ;;  %v5209_v61 = vld [vmem:[%s7974_s1 + $0x34] sm:$0xf] }
  0x5b   : > { %1094 = vmatpush.bf16.msra.mxu3 %v3848_v8  ;;  %1124 = vmatpush.bf16.msrb.mxu1 %v3944_v9  ;;  %v6262_v8 = vpack.c.b16 %v900_v57, %v900_v57  ;;  %v5225_v9 = vld [vmem:[%s7974_s1 + $0xb4] sm:$0xf]  ;;  %v3844_v13 = vor.u32 %v5209_v61, %v3841_v62  ;;  %v4089_v61 = vld [vmem:[%s7975_s2 + $0x100] sm:$0xf]  ;;  %v5272_v62 = vld [vmem:[%s7975_s2 + $0x104] sm:$0xf0] }
  0x5c   : > { %879 = vmatpush.bf16.msrb.mxu2 %v3738_v18  ;;  %v901_v18 = vunpack.c.h.b16 %v6216_v46  ;;  %v4097_v46 = vld [vmem:[%s7975_s2 + $0x110] sm:$0xf] }
  0x5e   : > { %1106 = vmatpush.bf16.msrb.mxu0 %v3920_v12  ;;  %3812 = vmatmul.msk.bf16.vlgmr.msra.gmra.mxu1 %vm521_vm0, %v5869_v3  ;;  %v3895_v3 = vld [vmem:[%s7974_s1 + $0xa0] sm:$0xf]  ;;  %v5254_v12 = vld [vmem:[%s7975_s2 + $0x74] sm:$0xf0]  ;;  %v6310_v33 = vpack.c.b16 %v901_v18, %v901_v18  ;;  %v4075_v18 = vld [vmem:[%s7975_s2 + $0xe8] sm:$0xf0] }
  0x5f   : > { %1095 = vmatpush.bf16.msra.mxu3 %v3840_v23  ;;  %1143 = vmatpush.bf16.msra.mxu1 %v3940_v27  ;;  %v3896_v47 = vor.u32 %v5224_v40, %v3895_v3  ;;  %v6289_v23 = vpack.c.b16 %v902_v7, %v902_v7  ;;  %v4018_v11 = vor.u32 %v5254_v12, %v4017_v10  ;;  %v4009_v27 = vld [vmem:[%s7975_s2 + $0x60] sm:$0xf]  ;;  %v4001_v3 = vld [vmem:[%s7975_s2 + $0x50] sm:$0xf]  ;;  %v5250_v40 = vld [vmem:[%s7975_s2 + $0x54] sm:$0xf0] }
  0x60   : > { %1130 = vmatpush.bf16.msra.mxu2 %v3876_v21  ;;  %v3880_v21 = vor.u32 %v5220_v4, %v3879_v1  ;;  %v4002_v48 = vor.u32 %v5250_v40, %v4001_v3  ;;  %v4083_v1 = vld [vmem:[%s7975_s2 + $0xf8] sm:$0xf0]  ;;  %v4058_v4 = vor.u32 %v5264_v58, %v4057_v56  ;;  %v5246_v7 = vld [vmem:[%s7975_s2 + $0x34] sm:$0xf0]  ;;  %v4090_v10 = vor.u32 %v5272_v62, %v4089_v61  ;;  %v3995_v3 = vld [vmem:[%s7975_s2 + $0x48] sm:$0xf0] }
  0x61   : > { %880 = vmatmul.bf16.vlgmr.msrb.gmra.mxu2 %v5887_v14  ;;  %v5211_v14 = vld [vmem:[%s7974_s1 + $0x44] sm:$0xf]  ;;  %v5262_v12 = vld [vmem:[%s7975_s2 + $0xb4] sm:$0xf0]  ;;  %v3986_v19 = vor.u32 %v5246_v7, %v3985_v6  ;;  %v5261_v56 = vld [vmem:[%s7975_s2 + $0xb4] sm:$0xf] }
  0x62   : > { %1107 = vmatpush.bf16.msrb.mxu0 %v3912_v24  ;;  %v3852_v59 = vor.u32 %v5211_v14, %v3849_v44  ;;  %v3908_v24 = vor.u32 %v5225_v9, %v3905_v15  ;;  %v5266_v14 = vld [vmem:[%s7975_s2 + $0xd4] sm:$0xf0]  ;;  %v5203_v44 = vld [vmem:[%s7974_s1 + $0x4] sm:$0xf]  ;;  %v4049_v9 = vld [vmem:[%s7975_s2 + $0xb0] sm:$0xf] }
  0x63   : > { %1096 = vmatpush.bf16.msra.mxu3 %v3832_v34  ;;  %1144 = vmatpush.bf16.msra.mxu1 %v3932_v39  ;;  %v5205_v34 = vld [vmem:[%s7974_s1 + $0x14] sm:$0xf]  ;;  %v4011_v15 = vld [vmem:[%s7975_s2 + $0x68] sm:$0xf0]  ;;  %v4050_v20 = vor.u32 %v5262_v12, %v4049_v9  ;;  %v4191_v6 = vld [vmem:[%s7974_s1 + $0x2a0] sm:$0xf] }
  0x64   : > { %1131 = vmatpush.bf16.msra.mxu2 %v3868_v32  ;;  %v5268_v32 = vld [vmem:[%s7975_s2 + $0xe4] sm:$0xf0]  ;;  %v5221_v39 = vld [vmem:[%s7974_s1 + $0x94] sm:$0xf]  ;;  %v3828_v41 = vor.u32 %v5205_v34, %v3825_v35  ;;  %v3969_v35 = vld [vmem:[%s7975_s2 + $0x10] sm:$0xf] }
  0x65   : > { %v4074_v38 = vor.u32 %v5268_v32, %v4073_v31  ;;  %v3892_v49 = vor.u32 %v5221_v39, %v3889_v42  ;;  %v5247_v39 = vld [vmem:[%s7975_s2 + $0x44] sm:$0xf]  ;;  %v4059_v42 = vld [vmem:[%s7975_s2 + $0xc8] sm:$0xf0]  ;;  %v5360_v7 = vld [vmem:[%s7974_s1 + $0x2a4] sm:$0xf0] }
  0x66   : > { %1108 = vmatpush.bf16.msrb.mxu0 %v3904_v36  ;;  %v4010_v36 = vor.u32 %v5252_v28, %v4009_v27  ;;  %v4003_v27 = vld [vmem:[%s7975_s2 + $0x58] sm:$0xf0]  ;;  %v4078_v28 = vor.u32 %v5267_v17, %v4075_v18  ;;  %v4043_v9 = vld [vmem:[%s7975_s2 + $0xa8] sm:$0xf0]  ;;  %v5378_v12 = vld [vmem:[%s7974_s1 + $0x334] sm:$0xf0] }
  0x67   : > { %1097 = vmatpush.bf16.msra.mxu3 %v3824_v45  ;;  %1145 = vmatpush.bf16.msra.mxu1 %v3924_v51  ;;  %v3817_v45 = vld [vmem:[%s7974_s1 + $0x8] sm:$0xf0]  ;;  %v3993_v51 = vld [vmem:[%s7975_s2 + $0x40] sm:$0xf]  ;;  %v4006_v34 = vor.u32 %v5249_v26, %v4003_v27  ;;  %v5241_v17 = vld [vmem:[%s7975_s2 + $0x14] sm:$0xf] }
  0x68   : > { %1132 = vmatpush.bf16.msra.mxu2 %v3860_v43  ;;  %v4065_v43 = vld [vmem:[%s7975_s2 + $0xd0] sm:$0xf]  ;;  %v3820_v53 = vor.u32 %v5203_v44, %v3817_v45  ;;  %v3998_v45 = vor.u32 %v5247_v39, %v3995_v3  ;;  %v3971_v18 = vld [vmem:[%s7975_s2 + $0x18] sm:$0xf0]  ;;  %v5376_v26 = vld [vmem:[%s7974_s1 + $0x324] sm:$0xf0] }
  0x69   : > { %v4066_v50 = vor.u32 %v5266_v14, %v4065_v43  ;;  %v3961_v14 = vld [vmem:[%s7975_s2] sm:$0xf]  ;;  %v3974_v27 = vor.u32 %v5241_v17, %v3971_v18  ;;  %v4027_v39 = vld [vmem:[%s7975_s2 + $0x88] sm:$0xf0]  ;;  %v4247_v3 = vld [vmem:[%s7974_s1 + $0x310] sm:$0xf] }
  0x6a   : > { %1109 = vmatpush.bf16.msrb.mxu0 %v3896_v47  ;;  %v5274_v47 = vld [vmem:[%s7975_s2 + $0x114] sm:$0xf0]  ;;  %v4223_v18 = vld [vmem:[%s7974_s1 + $0x2e0] sm:$0xf] }
  0x6b   : > { %1098 = vmatpush.bf16.msra.mxu3 %v3816_v60  ;;  %1146 = vmatpush.bf16.msra.mxu1 %v3916_v2  ;;  %v4098_v57 = vor.u32 %v5274_v47, %v4097_v46  ;;  %v4019_v60 = vld [vmem:[%s7975_s2 + $0x78] sm:$0xf0]  ;;  %v3884_v2 = vor.u32 %v5219_v54, %v3881_v55  ;;  %v5240_v46 = vld [vmem:[%s7975_s2 + $0x4] sm:$0xf0]  ;;  %v4025_v47 = vld [vmem:[%s7975_s2 + $0x80] sm:$0xf] }
  0x6c   : > { %1133 = vmatpush.bf16.msra.mxu2 %v3852_v59  ;;  %v5253_v59 = vld [vmem:[%s7975_s2 + $0x74] sm:$0xf]  ;;  %v4199_v54 = vld [vmem:[%s7974_s1 + $0x2b0] sm:$0xf]  ;;  %v5362_v55 = vld [vmem:[%s7974_s1 + $0x2b4] sm:$0xf0]  ;;  %v3962_v58 = vor.u32 %v5240_v46, %v3961_v14 }
  0x6d   : > { %v4022_v5 = vor.u32 %v5253_v59, %v4019_v60  ;;  %v4200_v62 = vor.u32 %v5362_v55, %v4199_v54  ;;  %v5380_v54 = vld [vmem:[%s7974_s1 + $0x344] sm:$0xf0]  ;;  %v4193_v55 = vld [vmem:[%s7974_s1 + $0x2a8] sm:$0xf0] }
  0x6e   : > { %1110 = vmatpush.bf16.msrb.mxu0 %v3888_v63  ;;  %1099 = vmatmul.bf16.vlgmr.msra.gmra.mxu3 %v6262_v8  ;;  %v3994_v63 = vor.u32 %v5248_v52, %v3993_v51  ;;  %v5273_v51 = vld [vmem:[%s7975_s2 + $0x114] sm:$0xf] }
  0x6f   : > { %1162 = vmatpush.bf16.msrb.mxu3 %v3956_v0  ;;  %3957 = vmatmul.msk.bf16.vlgmr.msrb.gmra.mxu1 %vm521_vm0, %v6289_v23  ;;  %v5269_v0 = vld [vmem:[%s7975_s2 + $0xf4] sm:$0xf] }
  0x70   : > { %1134 = vmatpush.bf16.msra.mxu2 %v3844_v13  ;;  %1147 = vmatpush.bf16.msra.mxu1 %v3908_v24  ;;  %v5251_v13 = vld [vmem:[%s7975_s2 + $0x64] sm:$0xf]  ;;  %v4086_v16 = vor.u32 %v5269_v0, %v4083_v1  ;;  %v4041_v24 = vld [vmem:[%s7975_s2 + $0xa0] sm:$0xf]  ;;  %v3979_v1 = vld [vmem:[%s7975_s2 + $0x28] sm:$0xf0] }
  0x71   : > { %v5243_v0 = vld [vmem:[%s7975_s2 + $0x24] sm:$0xf] }
  0x72   : > { %1111 = vmatpush.bf16.msrb.mxu0 %v3880_v21  ;;  %v4014_v21 = vor.u32 %v5251_v13, %v4011_v15  ;;  %v3982_v13 = vor.u32 %v5243_v0, %v3979_v1  ;;  %v5357_v0 = vld [vmem:[%s7974_s1 + $0x294] sm:$0xf] }
  0x73   : > { %1163 = vmatpush.bf16.msrb.mxu3 %v3948_v22  ;;  %v3977_v22 = vld [vmem:[%s7975_s2 + $0x20] sm:$0xf] }
  0x74   : > { %1135 = vmatpush.bf16.msra.mxu2 %v3836_v29  ;;  %1148 = vmatpush.bf16.msra.mxu1 %v3900_v37  ;;  %v5265_v29 = vld [vmem:[%s7975_s2 + $0xd4] sm:$0xf]  ;;  %v4033_v37 = vld [vmem:[%s7975_s2 + $0x90] sm:$0xf] }
  0x75   : > { %1112 = vmatmul.bf16.vlgmr.msrb.gmra.mxu0 %v6310_v33  ;;  %v4070_v40 = vor.u32 %v5265_v29, %v4067_v30  ;;  %v5255_v29 = vld [vmem:[%s7975_s2 + $0x84] sm:$0xf] }
  0x76   : > { %1349 = vmatpush.bf16.msra.mxu0 %v4018_v11  ;;  %v5244_v11 = vld [vmem:[%s7975_s2 + $0x24] sm:$0xf0]  ;;  %v5239_v30 = vld [vmem:[%s7975_s2 + $0x4] sm:$0xf] }
  0x77   : > { %1362 = vmatpush.bf16.msra.mxu3 %v4082_v25  ;;  %v5260_v25 = vld [vmem:[%s7975_s2 + $0xa4] sm:$0xf0]  ;;  %v3978_v31 = vor.u32 %v5244_v11, %v3977_v22  ;;  %v4183_v22 = vld [vmem:[%s7974_s1 + $0x290] sm:$0xf]  ;;  %v5358_v11 = vld [vmem:[%s7974_s1 + $0x294] sm:$0xf0] }
  0x78   : > { %1136 = vmatpush.bf16.msra.mxu2 %v3828_v41  ;;  %1149 = vmatpush.bf16.msra.mxu1 %v3892_v49  ;;  %v4042_v32 = vor.u32 %v5260_v25, %v4041_v24  ;;  %v5263_v41 = vld [vmem:[%s7975_s2 + $0xc4] sm:$0xf]  ;;  %v5245_v49 = vld [vmem:[%s7975_s2 + $0x34] sm:$0xf]  ;;  %v4035_v24 = vld [vmem:[%s7975_s2 + $0x98] sm:$0xf0] }
  0x79   : > { %v4062_v52 = vor.u32 %v5263_v41, %v4059_v42  ;;  %v4255_v25 = vld [vmem:[%s7974_s1 + $0x320] sm:$0xf]  ;;  %v5361_v41 = vld [vmem:[%s7974_s1 + $0x2b4] sm:$0xf]  ;;  %v4201_v42 = vld [vmem:[%s7974_s1 + $0x2b8] sm:$0xf0] }
  0x7a   : > { %1350 = vmatpush.bf16.msra.mxu0 %v4010_v36  ;;  %v5242_v36 = vld [vmem:[%s7975_s2 + $0x14] sm:$0xf0] }
  0x7b   : > { %1363 = vmatpush.bf16.msra.mxu3 %v4074_v38  ;;  %v5258_v38 = vld [vmem:[%s7975_s2 + $0x94] sm:$0xf0]  ;;  %v3970_v43 = vor.u32 %v5242_v36, %v3969_v35  ;;  %v4256_v35 = vor.u32 %v5376_v26, %v4255_v25  ;;  %v5356_v36 = vld [vmem:[%s7974_s1 + $0x284] sm:$0xf0] }
  0x7c   : > { %1137 = vmatpush.bf16.msra.mxu2 %v3820_v53  ;;  %1150 = vmatpush.bf16.msra.mxu1 %v3884_v2  ;;  %v4034_v44 = vor.u32 %v5258_v38, %v4033_v37  ;;  %v4099_v53 = vld [vmem:[%s7975_s2 + $0x118] sm:$0xf0]  ;;  %v5271_v2 = vld [vmem:[%s7975_s2 + $0x104] sm:$0xf]  ;;  %v4279_v37 = vld [vmem:[%s7974_s1 + $0x350] sm:$0xf] }
  0x7d   : > { %v4102_v61 = vor.u32 %v5273_v51, %v4099_v53  ;;  %v5382_v38 = vld [vmem:[%s7974_s1 + $0x354] sm:$0xf0]  ;;  %v4204_v51 = vor.u32 %v5361_v41, %v4201_v42  ;;  %v4271_v53 = vld [vmem:[%s7974_s1 + $0x340] sm:$0xf] }
  0x7e   : > { %1351 = vmatpush.bf16.msra.mxu0 %v4002_v48  ;;  %3958 = vmatmul.msk.bf16.vlgmr.msrb.gmra.mxu3 %vm521_vm0, %v6289_v23  ;;  %v5256_v48 = vld [vmem:[%s7975_s2 + $0x84] sm:$0xf0] }
  0x7f   : > { %1364 = vmatpush.bf16.msra.mxu3 %v4066_v50  ;;  %1138 = vmatmul.bf16.vlgmr.msra.gmra.mxu2 %v6262_v8  ;;  %v3987_v50 = vld [vmem:[%s7975_s2 + $0x38] sm:$0xf0]  ;;  %v4026_v59 = vor.u32 %v5256_v48, %v4025_v47  ;;  %v5359_v47 = vld [vmem:[%s7974_s1 + $0x2a4] sm:$0xf]  ;;  %v4167_v48 = vld [vmem:[%s7974_s1 + $0x270] sm:$0xf] }
  0x80   : > { %1381 = vmatpush.bf16.msrb.mxu2 %v4098_v57  ;;  %1388 = vmatpush.bf16.msrb.mxu1 %v4022_v5  ;;  %v4051_v57 = vld [vmem:[%s7975_s2 + $0xb8] sm:$0xf0]  ;;  %v3990_v60 = vor.u32 %v5245_v49, %v3987_v50  ;;  %v4091_v5 = vld [vmem:[%s7975_s2 + $0x108] sm:$0xf0]  ;;  %v5354_v49 = vld [vmem:[%s7974_s1 + $0x274] sm:$0xf0] }
  0x81   : > { %1151 = vmatmul.bf16.vlgmr.msra.gmra.mxu1 %v6310_v33  ;;  %v4094_v15 = vor.u32 %v5271_v2, %v4091_v5  ;;  %v4239_v50 = vld [vmem:[%s7974_s1 + $0x300] sm:$0xf]  ;;  %v4231_v2 = vld [vmem:[%s7974_s1 + $0x2f0] sm:$0xf]  ;;  %v4185_v5 = vld [vmem:[%s7974_s1 + $0x298] sm:$0xf0] }
  0x82   : > { %1352 = vmatpush.bf16.msra.mxu0 %v3994_v63  ;;  %v5259_v63 = vld [vmem:[%s7975_s2 + $0xa4] sm:$0xf] }
  0x83   : > { %1365 = vmatpush.bf16.msra.mxu3 %v4058_v4  ;;  %v4054_v4 = vor.u32 %v5261_v56, %v4051_v57  ;;  %v5377_v56 = vld [vmem:[%s7974_s1 + $0x334] sm:$0xf]  ;;  %v4265_v57 = vld [vmem:[%s7974_s1 + $0x338] sm:$0xf0] }
  0x84   : > { %1382 = vmatpush.bf16.msrb.mxu2 %v4090_v10  ;;  %1389 = vmatpush.bf16.msrb.mxu1 %v4014_v21  ;;  %v4263_v10 = vld [vmem:[%s7974_s1 + $0x330] sm:$0xf]  ;;  %v4268_v1 = vor.u32 %v5377_v56, %v4265_v57  ;;  %v5414_v57 = vld [vmem:[%s7975_s2 + $0x334] sm:$0xf0] }
  0x85   : > { %v4264_v21 = vor.u32 %v5378_v12, %v4263_v10  ;;  %v1428_v10 = vld [vmem:[%s5793_s10 + $0x8] sm:$0x6] }
  0x86   : > { %1353 = vmatpush.bf16.msra.mxu0 %v3986_v19  ;;  %v4046_v19 = vor.u32 %v5259_v63, %v4043_v9  ;;  %v4196_v63 = vor.u32 %v5359_v47, %v4193_v55  ;;  %v1427_v9 = vld [vmem:[%s5793_s10] sm:$0x66]  ;;  %v4445_v55 = vld [vmem:[%s7975_s2 + $0x330] sm:$0xf] }
  0x87   : > { %1366 = vmatpush.bf16.msra.mxu3 %v4050_v20  ;;  %v5257_v20 = vld [vmem:[%s7975_s2 + $0x94] sm:$0xf] }
  0x88   : > { %1401 = vmatpush.bf16.msra.mxu2 %v4086_v16  ;;  %1390 = vmatpush.bf16.msrb.mxu1 %v4006_v34  ;;  %v4192_v16 = vor.u32 %v5360_v7, %v4191_v6  ;;  %v4038_v34 = vor.u32 %v5257_v20, %v4035_v24  ;;  %v4257_v6 = vld [vmem:[%s7974_s1 + $0x328] sm:$0xf0]  ;;  %v1470_v24 = vunpack.c.l.b16 %v1428_v10  ;;  %v5412_v10 = vld [vmem:[%s7975_s2 + $0x324] sm:$0xf0] }
  0x89   : > { %v4177_v20 = vld [vmem:[%s7974_s1 + $0x288] sm:$0xf0] }
  0x8a   : > { %1354 = vmatpush.bf16.msra.mxu0 %v3978_v31  ;;  %v3963_v31 = vld [vmem:[%s7975_s2 + $0x8] sm:$0xf0] }
  0x8b   : > { %1367 = vmatpush.bf16.msra.mxu3 %v4042_v32  ;;  %v4175_v32 = vld [vmem:[%s7974_s1 + $0x280] sm:$0xf] }
  0x8c   : > { %1402 = vmatpush.bf16.msra.mxu2 %v4078_v28  ;;  %1391 = vmatpush.bf16.msrb.mxu1 %v3998_v45  ;;  %v4184_v28 = vor.u32 %v5358_v11, %v4183_v22  ;;  %v4176_v14 = vor.u32 %v5356_v36, %v4175_v32  ;;  %v4030_v45 = vor.u32 %v5255_v29, %v4027_v39  ;;  %v4249_v22 = vld [vmem:[%s7974_s1 + $0x318] sm:$0xf0]  ;;  %v1468_v11 = vunpack.c.l.b16 %v1427_v9  ;;  %v4215_v29 = vld [vmem:[%s7974_s1 + $0x2d0] sm:$0xf]  ;;  %v5366_v32 = vld [vmem:[%s7974_s1 + $0x2d4] sm:$0xf0] }
  0x8d   : > { %v1469_v36 = vunpack.c.h.b16 %v1427_v9  ;;  %v5371_v39 = vld [vmem:[%s7974_s1 + $0x304] sm:$0xf]  ;;  %v4216_v42 = vor.u32 %v5366_v32, %v4215_v29  ;;  %v4217_v29 = vld [vmem:[%s7974_s1 + $0x2d8] sm:$0xf0] }
  0x8e   : > { %1355 = vmatpush.bf16.msra.mxu0 %v3970_v43  ;;  %v3966_v43 = vor.u32 %v5239_v30, %v3963_v31 }
  0x8f   : > { %1368 = vmatpush.bf16.msra.mxu3 %v4034_v44  ;;  %4103 = vmatmul.msk.bf16.vlgmr.msrb.gmra.mxu2 %vm521_vm0, %v6289_v23  ;;  %v4280_v44 = vor.u32 %v5382_v38, %v4279_v37  ;;  %v4169_v37 = vld [vmem:[%s7974_s1 + $0x278] sm:$0xf0]  ;;  %v1471_v38 = vpack.c.b16 %v1468_v11, %v1468_v11  ;;  %v4365_v11 = vld [vmem:[%s7975_s2 + $0x290] sm:$0xf] }
  0x90   : > { %1403 = vmatpush.bf16.msra.mxu2 %v4070_v40  ;;  %1392 = vmatpush.bf16.msrb.mxu1 %v3990_v60  ;;  %v5374_v40 = vld [vmem:[%s7974_s1 + $0x314] sm:$0xf0]  ;;  %v4272_v60 = vor.u32 %v5380_v54, %v4271_v53 }
  0x91   : > { %v4248_v46 = vor.u32 %v5374_v40, %v4247_v3  ;;  %v4241_v3 = vld [vmem:[%s7974_s1 + $0x308] sm:$0xf0]  ;;  %v1473_v40 = vpack.c.b16 %v1470_v24, %v1470_v24  ;;  %v6728_v53 = vrot.slane %v1471_v38, 1  ;;  %v5398_v54 = vld [vmem:[%s7975_s2 + $0x2b4] sm:$0xf0] }
  0x92   : > { %1356 = vmatpush.bf16.msra.mxu0 %v3962_v58  ;;  %v4168_v58 = vor.u32 %v5354_v49, %v4167_v48  ;;  %v4244_v48 = vor.u32 %v5371_v39, %v4241_v3  ;;  %v5379_v49 = vld [vmem:[%s7974_s1 + $0x344] sm:$0xf]  ;;  %v5394_v24 = vld [vmem:[%s7975_s2 + $0x294] sm:$0xf0]  ;;  %v5416_v38 = vld [vmem:[%s7975_s2 + $0x344] sm:$0xf0] }
  0x93   : > { %1369 = vmatpush.bf16.msra.mxu3 %v4026_v59  ;;  %v6736_v56 = vrot.slane %v1473_v40, 1  ;;  %v4366_v32 = vor.u32 %v5394_v24, %v4365_v11  ;;  %v4357_v39 = vld [vmem:[%s7975_s2 + $0x280] sm:$0xf]  ;;  %v5392_v3 = vld [vmem:[%s7975_s2 + $0x284] sm:$0xf0] }
  0x94   : > { %1404 = vmatpush.bf16.msra.mxu2 %v4062_v52  ;;  %1393 = vmatpush.bf16.msrb.mxu1 %v3982_v13  ;;  %v5372_v52 = vld [vmem:[%s7974_s1 + $0x304] sm:$0xf0]  ;;  %v4151_v13 = vld [vmem:[%s7974_s1 + $0x250] sm:$0xf]  ;;  %v5386_v11 = vld [vmem:[%s7975_s2 + $0x254] sm:$0xf0] }
  0x95   : > { %1357 = vmatmul.bf16.vlgmr.msra.gmra.mxu0 %v6262_v8  ;;  %v4240_v59 = vor.u32 %v5372_v52, %v4239_v50  ;;  %v4273_v50 = vld [vmem:[%s7974_s1 + $0x348] sm:$0xf0]  ;;  %v1472_v52 = vpack.c.b16 %v1469_v36, %v1469_v36 }
  0x96   : > { %1420 = vmatpush.bf16.msrb.mxu0 %v4102_v61  ;;  %1370 = vmatmul.bf16.vlgmr.msra.gmra.mxu3 %v6310_v33  ;;  %v4159_v61 = vld [vmem:[%s7974_s1 + $0x260] sm:$0xf] }
  0x97   : > { %1662 = vmatpush.bf16.msrb.mxu3 %v4200_v62  ;;  %v5352_v62 = vld [vmem:[%s7974_s1 + $0x264] sm:$0xf0] }
  0x98   : > { %1405 = vmatpush.bf16.msra.mxu2 %v4054_v4  ;;  %1394 = vmatpush.bf16.msrb.mxu1 %v3974_v27  ;;  %v5370_v4 = vld [vmem:[%s7974_s1 + $0x2f4] sm:$0xf0]  ;;  %v4160_v7 = vor.u32 %v5352_v62, %v4159_v61  ;;  %v4143_v27 = vld [vmem:[%s7974_s1 + $0x240] sm:$0xf]  ;;  %v4276_v61 = vor.u32 %v5379_v49, %v4273_v50  ;;  %v5397_v49 = vld [vmem:[%s7975_s2 + $0x2b4] sm:$0xf] }
  0x99   : > { %v4232_v12 = vor.u32 %v5370_v4, %v4231_v2  ;;  %v6753_v2 = vrot.slane %v1472_v52, 1  ;;  %v4446_v4 = vor.u32 %v5414_v57, %v4445_v55  ;;  %v4383_v50 = vld [vmem:[%s7975_s2 + $0x2b8] sm:$0xf0]  ;;  %v5390_v55 = vld [vmem:[%s7975_s2 + $0x274] sm:$0xf0] }
  0x9a   : > { %1421 = vmatpush.bf16.msrb.mxu0 %v4094_v15  ;;  %v5350_v15 = vld [vmem:[%s7974_s1 + $0x254] sm:$0xf0] }
  0x9b   : > { %1663 = vmatpush.bf16.msrb.mxu3 %v4192_v16  ;;  %v4188_v16 = vor.u32 %v5357_v0, %v4185_v5  ;;  %v4152_v25 = vor.u32 %v5350_v15, %v4151_v13  ;;  %v4153_v0 = vld [vmem:[%s7974_s1 + $0x258] sm:$0xf0]  ;;  %v4225_v13 = vld [vmem:[%s7974_s1 + $0x2e8] sm:$0xf0] }
  0x9c   : > { %1406 = vmatpush.bf16.msra.mxu2 %v4046_v19  ;;  %1395 = vmatpush.bf16.msrb.mxu1 %v3966_v43  ;;  %v5368_v19 = vld [vmem:[%s7974_s1 + $0x2e4] sm:$0xf0] }
  0x9d   : > { %v4224_v26 = vor.u32 %v5368_v19, %v4223_v18  ;;  %v4145_v18 = vld [vmem:[%s7974_s1 + $0x248] sm:$0xf0] }
  0x9e   : > { %1675 = vmatpush.bf16.msra.mxu0 %v4264_v21  ;;  %v5373_v21 = vld [vmem:[%s7974_s1 + $0x314] sm:$0xf] }
  0x9f   : > { %1664 = vmatpush.bf16.msrb.mxu3 %v4184_v28  ;;  %1396 = vmatmul.bf16.vlgmr.msrb.gmra.mxu1 %v6262_v8  ;;  %v5375_v8 = vld [vmem:[%s7974_s1 + $0x324] sm:$0xf]  ;;  %v5348_v28 = vld [vmem:[%s7974_s1 + $0x244] sm:$0xf0]  ;;  %v4252_v31 = vor.u32 %v5373_v21, %v4249_v22  ;;  %v4461_v22 = vld [vmem:[%s7975_s2 + $0x350] sm:$0xf] }
  0xa0   : > { %1407 = vmatpush.bf16.msra.mxu2 %v4038_v34  ;;  %1694 = vmatpush.bf16.msra.mxu1 %v4280_v44  ;;  %v4260_v17 = vor.u32 %v5375_v8, %v4257_v6  ;;  %v5381_v34 = vld [vmem:[%s7974_s1 + $0x354] sm:$0xf]  ;;  %v4144_v41 = vor.u32 %v5348_v28, %v4143_v27  ;;  %v4161_v44 = vld [vmem:[%s7974_s1 + $0x268] sm:$0xf0]  ;;  %v4373_v8 = vld [vmem:[%s7975_s2 + $0x2a0] sm:$0xf] }
  0xa1   : > { %v5396_v6 = vld [vmem:[%s7975_s2 + $0x2a4] sm:$0xf0]  ;;  %v5410_v27 = vld [vmem:[%s7975_s2 + $0x314] sm:$0xf0]  ;;  %v5365_v28 = vld [vmem:[%s7974_s1 + $0x2d4] sm:$0xf] }
  0xa2   : > { %1676 = vmatpush.bf16.msra.mxu0 %v4256_v35  ;;  %v4281_v35 = vld [vmem:[%s7974_s1 + $0x358] sm:$0xf0]  ;;  %v4374_v19 = vor.u32 %v5396_v6, %v4373_v8  ;;  %v4220_v40 = vor.u32 %v5365_v28, %v4217_v29  ;;  %v5407_v29 = vld [vmem:[%s7975_s2 + $0x304] sm:$0xf] }
  0xa3   : > { %1665 = vmatpush.bf16.msrb.mxu3 %v4176_v14  ;;  %v4284_v43 = vor.u32 %v5381_v34, %v4281_v35  ;;  %v5351_v14 = vld [vmem:[%s7974_s1 + $0x264] sm:$0xf]  ;;  %v4453_v34 = vld [vmem:[%s7975_s2 + $0x340] sm:$0xf] }
  0xa4   : > { %1408 = vmatpush.bf16.msra.mxu2 %v4030_v45  ;;  %1695 = vmatpush.bf16.msra.mxu1 %v4272_v60  ;;  %v4207_v45 = vld [vmem:[%s7974_s1 + $0x2c0] sm:$0xf]  ;;  %v4164_v62 = vor.u32 %v5351_v14, %v4161_v44  ;;  %v5408_v14 = vld [vmem:[%s7975_s2 + $0x304] sm:$0xf0]  ;;  %v4447_v44 = vld [vmem:[%s7975_s2 + $0x338] sm:$0xf0] }
  0xa5   : > { %4104 = vmatmul.msk.bf16.vlgmr.msrb.gmra.mxu0 %vm521_vm0, %v6289_v23  ;;  %v5353_v23 = vld [vmem:[%s7974_s1 + $0x274] sm:$0xf] }
  0xa6   : > { %1677 = vmatpush.bf16.msra.mxu0 %v4248_v46  ;;  %v5364_v46 = vld [vmem:[%s7974_s1 + $0x2c4] sm:$0xf0]  ;;  %v4172_v47 = vor.u32 %v5353_v23, %v4169_v37  ;;  %v4429_v23 = vld [vmem:[%s7975_s2 + $0x310] sm:$0xf] }
  0xa7   : > { %1409 = vmatmul.bf16.vlgmr.msra.gmra.mxu2 %v6310_v33  ;;  %1666 = vmatpush.bf16.msrb.mxu3 %v4168_v58  ;;  %v5355_v33 = vld [vmem:[%s7974_s1 + $0x284] sm:$0xf]  ;;  %v5369_v58 = vld [vmem:[%s7974_s1 + $0x2f4] sm:$0xf]  ;;  %v4208_v60 = vor.u32 %v5364_v46, %v4207_v45  ;;  %v4430_v37 = vor.u32 %v5410_v27, %v4429_v23  ;;  %v4209_v46 = vld [vmem:[%s7974_s1 + $0x2c8] sm:$0xf0] }
  0xa8   : > { %1701 = vmatpush.bf16.msrb.mxu2 %v4204_v51  ;;  %1714 = vmatpush.bf16.msrb.mxu1 %v4268_v1  ;;  %v4180_v30 = vor.u32 %v5355_v33, %v4177_v20  ;;  %v4381_v51 = vld [vmem:[%s7975_s2 + $0x2b0] sm:$0xf]  ;;  %v5363_v45 = vld [vmem:[%s7974_s1 + $0x2c4] sm:$0xf]  ;;  %v5402_v23 = vld [vmem:[%s7975_s2 + $0x2d4] sm:$0xf0] }
  0xa9   : > { %v4382_v1 = vor.u32 %v5398_v54, %v4381_v51  ;;  %v4454_v51 = vor.u32 %v5416_v38, %v4453_v34  ;;  %v4349_v54 = vld [vmem:[%s7975_s2 + $0x270] sm:$0xf]  ;;  %v5391_v34 = vld [vmem:[%s7975_s2 + $0x284] sm:$0xf]  ;;  %v5405_v38 = vld [vmem:[%s7975_s2 + $0x2f4] sm:$0xf] }
  0xaa   : > { %1678 = vmatpush.bf16.msra.mxu0 %v4240_v59  ;;  %v4233_v59 = vld [vmem:[%s7974_s1 + $0x2f8] sm:$0xf0]  ;;  %v534_v9 = vpop.f32.mrf.mxu0 }
  0xab   : > { %1667 = vmatpush.bf16.msrb.mxu3 %v4160_v7  ;;  %v4236_v5 = vor.u32 %v5369_v58, %v4233_v59  ;;  %v4437_v7 = vld [vmem:[%s7975_s2 + $0x320] sm:$0xf]  ;;  %v4212_v59 = vor.u32 %v5363_v45, %v4209_v46  ;;  %v4415_v45 = vld [vmem:[%s7975_s2 + $0x2f8] sm:$0xf0]  ;;  %v4563_v46 = vld [vmem:[%s7974_s1 + $0x3d0] sm:$0xf] }
  0xac   : > { %1702 = vmatpush.bf16.msrb.mxu2 %v4196_v63  ;;  %1715 = vmatpush.bf16.msrb.mxu1 %v4260_v17  ;;  %v5349_v63 = vld [vmem:[%s7974_s1 + $0x254] sm:$0xf]  ;;  %v5347_v17 = vld [vmem:[%s7974_s1 + $0x244] sm:$0xf]  ;;  %v4438_v20 = vor.u32 %v5412_v10, %v4437_v7  ;;  %v4341_v7 = vld [vmem:[%s7975_s2 + $0x260] sm:$0xf] }
  0xad   : > { %v547_v15 = vpop.f32.mrf.mxu1 }
  0xae   : > { %1679 = vmatpush.bf16.msra.mxu0 %v4232_v12  ;;  %v5367_v12 = vld [vmem:[%s7974_s1 + $0x2e4] sm:$0xf]  ;;  %v548_v33 = vadd.f32 %v547_v15, %v534_v9  ;;  %v5388_v9 = vld [vmem:[%s7975_s2 + $0x264] sm:$0xf0] }
  0xaf   : > { %1668 = vmatpush.bf16.msrb.mxu3 %v4152_v25  ;;  %4285 = vmatmul.msk.bf16.vlgmr.msra.gmra.mxu1 %vm521_vm0, %v6736_v56  ;;  %v4228_v21 = vor.u32 %v5367_v12, %v4225_v13  ;;  %v560_v25 = vpop.f32.mrf.mxu2  ;;  %v4405_v12 = vld [vmem:[%s7975_s2 + $0x2e0] sm:$0xf]  ;;  %v5404_v13 = vld [vmem:[%s7975_s2 + $0x2e4] sm:$0xf0] }
  0xb0   : > { %1703 = vmatpush.bf16.msrb.mxu2 %v4188_v16  ;;  %1716 = vmatpush.bf16.msrb.mxu1 %v4252_v31  ;;  %v4156_v16 = vor.u32 %v5349_v63, %v4153_v0  ;;  %v4148_v31 = vor.u32 %v5347_v17, %v4145_v18  ;;  %v5411_v63 = vld [vmem:[%s7975_s2 + $0x324] sm:$0xf]  ;;  %v4439_v0 = vld [vmem:[%s7975_s2 + $0x328] sm:$0xf0]  ;;  %v4342_v18 = vor.u32 %v5388_v9, %v4341_v7  ;;  %v5450_v7 = vld [vmem:[%s7974_s1 + $0x454] sm:$0xf0] }
  0xb1   : > { %v6812_v35 = vpop.f32.mrf.mxu3  ;;  %v4442_v10 = vor.u32 %v5411_v63, %v4439_v0 }
  0xb2   : > { %1680 = vmatpush.bf16.msra.mxu0 %v4224_v26  ;;  %v5418_v26 = vld [vmem:[%s7975_s2 + $0x354] sm:$0xf0] }
  0xb3   : > { %1669 = vmatpush.bf16.msrb.mxu3 %v4144_v41  ;;  %v4462_v36 = vor.u32 %v5418_v26, %v4461_v22  ;;  %v536_v41 = vpop.f32.mrf.mxu0  ;;  %v4333_v22 = vld [vmem:[%s7975_s2 + $0x250] sm:$0xf] }
  0xb4   : > { %1704 = vmatpush.bf16.msrb.mxu2 %v4180_v30  ;;  %1717 = vmatpush.bf16.msrb.mxu1 %v4244_v48  ;;  %v6807_v30 = vadd.f32 %v560_v25, %v548_v33  ;;  %v4358_v48 = vor.u32 %v5392_v3, %v4357_v39  ;;  %v4431_v33 = vld [vmem:[%s7975_s2 + $0x318] sm:$0xf0]  ;;  %v4397_v26 = vld [vmem:[%s7975_s2 + $0x2d0] sm:$0xf]  ;;  %v4325_v39 = vld [vmem:[%s7975_s2 + $0x240] sm:$0xf] }
  0xb5   : > { %v5384_v3 = vld [vmem:[%s7975_s2 + $0x244] sm:$0xf0] }
  0xb6   : > { %1681 = vmatpush.bf16.msra.mxu0 %v4216_v42  ;;  %1670 = vmatmul.bf16.vlgmr.msrb.gmra.mxu3 %v6728_v53  ;;  %v5413_v42 = vld [vmem:[%s7975_s2 + $0x334] sm:$0xf] }
  0xb7   : > { %1733 = vmatpush.bf16.msra.mxu3 %v4284_v43  ;;  %v4421_v43 = vld [vmem:[%s7975_s2 + $0x300] sm:$0xf]  ;;  %v562_v57 = vpop.f32.mrf.mxu2  ;;  %v4450_v58 = vor.u32 %v5413_v42, %v4447_v44  ;;  %v5400_v42 = vld [vmem:[%s7975_s2 + $0x2c4] sm:$0xf0] }
  0xb8   : > { %1705 = vmatpush.bf16.msrb.mxu2 %v4172_v47  ;;  %1718 = vmatpush.bf16.msrb.mxu1 %v4236_v5  ;;  %v549_v47 = vpop.f32.mrf.mxu1  ;;  %v4422_v52 = vor.u32 %v5408_v14, %v4421_v43  ;;  %v4375_v5 = vld [vmem:[%s7975_s2 + $0x2a8] sm:$0xf0]  ;;  %v5417_v43 = vld [vmem:[%s7975_s2 + $0x354] sm:$0xf]  ;;  %v4463_v14 = vld [vmem:[%s7975_s2 + $0x358] sm:$0xf0] }
  0xb9   : > { %v575_v8 = vpop.f32.mrf.mxu3  ;;  %v5434_v47 = vld [vmem:[%s7974_s1 + $0x3d4] sm:$0xf0] }
  0xba   : > { %1682 = vmatpush.bf16.msra.mxu0 %v4208_v60  ;;  %v4413_v60 = vld [vmem:[%s7975_s2 + $0x2f0] sm:$0xf]  ;;  %v4343_v8 = vld [vmem:[%s7975_s2 + $0x268] sm:$0xf0] }
  0xbb   : > { %1734 = vmatpush.bf16.msra.mxu3 %v4276_v61  ;;  %v5406_v61 = vld [vmem:[%s7975_s2 + $0x2f4] sm:$0xf0]  ;;  %v599_v17 = vpop.f32.mrf.mxu0 }
  0xbc   : > { %1706 = vmatpush.bf16.msrb.mxu2 %v4164_v62  ;;  %1719 = vmatpush.bf16.msrb.mxu1 %v4228_v21  ;;  %v4386_v62 = vor.u32 %v5397_v49, %v4383_v50  ;;  %v4414_v6 = vor.u32 %v5406_v61, %v4413_v60  ;;  %v4406_v21 = vor.u32 %v5404_v13, %v4405_v12  ;;  %v5389_v50 = vld [vmem:[%s7975_s2 + $0x274] sm:$0xf]  ;;  %v4407_v60 = vld [vmem:[%s7975_s2 + $0x2e8] sm:$0xf0]  ;;  %v5415_v61 = vld [vmem:[%s7975_s2 + $0x344] sm:$0xf] }
  0xbd   : > { %1683 = vmatmul.bf16.vlgmr.msra.gmra.mxu0 %v6753_v2  ;;  %v4326_v49 = vor.u32 %v5384_v3, %v4325_v39  ;;  %v5401_v13 = vld [vmem:[%s7975_s2 + $0x2d4] sm:$0xf]  ;;  %v5383_v39 = vld [vmem:[%s7975_s2 + $0x244] sm:$0xf]  ;;  %v4327_v3 = vld [vmem:[%s7975_s2 + $0x248] sm:$0xf0] }
  0xbe   : > { %1957 = vmatpush.bf16.msrb.mxu0 %v4382_v1  ;;  %v4350_v1 = vor.u32 %v5390_v55, %v4349_v54  ;;  %v4466_v54 = vor.u32 %v5417_v43, %v4463_v14  ;;  %v5403_v55 = vld [vmem:[%s7975_s2 + $0x2e4] sm:$0xf]  ;;  %v4643_v43 = vld [vmem:[%s7974_s1 + $0x470] sm:$0xf]  ;;  %v5454_v14 = vld [vmem:[%s7974_s1 + $0x474] sm:$0xf0] }
  0xbf   : > { %1970 = vmatpush.bf16.msrb.mxu3 %v4446_v4  ;;  %v5395_v4 = vld [vmem:[%s7975_s2 + $0x2a4] sm:$0xf]  ;;  %v586_v24 = vpop.f32.mrf.mxu2 }
  0xc0   : > { %1707 = vmatpush.bf16.msrb.mxu2 %v4156_v16  ;;  %1720 = vmatpush.bf16.msrb.mxu1 %v4220_v40  ;;  %v4378_v15 = vor.u32 %v5395_v4, %v4375_v5  ;;  %v5409_v16 = vld [vmem:[%s7975_s2 + $0x314] sm:$0xf]  ;;  %v587_v27 = vadd.f32 %v586_v24, %v6812_v35  ;;  %v4389_v40 = vld [vmem:[%s7975_s2 + $0x2c0] sm:$0xf]  ;;  %v5432_v4 = vld [vmem:[%s7974_s1 + $0x3c4] sm:$0xf0] }
  0xc1   : > { %v4434_v25 = vor.u32 %v5409_v16, %v4431_v33  ;;  %v5387_v5 = vld [vmem:[%s7975_s2 + $0x264] sm:$0xf] }
  0xc2   : > { %1958 = vmatpush.bf16.msrb.mxu0 %v4374_v19  ;;  %v5393_v19 = vld [vmem:[%s7975_s2 + $0x294] sm:$0xf]  ;;  %v6924_v35 = vadd.f32 %v599_v17, %v587_v27  ;;  %v4346_v16 = vor.u32 %v5387_v5, %v4343_v8  ;;  %v4547_v17 = vld [vmem:[%s7974_s1 + $0x3b0] sm:$0xf]  ;;  %v4629_v5 = vld [vmem:[%s7974_s1 + $0x458] sm:$0xf0] }
  0xc3   : > { %1971 = vmatpush.bf16.msrb.mxu3 %v4438_v20  ;;  %v4367_v20 = vld [vmem:[%s7975_s2 + $0x298] sm:$0xf0] }
  0xc4   : > { %1708 = vmatpush.bf16.msrb.mxu2 %v4148_v31  ;;  %1721 = vmatpush.bf16.msrb.mxu1 %v4212_v59  ;;  %v4370_v28 = vor.u32 %v5393_v19, %v4367_v20  ;;  %v4423_v31 = vld [vmem:[%s7975_s2 + $0x308] sm:$0xf0]  ;;  %v4564_v59 = vor.u32 %v5434_v47, %v4563_v46  ;;  %v5385_v19 = vld [vmem:[%s7975_s2 + $0x254] sm:$0xf]  ;;  %v4335_v20 = vld [vmem:[%s7975_s2 + $0x258] sm:$0xf0] }
  0xc5   : > { %v4426_v41 = vor.u32 %v5407_v29, %v4423_v31  ;;  %v4338_v31 = vor.u32 %v5385_v19, %v4335_v20  ;;  %v7061_v47 = vld [vmem:[%s5793_s10] sm:$0xee]  ;;  %v4595_v19 = vld [vmem:[%s7974_s1 + $0x410] sm:$0xf]  ;;  %v5442_v20 = vld [vmem:[%s7974_s1 + $0x414] sm:$0xf0] }
  0xc6   : > { %1959 = vmatpush.bf16.msrb.mxu0 %v4366_v32  ;;  %4286 = vmatmul.msk.bf16.vlgmr.msra.gmra.mxu3 %vm521_vm0, %v6736_v56  ;;  %v4334_v32 = vor.u32 %v5386_v11, %v4333_v22  ;;  %v5448_v22 = vld [vmem:[%s7974_s1 + $0x444] sm:$0xf0] }
  0xc7   : > { %1972 = vmatpush.bf16.msrb.mxu3 %v4430_v37  ;;  %1709 = vmatmul.bf16.vlgmr.msrb.gmra.mxu2 %v6728_v53  ;;  %v4398_v37 = vor.u32 %v5402_v23, %v4397_v26  ;;  %v588_v57 = vpop.f32.mrf.mxu2  ;;  %v5399_v26 = vld [vmem:[%s7975_s2 + $0x2c4] sm:$0xf]  ;;  %v4391_v23 = vld [vmem:[%s7975_s2 + $0x2c8] sm:$0xf0] }
  0xc8   : > { %1989 = vmatpush.bf16.msra.mxu2 %v4462_v36  ;;  %1996 = vmatpush.bf16.msra.mxu1 %v4386_v62  ;;  %v4359_v36 = vld [vmem:[%s7975_s2 + $0x288] sm:$0xf0]  ;;  %v5431_v57 = vld [vmem:[%s7974_s1 + $0x3c4] sm:$0xf] }
  0xc9   : > { %1722 = vmatmul.bf16.vlgmr.msrb.gmra.mxu1 %v6753_v2  ;;  %v4362_v44 = vor.u32 %v5391_v34, %v4359_v36  ;;  %v4455_v62 = vld [vmem:[%s7975_s2 + $0x348] sm:$0xf0]  ;;  %v4565_v36 = vld [vmem:[%s7974_s1 + $0x3d8] sm:$0xf0] }
  0xca   : > { %1960 = vmatpush.bf16.msrb.mxu0 %v4358_v48  ;;  %v601_v48 = vpop.f32.mrf.mxu0  ;;  %v4458_v9 = vor.u32 %v5415_v61, %v4455_v62  ;;  %v4635_v61 = vld [vmem:[%s7974_s1 + $0x460] sm:$0xf]  ;;  %v5452_v62 = vld [vmem:[%s7974_s1 + $0x464] sm:$0xf0] }
  0xcb   : > { %1973 = vmatpush.bf16.msrb.mxu3 %v4422_v52  ;;  %v4390_v52 = vor.u32 %v5400_v42, %v4389_v40  ;;  %v829_v63 = vpop.f32.mrf.mxu1  ;;  %v4611_v40 = vld [vmem:[%s7974_s1 + $0x430] sm:$0xf]  ;;  %v5446_v42 = vld [vmem:[%s7974_s1 + $0x434] sm:$0xf0] }
  0xcc   : > { %1990 = vmatpush.bf16.msra.mxu2 %v4454_v51  ;;  %1997 = vmatpush.bf16.msra.mxu1 %v4378_v15  ;;  %v4351_v51 = vld [vmem:[%s7975_s2 + $0x278] sm:$0xf0] }
  0xcd   : > { %v4354_v0 = vor.u32 %v5389_v50, %v4351_v51  ;;  %v4399_v15 = vld [vmem:[%s7975_s2 + $0x2d8] sm:$0xf0]  ;;  %v4531_v50 = vld [vmem:[%s7974_s1 + $0x390] sm:$0xf]  ;;  %v5426_v51 = vld [vmem:[%s7974_s1 + $0x394] sm:$0xf0] }
  0xce   : > { %1961 = vmatpush.bf16.msrb.mxu0 %v4350_v1  ;;  %v4555_v1 = vld [vmem:[%s7974_s1 + $0x3c0] sm:$0xf]  ;;  %v4402_v11 = vor.u32 %v5401_v13, %v4399_v15  ;;  %v4636_v15 = vor.u32 %v5452_v62, %v4635_v61  ;;  %v5423_v62 = vld [vmem:[%s7974_s1 + $0x384] sm:$0xf] }
  0xcf   : > { %1974 = vmatpush.bf16.msrb.mxu3 %v4414_v6  ;;  %v4627_v6 = vld [vmem:[%s7974_s1 + $0x450] sm:$0xf]  ;;  %v4556_v12 = vor.u32 %v5432_v4, %v4555_v1  ;;  %v855_v24 = vpop.f32.mrf.mxu2  ;;  %v4532_v1 = vor.u32 %v5426_v51, %v4531_v50  ;;  %v5449_v4 = vld [vmem:[%s7974_s1 + $0x454] sm:$0xf] }
  0xd0   : > { %2009 = vmatpush.bf16.msrb.mxu2 %v4450_v58  ;;  %1998 = vmatpush.bf16.msra.mxu1 %v4370_v28  ;;  %v4418_v58 = vor.u32 %v5405_v38, %v4415_v45  ;;  %v4628_v33 = vor.u32 %v5450_v7, %v4627_v6  ;;  %v5433_v28 = vld [vmem:[%s7974_s1 + $0x3d4] sm:$0xf]  ;;  %v5428_v38 = vld [vmem:[%s7974_s1 + $0x3a4] sm:$0xf0]  ;;  %v4394_v45 = vor.u32 %v5399_v26, %v4391_v23  ;;  %v4515_v26 = vld [vmem:[%s7974_s1 + $0x370] sm:$0xf]  ;;  %v2081_v23 = vunpack.c.h.b16 %v7061_v47 }
  0xd1   : > { %v4568_v48 = vor.u32 %v5433_v28, %v4565_v36  ;;  %v5427_v28 = vld [vmem:[%s7974_s1 + $0x3a4] sm:$0xf]  ;;  %v5453_v51 = vld [vmem:[%s7974_s1 + $0x474] sm:$0xf] }
  0xd2   : > { %1962 = vmatpush.bf16.msrb.mxu0 %v4342_v18  ;;  %v5430_v18 = vld [vmem:[%s7974_s1 + $0x3b4] sm:$0xf0] }
  0xd3   : > { %1975 = vmatpush.bf16.msrb.mxu3 %v4406_v21  ;;  %v4619_v21 = vld [vmem:[%s7974_s1 + $0x440] sm:$0xf]  ;;  %v842_v27 = vpop.f32.mrf.mxu3  ;;  %v831_v29 = vpop.f32.mrf.mxu1 }
  0xd4   : > { %2010 = vmatpush.bf16.msrb.mxu2 %v4442_v10  ;;  %1999 = vmatpush.bf16.msra.mxu1 %v4362_v44  ;;  %v4410_v10 = vor.u32 %v5403_v55, %v4407_v60  ;;  %v843_v34 = vadd.f32 %v842_v27, %v829_v63  ;;  %v4644_v55 = vor.u32 %v5454_v14, %v4643_v43  ;;  %v5444_v60 = vld [vmem:[%s7974_s1 + $0x424] sm:$0xf0]  ;;  %v2080_v63 = vunpack.c.l.b16 %v7061_v47  ;;  %v4507_v47 = vld [vmem:[%s7974_s1 + $0x360] sm:$0xf] }
  0xd5   : > { %v4596_v27 = vor.u32 %v5442_v20, %v4595_v19  ;;  %v4809_v19 = vld [vmem:[%s7975_s2 + $0x450] sm:$0xf]  ;;  %v5486_v20 = vld [vmem:[%s7975_s2 + $0x454] sm:$0xf0] }
  0xd6   : > { %1963 = vmatpush.bf16.msrb.mxu0 %v4334_v32  ;;  %v4620_v32 = vor.u32 %v5448_v22, %v4619_v21  ;;  %v7058_v44 = vadd.f32 %v855_v24, %v843_v34  ;;  %v2083_v21 = vpack.c.b16 %v2080_v63, %v2080_v63  ;;  %v5443_v63 = vld [vmem:[%s7974_s1 + $0x424] sm:$0xf] }
  0xd7   : > { %1976 = vmatpush.bf16.msrb.mxu3 %v4398_v37  ;;  %4467 = vmatmul.msk.bf16.vlgmr.msra.gmra.mxu2 %vm521_vm0, %v6736_v56  ;;  %v4539_v37 = vld [vmem:[%s7974_s1 + $0x3a0] sm:$0xf] }
  0xd8   : > { %2011 = vmatpush.bf16.msrb.mxu2 %v4434_v25  ;;  %2000 = vmatpush.bf16.msra.mxu1 %v4354_v0  ;;  %v4548_v25 = vor.u32 %v5430_v18, %v4547_v17  ;;  %v4540_v46 = vor.u32 %v5428_v38, %v4539_v37  ;;  %v857_v0 = vpop.f32.mrf.mxu2  ;;  %v4632_v18 = vor.u32 %v5449_v4, %v4629_v5  ;;  %v2087_v34 = vshrl.u32 %v2083_v21, 16 }
  0xd9   : > { %v2090_v36 = vshll.u32 %v2083_v21, 16  ;;  %v4605_v0 = vld [vmem:[%s7974_s1 + $0x428] sm:$0xf0]  ;;  %v5470_v21 = vld [vmem:[%s7975_s2 + $0x3d4] sm:$0xf0] }
  0xda   : > { %1964 = vmatpush.bf16.msrb.mxu0 %v4326_v49  ;;  %v4330_v49 = vor.u32 %v5383_v39, %v4327_v3  ;;  %v5445_v39 = vld [vmem:[%s7974_s1 + $0x434] sm:$0xf]  ;;  %v4613_v3 = vld [vmem:[%s7974_s1 + $0x438] sm:$0xf0] }
  0xdb   : > { %1977 = vmatpush.bf16.msrb.mxu3 %v4390_v52  ;;  %v2040_v52 = vld [vmem:[%s5793_s10 + $0x8] sm:$0xe]  ;;  %v844_v8 = vpop.f32.mrf.mxu3 }
  0xdc   : > { %2012 = vmatpush.bf16.msrb.mxu2 %v4426_v41  ;;  %2001 = vmatpush.bf16.msra.mxu1 %v4346_v16  ;;  %v7047_v41 = vpop.f32.mrf.mxu0  ;;  %v2082_v6 = vunpack.c.l.b16 %v2040_v52  ;;  %v5429_v16 = vld [vmem:[%s7974_s1 + $0x3b4] sm:$0xf]  ;;  %v4645_v52 = vld [vmem:[%s7974_s1 + $0x478] sm:$0xf0] }
  0xdd   : > { %1965 = vmatmul.bf16.vlgmr.msrb.gmra.mxu0 %v6728_v53  ;;  %v4648_v8 = vor.u32 %v5453_v51, %v4645_v52 }
  0xde   : > { %2028 = vmatpush.bf16.msra.mxu0 %v4466_v54  ;;  %1978 = vmatmul.bf16.vlgmr.msrb.gmra.mxu3 %v6753_v2  ;;  %v4612_v54 = vor.u32 %v5446_v42, %v4611_v40  ;;  %v2085_v24 = vpack.c.b16 %v2082_v6, %v2082_v6  ;;  %v4525_v6 = vld [vmem:[%s7974_s1 + $0x388] sm:$0xf0] }
  0xdf   : > { %2295 = vmatpush.bf16.msra.mxu3 %v4564_v59  ;;  %v4603_v59 = vld [vmem:[%s7974_s1 + $0x420] sm:$0xf] }
  0xe0   : > { %2013 = vmatpush.bf16.msrb.mxu2 %v4418_v58  ;;  %2002 = vmatpush.bf16.msra.mxu1 %v4338_v31  ;;  %v4557_v58 = vld [vmem:[%s7974_s1 + $0x3c8] sm:$0xf0]  ;;  %v4604_v13 = vor.u32 %v5444_v60, %v4603_v59  ;;  %v4587_v31 = vld [vmem:[%s7974_s1 + $0x400] sm:$0xf]  ;;  %v2103_v40 = vshrl.u32 %v2085_v24, 16  ;;  %v2106_v42 = vshll.u32 %v2085_v24, 16 }
  0xe1   : > { %v4560_v7 = vor.u32 %v5431_v57, %v4557_v58  ;;  %v5438_v57 = vld [vmem:[%s7974_s1 + $0x3f4] sm:$0xf0]  ;;  %v2089_v58 = vrot.slane %v2087_v34, 1  ;;  %v2092_v59 = vrot.slane %v2090_v36, 2  ;;  %v4737_v36 = vld [vmem:[%s7975_s2 + $0x3c0] sm:$0xf] }
  0xe2   : > { %2029 = vmatpush.bf16.msra.mxu0 %v4458_v9  ;;  %v7095_v9 = vpop.f32.mrf.mxu1  ;;  %v2108_v4 = vrot.slane %v2106_v42, 2  ;;  %v4589_v42 = vld [vmem:[%s7974_s1 + $0x408] sm:$0xf0] }
  0xe3   : > { %2296 = vmatpush.bf16.msra.mxu3 %v4556_v12  ;;  %v5424_v12 = vld [vmem:[%s7974_s1 + $0x384] sm:$0xf0] }
  0xe4   : > { %2014 = vmatpush.bf16.msrb.mxu2 %v4410_v10  ;;  %2003 = vmatpush.bf16.msra.mxu1 %v4330_v49  ;;  %v4523_v10 = vld [vmem:[%s7974_s1 + $0x380] sm:$0xf]  ;;  %v870_v17 = vpop.f32.mrf.mxu0  ;;  %v881_v37 = vpop.f32.mrf.mxu2  ;;  %v2084_v49 = vpack.c.b16 %v2081_v23, %v2081_v23 }
  0xe5   : > { %v4524_v22 = vor.u32 %v5424_v12, %v4523_v10  ;;  %v882_v14 = vadd.f32 %v881_v37, %v7047_v41  ;;  %v4533_v41 = vld [vmem:[%s7974_s1 + $0x398] sm:$0xf0]  ;;  %v4608_v17 = vor.u32 %v5443_v63, %v4605_v0  ;;  %v4801_v37 = vld [vmem:[%s7975_s2 + $0x440] sm:$0xf] }
  0xe6   : > { %2308 = vmatpush.bf16.msrb.mxu0 %v4628_v33  ;;  %v4549_v33 = vld [vmem:[%s7974_s1 + $0x3b8] sm:$0xf0]  ;;  %v2098_v10 = vshll.u32 %v2084_v49, 16 }
  0xe7   : > { %2297 = vmatpush.bf16.msra.mxu3 %v4548_v25  ;;  %2004 = vmatmul.bf16.vlgmr.msra.gmra.mxu1 %v6728_v53  ;;  %v4552_v25 = vor.u32 %v5429_v16, %v4549_v33  ;;  %v5422_v53 = vld [vmem:[%s7974_s1 + $0x374] sm:$0xf0]  ;;  %v7176_v60 = vadd.f32 %v7095_v9, %v882_v14  ;;  %v2095_v9 = vshrl.u32 %v2084_v49, 16  ;;  %v4637_v16 = vld [vmem:[%s7974_s1 + $0x468] sm:$0xf0]  ;;  %v7202_v33 = vor.u32 %v2092_v59, %v2089_v58 }
  0xe8   : > { %2015 = vmatpush.bf16.msrb.mxu2 %v4402_v11  ;;  %2327 = vmatpush.bf16.msrb.mxu1 %v4644_v55  ;;  %v5447_v11 = vld [vmem:[%s7974_s1 + $0x444] sm:$0xf]  ;;  %v4516_v38 = vor.u32 %v5422_v53, %v4515_v26  ;;  %v4579_v55 = vld [vmem:[%s7974_s1 + $0x3f0] sm:$0xf]  ;;  %v2100_v23 = vrot.slane %v2098_v10, 2 }
  0xe9   : > { %v4580_v12 = vor.u32 %v5438_v57, %v4579_v55  ;;  %v2097_v53 = vrot.slane %v2095_v9, 1  ;;  %v5482_v55 = vld [vmem:[%s7975_s2 + $0x434] sm:$0xf0]  ;;  %v5437_v59 = vld [vmem:[%s7974_s1 + $0x3f4] sm:$0xf] }
  0xea   : > { %2309 = vmatpush.bf16.msrb.mxu0 %v4620_v32  ;;  %v5440_v32 = vld [vmem:[%s7974_s1 + $0x404] sm:$0xf0]  ;;  %v5466_v58 = vld [vmem:[%s7975_s2 + $0x3b4] sm:$0xf0]  ;;  %v5485_v9 = vld [vmem:[%s7975_s2 + $0x454] sm:$0xf] }
  0xeb   : > { %2298 = vmatpush.bf16.msra.mxu3 %v4540_v46  ;;  %v5425_v46 = vld [vmem:[%s7974_s1 + $0x394] sm:$0xf]  ;;  %v4588_v50 = vor.u32 %v5440_v32, %v4587_v31  ;;  %v4810_v31 = vor.u32 %v5486_v20, %v4809_v19  ;;  %v4785_v10 = vld [vmem:[%s7975_s2 + $0x420] sm:$0xf]  ;;  %v5435_v19 = vld [vmem:[%s7974_s1 + $0x3e4] sm:$0xf] }
  0xec   : > { %2016 = vmatpush.bf16.msrb.mxu2 %v4394_v45  ;;  %2328 = vmatpush.bf16.msrb.mxu1 %v4636_v15  ;;  %v896_v45 = vpop.f32.mrf.mxu1  ;;  %v4536_v5 = vor.u32 %v5425_v46, %v4533_v41  ;;  %v5451_v15 = vld [vmem:[%s7974_s1 + $0x464] sm:$0xf]  ;;  %v883_v24 = vpop.f32.mrf.mxu2  ;;  %v5490_v41 = vld [vmem:[%s7975_s2 + $0x474] sm:$0xf0]  ;;  %v4573_v20 = vld [vmem:[%s7974_s1 + $0x3e8] sm:$0xf0] }
  0xed   : > { %4468 = vmatmul.msk.bf16.vlgmr.msra.gmra.mxu0 %vm521_vm0, %v6736_v56  ;;  %v4541_v56 = vld [vmem:[%s7974_s1 + $0x3a8] sm:$0xf0]  ;;  %v4640_v26 = vor.u32 %v5451_v15, %v4637_v16  ;;  %v7251_v45 = vor.u32 %v2100_v23, %v2097_v53  ;;  %v5419_v46 = vld [vmem:[%s7974_s1 + $0x364] sm:$0xf]  ;;  %v4721_v15 = vld [vmem:[%s7975_s2 + $0x3a0] sm:$0xf] }
  0xee   : > { %2310 = vmatpush.bf16.msrb.mxu0 %v4612_v54  ;;  %v4544_v43 = vor.u32 %v5427_v28, %v4541_v56  ;;  %v4616_v54 = vor.u32 %v5445_v39, %v4613_v3  ;;  %v5421_v56 = vld [vmem:[%s7974_s1 + $0x374] sm:$0xf]  ;;  %v5468_v3 = vld [vmem:[%s7975_s2 + $0x3c4] sm:$0xf0]  ;;  %v4747_v24 = vld [vmem:[%s7975_s2 + $0x3d8] sm:$0xf0] }
  0xef   : > { %2017 = vmatmul.bf16.vlgmr.msrb.gmra.mxu2 %v6753_v2  ;;  %2299 = vmatpush.bf16.msra.mxu3 %v4532_v1  ;;  %v4621_v2 = vld [vmem:[%s7974_s1 + $0x448] sm:$0xf0]  ;;  %v2105_v1 = vrot.slane %v2103_v40, 1  ;;  %v5439_v40 = vld [vmem:[%s7974_s1 + $0x404] sm:$0xf]  ;;  %v4738_v51 = vor.u32 %v5468_v3, %v4737_v36 }
  0xf0   : > { %2334 = vmatpush.bf16.msra.mxu2 %v4568_v48  ;;  %2347 = vmatpush.bf16.msra.mxu1 %v4632_v18  ;;  %v4624_v29 = vor.u32 %v5447_v11, %v4621_v2  ;;  %v5420_v48 = vld [vmem:[%s7974_s1 + $0x364] sm:$0xf0]  ;;  %v4745_v18 = vld [vmem:[%s7975_s2 + $0x3d0] sm:$0xf]  ;;  %v5441_v11 = vld [vmem:[%s7974_s1 + $0x414] sm:$0xf]  ;;  %v4592_v52 = vor.u32 %v5439_v40, %v4589_v42 }
  0xf1   : > { %v4508_v61 = vor.u32 %v5420_v48, %v4507_v47  ;;  %v4597_v2 = vld [vmem:[%s7974_s1 + $0x418] sm:$0xf0]  ;;  %v4746_v32 = vor.u32 %v5470_v21, %v4745_v18  ;;  %v1100_v14 = vpop.f32.mrf.mxu3  ;;  %v4509_v48 = vld [vmem:[%s7974_s1 + $0x368] sm:$0xf0]  ;;  %v5464_v16 = vld [vmem:[%s7975_s2 + $0x3a4] sm:$0xf0] }
  0xf2   : > { %2311 = vmatpush.bf16.msrb.mxu0 %v4604_v13  ;;  %v5436_v13 = vld [vmem:[%s7974_s1 + $0x3e4] sm:$0xf0]  ;;  %v4600_v34 = vor.u32 %v5441_v11, %v4597_v2  ;;  %v1113_v39 = vpop.f32.mrf.mxu0  ;;  %v1101_v47 = vadd.f32 %v1100_v14, %v6807_v30  ;;  %v4729_v30 = vld [vmem:[%s7975_s2 + $0x3b0] sm:$0xf]  ;;  %v5469_v2 = vld [vmem:[%s7975_s2 + $0x3d4] sm:$0xf] }
  0xf3   : > { %2300 = vmatpush.bf16.msra.mxu3 %v4524_v22  ;;  %v7216_v22 = vor.u32 %v2108_v4, %v2105_v1  ;;  %v5483_v53 = vld [vmem:[%s7975_s2 + $0x444] sm:$0xf]  ;;  %v4777_v23 = vld [vmem:[%s7975_s2 + $0x410] sm:$0xf]  ;;  %v5481_v40 = vld [vmem:[%s7975_s2 + $0x434] sm:$0xf] }
  0xf4   : > { %2335 = vmatpush.bf16.msra.mxu2 %v4560_v7  ;;  %2348 = vmatpush.bf16.msra.mxu1 %v4624_v29  ;;  %v4571_v7 = vld [vmem:[%s7974_s1 + $0x3e0] sm:$0xf]  ;;  %v4517_v29 = vld [vmem:[%s7974_s1 + $0x378] sm:$0xf0]  ;;  %v1114_v57 = vadd.f32 %v1113_v39, %v1101_v47  ;;  %v5460_v47 = vld [vmem:[%s7975_s2 + $0x384] sm:$0xf0] }
  0xf5   : > { %v4572_v28 = vor.u32 %v5436_v13, %v4571_v7  ;;  %v4811_v13 = vld [vmem:[%s7975_s2 + $0x458] sm:$0xf0]  ;;  %v4769_v42 = vld [vmem:[%s7975_s2 + $0x400] sm:$0xf] }
  0xf6   : > { %2312 = vmatpush.bf16.msrb.mxu0 %v4596_v27  ;;  %v1126_v27 = vpop.f32.mrf.mxu1  ;;  %v4795_v14 = vld [vmem:[%s7975_s2 + $0x438] sm:$0xf0] }
  0xf7   : > { %2301 = vmatpush.bf16.msra.mxu3 %v4516_v38  ;;  %v5484_v38 = vld [vmem:[%s7975_s2 + $0x444] sm:$0xf0]  ;;  %4649 = vmatmul.msk.bf16.vlgmr.msrb.gmra.mxu1 %vm521_vm0, %v7216_v22  ;;  %v7285_v63 = vadd.f32 %v1126_v27, %v1114_v57  ;;  %v5478_v27 = vld [vmem:[%s7975_s2 + $0x414] sm:$0xf0]  ;;  %v5479_v57 = vld [vmem:[%s7975_s2 + $0x424] sm:$0xf] }
  0xf8   : > { %2336 = vmatpush.bf16.msra.mxu2 %v4552_v25  ;;  %2349 = vmatpush.bf16.msra.mxu1 %v4616_v54  ;;  %v4528_v25 = vor.u32 %v5423_v62, %v4525_v6  ;;  %v4802_v49 = vor.u32 %v5484_v38, %v4801_v37  ;;  %v4793_v54 = vld [vmem:[%s7975_s2 + $0x430] sm:$0xf]  ;;  %v4512_v62 = vor.u32 %v5419_v46, %v4509_v48  ;;  %v5467_v37 = vld [vmem:[%s7975_s2 + $0x3c4] sm:$0xf]  ;;  %v4739_v38 = vld [vmem:[%s7975_s2 + $0x3c8] sm:$0xf0] }
  0xf9   : > { %v4794_v4 = vor.u32 %v5482_v55, %v4793_v54  ;;  %v4730_v6 = vor.u32 %v5466_v58, %v4729_v30  ;;  %v1102_v18 = vpop.f32.mrf.mxu3  ;;  %v4778_v36 = vor.u32 %v5478_v27, %v4777_v23  ;;  %v4705_v46 = vld [vmem:[%s7975_s2 + $0x380] sm:$0xf]  ;;  %v4798_v54 = vor.u32 %v5481_v40, %v4795_v14  ;;  %v5474_v58 = vld [vmem:[%s7975_s2 + $0x3f4] sm:$0xf0] }
  0xfa   : > { %2313 = vmatpush.bf16.msrb.mxu0 %v4588_v50  ;;  %v4825_v50 = vld [vmem:[%s7975_s2 + $0x470] sm:$0xf]  ;;  %v4706_v55 = vor.u32 %v5460_v47, %v4705_v46  ;;  %v5456_v18 = vld [vmem:[%s7975_s2 + $0x364] sm:$0xf0]  ;;  %v5522_v14 = vld [vmem:[%s7974_s1 + $0x574] sm:$0xf0] }
  0xfb   : > { %2302 = vmatpush.bf16.msra.mxu3 %v4508_v61  ;;  %v4581_v61 = vld [vmem:[%s7974_s1 + $0x3f8] sm:$0xf0]  ;;  %v4826_v0 = vor.u32 %v5490_v41, %v4825_v50 }
  0xfc   : > { %2337 = vmatpush.bf16.msra.mxu2 %v4544_v43  ;;  %2350 = vmatpush.bf16.msra.mxu1 %v4608_v17  ;;  %v4520_v43 = vor.u32 %v5421_v56, %v4517_v29  ;;  %v4584_v7 = vor.u32 %v5437_v59, %v4581_v61  ;;  %v1115_v17 = vpop.f32.mrf.mxu0  ;;  %v4803_v56 = vld [vmem:[%s7975_s2 + $0x448] sm:$0xf0]  ;;  %v4713_v29 = vld [vmem:[%s7975_s2 + $0x390] sm:$0xf] }
  0xfd   : > { %v4806_v39 = vor.u32 %v5483_v53, %v4803_v56  ;;  %v4787_v61 = vld [vmem:[%s7975_s2 + $0x428] sm:$0xf0]  ;;  %v4689_v17 = vld [vmem:[%s7975_s2 + $0x360] sm:$0xf]  ;;  %v4715_v53 = vld [vmem:[%s7975_s2 + $0x398] sm:$0xf0] }
  0xfe   : > { %2314 = vmatpush.bf16.msrb.mxu0 %v4580_v12  ;;  %2303 = vmatmul.bf16.vlgmr.msra.gmra.mxu3 %v7202_v33  ;;  %v1128_v1 = vpop.f32.mrf.mxu1  ;;  %v5480_v12 = vld [vmem:[%s7975_s2 + $0x424] sm:$0xf0]  ;;  %v5475_v56 = vld [vmem:[%s7975_s2 + $0x404] sm:$0xf] }
  0xff   : > { %2366 = vmatpush.bf16.msrb.mxu3 %v4648_v8  ;;  %v5488_v8 = vld [vmem:[%s7975_s2 + $0x464] sm:$0xf0]  ;;  %v4786_v11 = vor.u32 %v5480_v12, %v4785_v10  ;;  %v4790_v10 = vor.u32 %v5479_v57, %v4787_v61  ;;  %v4699_v57 = vld [vmem:[%s7975_s2 + $0x378] sm:$0xf0]  ;;  %v5471_v61 = vld [vmem:[%s7975_s2 + $0x3e4] sm:$0xf] }
 0x100   : > { %2338 = vmatpush.bf16.msra.mxu2 %v4536_v5  ;;  %2351 = vmatpush.bf16.msra.mxu1 %v4600_v34  ;;  %v4817_v5 = vld [vmem:[%s7975_s2 + $0x460] sm:$0xf] }
 0x101   : > { %v4818_v21 = vor.u32 %v5488_v8, %v4817_v5  ;;  %v1165_v30 = vpop.f32.mrf.mxu3  ;;  %v5463_v8 = vld [vmem:[%s7975_s2 + $0x3a4] sm:$0xf] }
 0x102   : > { %2315 = vmatpush.bf16.msrb.mxu0 %v4572_v28  ;;  %v4576_v28 = vor.u32 %v5435_v19, %v4573_v20  ;;  %v1139_v48 = vpop.f32.mrf.mxu2  ;;  %v5489_v19 = vld [vmem:[%s7975_s2 + $0x474] sm:$0xf] }
 0x103   : > { %2367 = vmatpush.bf16.msrb.mxu3 %v4640_v26  ;;  %v4722_v26 = vor.u32 %v5464_v16, %v4721_v15  ;;  %v1140_v50 = vadd.f32 %v1139_v48, %v6924_v35  ;;  %v4761_v35 = vld [vmem:[%s7975_s2 + $0x3f0] sm:$0xf]  ;;  %v4753_v15 = vld [vmem:[%s7975_s2 + $0x3e0] sm:$0xf]  ;;  %v5472_v16 = vld [vmem:[%s7975_s2 + $0x3e4] sm:$0xf0] }
 0x104   : > { %2339 = vmatpush.bf16.msra.mxu2 %v4528_v25  ;;  %2352 = vmatpush.bf16.msra.mxu1 %v4592_v52  ;;  %v4814_v25 = vor.u32 %v5485_v9, %v4811_v13  ;;  %v4731_v52 = vld [vmem:[%s7975_s2 + $0x3b8] sm:$0xf0]  ;;  %v4762_v5 = vor.u32 %v5474_v58, %v4761_v35  ;;  %v4983_v35 = vld [vmem:[%s7974_s1 + $0x560] sm:$0xf]  ;;  %v5520_v58 = vld [vmem:[%s7974_s1 + $0x564] sm:$0xf0] }
 0x105   : > { %2316 = vmatmul.bf16.vlgmr.msrb.gmra.mxu0 %v7251_v45  ;;  %v4779_v13 = vld [vmem:[%s7975_s2 + $0x418] sm:$0xf0] }
 0x106   : > { %2590 = vmatpush.bf16.msra.mxu0 %v4746_v32  ;;  %v4750_v32 = vor.u32 %v5469_v2, %v4747_v24  ;;  %v1152_v34 = vpop.f32.mrf.mxu1  ;;  %v4927_v2 = vld [vmem:[%s7974_s1 + $0x4f0] sm:$0xf]  ;;  %v5506_v24 = vld [vmem:[%s7974_s1 + $0x4f4] sm:$0xf0] }
 0x107   : > { %2603 = vmatpush.bf16.msra.mxu3 %v4810_v31  ;;  %v5462_v31 = vld [vmem:[%s7975_s2 + $0x394] sm:$0xf0]  ;;  %v1153_v59 = vadd.f32 %v1152_v34, %v1140_v50  ;;  %v5487_v34 = vld [vmem:[%s7975_s2 + $0x464] sm:$0xf]  ;;  %v5473_v50 = vld [vmem:[%s7975_s2 + $0x3f4] sm:$0xf] }
 0x108   : > { %2340 = vmatpush.bf16.msra.mxu2 %v4520_v43  ;;  %2353 = vmatpush.bf16.msra.mxu1 %v4584_v7  ;;  %v4714_v3 = vor.u32 %v5462_v31, %v4713_v29  ;;  %v5476_v43 = vld [vmem:[%s7975_s2 + $0x404] sm:$0xf0]  ;;  %v5477_v7 = vld [vmem:[%s7975_s2 + $0x414] sm:$0xf]  ;;  %v4928_v31 = vor.u32 %v5506_v24, %v4927_v2 }
 0x109   : > { %v4770_v41 = vor.u32 %v5476_v43, %v4769_v42  ;;  %v4782_v23 = vor.u32 %v5477_v7, %v4779_v13  ;;  %v1167_v27 = vpop.f32.mrf.mxu3  ;;  %v4707_v42 = vld [vmem:[%s7975_s2 + $0x388] sm:$0xf0]  ;;  %v4991_v43 = vld [vmem:[%s7974_s1 + $0x570] sm:$0xf]  ;;  %v4984_v7 = vor.u32 %v5520_v58, %v4983_v35 }
 0x10a   : > { %2591 = vmatpush.bf16.msra.mxu0 %v4738_v51  ;;  %v5465_v51 = vld [vmem:[%s7975_s2 + $0x3b4] sm:$0xf]  ;;  %v1141_v20 = vpop.f32.mrf.mxu2  ;;  %v4921_v27 = vld [vmem:[%s7974_s1 + $0x4e8] sm:$0xf0] }
 0x10b   : > { %2604 = vmatpush.bf16.msra.mxu3 %v4802_v49  ;;  %v4742_v49 = vor.u32 %v5467_v37, %v4739_v38  ;;  %v4734_v1 = vor.u32 %v5465_v51, %v4731_v52  ;;  %v4919_v38 = vld [vmem:[%s7974_s1 + $0x4e0] sm:$0xf]  ;;  %v5007_v20 = vld [vmem:[%s7974_s1 + $0x590] sm:$0xf]  ;;  %v4905_v58 = vld [vmem:[%s7974_s1 + $0x4c8] sm:$0xf0] }
 0x10c   : > { %2341 = vmatpush.bf16.msra.mxu2 %v4512_v62  ;;  %2354 = vmatpush.bf16.msra.mxu1 %v4576_v28  ;;  %v4697_v62 = vld [vmem:[%s7975_s2 + $0x370] sm:$0xf]  ;;  %v4690_v28 = vor.u32 %v5456_v18, %v4689_v17  ;;  %v5518_v18 = vld [vmem:[%s7974_s1 + $0x554] sm:$0xf0] }
 0x10d   : > { %v4975_v17 = vld [vmem:[%s7974_s1 + $0x550] sm:$0xf] }
 0x10e   : > { %2592 = vmatpush.bf16.msra.mxu0 %v4730_v6  ;;  %4650 = vmatmul.msk.bf16.vlgmr.msrb.gmra.mxu3 %vm521_vm0, %v7216_v22  ;;  %v4723_v6 = vld [vmem:[%s7975_s2 + $0x3a8] sm:$0xf0]  ;;  %v1154_v9 = vpop.f32.mrf.mxu1 }
 0x10f   : > { %2605 = vmatpush.bf16.msra.mxu3 %v4794_v4  ;;  %2342 = vmatmul.bf16.vlgmr.msra.gmra.mxu2 %v7202_v33  ;;  %v7394_v4 = vadd.f32 %v1165_v30, %v1153_v59  ;;  %v4992_v30 = vor.u32 %v5522_v14, %v4991_v43  ;;  %v4903_v9 = vld [vmem:[%s7974_s1 + $0x4c0] sm:$0xf]  ;;  %v4993_v43 = vld [vmem:[%s7974_s1 + $0x578] sm:$0xf0] }
 0x110   : > { %2622 = vmatpush.bf16.msrb.mxu2 %v4826_v0  ;;  %2629 = vmatpush.bf16.msrb.mxu1 %v4750_v32  ;;  %v5458_v0 = vld [vmem:[%s7975_s2 + $0x374] sm:$0xf0]  ;;  %v4771_v32 = vld [vmem:[%s7975_s2 + $0x408] sm:$0xf0] }
 0x111   : > { %2355 = vmatmul.bf16.vlgmr.msra.gmra.mxu1 %v7251_v45  ;;  %v4698_v12 = vor.u32 %v5458_v0, %v4697_v62  ;;  %v4774_v47 = vor.u32 %v5475_v56, %v4771_v32  ;;  %v4755_v0 = vld [vmem:[%s7975_s2 + $0x3e8] sm:$0xf0]  ;;  %v5498_v56 = vld [vmem:[%s7974_s1 + $0x4b4] sm:$0xf0]  ;;  %v5516_v32 = vld [vmem:[%s7974_s1 + $0x544] sm:$0xf0] }
 0x112   : > { %2593 = vmatpush.bf16.msra.mxu0 %v4722_v26  ;;  %v5461_v26 = vld [vmem:[%s7975_s2 + $0x394] sm:$0xf]  ;;  %v1358_v40 = vpop.f32.mrf.mxu0  ;;  %v1384_v51 = vpop.f32.mrf.mxu2 }
 0x113   : > { %2606 = vmatpush.bf16.msra.mxu3 %v4786_v11  ;;  %v4827_v11 = vld [vmem:[%s7975_s2 + $0x478] sm:$0xf0]  ;;  %v4718_v37 = vor.u32 %v5461_v26, %v4715_v53  ;;  %v1359_v46 = vadd.f32 %v1358_v40, %v7058_v44  ;;  %v4911_v44 = vld [vmem:[%s7974_s1 + $0x4d0] sm:$0xf]  ;;  %v5501_v40 = vld [vmem:[%s7974_s1 + $0x4d4] sm:$0xf] }
 0x114   : > { %2623 = vmatpush.bf16.msrb.mxu2 %v4818_v21  ;;  %2630 = vmatpush.bf16.msrb.mxu1 %v4742_v49  ;;  %v4726_v21 = vor.u32 %v5463_v8, %v4723_v6  ;;  %v4830_v29 = vor.u32 %v5489_v19, %v4827_v11  ;;  %v4758_v19 = vor.u32 %v5471_v61, %v4755_v0  ;;  %v5494_v61 = vld [vmem:[%s7974_s1 + $0x494] sm:$0xf0]  ;;  %v5512_v0 = vld [vmem:[%s7974_s1 + $0x524] sm:$0xf0] }
 0x116   : > { %2594 = vmatpush.bf16.msra.mxu0 %v4714_v3  ;;  %v5459_v3 = vld [vmem:[%s7975_s2 + $0x384] sm:$0xf] }
 0x117   : > { %2607 = vmatpush.bf16.msra.mxu3 %v4778_v36  ;;  %v4819_v36 = vld [vmem:[%s7975_s2 + $0x468] sm:$0xf0]  ;;  %v4710_v52 = vor.u32 %v5459_v3, %v4707_v42  ;;  %v5521_v42 = vld [vmem:[%s7974_s1 + $0x574] sm:$0xf] }
 0x118   : > { %2642 = vmatpush.bf16.msra.mxu2 %v4814_v25  ;;  %2631 = vmatpush.bf16.msrb.mxu1 %v4734_v1  ;;  %v4754_v25 = vor.u32 %v5472_v16, %v4753_v15  ;;  %v4822_v48 = vor.u32 %v5487_v34, %v4819_v36  ;;  %v5505_v1 = vld [vmem:[%s7974_s1 + $0x4f4] sm:$0xf]  ;;  %v4691_v16 = vld [vmem:[%s7975_s2 + $0x368] sm:$0xf0]  ;;  %v4999_v36 = vld [vmem:[%s7974_s1 + $0x580] sm:$0xf] }
 0x119   : > { %v1371_v8 = vpop.f32.mrf.mxu3 }
 0x11a   : > { %2595 = vmatpush.bf16.msra.mxu0 %v4706_v55  ;;  %v5457_v55 = vld [vmem:[%s7975_s2 + $0x374] sm:$0xf]  ;;  %v1372_v13 = vadd.f32 %v1371_v8, %v1359_v46  ;;  %v1360_v15 = vpop.f32.mrf.mxu0  ;;  %v1386_v26 = vpop.f32.mrf.mxu2  ;;  %v4887_v46 = vld [vmem:[%s7974_s1 + $0x4a0] sm:$0xf] }
 0x11b   : > { %2608 = vmatpush.bf16.msra.mxu3 %v4770_v41  ;;  %v4763_v41 = vld [vmem:[%s7975_s2 + $0x3f8] sm:$0xf0]  ;;  %v4702_v6 = vor.u32 %v5457_v55, %v4699_v57  ;;  %v5519_v55 = vld [vmem:[%s7974_s1 + $0x564] sm:$0xf]  ;;  %v4985_v57 = vld [vmem:[%s7974_s1 + $0x568] sm:$0xf0] }
 0x11c   : > { %2643 = vmatpush.bf16.msra.mxu2 %v4806_v39  ;;  %2632 = vmatpush.bf16.msrb.mxu1 %v4726_v21  ;;  %v5504_v39 = vld [vmem:[%s7974_s1 + $0x4e4] sm:$0xf0]  ;;  %v4766_v59 = vor.u32 %v5473_v50, %v4763_v41  ;;  %v5526_v21 = vld [vmem:[%s7974_s1 + $0x594] sm:$0xf0]  ;;  %v7533_v11 = vadd.f32 %v1384_v51, %v1372_v13  ;;  %v1397_v34 = vpop.f32.mrf.mxu1  ;;  %v4959_v50 = vld [vmem:[%s7974_s1 + $0x530] sm:$0xf] }
 0x11d   : > { %v4920_v49 = vor.u32 %v5504_v39, %v4919_v38  ;;  %v1398_v38 = vadd.f32 %v1397_v34, %v7176_v60  ;;  %v4913_v60 = vld [vmem:[%s7974_s1 + $0x4d8] sm:$0xf0]  ;;  %v5514_v41 = vld [vmem:[%s7974_s1 + $0x534] sm:$0xf0]  ;;  %v7586_v51 = vld [vmem:[%s5793_s10] sm:$0xcc] }
 0x11e   : > { %2596 = vmatpush.bf16.msra.mxu0 %v4698_v12  ;;  %v5455_v12 = vld [vmem:[%s7975_s2 + $0x364] sm:$0xf]  ;;  %v4960_v35 = vor.u32 %v5514_v41, %v4959_v50  ;;  %v5517_v13 = vld [vmem:[%s7974_s1 + $0x554] sm:$0xf]  ;;  %v4977_v15 = vld [vmem:[%s7974_s1 + $0x558] sm:$0xf0] }
 0x11f   : > { %2609 = vmatpush.bf16.msra.mxu3 %v4762_v5  ;;  %4831 = vmatmul.msk.bf16.vlgmr.msrb.gmra.mxu2 %vm521_vm0, %v7216_v22  ;;  %v4929_v5 = vld [vmem:[%s7974_s1 + $0x4f8] sm:$0xf0]  ;;  %v4694_v53 = vor.u32 %v5455_v12, %v4691_v16  ;;  %v4969_v34 = vld [vmem:[%s7974_s1 + $0x548] sm:$0xf0] }
 0x120   : > { %2644 = vmatpush.bf16.msra.mxu2 %v4798_v54  ;;  %2633 = vmatpush.bf16.msrb.mxu1 %v4718_v37  ;;  %v5502_v54 = vld [vmem:[%s7974_s1 + $0x4d4] sm:$0xf0]  ;;  %v4932_v2 = vor.u32 %v5505_v1, %v4929_v5  ;;  %v5524_v37 = vld [vmem:[%s7974_s1 + $0x584] sm:$0xf0]  ;;  %v4988_v5 = vor.u32 %v5519_v55, %v4985_v57  ;;  %v4897_v12 = vld [vmem:[%s7974_s1 + $0x4b8] sm:$0xf0] }
 0x121   : > { %v4912_v62 = vor.u32 %v5502_v54, %v4911_v44  ;;  %v4961_v55 = vld [vmem:[%s7974_s1 + $0x538] sm:$0xf0] }
 0x122   : > { %2597 = vmatpush.bf16.msra.mxu0 %v4690_v28  ;;  %v4895_v28 = vld [vmem:[%s7974_s1 + $0x4b0] sm:$0xf]  ;;  %v1423_v44 = vpop.f32.mrf.mxu0 }
 0x123   : > { %2610 = vmatpush.bf16.msra.mxu3 %v4754_v25  ;;  %v5503_v25 = vld [vmem:[%s7974_s1 + $0x4e4] sm:$0xf]  ;;  %v4896_v3 = vor.u32 %v5498_v56, %v4895_v28 }
 0x124   : > { %2645 = vmatpush.bf16.msra.mxu2 %v4790_v10  ;;  %2634 = vmatpush.bf16.msrb.mxu1 %v4710_v52  ;;  %v5500_v10 = vld [vmem:[%s7974_s1 + $0x4c4] sm:$0xf0]  ;;  %v4924_v39 = vor.u32 %v5503_v25, %v4921_v27  ;;  %v4996_v52 = vor.u32 %v5521_v42, %v4993_v43  ;;  %v1399_v8 = vpop.f32.mrf.mxu1  ;;  %v5009_v25 = vld [vmem:[%s7974_s1 + $0x598] sm:$0xf0]  ;;  %v5001_v42 = vld [vmem:[%s7974_s1 + $0x588] sm:$0xf0] }
 0x125   : > { %2598 = vmatmul.bf16.vlgmr.msra.gmra.mxu0 %v7202_v33  ;;  %v4904_v24 = vor.u32 %v5500_v10, %v4903_v9  ;;  %v5109_v43 = vld [vmem:[%s7975_s2 + $0x4f0] sm:$0xf]  ;;  %v5491_v8 = vld [vmem:[%s7974_s1 + $0x484] sm:$0xf] }
 0x126   : > { %2661 = vmatpush.bf16.msrb.mxu0 %v4830_v29  ;;  %2611 = vmatmul.bf16.vlgmr.msra.gmra.mxu3 %v7251_v45  ;;  %v5008_v29 = vor.u32 %v5526_v21, %v5007_v20 }
 0x127   : > { %2907 = vmatpush.bf16.msrb.mxu3 %v4928_v31  ;;  %v4967_v31 = vld [vmem:[%s7974_s1 + $0x540] sm:$0xf] }
 0x128   : > { %2646 = vmatpush.bf16.msra.mxu2 %v4782_v23  ;;  %2635 = vmatpush.bf16.msrb.mxu1 %v4702_v6  ;;  %v4976_v23 = vor.u32 %v5518_v18, %v4975_v17  ;;  %v4968_v14 = vor.u32 %v5516_v32, %v4967_v31  ;;  %v5497_v6 = vld [vmem:[%s7974_s1 + $0x4b4] sm:$0xf]  ;;  %v4871_v17 = vld [vmem:[%s7974_s1 + $0x480] sm:$0xf]  ;;  %v5492_v18 = vld [vmem:[%s7974_s1 + $0x484] sm:$0xf0]  ;;  %v2714_v31 = vunpack.c.h.b16 %v7586_v51 }
 0x129   : > { %v4900_v27 = vor.u32 %v5497_v6, %v4897_v12  ;;  %v4872_v56 = vor.u32 %v5492_v18, %v4871_v17  ;;  %v5515_v32 = vld [vmem:[%s7974_s1 + $0x544] sm:$0xf]  ;;  %v5093_v17 = vld [vmem:[%s7975_s2 + $0x4d0] sm:$0xf] }
 0x12a   : > { %2662 = vmatpush.bf16.msrb.mxu0 %v4822_v48  ;;  %v1373_v48 = vpop.f32.mrf.mxu3  ;;  %v1410_v1 = vpop.f32.mrf.mxu2  ;;  %v2717_v41 = vpack.c.b16 %v2714_v31, %v2714_v31  ;;  %v5181_v31 = vld [vmem:[%s7975_s2 + $0x580] sm:$0xf] }
 0x12b   : > { %2908 = vmatpush.bf16.msrb.mxu3 %v4920_v49  ;;  %v5000_v49 = vor.u32 %v5524_v37, %v4999_v36  ;;  %v1411_v9 = vadd.f32 %v1410_v1, %v1398_v38  ;;  %v1425_v28 = vpop.f32.mrf.mxu0  ;;  %v5558_v48 = vld [vmem:[%s7975_s2 + $0x574] sm:$0xf0] }
 0x12c   : > { %2647 = vmatpush.bf16.msra.mxu2 %v4774_v47  ;;  %2636 = vmatpush.bf16.msrb.mxu1 %v4694_v53  ;;  %v5496_v47 = vld [vmem:[%s7974_s1 + $0x4a4] sm:$0xf0]  ;;  %v4980_v53 = vor.u32 %v5517_v13, %v4977_v15  ;;  %v5189_v15 = vld [vmem:[%s7975_s2 + $0x590] sm:$0xf]  ;;  %v4945_v28 = vld [vmem:[%s7974_s1 + $0x518] sm:$0xf0] }
 0x12d   : > { %v4888_v54 = vor.u32 %v5496_v47, %v4887_v46  ;;  %v7638_v21 = vadd.f32 %v1423_v44, %v1411_v9  ;;  %v5542_v46 = vld [vmem:[%s7975_s2 + $0x4f4] sm:$0xf0]  ;;  %v5173_v47 = vld [vmem:[%s7975_s2 + $0x570] sm:$0xf]  ;;  %v5511_v9 = vld [vmem:[%s7974_s1 + $0x524] sm:$0xf] }
 0x12e   : > { %2920 = vmatpush.bf16.msra.mxu0 %v4992_v30  ;;  %v4916_v30 = vor.u32 %v5501_v40, %v4913_v60  ;;  %v5523_v40 = vld [vmem:[%s7974_s1 + $0x584] sm:$0xf]  ;;  %v4972_v60 = vor.u32 %v5515_v32, %v4969_v34  ;;  %v5110_v57 = vor.u32 %v5542_v46, %v5109_v43  ;;  %v5560_v32 = vld [vmem:[%s7975_s2 + $0x584] sm:$0xf0]  ;;  %v5557_v34 = vld [vmem:[%s7975_s2 + $0x574] sm:$0xf] }
 0x12f   : > { %2909 = vmatpush.bf16.msrb.mxu3 %v4912_v62  ;;  %2637 = vmatmul.bf16.vlgmr.msrb.gmra.mxu1 %v7202_v33  ;;  %v2713_v62 = vunpack.c.l.b16 %v7586_v51  ;;  %v4951_v33 = vld [vmem:[%s7974_s1 + $0x520] sm:$0xf]  ;;  %v1697_v51 = vpop.f32.mrf.mxu1  ;;  %v5004_v44 = vor.u32 %v5523_v40, %v5001_v42  ;;  %v5552_v42 = vld [vmem:[%s7975_s2 + $0x544] sm:$0xf0]  ;;  %v5182_v43 = vor.u32 %v5560_v32, %v5181_v31 }
 0x130   : > { %2648 = vmatpush.bf16.msra.mxu2 %v4766_v59  ;;  %2939 = vmatpush.bf16.msra.mxu1 %v5008_v29  ;;  %v4879_v59 = vld [vmem:[%s7974_s1 + $0x490] sm:$0xf]  ;;  %v4952_v16 = vor.u32 %v5512_v0, %v4951_v33  ;;  %v4889_v29 = vld [vmem:[%s7974_s1 + $0x4a8] sm:$0xf0]  ;;  %v5556_v33 = vld [vmem:[%s7975_s2 + $0x564] sm:$0xf0] }
 0x131   : > { %v4880_v10 = vor.u32 %v5494_v61, %v4879_v59  ;;  %v2716_v20 = vpack.c.b16 %v2713_v62, %v2713_v62  ;;  %v5101_v59 = vld [vmem:[%s7975_s2 + $0x4e0] sm:$0xf]  ;;  %v5540_v61 = vld [vmem:[%s7975_s2 + $0x4e4] sm:$0xf0]  ;;  %v7715_v0 = vrot.slane %v2717_v41, 2 }
 0x132   : > { %2921 = vmatpush.bf16.msra.mxu0 %v4984_v7  ;;  %v2673_v7 = vld [vmem:[%s5793_s10 + $0x8] sm:$0xc]  ;;  %v5165_v62 = vld [vmem:[%s7975_s2 + $0x560] sm:$0xf]  ;;  %v5102_v12 = vor.u32 %v5540_v61, %v5101_v59  ;;  %v5111_v41 = vld [vmem:[%s7975_s2 + $0x4f8] sm:$0xf0] }
 0x133   : > { %2910 = vmatpush.bf16.msrb.mxu3 %v4904_v24  ;;  %v5525_v24 = vld [vmem:[%s7974_s1 + $0x594] sm:$0xf]  ;;  %v2715_v26 = vunpack.c.l.b16 %v2673_v7  ;;  %v7662_v38 = vrot.slane %v2716_v20, 2  ;;  %v4873_v7 = vld [vmem:[%s7974_s1 + $0x488] sm:$0xf0]  ;;  %v5166_v13 = vor.u32 %v5556_v33, %v5165_v62 }
 0x134   : > { %2649 = vmatpush.bf16.msra.mxu2 %v4758_v19  ;;  %2940 = vmatpush.bf16.msra.mxu1 %v5000_v49  ;;  %v4943_v19 = vld [vmem:[%s7974_s1 + $0x510] sm:$0xf]  ;;  %v5012_v37 = vor.u32 %v5525_v24, %v5009_v25  ;;  %v1412_v49 = vpop.f32.mrf.mxu2  ;;  %v4876_v24 = vor.u32 %v5491_v8, %v4873_v7  ;;  %v5539_v62 = vld [vmem:[%s7975_s2 + $0x4e4] sm:$0xf]  ;;  %v5103_v33 = vld [vmem:[%s7975_s2 + $0x4e8] sm:$0xf0] }
 0x135   : > { %4832 = vmatmul.msk.bf16.vlgmr.msrb.gmra.mxu0 %vm521_vm0, %v7216_v22  ;;  %v5157_v20 = vld [vmem:[%s7975_s2 + $0x550] sm:$0xf]  ;;  %v5159_v8 = vld [vmem:[%s7975_s2 + $0x558] sm:$0xf0]  ;;  %v5532_v7 = vld [vmem:[%s7975_s2 + $0x4a4] sm:$0xf0] }
 0x136   : > { %2922 = vmatpush.bf16.msra.mxu0 %v4976_v23  ;;  %v5495_v23 = vld [vmem:[%s7974_s1 + $0x4a4] sm:$0xf] }
 0x137   : > { %2650 = vmatmul.bf16.vlgmr.msra.gmra.mxu2 %v7251_v45  ;;  %2911 = vmatpush.bf16.msrb.mxu3 %v4896_v3  ;;  %v5499_v45 = vld [vmem:[%s7974_s1 + $0x4c4] sm:$0xf]  ;;  %v5508_v3 = vld [vmem:[%s7974_s1 + $0x504] sm:$0xf0]  ;;  %v4892_v50 = vor.u32 %v5495_v23, %v4889_v29 }
 0x138   : > { %2946 = vmatpush.bf16.msrb.mxu2 %v4932_v2  ;;  %2959 = vmatpush.bf16.msrb.mxu1 %v4996_v52  ;;  %v4908_v22 = vor.u32 %v5499_v45, %v4905_v58  ;;  %v5510_v2 = vld [vmem:[%s7974_s1 + $0x514] sm:$0xf0]  ;;  %v5493_v52 = vld [vmem:[%s7974_s1 + $0x494] sm:$0xf] }
 0x139   : > { %v4944_v36 = vor.u32 %v5510_v2, %v4943_v19  ;;  %v5513_v45 = vld [vmem:[%s7974_s1 + $0x534] sm:$0xf]  ;;  %v5538_v19 = vld [vmem:[%s7975_s2 + $0x4d4] sm:$0xf0] }
 0x13a   : > { %2923 = vmatpush.bf16.msra.mxu0 %v4968_v14  ;;  %v2718_v14 = vpack.c.b16 %v2715_v26, %v2715_v26  ;;  %v1684_v6 = vpop.f32.mrf.mxu0  ;;  %v5554_v2 = vld [vmem:[%s7975_s2 + $0x554] sm:$0xf0]  ;;  %v1699_v26 = vpop.f32.mrf.mxu1 }
 0x13b   : > { %2912 = vmatpush.bf16.msrb.mxu3 %v4888_v54  ;;  %v4881_v54 = vld [vmem:[%s7974_s1 + $0x498] sm:$0xf0]  ;;  %v5158_v29 = vor.u32 %v5554_v2, %v5157_v20  ;;  %v5551_v20 = vld [vmem:[%s7975_s2 + $0x544] sm:$0xf]  ;;  %v5530_v26 = vld [vmem:[%s7975_s2 + $0x494] sm:$0xf0] }
 0x13c   : > { %2947 = vmatpush.bf16.msrb.mxu2 %v4924_v39  ;;  %2960 = vmatpush.bf16.msrb.mxu1 %v4988_v5  ;;  %v4935_v39 = vld [vmem:[%s7974_s1 + $0x500] sm:$0xf]  ;;  %v7700_v58 = vrot.slane %v2718_v14, 2  ;;  %v4884_v1 = vor.u32 %v5493_v52, %v4881_v54  ;;  %v4964_v5 = vor.u32 %v5513_v45, %v4961_v55  ;;  %v5507_v14 = vld [vmem:[%s7974_s1 + $0x504] sm:$0xf] }
 0x13d   : > { %v5534_v54 = vld [vmem:[%s7975_s2 + $0x4b4] sm:$0xf0]  ;;  %v5141_v55 = vld [vmem:[%s7975_s2 + $0x530] sm:$0xf] }
 0x13e   : > { %2924 = vmatpush.bf16.msra.mxu0 %v4960_v35  ;;  %v5174_v35 = vor.u32 %v5558_v48, %v5173_v47 }
 0x13f   : > { %2913 = vmatpush.bf16.msrb.mxu3 %v4880_v10  ;;  %v1671_v10 = vpop.f32.mrf.mxu3  ;;  %5013 = vmatmul.msk.bf16.vlgmr.msra.gmra.mxu1 %vm521_vm0, %v7700_v58 }
 0x140   : > { %2948 = vmatpush.bf16.msrb.mxu2 %v4916_v30  ;;  %2961 = vmatpush.bf16.msrb.mxu1 %v4980_v53  ;;  %v4936_v30 = vor.u32 %v5508_v3, %v4935_v39  ;;  %v1685_v18 = vadd.f32 %v1684_v6, %v1671_v10  ;;  %v5085_v39 = vld [vmem:[%s7975_s2 + $0x4c0] sm:$0xf]  ;;  %v5536_v3 = vld [vmem:[%s7975_s2 + $0x4c4] sm:$0xf0] }
 0x141   : > { %v5086_v49 = vor.u32 %v5536_v3, %v5085_v39  ;;  %v5069_v6 = vld [vmem:[%s7975_s2 + $0x4a0] sm:$0xf]  ;;  %v5143_v39 = vld [vmem:[%s7975_s2 + $0x538] sm:$0xf0] }
 0x142   : > { %2925 = vmatpush.bf16.msra.mxu0 %v4952_v16  ;;  %v5562_v16 = vld [vmem:[%s7975_s2 + $0x594] sm:$0xf0]  ;;  %v1698_v53 = vadd.f32 %v1697_v51, %v1685_v18  ;;  %v1686_v46 = vpop.f32.mrf.mxu0  ;;  %v5555_v51 = vld [vmem:[%s7975_s2 + $0x564] sm:$0xf]  ;;  %v5133_v10 = vld [vmem:[%s7975_s2 + $0x520] sm:$0xf] }
 0x143   : > { %2914 = vmatpush.bf16.msrb.mxu3 %v4872_v56  ;;  %v5190_v23 = vor.u32 %v5562_v16, %v5189_v15  ;;  %v5094_v56 = vor.u32 %v5538_v19, %v5093_v17  ;;  %v5106_v15 = vor.u32 %v5539_v62, %v5103_v33  ;;  %v5070_v17 = vor.u32 %v5532_v7, %v5069_v6  ;;  %v5537_v18 = vld [vmem:[%s7975_s2 + $0x4d4] sm:$0xf]  ;;  %v5095_v19 = vld [vmem:[%s7975_s2 + $0x4d8] sm:$0xf0]  ;;  %v5531_v62 = vld [vmem:[%s7975_s2 + $0x4a4] sm:$0xf] }
 0x144   : > { %2949 = vmatpush.bf16.msrb.mxu2 %v4908_v22  ;;  %2962 = vmatpush.bf16.msrb.mxu1 %v4972_v60  ;;  %v4953_v22 = vld [vmem:[%s7974_s1 + $0x528] sm:$0xf0]  ;;  %v5561_v46 = vld [vmem:[%s7975_s2 + $0x594] sm:$0xf] }
 0x145   : > { %v4956_v25 = vor.u32 %v5511_v9, %v4953_v22  ;;  %v4937_v60 = vld [vmem:[%s7974_s1 + $0x508] sm:$0xf0] }
 0x146   : > { %2926 = vmatpush.bf16.msra.mxu0 %v4944_v36  ;;  %2915 = vmatmul.bf16.vlgmr.msrb.gmra.mxu3 %v7662_v38  ;;  %v7766_v36 = vadd.f32 %v1698_v53, %v7285_v63  ;;  %v5149_v63 = vld [vmem:[%s7975_s2 + $0x540] sm:$0xf]  ;;  %v4940_v45 = vor.u32 %v5507_v14, %v4937_v60  ;;  %v1723_v22 = vpop.f32.mrf.mxu1  ;;  %v5071_v33 = vld [vmem:[%s7975_s2 + $0x4a8] sm:$0xf0] }
 0x147   : > { %2978 = vmatpush.bf16.msra.mxu3 %v5012_v37  ;;  %v5175_v37 = vld [vmem:[%s7975_s2 + $0x578] sm:$0xf0]  ;;  %v1673_v47 = vpop.f32.mrf.mxu3  ;;  %v5150_v52 = vor.u32 %v5552_v42, %v5149_v63  ;;  %v5053_v63 = vld [vmem:[%s7975_s2 + $0x480] sm:$0xf]  ;;  %v5528_v42 = vld [vmem:[%s7975_s2 + $0x484] sm:$0xf0]  ;;  %v5074_v7 = vor.u32 %v5531_v62, %v5071_v33 }
 0x148   : > { %2950 = vmatpush.bf16.msrb.mxu2 %v4900_v27  ;;  %2963 = vmatpush.bf16.msrb.mxu1 %v4964_v5  ;;  %v5509_v27 = vld [vmem:[%s7974_s1 + $0x514] sm:$0xf]  ;;  %v5178_v48 = vor.u32 %v5557_v34, %v5175_v37  ;;  %v5087_v34 = vld [vmem:[%s7975_s2 + $0x4c8] sm:$0xf0]  ;;  %v5191_v47 = vld [vmem:[%s7975_s2 + $0x598] sm:$0xf0] }
 0x149   : > { %v4948_v40 = vor.u32 %v5509_v27, %v4945_v28  ;;  %v5546_v27 = vld [vmem:[%s7975_s2 + $0x514] sm:$0xf0]  ;;  %v5549_v37 = vld [vmem:[%s7975_s2 + $0x534] sm:$0xf] }
 0x14a   : > { %2927 = vmatpush.bf16.msra.mxu0 %v4936_v30  ;;  %v5167_v30 = vld [vmem:[%s7975_s2 + $0x568] sm:$0xf0]  ;;  %v1710_v9 = vpop.f32.mrf.mxu2 }
 0x14b   : > { %2979 = vmatpush.bf16.msra.mxu3 %v5004_v44  ;;  %v5077_v44 = vld [vmem:[%s7975_s2 + $0x4b0] sm:$0xf]  ;;  %v5170_v59 = vor.u32 %v5555_v51, %v5167_v30  ;;  %v5079_v51 = vld [vmem:[%s7975_s2 + $0x4b8] sm:$0xf0]  ;;  %v5547_v30 = vld [vmem:[%s7975_s2 + $0x524] sm:$0xf] }
 0x14c   : > { %2951 = vmatpush.bf16.msrb.mxu2 %v4892_v50  ;;  %2964 = vmatpush.bf16.msrb.mxu1 %v4956_v25  ;;  %v5541_v50 = vld [vmem:[%s7975_s2 + $0x4f4] sm:$0xf]  ;;  %v5078_v61 = vor.u32 %v5534_v54, %v5077_v44  ;;  %v5061_v25 = vld [vmem:[%s7975_s2 + $0x490] sm:$0xf]  ;;  %v5135_v44 = vld [vmem:[%s7975_s2 + $0x528] sm:$0xf0]  ;;  %v5194_v54 = vor.u32 %v5561_v46, %v5191_v47 }
 0x14d   : > { %2928 = vmatmul.bf16.vlgmr.msra.gmra.mxu0 %v7715_v0  ;;  %v5062_v32 = vor.u32 %v5530_v26, %v5061_v25 }
 0x14e   : > { %3202 = vmatpush.bf16.msrb.mxu0 %v5110_v57  ;;  %v5550_v57 = vld [vmem:[%s7975_s2 + $0x534] sm:$0xf0]  ;;  %v1725_v60 = vpop.f32.mrf.mxu1 }
 0x14f   : > { %3215 = vmatpush.bf16.msrb.mxu3 %v5174_v35  ;;  %v5114_v35 = vor.u32 %v5541_v50, %v5111_v41  ;;  %v5142_v5 = vor.u32 %v5550_v57, %v5141_v55  ;;  %v1736_v53 = vpop.f32.mrf.mxu3  ;;  %v5054_v50 = vor.u32 %v5528_v42, %v5053_v63  ;;  %v5533_v41 = vld [vmem:[%s7975_s2 + $0x4b4] sm:$0xf]  ;;  %v5559_v55 = vld [vmem:[%s7975_s2 + $0x584] sm:$0xf]  ;;  %v5183_v57 = vld [vmem:[%s7975_s2 + $0x588] sm:$0xf0] }
 0x150   : > { %2952 = vmatpush.bf16.msrb.mxu2 %v4884_v1  ;;  %2965 = vmatpush.bf16.msrb.mxu1 %v4948_v40  ;;  %v5553_v1 = vld [vmem:[%s7975_s2 + $0x554] sm:$0xf] }
 0x151   : > { %v5162_v16 = vor.u32 %v5553_v1, %v5159_v8  ;;  %v5545_v1 = vld [vmem:[%s7975_s2 + $0x514] sm:$0xf]  ;;  %v5186_v8 = vor.u32 %v5559_v55, %v5183_v57 }
 0x152   : > { %3203 = vmatpush.bf16.msrb.mxu0 %v5102_v12  ;;  %v5548_v12 = vld [vmem:[%s7975_s2 + $0x524] sm:$0xf0]  ;;  %v1712_v14 = vpop.f32.mrf.mxu2 }
 0x153   : > { %3216 = vmatpush.bf16.msrb.mxu3 %v5166_v13  ;;  %v1724_v13 = vadd.f32 %v1723_v22, %v1710_v9  ;;  %v5134_v2 = vor.u32 %v5548_v12, %v5133_v10  ;;  %v5529_v22 = vld [vmem:[%s7975_s2 + $0x494] sm:$0xf]  ;;  %v5063_v10 = vld [vmem:[%s7975_s2 + $0x498] sm:$0xf0]  ;;  %v5543_v12 = vld [vmem:[%s7975_s2 + $0x504] sm:$0xf] }
 0x154   : > { %2953 = vmatpush.bf16.msrb.mxu2 %v4876_v24  ;;  %2966 = vmatpush.bf16.msrb.mxu1 %v4940_v45  ;;  %v5151_v24 = vld [vmem:[%s7975_s2 + $0x548] sm:$0xf0] }
 0x155   : > { %v1737_v28 = vadd.f32 %v1736_v53, %v1724_v13  ;;  %v5154_v31 = vor.u32 %v5551_v20, %v5151_v24  ;;  %v5119_v13 = vld [vmem:[%s7975_s2 + $0x508] sm:$0xf0]  ;;  %v5527_v20 = vld [vmem:[%s7975_s2 + $0x484] sm:$0xf] }
 0x156   : > { %3204 = vmatpush.bf16.msrb.mxu0 %v5094_v56  ;;  %5014 = vmatmul.msk.bf16.vlgmr.msra.gmra.mxu3 %vm521_vm0, %v7700_v58  ;;  %v5098_v56 = vor.u32 %v5537_v18, %v5095_v19  ;;  %v5122_v18 = vor.u32 %v5543_v12, %v5119_v13 }
 0x157   : > { %3217 = vmatpush.bf16.msrb.mxu3 %v5158_v29  ;;  %2954 = vmatmul.bf16.vlgmr.msrb.gmra.mxu2 %v7662_v38  ;;  %v5535_v29 = vld [vmem:[%s7975_s2 + $0x4c4] sm:$0xf]  ;;  %v7878_v3 = vadd.f32 %v1737_v28, %v7394_v4  ;;  %v5544_v4 = vld [vmem:[%s7975_s2 + $0x504] sm:$0xf0]  ;;  %v1738_v45 = vpop.f32.mrf.mxu3 }
 0x158   : > { %3234 = vmatpush.bf16.msra.mxu2 %v5190_v23  ;;  %3241 = vmatpush.bf16.msra.mxu1 %v5114_v35  ;;  %v5125_v23 = vld [vmem:[%s7975_s2 + $0x510] sm:$0xf]  ;;  %v5082_v35 = vor.u32 %v5533_v41, %v5079_v51 }
 0x159   : > { %2967 = vmatmul.bf16.vlgmr.msrb.gmra.mxu1 %v7715_v0  ;;  %v5126_v40 = vor.u32 %v5546_v27, %v5125_v23 }
 0x15a   : > { %3205 = vmatpush.bf16.msrb.mxu0 %v5086_v49  ;;  %v5146_v49 = vor.u32 %v5549_v37, %v5143_v39  ;;  %v1992_v6 = vpop.f32.mrf.mxu2 }
 0x15b   : > { %3218 = vmatpush.bf16.msrb.mxu3 %v5150_v52 }
 0x15c   : > { %3235 = vmatpush.bf16.msra.mxu2 %v5182_v43  ;;  %3242 = vmatpush.bf16.msra.mxu1 %v5106_v15  ;;  %v5117_v43 = vld [vmem:[%s7975_s2 + $0x500] sm:$0xf] }
 0x15d   : > { %v5118_v52 = vor.u32 %v5544_v4, %v5117_v43 }
 0x15e   : > { %3206 = vmatpush.bf16.msrb.mxu0 %v5078_v61  ;;  %v1966_v61 = vpop.f32.mrf.mxu0 }
 0x15f   : > { %3219 = vmatpush.bf16.msrb.mxu3 %v5142_v5  ;;  %v5127_v5 = vld [vmem:[%s7975_s2 + $0x518] sm:$0xf0] }
 0x160   : > { %3254 = vmatpush.bf16.msrb.mxu2 %v5178_v48  ;;  %3243 = vmatpush.bf16.msra.mxu1 %v5098_v56  ;;  %v5090_v48 = vor.u32 %v5535_v29, %v5087_v34  ;;  %v5130_v9 = vor.u32 %v5545_v1, %v5127_v5 }
 0x161   : > { %v1979_v15 = vpop.f32.mrf.mxu3 }
 0x162   : > { %3207 = vmatpush.bf16.msrb.mxu0 %v5070_v17  ;;  %v1980_v17 = vadd.f32 %v1979_v15, %v1966_v61  ;;  %v1994_v25 = vpop.f32.mrf.mxu2 }
 0x163   : > { %3220 = vmatpush.bf16.msrb.mxu3 %v5134_v2  ;;  %v5055_v2 = vld [vmem:[%s7975_s2 + $0x488] sm:$0xf0] }
 0x164   : > { %3255 = vmatpush.bf16.msrb.mxu2 %v5170_v59  ;;  %3244 = vmatpush.bf16.msra.mxu1 %v5090_v48  ;;  %v5138_v59 = vor.u32 %v5547_v30, %v5135_v44  ;;  %v1993_v24 = vadd.f32 %v1992_v6, %v1980_v17  ;;  %v5058_v26 = vor.u32 %v5527_v20, %v5055_v2  ;;  %v2005_v23 = vpop.f32.mrf.mxu1 }
 0x166   : > { %3208 = vmatpush.bf16.msrb.mxu0 %v5062_v32  ;;  %v1968_v19 = vpop.f32.mrf.mxu0  ;;  %v2037_v53 = vadd.f32 %v1993_v24, %v7533_v11  ;;  %v3298_v24 = vlaneseq }
 0x167   : > { %5195 = vmatmul.msk.bf16.vlgmr.msra.gmra.mxu2 %vm521_vm0, %v7700_v58  ;;  %3221 = vmatpush.bf16.msrb.mxu3 %v5126_v40 }
 0x168   : > { %3256 = vmatpush.bf16.msrb.mxu2 %v5162_v16  ;;  %3245 = vmatpush.bf16.msra.mxu1 %v5082_v35  ;;  %v5066_v16 = vor.u32 %v5529_v22, %v5063_v10 }
 0x169   : > { %v1981_v27 = vpop.f32.mrf.mxu3 }
 0x16a   : > { %3209 = vmatpush.bf16.msrb.mxu0 %v5054_v50 }
 0x16b   : > { %3222 = vmatpush.bf16.msrb.mxu3 %v5118_v52 }
 0x16c   : > { %3257 = vmatpush.bf16.msrb.mxu2 %v5154_v31  ;;  %3246 = vmatpush.bf16.msra.mxu1 %v5074_v7  ;;  %v2007_v32 = vpop.f32.mrf.mxu1 }
 0x16d   : > { %3210 = vmatmul.bf16.vlgmr.msrb.gmra.mxu0 %v7662_v38 }
 0x16e   : > { %3273 = vmatpush.bf16.msra.mxu0 %v5194_v54  ;;  %3223 = vmatmul.bf16.vlgmr.msrb.gmra.mxu3 %v7715_v0  ;;  %v2031_v28 = vpop.f32.mrf.mxu0 }
 0x170   : > { %3258 = vmatpush.bf16.msrb.mxu2 %v5146_v49  ;;  %3247 = vmatpush.bf16.msra.mxu1 %v5066_v16 }
 0x172   : > { %3274 = vmatpush.bf16.msra.mxu0 %v5186_v8  ;;  %v2018_v56 = vpop.f32.mrf.mxu2 }
 0x173   : > { %v2019_v29 = vadd.f32 %v2018_v56, %v2005_v23 }
 0x174   : > { %3259 = vmatpush.bf16.msrb.mxu2 %v5138_v59  ;;  %3248 = vmatpush.bf16.msra.mxu1 %v5058_v26  ;;  %v2330_v39 = vpop.f32.mrf.mxu1  ;;  %v3299_v26 = vshrl.u32 %v3298_v24, 7 }
 0x175   : > { %v2032_v31 = vadd.f32 %v2031_v28, %v2019_v29  ;;  %v3286_v29 = vld [vmem:[%s7976_s3] sm:$0x3] }
 0x176   : > { %v2033_v34 = vpop.f32.mrf.mxu0  ;;  %v3302_v32 = vmul.u32 2, %v3299_v26 }
 0x177   : > { %3249 = vmatmul.bf16.vlgmr.msra.gmra.mxu1 %v7662_v38  ;;  %v2038_v37 = vadd.f32 %v2032_v31, %v7638_v21 }
 0x178   : > { %3260 = vmatpush.bf16.msrb.mxu2 %v5130_v9 }
 0x17a   : > { %v2020_v11 = vpop.f32.mrf.mxu2 }
 0x17b   : > { %v3288_v11 = vperm.slane %v3286_v29, 0 }
 0x17c   : > { %3261 = vmatpush.bf16.msrb.mxu2 %v5122_v18  ;;  %v2332_v43 = vpop.f32.mrf.mxu1 }
 0x17d   : > { %5196 = vmatmul.msk.bf16.vlgmr.msra.gmra.mxu0 %vm521_vm0, %v7700_v58 }
 0x17f   : > { %3262 = vmatmul.bf16.vlgmr.msrb.gmra.mxu2 %v7715_v0 }
 0x181   : > { %v2304_v40 = vpop.f32.mrf.mxu3 }
 0x182   : > { %v2317_v0 = vpop.f32.mrf.mxu0 }
 0x183   : > { %v2318_v63 = vadd.f32 %v2317_v0, %v2304_v40  ;;  %v3306_v40 = vadd.s32 1, %v3302_v32 }
 0x185   : > { %v2331_v42 = vadd.f32 %v2330_v39, %v2318_v63  ;;  %v3301_v39 = vand.u32 127, %v3298_v24 }
 0x187   : > { %v2668_v14 = vadd.f32 %v2331_v42, %v7766_v36  ;;  %vm3303_vm1 = vcmp.eq.s32.totalorder %v3301_v39, %v3302_v32  ;;  %vm3307_vm2 = vcmp.eq.s32.totalorder %v3301_v39, %v3306_v40 }
 0x189   : > { %v2306_v38 = vpop.f32.mrf.mxu3 }
 0x18a   : > { %v2319_v4 = vpop.f32.mrf.mxu0 }
 0x18e   : > { %v2356_v58 = vpop.f32.mrf.mxu1 }
 0x191   : > { %v2369_v47 = vpop.f32.mrf.mxu3 }
 0x192   : > { %v2343_v60 = vpop.f32.mrf.mxu2 }
 0x193   : > { %v2357_v46 = vadd.f32 %v2356_v58, %v2343_v60 }
 0x195   : > { %v2370_v48 = vadd.f32 %v2369_v47, %v2357_v46 }
 0x196   : > { %v2358_v50 = vpop.f32.mrf.mxu1 }
 0x197   : > { %v7958_v49 = vadd.f32 %v2370_v48, %v7878_v3  ;;  %v5581_v48 = vmov 0.0  }
 0x199   : > { %v2371_v41 = vpop.f32.mrf.mxu3 }
 0x19a   : > { %v2345_v21 = vpop.f32.mrf.mxu2 }
 0x19b   : > { %v3304_v21 = vsel %vm3303_vm1, 1.0, %v5581_v48 }
 0x1a2   : > { %v2625_v51 = vpop.f32.mrf.mxu2  ;;  %v2599_v52 = vpop.f32.mrf.mxu0 }
 0x1a9   : > { %v2612_v30 = vpop.f32.mrf.mxu3 }
 0x1aa   : > { %v2613_v44 = vadd.f32 %v2612_v30, %v2599_v52  ;;  %v2627_v45 = vpop.f32.mrf.mxu2  ;;  %v2601_v36 = vpop.f32.mrf.mxu0  ;;  %v3305_v52 = vpack.c.bf16 %v3304_v21, %v3304_v21 }
 0x1ab   : > { %v3289_v36 = vperm.slane %v3286_v29, 1 }
 0x1ac   : > { %v2626_v54 = vadd.f32 %v2625_v51, %v2613_v44  ;;  %v2638_v35 = vpop.f32.mrf.mxu1 }
 0x1ae   : > { %v2670_v55 = vadd.f32 %v2626_v54, %v2037_v53 }
 0x1b1   : > { %v2614_v57 = vpop.f32.mrf.mxu3 }
 0x1b2   : > { %v2664_v59 = vpop.f32.mrf.mxu0 }
 0x1b4   : > { %v2640_v3 = vpop.f32.mrf.mxu1 }
 0x1ba   : > { %v2651_v61 = vpop.f32.mrf.mxu2  ;;  %v2666_v5 = vpop.f32.mrf.mxu0 }
 0x1bb   : > { %v2652_v62 = vadd.f32 %v2651_v61, %v2638_v35 }
 0x1bc   : > { %v2942_v6 = vpop.f32.mrf.mxu1 }
 0x1bd   : > { %v2665_v33 = vadd.f32 %v2664_v59, %v2652_v62 }
 0x1bf   : > { %v2671_v1 = vadd.f32 %v2665_v33, %v2038_v37 }
 0x1c2   : > { %v2653_v8 = vpop.f32.mrf.mxu2 }
 0x1c4   : > { %v2944_v22 = vpop.f32.mrf.mxu1 }
 0x1c9   : > { %v2916_v7 = vpop.f32.mrf.mxu3 }
 0x1ca   : > { %v2929_v9 = vpop.f32.mrf.mxu0 }
 0x1cb   : > { %v2930_v25 = vadd.f32 %v2929_v9, %v2916_v7 }
 0x1cd   : > { %v2943_v53 = vadd.f32 %v2942_v6, %v2930_v25 }
 0x1cf   : > { %v3280_v34 = vadd.f32 %v2943_v53, %v2668_v14  ;;  %v3308_v14 = vsel %vm3307_vm2, 1.0, %v5581_v48 }
 0x1d0   : > { %v3309_v30 = vpack.c.bf16 %v3308_v14, %v3308_v14 }
 0x1d1   : > { %v2918_v10 = vpop.f32.mrf.mxu3 }
 0x1d2   : > { %v2931_v12 = vpop.f32.mrf.mxu0 }
 0x1d6   : > { %v2968_v15 = vpop.f32.mrf.mxu1 }
 0x1d9   : > { %v2981_v16 = vpop.f32.mrf.mxu3 }
 0x1da   : > { %v2955_v13 = vpop.f32.mrf.mxu2 }
 0x1db   : > { %v2969_v0 = vadd.f32 %v2968_v15, %v2955_v13 }
 0x1dd   : > { %v2982_v60 = vadd.f32 %v2981_v16, %v2969_v0 }
 0x1de   : > { %v2970_v18 = vpop.f32.mrf.mxu1 }
 0x1df   : > { %v3281_v44 = vadd.f32 %v2982_v60, %v7958_v49 }
 0x1e1   : > { %v2983_v19 = vpop.f32.mrf.mxu3 }
 0x1e2   : > { %v2957_v17 = vpop.f32.mrf.mxu2 }
 0x1ea   : > { %v3237_v20 = vpop.f32.mrf.mxu2  ;;  %v3211_v2 = vpop.f32.mrf.mxu0 }
 0x1f1   : > { %v3224_v23 = vpop.f32.mrf.mxu3 }
 0x1f2   : > { %v3225_v27 = vadd.f32 %v3224_v23, %v3211_v2  ;;  %v3239_v28 = vpop.f32.mrf.mxu2  ;;  %v3213_v56 = vpop.f32.mrf.mxu0 }
 0x1f4   : > { %v3238_v31 = vadd.f32 %v3237_v20, %v3225_v27  ;;  %v3250_v43 = vpop.f32.mrf.mxu1 }
 0x1f6   : > { %v3282_v37 = vadd.f32 %v3238_v31, %v2670_v55 }
 0x1f8   : > { %v3284_v63 = vmax.f32 %v3280_v34, %v3282_v37 }
 0x1f9   : > { %v3226_v42 = vpop.f32.mrf.mxu3 }
 0x1fa   : > { %v3276_v38 = vpop.f32.mrf.mxu0  ;;  %v3292_v4 = vadd.f32 %v3288_v11, %v3284_v63 }
 0x1fc   : > { %v3294_v46 = vmax.f32 %v3292_v4, 0.0  ;;  %v3252_v45 = vpop.f32.mrf.mxu1 }
 0x1fe   : > { %v3296_v50 = vpack.c.bf16 %v3294_v46, %v3294_v46 }
 0x200   : > { %v3316_v51 = vsel %vm3314_vm3, %v3296_v50, 0 }
 0x201   : > { %3328 = vmatpush.bf16.msra.mxu3 %v3316_v51  ;;  %3357 = vmatpush.bf16.msrb.mxu1 %v3316_v51 }
 0x202   : > { %v3263_v58 = vpop.f32.mrf.mxu2  ;;  %v3278_v55 = vpop.f32.mrf.mxu0 }
 0x203   : > { %v3264_v47 = vadd.f32 %v3263_v58, %v3250_v43 }
 0x204   : > { %5197 = vmatmul.msk.bf16.vlgmr.msra.gmra.mxu3 %vm3310_vm4, %v3305_v52  ;;  %5199 = vmatmul.msk.bf16.vlgmr.msrb.gmra.mxu1 %vm3310_vm4, %v3309_v30 }
 0x205   : > { %v3277_v41 = vadd.f32 %v3276_v38, %v3264_v47 }
 0x207   : > { %v3283_v54 = vadd.f32 %v3277_v41, %v2671_v1 }
 0x209   : > { %v3285_v57 = vmax.f32 %v3281_v44, %v3283_v54 }
 0x20a   : > { %v3265_v35 = vpop.f32.mrf.mxu2 }
 0x20b   : > { %v3293_v59 = vadd.f32 %v3289_v36, %v3285_v57 }
 0x20d   : > { %v3295_v61 = vmax.f32 %v3293_v59, 0.0 }
 0x20f   : > { %v3297_v62 = vpack.c.bf16 %v3295_v61, %v3295_v61 }
 0x211   : > { %v3319_v33 = vsel %vm3314_vm3, %v3297_v62, 0 }
 0x212   : > { %3341 = vmatpush.bf16.msrb.mxu0 %v3319_v33  ;;  %3370 = vmatpush.bf16.msrb.mxu3 %v3319_v33 }
 0x215   : > { %5198 = vmatmul.msk.bf16.vlgmr.msrb.gmra.mxu0 %vm3310_vm4, %v3305_v52  ;;  %5200 = vmatmul.msk.bf16.vlgmr.msrb.gmra.mxu3 %vm3310_vm4, %v3309_v30 }
 0x281   : > { %v3359_v49 = vpop.f32.mrf.mxu1 }
 0x287   : > { %v3330_v1 = vpop.f32.mrf.mxu3 }
 0x288   : > { %v3376_v9 = vmax.f32 %v3330_v1, %v3359_v49 }
 0x289   : > { %v3361_v3 = vpop.f32.mrf.mxu1 }
 0x28f   : > { %v3332_v8 = vpop.f32.mrf.mxu3 }
 0x292   : > { %v3343_v5 = vpop.f32.mrf.mxu0 }
 0x298   : > { %v3372_v7 = vpop.f32.mrf.mxu3 }
 0x299   : > { %v3377_v22 = vmax.f32 %v3343_v5, %v3372_v7 }
 0x29a   : > { %v3345_v6 = vpop.f32.mrf.mxu0 }
 0x29b   : > { %v3378_v10 = vpack.c.bf16 %v3377_v22, %v3376_v9 }
 0x29d   : > { %v3380_v12 = vrot.slane %v3378_v10, 3 }
 0x29f   : > { %v3384_v13 = vsel %vm3381_vm5, %v3378_v10, %v3380_v12 }
 0x2a0   : > { %3388 = vst.msk [vmem:[%s195_s26] sm:$0x3] %vm3387_vm7, %v3384_v13  ;;  %v3374_v15 = vpop.f32.mrf.mxu3 }
 0x2a1 PF: > { %s14_s15 = sadd.s32 1, %s5579_s15  }
 0x2a2   : > { %p11_p4 = scmp.ge.s32.totalorder %s14_s15, 4  }
 0x2a4   :  { %13 = sbr.rel (!%p11_p4) target bundleno = 1 (0x1), region = 74 }

// kernel: lenet_audio_forward.7
= control target key start
LH: loop header
LB: loop body
LE: loop exit
PB: predicated region body
PF: predicated region fallthrough
CT: control target
= control target key end

     0   :  { %s785_s0 = inlined_call_operand.vmem [shape: bf16[2,448], index: 0, kind: input, shape index: {}]   ;;  %s786_s1 = inlined_call_operand.vmem [shape: bf16[448,100], index: 1, kind: input, shape index: {}]   ;;  %s787_s2 = inlined_call_operand.vmem [shape: f32[1,100], index: 2, kind: input, shape index: {}]   ;;  %s788_s3 = inlined_call_operand.vmem [shape: bf16[100,10], index: 3, kind: input, shape index: {}]   ;;  %s789_s4 = inlined_call_operand.vmem [shape: f32[1,10], index: 4, kind: input, shape index: {}]   ;;  %s790_s5 = inlined_call_operand.hbm [shape: f32[2,10], index: 5, kind: output, shape index: {}]  }
   0x1   :  { %v577_v0 = vld [vmem:[%s786_s1 + $0x38] sm:$0xff]  ;;  %v576_v3 = vld [vmem:[%s786_s1 + $0x30] sm:$0xff]  ;;  %v575_v8 = vld [vmem:[%s786_s1 + $0x28] sm:$0xff] }
   0x2   :  { %v585_v1 = vld [vmem:[%s786_s1 + $0x78] sm:$0xff]  ;;  %263 = vmatpush.bf16.msra.mxu0 %v577_v0  ;;  %v584_v4 = vld [vmem:[%s786_s1 + $0x70] sm:$0xff]  ;;  %v583_v9 = vld [vmem:[%s786_s1 + $0x68] sm:$0xff] }
   0x3   :  { %v593_v2 = vld [vmem:[%s786_s1 + $0xb8] sm:$0xff]  ;;  %276 = vmatpush.bf16.msra.mxu1 %v585_v1  ;;  %v592_v5 = vld [vmem:[%s786_s1 + $0xb0] sm:$0xff]  ;;  %v591_v10 = vld [vmem:[%s786_s1 + $0xa8] sm:$0xff] }
   0x4   :  { %289 = vmatpush.bf16.msra.mxu2 %v593_v2  ;;  %v597_v6 = vld [vmem:[%s786_s1 + $0xd8] sm:$0xff]  ;;  %v596_v7 = vld [vmem:[%s786_s1 + $0xd0] sm:$0xff]  ;;  %v22_v11 = vld [vmem:[%s785_s0] sm:$0xf] }
   0x5   :  { %306 = vmatpush.bf16.msra.mxu3 %v597_v6  ;;  %v595_v12 = vld [vmem:[%s786_s1 + $0xc8] sm:$0xff]  ;;  %84 = vst [vmem:[#allocation1] ss:$9 sm:$0xff] %v22_v11  ;;  %v329_v13 = vld [vmem:[%s788_s3 + $0x30] sm:$0x3]  ;;  %v574_v14 = vld [vmem:[%s786_s1 + $0x20] sm:$0xff] }
   0x6   :  { %264 = vmatpush.bf16.msra.mxu0 %v576_v3  ;;  %v582_v15 = vld [vmem:[%s786_s1 + $0x60] sm:$0xff]  ;;  %v359_v16 = vunpack.c.l.b16 %v329_v13 }
   0x7   :  { %277 = vmatpush.bf16.msra.mxu1 %v584_v4  ;;  %v590_v17 = vld [vmem:[%s786_s1 + $0xa0] sm:$0xff] }
   0x8   :  { %290 = vmatpush.bf16.msra.mxu2 %v592_v5 }
   0x9   :  { %307 = vmatpush.bf16.msra.mxu3 %v596_v7 }
   0xa   :  { %265 = vmatpush.bf16.msra.mxu0 %v575_v8 }
   0xb   :  { %278 = vmatpush.bf16.msra.mxu1 %v583_v9 }
   0xc   :  { %291 = vmatpush.bf16.msra.mxu2 %v591_v10 }
   0xd   :  { %10 = vsyncpa [#allocation3], 0  ;;  %v366_v18 = vpack.c.b16 %v359_v16, %v359_v16  ;;  %308 = vmatpush.bf16.msra.mxu3 %v595_v12  ;;  %v594_v19 = vld [vmem:[%s786_s1 + $0xc0] sm:$0xff]  ;;  %vm377_vm0 = vcmask 1041408   ;;  %v573_v20 = vld [vmem:[%s786_s1 + $0x18] sm:$0xff]  ;;  %vm260_vm1 = vcmask 523264  }
   0xe   :  { %266 = vmatpush.bf16.msra.mxu0 %v574_v14  ;;  %v581_v21 = vld [vmem:[%s786_s1 + $0x58] sm:$0xff]  ;;  %v572_v25 = vld [vmem:[%s786_s1 + $0x10] sm:$0xff]  ;;  %v603_v28 = vld [vmem:[%s788_s3 + $0x28] sm:$0xff]  ;;  %vm373_vm2 = vcmask 818176   ;;  %vm413_vm6 = vcmask 74752  }
   0xf   :  { %279 = vmatpush.bf16.msra.mxu1 %v582_v15  ;;  %v589_v22 = vld [vmem:[%s786_s1 + $0x98] sm:$0xff]  ;;  %v379_v23 = vsel %vm377_vm0, %v366_v18, 0  ;;  %v580_v26 = vld [vmem:[%s786_s1 + $0x50] sm:$0xff]  ;;  %v571_v29 = vld [vmem:[%s786_s1 + $0x8] sm:$0xff] }
  0x10   :  { %292 = vmatpush.bf16.msra.mxu2 %v590_v17  ;;  %v88_v24 = vld [vmem:[#allocation1 + $0x1b] sm:$0xff]  ;;  %v588_v27 = vld [vmem:[%s786_s1 + $0x90] sm:$0xff]  ;;  %v579_v30 = vld [vmem:[%s786_s1 + $0x48] sm:$0xff] }
  0x11   :  { %309 = vmatpush.bf16.msra.mxu3 %v594_v19  ;;  %v587_v31 = vld [vmem:[%s786_s1 + $0x88] sm:$0xff]  ;;  %v602_v32 = vld [vmem:[%s788_s3 + $0x20] sm:$0xff]  ;;  %v87_v38 = vld [vmem:[#allocation1 + $0x12] sm:$0xff] }
  0x12   :  { %267 = vmatpush.bf16.msra.mxu0 %v573_v20  ;;  %v570_v33 = vld [vmem:[%s786_s1] sm:$0xff]  ;;  %v86_v37 = vld [vmem:[#allocation1 + $0x9] sm:$0xff]  ;;  %v601_v39 = vld [vmem:[%s788_s3 + $0x18] sm:$0xff] }
  0x13   :  { %280 = vmatpush.bf16.msra.mxu1 %v581_v21  ;;  %v578_v34 = vld [vmem:[%s786_s1 + $0x40] sm:$0xff]  ;;  %v600_v40 = vld [vmem:[%s788_s3 + $0x10] sm:$0xff]  ;;  %v599_v41 = vld [vmem:[%s788_s3 + $0x8] sm:$0xff] }
  0x14   :  { %293 = vmatpush.bf16.msra.mxu2 %v589_v22  ;;  %543 = vmatmul.msk.bf16.vlgmr.msra.gmra.mxu3 %vm260_vm1, %v88_v24  ;;  %v586_v35 = vld [vmem:[%s786_s1 + $0x80] sm:$0xff] }
  0x15   :  { %382 = vmatpush.bf16.msrb.mxu3 %v379_v23  ;;  %v85_v36 = vld [vmem:[#allocation1] sm:$0xff] }
  0x16   :  { %268 = vmatpush.bf16.msra.mxu0 %v572_v25  ;;  %v598_v42 = vld [vmem:[%s788_s3] sm:$0xff] }
  0x17   :  { %281 = vmatpush.bf16.msra.mxu1 %v580_v26  ;;  %v605_v44 = vld [vmem:[%s787_s2] ss:$0 sm:$0xff]  ;;  %s637_s2 = smov [#allocation2]  }
  0x18   :  { %294 = vmatpush.bf16.msra.mxu2 %v588_v27  ;;  %v606_v58 = vld [vmem:[%s789_s4] ss:$0 sm:$0xff]  ;;  %s420_s15 = sshll.u32 %s637_s2, 4  ;;  %s422_s4 = sshll.u32 %s790_s5, 4  ;;  %s421_s15 = int_to_ptr.vmem [resolvable:$true] %s420_s15  ;;  %s423_s4 = int_to_ptr.hbm [resolvable:$true] %s422_s4 }
  0x19   :  { %383 = vmatpush.bf16.msrb.mxu3 %v603_v28 }
  0x1a   :  { %269 = vmatpush.bf16.msra.mxu0 %v571_v29 }
  0x1b   :  { %282 = vmatpush.bf16.msra.mxu1 %v579_v30 }
  0x1c   :  { %295 = vmatpush.bf16.msra.mxu2 %v587_v31 }
  0x1d   :  { %384 = vmatpush.bf16.msrb.mxu3 %v602_v32 }
  0x1e   :  { %270 = vmatpush.bf16.msra.mxu0 %v570_v33 }
  0x1f   :  { %283 = vmatpush.bf16.msra.mxu1 %v578_v34 }
  0x20   :  { %296 = vmatpush.bf16.msra.mxu2 %v586_v35 }
  0x21   :  { %271 = vmatmul.bf16.vlgmr.msra.gmra.mxu0 %v85_v36  ;;  %385 = vmatpush.bf16.msrb.mxu3 %v601_v39 }
  0x22   :  { %284 = vmatmul.bf16.vlgmr.msra.gmra.mxu1 %v86_v37 }
  0x23   :  { %297 = vmatmul.bf16.vlgmr.msra.gmra.mxu2 %v87_v38 }
  0x25   :  { %386 = vmatpush.bf16.msrb.mxu3 %v600_v40 }
  0x29   :  { %387 = vmatpush.bf16.msrb.mxu3 %v599_v41 }
  0x2d   :  { %388 = vmatpush.bf16.msrb.mxu3 %v598_v42 }
  0x97   :  { %v311_v43 = vpop.f32.mrf.mxu3 }
  0x9e   :  { %v272_v45 = vpop.f32.mrf.mxu0 }
  0x9f   :  { %v285_v46 = vpop.f32.mrf.mxu1  ;;  %v273_v47 = vadd.f32 %v605_v44, %v272_v45  ;;  %v313_v48 = vpop.f32.mrf.mxu3 }
  0xa1   :  { %v286_v49 = vadd.f32 %v285_v46, %v273_v47 }
  0xa6   :  { %v298_v50 = vpop.f32.mrf.mxu2  ;;  %v274_v52 = vpop.f32.mrf.mxu0 }
  0xa7   :  { %v299_v51 = vadd.f32 %v298_v50, %v286_v49  ;;  %v287_v53 = vpop.f32.mrf.mxu1 }
  0xa9   :  { %v312_v54 = vadd.f32 %v311_v43, %v299_v51 }
  0xab   :  { %v315_v55 = vmax.f32 %v312_v54, 0.0 }
  0xad   :  { %v316_v56 = vpack.c.bf16 %v315_v55, %v315_v55 }
  0xae   :  { %v300_v57 = vpop.f32.mrf.mxu2 }
  0xaf   :  { %568 = vmatmul.msk.bf16.vlgmr.msrb.gmra.mxu3 %vm373_vm2, %v316_v56 }
 0x132   :  { %v390_v59 = vpop.f32.mrf.mxu3 }
 0x133   :  { %v391_v60 = vadd.f32 %v606_v58, %v390_v59 }
 0x135   :  { %v569_v61 = vmul.f32 -1.442695, %v391_v60 }
 0x137   :  { %607 = vpow2.f32 %v569_v61 }
 0x13a   :  { %v392_v62 = vpop.f32.mrf.mxu3 }
 0x13d   :  { %v608_v63 = vpop.eup %607 }
 0x13e   :  { %v397_v0 = vadd.f32 1.0, %v608_v63 }
 0x140   :  { %609 = vrcp.f32 %v397_v0  ;;  %v409_v4 = vand.u32 2147483648, %v397_v0  ;;  %v407_v6 = vand.u32 2147483647, %v397_v0  ;;  %vm403_vm4 = vweird.f32 %v397_v0 }
 0x142   :  { %v410_v8 = vor.u32 1.1754944e-38, %v409_v4  ;;  %vm408_vm7 = vcmp.eq.f32.partialorder %v407_v6, 8.507059e+37 }
 0x146   :  { %v610_v1 = vpop.eup %609 }
 0x147   :  { %v399_v2 = vmul.f32 %v610_v1, %v397_v0  ;;  %vm404_vm3 = vweird.f32 %v610_v1 }
 0x148   :  { %vm405_vm5 = vmor %vm403_vm4, %vm404_vm3 }
 0x149   :  { %v400_v3 = vsub.f32 1.0, %v399_v2 }
 0x14b   :  { %v401_v5 = vmul.f32 %v610_v1, %v400_v3 }
 0x14d   :  { %v402_v7 = vadd.f32 %v610_v1, %v401_v5 }
 0x14f   :  { %v406_v9 = vsel %vm405_vm5, %v610_v1, %v402_v7 }
 0x150   :  { %v411_v10 = vsel %vm408_vm7, %v410_v8, %v406_v9 }
 0x151   :  { %414 = vst.msk [vmem:[#allocation2] sm:$0x3] %vm413_vm6, %v411_v10 }
 0x152   :  { %425 = dma.vmem_to_hbm [thread:$0]  %s421_s15, 32, %s423_s4, [#allocation3]  }
 0x153   :  { %635 = dma.done.wait [#allocation3], 32  }
 0x154   :  { %636 = vsyncadd [#allocation3], 4294967264 }
 0x155   :  { %430 = vsyncpa [#allocation3], 1 }

</bundles_post_ra>
